<compile_context>
chip_gen: v7x
topology: tpu7x:2x2x1
jax: 0.10.0
libtpu: 0.0.40
codegen_flags: <defaults>
</compile_context>

<pallas_src>
import functools

import jax
import jax.numpy as jnp
from jax.experimental import pallas as pl
from jax.experimental.pallas import tpu as pltpu


# ----------------------------------------------------------------------------
# Pallas kernels: fused 3-layer pointwise MLP (folded BN) + ReLU + max over S
# ----------------------------------------------------------------------------
def _mlp_tail(h1, w2_ref, b2_ref, w3_ref, b3_ref, o_ref, tm, S):
    """h1: (tm*S, C1) f32 pre-activation of layer 1 (bias already added)."""
    h = jnp.maximum(h1, 0.0)

    h = jnp.dot(h.astype(jnp.bfloat16), w2_ref[...],
                preferred_element_type=jnp.float32)
    h = jnp.maximum(h + b2_ref[...], 0.0)

    h = jnp.dot(h.astype(jnp.bfloat16), w3_ref[...],
                preferred_element_type=jnp.float32)

    cout = o_ref.shape[-1]
    # max over nsample first (== F.max_pool2d over the last spatial dim), then
    # bias + ReLU on the much smaller (tm, cout) result.
    m = jnp.max(h.reshape(tm, S, cout), axis=1)
    o_ref[...] = jnp.maximum(m + b3_ref[...], 0.0)


def _xyz_fma(xg, w1x_ref):
    """xg: (M, 3) f32 relative xyz.  w1x_ref: (3, C1) f32.  VPU FMAs, no MXU."""
    w1x = w1x_ref[...]
    h = xg[:, 0:1] * w1x[0:1, :]
    h = h + xg[:, 1:2] * w1x[1:2, :]
    h = h + xg[:, 2:3] * w1x[2:3, :]
    return h


def _sa_kernel_xyz_only(xyz_ref, w1x_ref, b1_ref,
                        w2_ref, b2_ref, w3_ref, b3_ref, o_ref):
    tm, S, _ = xyz_ref.shape
    xg = xyz_ref[...].reshape(tm * S, 3)              # f32
    h1 = _xyz_fma(xg, w1x_ref) + b1_ref[...]
    _mlp_tail(h1, w2_ref, b2_ref, w3_ref, b3_ref, o_ref, tm, S)


def _sa_kernel_with_feat(xyz_ref, feat_ref, w1x_ref, w1f_ref, b1_ref,
                         w2_ref, b2_ref, w3_ref, b3_ref, o_ref):
    tm, S, _ = xyz_ref.shape
    cf = feat_ref.shape[-1]
    xg = xyz_ref[...].reshape(tm * S, 3)              # f32
    ff = feat_ref[...].reshape(tm * S, cf)            # bf16, K = 128/256 aligned
    h1 = jnp.dot(ff, w1f_ref[...], preferred_element_type=jnp.float32)
    h1 = h1 + _xyz_fma(xg, w1x_ref) + b1_ref[...]
    _mlp_tail(h1, w2_ref, b2_ref, w3_ref, b3_ref, o_ref, tm, S)


def _round_up(x, m):
    return ((x + m - 1) // m) * m


def _pick_tm(G, tm_target):
    """Prefer >=2 grid steps (megacore on v7x), blocks stay multiples of 8."""
    tm = min(tm_target, _round_up(G, 8))
    while tm > 8 and _round_up(G, tm) // tm < 2:
        tm = _round_up(max(8, tm // 2), 8)
    return tm


def sa_mlp_maxpool(gxyz, gfeat, params, tm_target=128):
    """gxyz: (G, S, 3) f32 relative xyz.  gfeat: (G, S, Cf) bf16 or None.
       Returns (G, Cout) f32."""
    G, S, _ = gxyz.shape
    w1x, w1f, b1 = params["w1x"], params["w1f"], params["b1"]
    w2, b2 = params["w2"], params["b2"]
    w3, b3 = params["w3"], params["b3"]
    cout = w3.shape[1]

    tm = _pick_tm(G, tm_target)
    Gp = _round_up(G, tm)
    if Gp != G:
        gxyz = jnp.pad(gxyz, ((0, Gp - G), (0, 0), (0, 0)))
        if gfeat is not None:
            gfeat = jnp.pad(gfeat, ((0, Gp - G), (0, 0), (0, 0)))

    def full_spec(arr):
        nd = arr.ndim
        return pl.BlockSpec(arr.shape, lambda i, _nd=nd: (0,) * _nd)

    common = dict(
        out_shape=jax.ShapeDtypeStruct((Gp, cout), jnp.float32),
        grid=(Gp // tm,),
        out_specs=pl.BlockSpec((tm, cout), lambda i: (i, 0)),
        compiler_params=pltpu.CompilerParams(
            dimension_semantics=("parallel",),
            vmem_limit_bytes=48 * 1024 * 1024),
    )

    if gfeat is None:
        out = pl.pallas_call(
            _sa_kernel_xyz_only,
            in_specs=[
                pl.BlockSpec((tm, S, 3), lambda i: (i, 0, 0)),
                full_spec(w1x), full_spec(b1),
                full_spec(w2), full_spec(b2),
                full_spec(w3), full_spec(b3),
            ],
            **common,
        )(gxyz, w1x, b1, w2, b2, w3, b3)
    else:
        Cf = gfeat.shape[-1]
        out = pl.pallas_call(
            _sa_kernel_with_feat,
            in_specs=[
                pl.BlockSpec((tm, S, 3), lambda i: (i, 0, 0)),
                pl.BlockSpec((tm, S, Cf), lambda i: (i, 0, 0)),
                full_spec(w1x), full_spec(w1f), full_spec(b1),
                full_spec(w2), full_spec(b2),
                full_spec(w3), full_spec(b3),
            ],
            **common,
        )(gxyz, gfeat, w1x, w1f, b1, w2, b2, w3, b3)
    return out[:G] if Gp != G else out


# ----------------------------------------------------------------------------
# JAX glue: ball-query + grouping (QueryAndGroup semantics), channels-last
# ----------------------------------------------------------------------------
def ball_query_and_group(xyz, new_xyz, features, radius, nsample):
    """xyz:(B,N,3) f32   new_xyz:(B,P,3) f32   features:(B,N,C) or None
       -> (grouped_xyz_rel (B,P,S,3) f32, grouped_feat (B,P,S,C) bf16 or None)."""
    B, N, _ = xyz.shape
    diff = xyz[:, None, :, :] - new_xyz[:, :, None, :]          # (B,P,N,3)
    d2 = jnp.sum(diff * diff, axis=-1)                          # (B,P,N)
    mask = d2 <= radius * radius
    arange = jnp.arange(N, dtype=jnp.int32)
    key = jnp.where(mask, arange[None, None, :], N)             # in-range -> idx, else N

    # First `nsample` in-range indices (ascending) via top_k on negated keys.
    k = min(nsample, N)
    neg_top, _ = jax.lax.top_k(-key, k)
    cand = (-neg_top).astype(jnp.int32)                         # (B,P,k), ascending
    if k < nsample:
        pad = jnp.full((B, new_xyz.shape[1], nsample - k), N, dtype=cand.dtype)
        cand = jnp.concatenate([cand, pad], axis=-1)

    first = cand[..., 0]
    first = jnp.where(first >= N, 0, first)                     # empty ball -> idx 0
    idx = jnp.where(cand >= N, first[..., None], cand)          # (B,P,nsample)

    bidx = jnp.arange(B)[:, None, None]
    grouped_xyz = xyz[bidx, idx] - new_xyz[:, :, None, :]       # (B,P,S,3) f32
    grouped_feat = None
    if features is not None:
        grouped_feat = features.astype(jnp.bfloat16)[bidx, idx]  # (B,P,S,C) bf16
    return grouped_xyz, grouped_feat


def set_abstraction(xyz, features, npoint, radius, nsample, params,
                    tm_target=128):
    """features channels-last (B, N, C) or None. Returns (B,P,3),(B,P,Cout),(B,P)."""
    B = xyz.shape[0]
    # use_fps=False: arange sampling indices (matches torch.arange(...).repeat)
    sample_idxs = jnp.tile(jnp.arange(npoint, dtype=jnp.int32)[None, :], (B, 1))
    new_xyz = xyz[:, :npoint, :]                                # gather w/ arange idx
    g_xyz, g_feat = ball_query_and_group(xyz, new_xyz, features, radius, nsample)

    G = B * npoint
    gx = g_xyz.reshape(G, nsample, 3).astype(jnp.float32)
    gf = None if g_feat is None else g_feat.reshape(G, nsample, g_feat.shape[-1])
    out = sa_mlp_maxpool(gx, gf, params, tm_target=tm_target)    # (G, Cout) f32
    new_features = out.reshape(B, npoint, out.shape[-1])         # channels-last
    return new_xyz, new_features, sample_idxs


# ----------------------------------------------------------------------------
# Parameter construction (deterministic, synthetic; BN folded; xyz/feat split)
# ----------------------------------------------------------------------------
MLPS = [[0, 64, 64, 128], [128, 128, 128, 256], [256, 256, 256, 256]]
RADII = [0.3, 0.5, 0.7]
NUM_SAMPLES = [32, 32, 32]
BN_EPS = 1e-5


def init_params(key):
    all_params = []
    for m_idx, mlps in enumerate(MLPS):
        c_feat = mlps[0]
        in_ch = c_feat + 3
        folded = []
        for l_idx, out_ch in enumerate(mlps[1:]):
            k = jax.random.fold_in(key, m_idx * 16 + l_idx)
            kw, kb, kg, kbe = jax.random.split(k, 4)
            w = 0.1 * jax.random.normal(kw, (in_ch, out_ch), jnp.float32)
            conv_b = 0.01 * jax.random.normal(kb, (out_ch,), jnp.float32)
            gamma = 1.0 + 0.01 * jax.random.normal(kg, (out_ch,), jnp.float32)
            beta = 0.01 * jax.random.normal(kbe, (out_ch,), jnp.float32)
            run_mean = jnp.zeros((out_ch,), jnp.float32)
            run_var = jnp.ones((out_ch,), jnp.float32)
            scale = gamma / jnp.sqrt(run_var + BN_EPS)           # fold BN (eval)
            w_folded = w * scale[None, :]
            bias = (beta + (conv_b - run_mean) * scale).reshape(1, -1)
            folded.append((w_folded, bias.astype(jnp.float32)))
            in_ch = out_ch
        (w1, b1), (w2, b2), (w3, b3) = folded
        all_params.append({
            # layer 1: xyz rows (first 3 channels, matches grouped_xyz-first
            # concat order in QueryAndGroup) kept f32 for the VPU-FMA path;
            # feature rows bf16 for the MXU dot (K = 128/256 aligned).
            "w1x": w1[:3].astype(jnp.float32),
            "w1f": None if c_feat == 0 else w1[3:].astype(jnp.bfloat16),
            "b1": b1,
            "w2": w2.astype(jnp.bfloat16), "b2": b2,
            "w3": w3.astype(jnp.bfloat16), "b3": b3,
        })
    return all_params


def pointnet_plus_plus_forward(pointcloud, npoints, params,
                               return_intermediate=False):
    xyz = pointcloud[..., 0:3]
    # keep features channels-last (B, N, C) internally; None if xyz-only
    features = pointcloud[..., 3:] if pointcloud.shape[-1] > 3 else None
    l_xyz, l_features, l_idx = [xyz], [features], []
    for i in range(3):
        xyz, features, idx = set_abstraction(
            xyz, features, npoints[i], RADII[i], NUM_SAMPLES[i], params[i],
            tm_target=128)
        l_xyz.append(xyz)
        l_features.append(features)
        l_idx.append(idx)
    # transpose only at the output boundary to match PyTorch (B, C, P) layout
    if return_intermediate:
        feats_nchw = [jnp.transpose(f, (0, 2, 1)) for f in l_features[1:]]
        return l_xyz[1:], feats_nchw, l_idx[0]
    return xyz, jnp.transpose(features, (0, 2, 1)), l_idx[0]


# ----------------------------------------------------------------------------
if __name__ == "__main__":
    key = jax.random.PRNGKey(0)
    k_pc, k_params = jax.random.split(key)

    B, N = 2, 32
    pointcloud = jax.random.uniform(k_pc, (B, N, 3), jnp.float32)  # xyz only
    npoints = [16, 8, 8]

    params = init_params(k_params)

    fwd = jax.jit(functools.partial(pointnet_plus_plus_forward,
                                    npoints=npoints, params=params))
    xyz_out, feat_out, idx_out = fwd(pointcloud)
    jax.block_until_ready((xyz_out, feat_out, idx_out))

    assert xyz_out.shape == (B, npoints[2], 3)
    assert feat_out.shape == (B, MLPS[2][-1], npoints[2])
    assert idx_out.shape == (B, npoints[0])
    assert bool(jnp.all(jnp.isfinite(feat_out)))

    print("KERNEL_OK")
</pallas_src>

<mosaic_0001>
module attributes {stable_mosaic.version = 11 : i64} {
  func.func @_sa_kernel_xyz_only(%arg0: i32, %arg1: memref<16x32x3xf32, #tpu.memory_space<vmem>>, %arg2: memref<3x64xf32, #tpu.memory_space<vmem>>, %arg3: memref<1x64xf32, #tpu.memory_space<vmem>>, %arg4: memref<64x64xbf16, #tpu.memory_space<vmem>>, %arg5: memref<1x64xf32, #tpu.memory_space<vmem>>, %arg6: memref<64x128xbf16, #tpu.memory_space<vmem>>, %arg7: memref<1x128xf32, #tpu.memory_space<vmem>>, %arg8: memref<16x128xf32, #tpu.memory_space<vmem>>) attributes {dimension_semantics = [#tpu.dimension_semantics<parallel>], iteration_bounds = array<i64: 2>, scalar_prefetch = 0 : i64, scratch_operands = 0 : i64, tpu.core_type = #tpu.core_type<tc>, window_params = [{transform_indices = @transform_0, window_bounds = array<i64: 16, 32, 3>}, {pipeline_mode = #tpu.pipeline_mode<synchronous>, transform_indices = @transform_1, window_bounds = array<i64: 3, 64>}, {pipeline_mode = #tpu.pipeline_mode<synchronous>, transform_indices = @transform_2, window_bounds = array<i64: 1, 64>}, {pipeline_mode = #tpu.pipeline_mode<synchronous>, transform_indices = @transform_3, window_bounds = array<i64: 64, 64>}, {pipeline_mode = #tpu.pipeline_mode<synchronous>, transform_indices = @transform_4, window_bounds = array<i64: 1, 64>}, {pipeline_mode = #tpu.pipeline_mode<synchronous>, transform_indices = @transform_5, window_bounds = array<i64: 64, 128>}, {pipeline_mode = #tpu.pipeline_mode<synchronous>, transform_indices = @transform_6, window_bounds = array<i64: 1, 128>}, {transform_indices = @transform_7, window_bounds = array<i64: 16, 128>}]} {
    %c0 = arith.constant 0 : index
    %c0_0 = arith.constant 0 : index
    %c0_1 = arith.constant 0 : index
    %0 = vector.load %arg1[%c0, %c0_0, %c0_1] : memref<16x32x3xf32, #tpu.memory_space<vmem>>, vector<16x32x3xf32>
    %1 = vector.shape_cast %0 : vector<16x32x3xf32> to vector<512x3xf32>
    %c0_2 = arith.constant 0 : index
    %c0_3 = arith.constant 0 : index
    %2 = vector.load %arg2[%c0_2, %c0_3] : memref<3x64xf32, #tpu.memory_space<vmem>>, vector<3x64xf32>
    %3 = vector.extract_strided_slice %1 {offsets = [0, 0], sizes = [512, 1], strides = [1, 1]} : vector<512x3xf32> to vector<512x1xf32>
    %4 = vector.extract_strided_slice %2 {offsets = [0, 0], sizes = [1, 64], strides = [1, 1]} : vector<3x64xf32> to vector<1x64xf32>
    %5 = vector.broadcast %3 : vector<512x1xf32> to vector<512x64xf32>
    %6 = vector.broadcast %4 : vector<1x64xf32> to vector<512x64xf32>
    %7 = arith.mulf %5, %6 : vector<512x64xf32>
    %8 = vector.extract_strided_slice %1 {offsets = [0, 1], sizes = [512, 1], strides = [1, 1]} : vector<512x3xf32> to vector<512x1xf32>
    %9 = vector.extract_strided_slice %2 {offsets = [1, 0], sizes = [1, 64], strides = [1, 1]} : vector<3x64xf32> to vector<1x64xf32>
    %10 = vector.broadcast %8 : vector<512x1xf32> to vector<512x64xf32>
    %11 = vector.broadcast %9 : vector<1x64xf32> to vector<512x64xf32>
    %12 = arith.mulf %10, %11 : vector<512x64xf32>
    %13 = arith.addf %7, %12 : vector<512x64xf32>
    %14 = vector.extract_strided_slice %1 {offsets = [0, 2], sizes = [512, 1], strides = [1, 1]} : vector<512x3xf32> to vector<512x1xf32>
    %15 = vector.extract_strided_slice %2 {offsets = [2, 0], sizes = [1, 64], strides = [1, 1]} : vector<3x64xf32> to vector<1x64xf32>
    %16 = vector.broadcast %14 : vector<512x1xf32> to vector<512x64xf32>
    %17 = vector.broadcast %15 : vector<1x64xf32> to vector<512x64xf32>
    %18 = arith.mulf %16, %17 : vector<512x64xf32>
    %19 = arith.addf %13, %18 : vector<512x64xf32>
    %c0_4 = arith.constant 0 : index
    %c0_5 = arith.constant 0 : index
    %20 = vector.load %arg3[%c0_4, %c0_5] : memref<1x64xf32, #tpu.memory_space<vmem>>, vector<1x64xf32>
    %21 = vector.broadcast %20 : vector<1x64xf32> to vector<512x64xf32>
    %22 = arith.addf %19, %21 : vector<512x64xf32>
    %cst = arith.constant 0.000000e+00 : f32
    %23 = vector.broadcast %cst : f32 to vector<512x64xf32>
    %24 = arith.maximumf %22, %23 : vector<512x64xf32>
    %25 = arith.truncf %24 : vector<512x64xf32> to vector<512x64xbf16>
    %c0_6 = arith.constant 0 : index
    %c0_7 = arith.constant 0 : index
    %26 = vector.load %arg4[%c0_6, %c0_7] : memref<64x64xbf16, #tpu.memory_space<vmem>>, vector<64x64xbf16>
    %cst_8 = arith.constant dense<0.000000e+00> : vector<512x64xf32>
    %27 = tpu.matmul %25, %26, %cst_8 {dimension_numbers = #tpu.dot_dimension_numbers<[1], [0], [0], [1], [0, 0, 1, 1], [], []>} : vector<512x64xbf16>, vector<64x64xbf16>, vector<512x64xf32> -> vector<512x64xf32>
    %c0_9 = arith.constant 0 : index
    %c0_10 = arith.constant 0 : index
    %28 = vector.load %arg5[%c0_9, %c0_10] : memref<1x64xf32, #tpu.memory_space<vmem>>, vector<1x64xf32>
    %29 = vector.broadcast %28 : vector<1x64xf32> to vector<512x64xf32>
    %30 = arith.addf %27, %29 : vector<512x64xf32>
    %cst_11 = arith.constant 0.000000e+00 : f32
    %31 = vector.broadcast %cst_11 : f32 to vector<512x64xf32>
    %32 = arith.maximumf %30, %31 : vector<512x64xf32>
    %33 = arith.truncf %32 : vector<512x64xf32> to vector<512x64xbf16>
    %c0_12 = arith.constant 0 : index
    %c0_13 = arith.constant 0 : index
    %34 = vector.load %arg6[%c0_12, %c0_13] : memref<64x128xbf16, #tpu.memory_space<vmem>>, vector<64x128xbf16>
    %cst_14 = arith.constant dense<0.000000e+00> : vector<512x128xf32>
    %35 = tpu.matmul %33, %34, %cst_14 {dimension_numbers = #tpu.dot_dimension_numbers<[1], [0], [0], [1], [0, 0, 1, 1], [], []>} : vector<512x64xbf16>, vector<64x128xbf16>, vector<512x128xf32> -> vector<512x128xf32>
    %36 = vector.shape_cast %35 : vector<512x128xf32> to vector<16x32x128xf32>
    %cst_15 = arith.constant dense<0xFF800000> : vector<16x128xf32>
    %37 = vector.multi_reduction <maximumf>, %36, %cst_15 [1] : vector<16x32x128xf32> to vector<16x128xf32>
    %c0_16 = arith.constant 0 : index
    %c0_17 = arith.constant 0 : index
    %38 = vector.load %arg7[%c0_16, %c0_17] : memref<1x128xf32, #tpu.memory_space<vmem>>, vector<1x128xf32>
    %39 = vector.broadcast %38 : vector<1x128xf32> to vector<16x128xf32>
    %40 = arith.addf %37, %39 : vector<16x128xf32>
    %cst_18 = arith.constant 0.000000e+00 : f32
    %41 = vector.broadcast %cst_18 : f32 to vector<16x128xf32>
    %42 = arith.maximumf %40, %41 : vector<16x128xf32>
    %c0_19 = arith.constant 0 : index
    %c0_20 = arith.constant 0 : index
    %43 = vector.load %arg8[%c0_19, %c0_20] : memref<16x128xf32, #tpu.memory_space<vmem>>, vector<16x128xf32>
    tpu.vector_store %arg8[%c0_19, %c0_20], %42 {strides = array<i32>} : memref<16x128xf32, #tpu.memory_space<vmem>>, vector<16x128xf32>,
    return
  }
  func.func @transform_0(%arg0: i32) -> (i32, i32, i32) {
    %c0_i32 = arith.constant 0 : i32
    %c0_i32_0 = arith.constant 0 : i32
    %c0_i32_1 = arith.constant 0 : i32
    return %arg0, %c0_i32, %c0_i32_0 : i32, i32, i32
  }
  func.func @transform_1(%arg0: i32) -> (i32, i32) {
    %c0_i32 = arith.constant 0 : i32
    %c0_i32_0 = arith.constant 0 : i32
    %c0_i32_1 = arith.constant 0 : i32
    return %c0_i32, %c0_i32_0 : i32, i32
  }
  func.func @transform_2(%arg0: i32) -> (i32, i32) {
    %c0_i32 = arith.constant 0 : i32
    %c0_i32_0 = arith.constant 0 : i32
    %c0_i32_1 = arith.constant 0 : i32
    return %c0_i32, %c0_i32_0 : i32, i32
  }
  func.func @transform_3(%arg0: i32) -> (i32, i32) {
    %c0_i32 = arith.constant 0 : i32
    %c0_i32_0 = arith.constant 0 : i32
    %c0_i32_1 = arith.constant 0 : i32
    return %c0_i32, %c0_i32_0 : i32, i32
  }
  func.func @transform_4(%arg0: i32) -> (i32, i32) {
    %c0_i32 = arith.constant 0 : i32
    %c0_i32_0 = arith.constant 0 : i32
    %c0_i32_1 = arith.constant 0 : i32
    return %c0_i32, %c0_i32_0 : i32, i32
  }
  func.func @transform_5(%arg0: i32) -> (i32, i32) {
    %c0_i32 = arith.constant 0 : i32
    %c0_i32_0 = arith.constant 0 : i32
    %c0_i32_1 = arith.constant 0 : i32
    return %c0_i32, %c0_i32_0 : i32, i32
  }
  func.func @transform_6(%arg0: i32) -> (i32, i32) {
    %c0_i32 = arith.constant 0 : i32
    %c0_i32_0 = arith.constant 0 : i32
    %c0_i32_1 = arith.constant 0 : i32
    return %c0_i32, %c0_i32_0 : i32, i32
  }
  func.func @transform_7(%arg0: i32) -> (i32, i32) {
    %c0_i32 = arith.constant 0 : i32
    %c0_i32_0 = arith.constant 0 : i32
    return %arg0, %c0_i32 : i32, i32
  }
}

module attributes {stable_mosaic.version = 11 : i64} {
  func.func @_sa_kernel_with_feat(%arg0: i32, %arg1: memref<8x32x3xf32, #tpu.memory_space<vmem>>, %arg2: memref<8x32x128xbf16, #tpu.memory_space<vmem>>, %arg3: memref<3x128xf32, #tpu.memory_space<vmem>>, %arg4: memref<128x128xbf16, #tpu.memory_space<vmem>>, %arg5: memref<1x128xf32, #tpu.memory_space<vmem>>, %arg6: memref<128x128xbf16, #tpu.memory_space<vmem>>, %arg7: memref<1x128xf32, #tpu.memory_space<vmem>>, %arg8: memref<128x256xbf16, #tpu.memory_space<vmem>>, %arg9: memref<1x256xf32, #tpu.memory_space<vmem>>, %arg10: memref<8x256xf32, #tpu.memory_space<vmem>>) attributes {dimension_semantics = [#tpu.dimension_semantics<parallel>], iteration_bounds = array<i64: 2>, scalar_prefetch = 0 : i64, scratch_operands = 0 : i64, tpu.core_type = #tpu.core_type<tc>, window_params = [{transform_indices = @transform_0, window_bounds = array<i64: 8, 32, 3>}, {transform_indices = @transform_1, window_bounds = array<i64: 8, 32, 128>}, {pipeline_mode = #tpu.pipeline_mode<synchronous>, transform_indices = @transform_2, window_bounds = array<i64: 3, 128>}, {pipeline_mode = #tpu.pipeline_mode<synchronous>, transform_indices = @transform_3, window_bounds = array<i64: 128, 128>}, {pipeline_mode = #tpu.pipeline_mode<synchronous>, transform_indices = @transform_4, window_bounds = array<i64: 1, 128>}, {pipeline_mode = #tpu.pipeline_mode<synchronous>, transform_indices = @transform_5, window_bounds = array<i64: 128, 128>}, {pipeline_mode = #tpu.pipeline_mode<synchronous>, transform_indices = @transform_6, window_bounds = array<i64: 1, 128>}, {pipeline_mode = #tpu.pipeline_mode<synchronous>, transform_indices = @transform_7, window_bounds = array<i64: 128, 256>}, {pipeline_mode = #tpu.pipeline_mode<synchronous>, transform_indices = @transform_8, window_bounds = array<i64: 1, 256>}, {transform_indices = @transform_9, window_bounds = array<i64: 8, 256>}]} {
    %c0 = arith.constant 0 : index
    %c0_0 = arith.constant 0 : index
    %c0_1 = arith.constant 0 : index
    %0 = vector.load %arg1[%c0, %c0_0, %c0_1] : memref<8x32x3xf32, #tpu.memory_space<vmem>>, vector<8x32x3xf32>
    %1 = vector.shape_cast %0 : vector<8x32x3xf32> to vector<256x3xf32>
    %c0_2 = arith.constant 0 : index
    %c0_3 = arith.constant 0 : index
    %c0_4 = arith.constant 0 : index
    %2 = vector.load %arg2[%c0_2, %c0_3, %c0_4] : memref<8x32x128xbf16, #tpu.memory_space<vmem>>, vector<8x32x128xbf16>
    %3 = vector.shape_cast %2 : vector<8x32x128xbf16> to vector<256x128xbf16>
    %c0_5 = arith.constant 0 : index
    %c0_6 = arith.constant 0 : index
    %4 = vector.load %arg4[%c0_5, %c0_6] : memref<128x128xbf16, #tpu.memory_space<vmem>>, vector<128x128xbf16>
    %cst = arith.constant dense<0.000000e+00> : vector<256x128xf32>
    %5 = tpu.matmul %3, %4, %cst {dimension_numbers = #tpu.dot_dimension_numbers<[1], [0], [0], [1], [0, 0, 1, 1], [], []>} : vector<256x128xbf16>, vector<128x128xbf16>, vector<256x128xf32> -> vector<256x128xf32>
    %c0_7 = arith.constant 0 : index
    %c0_8 = arith.constant 0 : index
    %6 = vector.load %arg3[%c0_7, %c0_8] : memref<3x128xf32, #tpu.memory_space<vmem>>, vector<3x128xf32>
    %7 = vector.extract_strided_slice %1 {offsets = [0, 0], sizes = [256, 1], strides = [1, 1]} : vector<256x3xf32> to vector<256x1xf32>
    %8 = vector.extract_strided_slice %6 {offsets = [0, 0], sizes = [1, 128], strides = [1, 1]} : vector<3x128xf32> to vector<1x128xf32>
    %9 = vector.broadcast %7 : vector<256x1xf32> to vector<256x128xf32>
    %10 = vector.broadcast %8 : vector<1x128xf32> to vector<256x128xf32>
    %11 = arith.mulf %9, %10 : vector<256x128xf32>
    %12 = vector.extract_strided_slice %1 {offsets = [0, 1], sizes = [256, 1], strides = [1, 1]} : vector<256x3xf32> to vector<256x1xf32>
    %13 = vector.extract_strided_slice %6 {offsets = [1, 0], sizes = [1, 128], strides = [1, 1]} : vector<3x128xf32> to vector<1x128xf32>
    %14 = vector.broadcast %12 : vector<256x1xf32> to vector<256x128xf32>
    %15 = vector.broadcast %13 : vector<1x128xf32> to vector<256x128xf32>
    %16 = arith.mulf %14, %15 : vector<256x128xf32>
    %17 = arith.addf %11, %16 : vector<256x128xf32>
    %18 = vector.extract_strided_slice %1 {offsets = [0, 2], sizes = [256, 1], strides = [1, 1]} : vector<256x3xf32> to vector<256x1xf32>
    %19 = vector.extract_strided_slice %6 {offsets = [2, 0], sizes = [1, 128], strides = [1, 1]} : vector<3x128xf32> to vector<1x128xf32>
    %20 = vector.broadcast %18 : vector<256x1xf32> to vector<256x128xf32>
    %21 = vector.broadcast %19 : vector<1x128xf32> to vector<256x128xf32>
    %22 = arith.mulf %20, %21 : vector<256x128xf32>
    %23 = arith.addf %17, %22 : vector<256x128xf32>
    %24 = arith.addf %5, %23 : vector<256x128xf32>
    %c0_9 = arith.constant 0 : index
    %c0_10 = arith.constant 0 : index
    %25 = vector.load %arg5[%c0_9, %c0_10] : memref<1x128xf32, #tpu.memory_space<vmem>>, vector<1x128xf32>
    %26 = vector.broadcast %25 : vector<1x128xf32> to vector<256x128xf32>
    %27 = arith.addf %24, %26 : vector<256x128xf32>
    %cst_11 = arith.constant 0.000000e+00 : f32
    %28 = vector.broadcast %cst_11 : f32 to vector<256x128xf32>
    %29 = arith.maximumf %27, %28 : vector<256x128xf32>
    %30 = arith.truncf %29 : vector<256x128xf32> to vector<256x128xbf16>
    %c0_12 = arith.constant 0 : index
    %c0_13 = arith.constant 0 : index
    %31 = vector.load %arg6[%c0_12, %c0_13] : memref<128x128xbf16, #tpu.memory_space<vmem>>, vector<128x128xbf16>
    %cst_14 = arith.constant dense<0.000000e+00> : vector<256x128xf32>
    %32 = tpu.matmul %30, %31, %cst_14 {dimension_numbers = #tpu.dot_dimension_numbers<[1], [0], [0], [1], [0, 0, 1, 1], [], []>} : vector<256x128xbf16>, vector<128x128xbf16>, vector<256x128xf32> -> vector<256x128xf32>
    %c0_15 = arith.constant 0 : index
    %c0_16 = arith.constant 0 : index
    %33 = vector.load %arg7[%c0_15, %c0_16] : memref<1x128xf32, #tpu.memory_space<vmem>>, vector<1x128xf32>
    %34 = vector.broadcast %33 : vector<1x128xf32> to vector<256x128xf32>
    %35 = arith.addf %32, %34 : vector<256x128xf32>
    %cst_17 = arith.constant 0.000000e+00 : f32
    %36 = vector.broadcast %cst_17 : f32 to vector<256x128xf32>
    %37 = arith.maximumf %35, %36 : vector<256x128xf32>
    %38 = arith.truncf %37 : vector<256x128xf32> to vector<256x128xbf16>
    %c0_18 = arith.constant 0 : index
    %c0_19 = arith.constant 0 : index
    %39 = vector.load %arg8[%c0_18, %c0_19] : memref<128x256xbf16, #tpu.memory_space<vmem>>, vector<128x256xbf16>
    %cst_20 = arith.constant dense<0.000000e+00> : vector<256x256xf32>
    %40 = tpu.matmul %38, %39, %cst_20 {dimension_numbers = #tpu.dot_dimension_numbers<[1], [0], [0], [1], [0, 0, 1, 1], [], []>} : vector<256x128xbf16>, vector<128x256xbf16>, vector<256x256xf32> -> vector<256x256xf32>
    %41 = vector.shape_cast %40 : vector<256x256xf32> to vector<8x32x256xf32>
    %cst_21 = arith.constant dense<0xFF800000> : vector<8x256xf32>
    %42 = vector.multi_reduction <maximumf>, %41, %cst_21 [1] : vector<8x32x256xf32> to vector<8x256xf32>
    %c0_22 = arith.constant 0 : index
    %c0_23 = arith.constant 0 : index
    %43 = vector.load %arg9[%c0_22, %c0_23] : memref<1x256xf32, #tpu.memory_space<vmem>>, vector<1x256xf32>
    %44 = vector.broadcast %43 : vector<1x256xf32> to vector<8x256xf32>
    %45 = arith.addf %42, %44 : vector<8x256xf32>
    %cst_24 = arith.constant 0.000000e+00 : f32
    %46 = vector.broadcast %cst_24 : f32 to vector<8x256xf32>
    %47 = arith.maximumf %45, %46 : vector<8x256xf32>
    %c0_25 = arith.constant 0 : index
    %c0_26 = arith.constant 0 : index
    %48 = vector.load %arg10[%c0_25, %c0_26] : memref<8x256xf32, #tpu.memory_space<vmem>>, vector<8x256xf32>
    tpu.vector_store %arg10[%c0_25, %c0_26], %47 {strides = array<i32>} : memref<8x256xf32, #tpu.memory_space<vmem>>, vector<8x256xf32>,
    return
  }
  func.func @transform_0(%arg0: i32) -> (i32, i32, i32) {
    %c0_i32 = arith.constant 0 : i32
    %c0_i32_0 = arith.constant 0 : i32
    %c0_i32_1 = arith.constant 0 : i32
    return %arg0, %c0_i32, %c0_i32_0 : i32, i32, i32
  }
  func.func @transform_1(%arg0: i32) -> (i32, i32, i32) {
    %c0_i32 = arith.constant 0 : i32
    %c0_i32_0 = arith.constant 0 : i32
    %c0_i32_1 = arith.constant 0 : i32
    return %arg0, %c0_i32, %c0_i32_0 : i32, i32, i32
  }
  func.func @transform_2(%arg0: i32) -> (i32, i32) {
    %c0_i32 = arith.constant 0 : i32
    %c0_i32_0 = arith.constant 0 : i32
    %c0_i32_1 = arith.constant 0 : i32
    return %c0_i32, %c0_i32_0 : i32, i32
  }
  func.func @transform_3(%arg0: i32) -> (i32, i32) {
    %c0_i32 = arith.constant 0 : i32
    %c0_i32_0 = arith.constant 0 : i32
    %c0_i32_1 = arith.constant 0 : i32
    return %c0_i32, %c0_i32_0 : i32, i32
  }
  func.func @transform_4(%arg0: i32) -> (i32, i32) {
    %c0_i32 = arith.constant 0 : i32
    %c0_i32_0 = arith.constant 0 : i32
    %c0_i32_1 = arith.constant 0 : i32
    return %c0_i32, %c0_i32_0 : i32, i32
  }
  func.func @transform_5(%arg0: i32) -> (i32, i32) {
    %c0_i32 = arith.constant 0 : i32
    %c0_i32_0 = arith.constant 0 : i32
    %c0_i32_1 = arith.constant 0 : i32
    return %c0_i32, %c0_i32_0 : i32, i32
  }
  func.func @transform_6(%arg0: i32) -> (i32, i32) {
    %c0_i32 = arith.constant 0 : i32
    %c0_i32_0 = arith.constant 0 : i32
    %c0_i32_1 = arith.constant 0 : i32
    return %c0_i32, %c0_i32_0 : i32, i32
  }
  func.func @transform_7(%arg0: i32) -> (i32, i32) {
    %c0_i32 = arith.constant 0 : i32
    %c0_i32_0 = arith.constant 0 : i32
    %c0_i32_1 = arith.constant 0 : i32
    return %c0_i32, %c0_i32_0 : i32, i32
  }
  func.func @transform_8(%arg0: i32) -> (i32, i32) {
    %c0_i32 = arith.constant 0 : i32
    %c0_i32_0 = arith.constant 0 : i32
    %c0_i32_1 = arith.constant 0 : i32
    return %c0_i32, %c0_i32_0 : i32, i32
  }
  func.func @transform_9(%arg0: i32) -> (i32, i32) {
    %c0_i32 = arith.constant 0 : i32
    %c0_i32_0 = arith.constant 0 : i32
    return %arg0, %c0_i32 : i32, i32
  }
}

module attributes {stable_mosaic.version = 11 : i64} {
  func.func @_sa_kernel_with_feat(%arg0: i32, %arg1: memref<8x32x3xf32, #tpu.memory_space<vmem>>, %arg2: memref<8x32x256xbf16, #tpu.memory_space<vmem>>, %arg3: memref<3x256xf32, #tpu.memory_space<vmem>>, %arg4: memref<256x256xbf16, #tpu.memory_space<vmem>>, %arg5: memref<1x256xf32, #tpu.memory_space<vmem>>, %arg6: memref<256x256xbf16, #tpu.memory_space<vmem>>, %arg7: memref<1x256xf32, #tpu.memory_space<vmem>>, %arg8: memref<256x256xbf16, #tpu.memory_space<vmem>>, %arg9: memref<1x256xf32, #tpu.memory_space<vmem>>, %arg10: memref<8x256xf32, #tpu.memory_space<vmem>>) attributes {dimension_semantics = [#tpu.dimension_semantics<parallel>], iteration_bounds = array<i64: 2>, scalar_prefetch = 0 : i64, scratch_operands = 0 : i64, tpu.core_type = #tpu.core_type<tc>, window_params = [{transform_indices = @transform_0, window_bounds = array<i64: 8, 32, 3>}, {transform_indices = @transform_1, window_bounds = array<i64: 8, 32, 256>}, {pipeline_mode = #tpu.pipeline_mode<synchronous>, transform_indices = @transform_2, window_bounds = array<i64: 3, 256>}, {pipeline_mode = #tpu.pipeline_mode<synchronous>, transform_indices = @transform_3, window_bounds = array<i64: 256, 256>}, {pipeline_mode = #tpu.pipeline_mode<synchronous>, transform_indices = @transform_4, window_bounds = array<i64: 1, 256>}, {pipeline_mode = #tpu.pipeline_mode<synchronous>, transform_indices = @transform_5, window_bounds = array<i64: 256, 256>}, {pipeline_mode = #tpu.pipeline_mode<synchronous>, transform_indices = @transform_6, window_bounds = array<i64: 1, 256>}, {pipeline_mode = #tpu.pipeline_mode<synchronous>, transform_indices = @transform_7, window_bounds = array<i64: 256, 256>}, {pipeline_mode = #tpu.pipeline_mode<synchronous>, transform_indices = @transform_8, window_bounds = array<i64: 1, 256>}, {transform_indices = @transform_9, window_bounds = array<i64: 8, 256>}]} {
    %c0 = arith.constant 0 : index
    %c0_0 = arith.constant 0 : index
    %c0_1 = arith.constant 0 : index
    %0 = vector.load %arg1[%c0, %c0_0, %c0_1] : memref<8x32x3xf32, #tpu.memory_space<vmem>>, vector<8x32x3xf32>
    %1 = vector.shape_cast %0 : vector<8x32x3xf32> to vector<256x3xf32>
    %c0_2 = arith.constant 0 : index
    %c0_3 = arith.constant 0 : index
    %c0_4 = arith.constant 0 : index
    %2 = vector.load %arg2[%c0_2, %c0_3, %c0_4] : memref<8x32x256xbf16, #tpu.memory_space<vmem>>, vector<8x32x256xbf16>
    %3 = vector.shape_cast %2 : vector<8x32x256xbf16> to vector<256x256xbf16>
    %c0_5 = arith.constant 0 : index
    %c0_6 = arith.constant 0 : index
    %4 = vector.load %arg4[%c0_5, %c0_6] : memref<256x256xbf16, #tpu.memory_space<vmem>>, vector<256x256xbf16>
    %cst = arith.constant dense<0.000000e+00> : vector<256x256xf32>
    %5 = tpu.matmul %3, %4, %cst {dimension_numbers = #tpu.dot_dimension_numbers<[1], [0], [0], [1], [0, 0, 1, 1], [], []>} : vector<256x256xbf16>, vector<256x256xbf16>, vector<256x256xf32> -> vector<256x256xf32>
    %c0_7 = arith.constant 0 : index
    %c0_8 = arith.constant 0 : index
    %6 = vector.load %arg3[%c0_7, %c0_8] : memref<3x256xf32, #tpu.memory_space<vmem>>, vector<3x256xf32>
    %7 = vector.extract_strided_slice %1 {offsets = [0, 0], sizes = [256, 1], strides = [1, 1]} : vector<256x3xf32> to vector<256x1xf32>
    %8 = vector.extract_strided_slice %6 {offsets = [0, 0], sizes = [1, 256], strides = [1, 1]} : vector<3x256xf32> to vector<1x256xf32>
    %9 = vector.broadcast %7 : vector<256x1xf32> to vector<256x256xf32>
    %10 = vector.broadcast %8 : vector<1x256xf32> to vector<256x256xf32>
    %11 = arith.mulf %9, %10 : vector<256x256xf32>
    %12 = vector.extract_strided_slice %1 {offsets = [0, 1], sizes = [256, 1], strides = [1, 1]} : vector<256x3xf32> to vector<256x1xf32>
    %13 = vector.extract_strided_slice %6 {offsets = [1, 0], sizes = [1, 256], strides = [1, 1]} : vector<3x256xf32> to vector<1x256xf32>
    %14 = vector.broadcast %12 : vector<256x1xf32> to vector<256x256xf32>
    %15 = vector.broadcast %13 : vector<1x256xf32> to vector<256x256xf32>
    %16 = arith.mulf %14, %15 : vector<256x256xf32>
    %17 = arith.addf %11, %16 : vector<256x256xf32>
    %18 = vector.extract_strided_slice %1 {offsets = [0, 2], sizes = [256, 1], strides = [1, 1]} : vector<256x3xf32> to vector<256x1xf32>
    %19 = vector.extract_strided_slice %6 {offsets = [2, 0], sizes = [1, 256], strides = [1, 1]} : vector<3x256xf32> to vector<1x256xf32>
    %20 = vector.broadcast %18 : vector<256x1xf32> to vector<256x256xf32>
    %21 = vector.broadcast %19 : vector<1x256xf32> to vector<256x256xf32>
    %22 = arith.mulf %20, %21 : vector<256x256xf32>
    %23 = arith.addf %17, %22 : vector<256x256xf32>
    %24 = arith.addf %5, %23 : vector<256x256xf32>
    %c0_9 = arith.constant 0 : index
    %c0_10 = arith.constant 0 : index
    %25 = vector.load %arg5[%c0_9, %c0_10] : memref<1x256xf32, #tpu.memory_space<vmem>>, vector<1x256xf32>
    %26 = vector.broadcast %25 : vector<1x256xf32> to vector<256x256xf32>
    %27 = arith.addf %24, %26 : vector<256x256xf32>
    %cst_11 = arith.constant 0.000000e+00 : f32
    %28 = vector.broadcast %cst_11 : f32 to vector<256x256xf32>
    %29 = arith.maximumf %27, %28 : vector<256x256xf32>
    %30 = arith.truncf %29 : vector<256x256xf32> to vector<256x256xbf16>
    %c0_12 = arith.constant 0 : index
    %c0_13 = arith.constant 0 : index
    %31 = vector.load %arg6[%c0_12, %c0_13] : memref<256x256xbf16, #tpu.memory_space<vmem>>, vector<256x256xbf16>
    %cst_14 = arith.constant dense<0.000000e+00> : vector<256x256xf32>
    %32 = tpu.matmul %30, %31, %cst_14 {dimension_numbers = #tpu.dot_dimension_numbers<[1], [0], [0], [1], [0, 0, 1, 1], [], []>} : vector<256x256xbf16>, vector<256x256xbf16>, vector<256x256xf32> -> vector<256x256xf32>
    %c0_15 = arith.constant 0 : index
    %c0_16 = arith.constant 0 : index
    %33 = vector.load %arg7[%c0_15, %c0_16] : memref<1x256xf32, #tpu.memory_space<vmem>>, vector<1x256xf32>
    %34 = vector.broadcast %33 : vector<1x256xf32> to vector<256x256xf32>
    %35 = arith.addf %32, %34 : vector<256x256xf32>
    %cst_17 = arith.constant 0.000000e+00 : f32
    %36 = vector.broadcast %cst_17 : f32 to vector<256x256xf32>
    %37 = arith.maximumf %35, %36 : vector<256x256xf32>
    %38 = arith.truncf %37 : vector<256x256xf32> to vector<256x256xbf16>
    %c0_18 = arith.constant 0 : index
    %c0_19 = arith.constant 0 : index
    %39 = vector.load %arg8[%c0_18, %c0_19] : memref<256x256xbf16, #tpu.memory_space<vmem>>, vector<256x256xbf16>
    %cst_20 = arith.constant dense<0.000000e+00> : vector<256x256xf32>
    %40 = tpu.matmul %38, %39, %cst_20 {dimension_numbers = #tpu.dot_dimension_numbers<[1], [0], [0], [1], [0, 0, 1, 1], [], []>} : vector<256x256xbf16>, vector<256x256xbf16>, vector<256x256xf32> -> vector<256x256xf32>
    %41 = vector.shape_cast %40 : vector<256x256xf32> to vector<8x32x256xf32>
    %cst_21 = arith.constant dense<0xFF800000> : vector<8x256xf32>
    %42 = vector.multi_reduction <maximumf>, %41, %cst_21 [1] : vector<8x32x256xf32> to vector<8x256xf32>
    %c0_22 = arith.constant 0 : index
    %c0_23 = arith.constant 0 : index
    %43 = vector.load %arg9[%c0_22, %c0_23] : memref<1x256xf32, #tpu.memory_space<vmem>>, vector<1x256xf32>
    %44 = vector.broadcast %43 : vector<1x256xf32> to vector<8x256xf32>
    %45 = arith.addf %42, %44 : vector<8x256xf32>
    %cst_24 = arith.constant 0.000000e+00 : f32
    %46 = vector.broadcast %cst_24 : f32 to vector<8x256xf32>
    %47 = arith.maximumf %45, %46 : vector<8x256xf32>
    %c0_25 = arith.constant 0 : index
    %c0_26 = arith.constant 0 : index
    %48 = vector.load %arg10[%c0_25, %c0_26] : memref<8x256xf32, #tpu.memory_space<vmem>>, vector<8x256xf32>
    tpu.vector_store %arg10[%c0_25, %c0_26], %47 {strides = array<i32>} : memref<8x256xf32, #tpu.memory_space<vmem>>, vector<8x256xf32>,
    return
  }
  func.func @transform_0(%arg0: i32) -> (i32, i32, i32) {
    %c0_i32 = arith.constant 0 : i32
    %c0_i32_0 = arith.constant 0 : i32
    %c0_i32_1 = arith.constant 0 : i32
    return %arg0, %c0_i32, %c0_i32_0 : i32, i32, i32
  }
  func.func @transform_1(%arg0: i32) -> (i32, i32, i32) {
    %c0_i32 = arith.constant 0 : i32
    %c0_i32_0 = arith.constant 0 : i32
    %c0_i32_1 = arith.constant 0 : i32
    return %arg0, %c0_i32, %c0_i32_0 : i32, i32, i32
  }
  func.func @transform_2(%arg0: i32) -> (i32, i32) {
    %c0_i32 = arith.constant 0 : i32
    %c0_i32_0 = arith.constant 0 : i32
    %c0_i32_1 = arith.constant 0 : i32
    return %c0_i32, %c0_i32_0 : i32, i32
  }
  func.func @transform_3(%arg0: i32) -> (i32, i32) {
    %c0_i32 = arith.constant 0 : i32
    %c0_i32_0 = arith.constant 0 : i32
    %c0_i32_1 = arith.constant 0 : i32
    return %c0_i32, %c0_i32_0 : i32, i32
  }
  func.func @transform_4(%arg0: i32) -> (i32, i32) {
    %c0_i32 = arith.constant 0 : i32
    %c0_i32_0 = arith.constant 0 : i32
    %c0_i32_1 = arith.constant 0 : i32
    return %c0_i32, %c0_i32_0 : i32, i32
  }
  func.func @transform_5(%arg0: i32) -> (i32, i32) {
    %c0_i32 = arith.constant 0 : i32
    %c0_i32_0 = arith.constant 0 : i32
    %c0_i32_1 = arith.constant 0 : i32
    return %c0_i32, %c0_i32_0 : i32, i32
  }
  func.func @transform_6(%arg0: i32) -> (i32, i32) {
    %c0_i32 = arith.constant 0 : i32
    %c0_i32_0 = arith.constant 0 : i32
    %c0_i32_1 = arith.constant 0 : i32
    return %c0_i32, %c0_i32_0 : i32, i32
  }
  func.func @transform_7(%arg0: i32) -> (i32, i32) {
    %c0_i32 = arith.constant 0 : i32
    %c0_i32_0 = arith.constant 0 : i32
    %c0_i32_1 = arith.constant 0 : i32
    return %c0_i32, %c0_i32_0 : i32, i32
  }
  func.func @transform_8(%arg0: i32) -> (i32, i32) {
    %c0_i32 = arith.constant 0 : i32
    %c0_i32_0 = arith.constant 0 : i32
    %c0_i32_1 = arith.constant 0 : i32
    return %c0_i32, %c0_i32_0 : i32, i32
  }
  func.func @transform_9(%arg0: i32) -> (i32, i32) {
    %c0_i32 = arith.constant 0 : i32
    %c0_i32_0 = arith.constant 0 : i32
    return %arg0, %c0_i32 : i32, i32
  }
}

</mosaic_0001>

<bundles_post_ra>
// kernel: neg.9
= control target key start
LH: loop header
LB: loop body
LE: loop exit
PB: predicated region body
PF: predicated region fallthrough
CT: control target
= control target key end

     0   :  { %s72_s0 = inlined_call_operand.vmem [shape: s32[2,8,16], index: 0, kind: input, shape index: {}]   ;;  %s73_s1 = inlined_call_operand.vmem [shape: s32[2,8,16], index: 1, kind: output, shape index: {}]  }
   0x1   :  { %v2_v0 = vld [vmem:[%s72_s0] sm:$0xff]  ;;  %v32_v1 = vld [vmem:[%s72_s0 + $0x10] sm:$0xff]  ;;  %v34_v2 = vld [vmem:[%s72_s0 + $0x8] sm:$0xff] }
   0x2   :  { %v5_v3 = vsub.s32 0, %v2_v0  ;;  %v12_v4 = vsub.s32 0, %v32_v1  ;;  %v20_v5 = vsub.s32 0, %v34_v2  ;;  %v36_v6 = vld [vmem:[%s72_s0 + $0x18] sm:$0xff] }
   0x3   :  { %v28_v7 = vsub.s32 0, %v36_v6 }
   0x4   :  { %7 = vst [vmem:[%s73_s1] sm:$0xff] %v5_v3  ;;  %33 = vst [vmem:[%s73_s1 + $0x10] sm:$0xff] %v12_v4 }
   0x5   :  { %35 = vst [vmem:[%s73_s1 + $0x8] sm:$0xff] %v20_v5  ;;  %37 = vst [vmem:[%s73_s1 + $0x18] sm:$0xff] %v28_v7 }

// kernel: neg.11
= control target key start
LH: loop header
LB: loop body
LE: loop exit
PB: predicated region body
PF: predicated region fallthrough
CT: control target
= control target key end

     0   :  { %s40_s0 = inlined_call_operand.vmem [shape: s32[2,8,8], index: 0, kind: input, shape index: {}]   ;;  %s41_s1 = inlined_call_operand.vmem [shape: s32[2,8,8], index: 1, kind: output, shape index: {}]  }
   0x1   :  { %v2_v0 = vld [vmem:[%s40_s0] sm:$0xff]  ;;  %v16_v1 = vld [vmem:[%s40_s0 + $0x8] sm:$0xff] }
   0x2   :  { %v5_v2 = vsub.s32 0, %v2_v0  ;;  %v12_v3 = vsub.s32 0, %v16_v1 }
   0x4   :  { %7 = vst [vmem:[%s41_s1] sm:$0xff] %v5_v2  ;;  %17 = vst [vmem:[%s41_s1 + $0x8] sm:$0xff] %v12_v3 }

// kernel: neg.7
= control target key start
LH: loop header
LB: loop body
LE: loop exit
PB: predicated region body
PF: predicated region fallthrough
CT: control target
= control target key end

     0   :  { %s72_s0 = inlined_call_operand.vmem [shape: s32[2,16,32], index: 0, kind: input, shape index: {}]   ;;  %s73_s1 = inlined_call_operand.vmem [shape: s32[2,16,32], index: 1, kind: output, shape index: {}]  }
   0x1   :  { %v2_v0 = vld [vmem:[%s72_s0] sm:$0xff]  ;;  %v32_v1 = vld [vmem:[%s72_s0 + $0x10] sm:$0xff]  ;;  %v34_v2 = vld [vmem:[%s72_s0 + $0x8] sm:$0xff] }
   0x2   :  { %v5_v3 = vsub.s32 0, %v2_v0  ;;  %v12_v4 = vsub.s32 0, %v32_v1  ;;  %v20_v5 = vsub.s32 0, %v34_v2  ;;  %v36_v6 = vld [vmem:[%s72_s0 + $0x18] sm:$0xff] }
   0x3   :  { %v28_v7 = vsub.s32 0, %v36_v6 }
   0x4   :  { %7 = vst [vmem:[%s73_s1] sm:$0xff] %v5_v3  ;;  %33 = vst [vmem:[%s73_s1 + $0x10] sm:$0xff] %v12_v4 }
   0x5   :  { %35 = vst [vmem:[%s73_s1 + $0x8] sm:$0xff] %v20_v5  ;;  %37 = vst [vmem:[%s73_s1 + $0x18] sm:$0xff] %v28_v7 }

// kernel: pointnet_plus_plus_forward.4
= control target key start
LH: loop header
LB: loop body
LE: loop exit
PB: predicated region body
PF: predicated region fallthrough
CT: control target
= control target key end

     0   :  { %s2691_s30 = smov 0   ;;  %s3416_s0 = inlined_call_operand.vmem [shape: f32[16,32,3], index: 0, kind: input, shape index: {}]   ;;  %s3417_s1 = inlined_call_operand.vmem [shape: bf16[16,32,128], index: 1, kind: input, shape index: {}]   ;;  %s3418_s2 = inlined_call_operand.vmem [shape: f32[3,128], index: 2, kind: input, shape index: {}]   ;;  %s3419_s3 = inlined_call_operand.vmem [shape: bf16[128,128], index: 3, kind: input, shape index: {}]   ;;  %s3420_s4 = inlined_call_operand.vmem [shape: f32[1,128], index: 4, kind: input, shape index: {}]   ;;  %s3421_s5 = inlined_call_operand.vmem [shape: bf16[128,128], index: 5, kind: input, shape index: {}]   ;;  %s3422_s6 = inlined_call_operand.vmem [shape: f32[1,128], index: 6, kind: input, shape index: {}]   ;;  %s3423_s7 = inlined_call_operand.vmem [shape: bf16[128,256], index: 7, kind: input, shape index: {}]   ;;  %s3424_s8 = inlined_call_operand.vmem [shape: f32[1,256], index: 8, kind: input, shape index: {}]   ;;  %s3425_s9 = inlined_call_operand.vmem [shape: f32[16,256], index: 9, kind: output, shape index: {}]  }
   0x1 LB: > { %s2697_s10 = sadd.s32 4294967295, %s2636_s30   ;;  %p2308_p0 = scmp.ge.s32.totalorder %s2636_s30, 1  ;;  %s2636_s30 = sphi %s2691_s30, %s19_s30  }
   0x2   : > { %p301_p1 = scmp.lt.s32.totalorder %s2636_s30, 3 }
   0x4   : > { %p302_p2 = pnand %p2308_p0, %p301_p1 }
   0x5   : > { %v2574_v0 = vld [vmem:[%s3419_s3] sm:$0xff] (!%p302_p2)   ;;  %v2638_v1 = vmov (!%p302_p2), 1   ;;  %v2575_v2 = vld [vmem:[%s3419_s3 + $0x8] sm:$0xff] (!%p302_p2)   ;;  %s2309_s15 = sshll.u32 (!%p302_p2), %s2697_s10, 3  ;;  %v2576_v3 = vld [vmem:[%s3419_s3 + $0x10] sm:$0xff] (!%p302_p2)   ;;  %v2639_v4 = vmov (!%p302_p2), 0  }
   0x6   : > { %305 = sbr.rel (%p302_p2) target bundleno = 893 (0x37d), region = 56  ;;  %2529 = vset.pattern.permute.xlu0 (!%p302_p2), %v2638_v1  ;;  %2527 = vset.pattern.permute.xlu1 (!%p302_p2), %v2638_v1  ;;  %p345_p3 = scmp.lt.s32.totalorder (!%p302_p2), %s2309_s15, 15  ;;  %v2577_v7 = vld [vmem:[%s3419_s3 + $0x18] sm:$0xff] (!%p302_p2)   ;;  %v2578_v10 = vld [vmem:[%s3419_s3 + $0x20] sm:$0xff] (!%p302_p2)   ;;  %v3428_v11 = vmov (!%p302_p2), 2   ;;  %v2579_v14 = vld [vmem:[%s3419_s3 + $0x28] sm:$0xff] (!%p302_p2)  }
   0x7   : > { %2420 = vmatprep.subr.bf16.mxu1 (!%p302_p2), %v2574_v0  ;;  %1833 = vmatprep.mubr.bf16.mxu0 (!%p302_p2), %v2639_v4  ;;  %v2580_v16 = vld [vmem:[%s3419_s3 + $0x30] sm:$0xff] (!%p302_p2)   ;;  %v2581_v18 = vld [vmem:[%s3419_s3 + $0x38] sm:$0xff] (!%p302_p2)   ;;  %v2598_v46 = vld [vmem:[%s3421_s5] sm:$0xff] (!%p302_p2)   ;;  %vm2199_vm0 = vcmask (!%p302_p2), 1041409   ;;  %vm2202_vm1 = vcmask (!%p302_p2), 1042434   ;;  %vm2205_vm2 = vcmask (!%p302_p2), 1043459  }
   0x8   : > { %2421 = vmatpush3.bf16.msra.mxu1 (!%p302_p2), %v2574_v0  ;;  %v2599_v47 = vld [vmem:[%s3421_s5 + $0x8] sm:$0xff] (!%p302_p2)   ;;  %v2600_v49 = vld [vmem:[%s3421_s5 + $0x10] sm:$0xff] (!%p302_p2)   ;;  %v2601_v50 = vld [vmem:[%s3421_s5 + $0x18] sm:$0xff] (!%p302_p2)   ;;  %vm2208_vm3 = vcmask (!%p302_p2), 1044484   ;;  %vm2211_vm4 = vcmask (!%p302_p2), 1045509   ;;  %vm2214_vm5 = vcmask (!%p302_p2), 1046534  }
   0x9   : > { %2422 = vmatprep.subr.bf16.mxu1 (!%p302_p2), %v2575_v2  ;;  %v2602_v52 = vld [vmem:[%s3421_s5 + $0x20] sm:$0xff] (!%p302_p2)   ;;  %v2603_v54 = vld [vmem:[%s3421_s5 + $0x28] sm:$0xff] (!%p302_p2)   ;;  %v2604_v56 = vld [vmem:[%s3421_s5 + $0x30] sm:$0xff] (!%p302_p2)   ;;  %p358_p4 = scmp.lt.s32.totalorder (!%p302_p2), %s2697_s10, 1  ;;  %vm2217_vm6 = vcmask (!%p302_p2), 1047559  }
   0xa   : > { %v2605_v57 = vld [vmem:[%s3421_s5 + $0x38] sm:$0xff] (!%p302_p2)  }
   0xc   : > { %2423 = vmatpush3.bf16.msra.mxu1 (!%p302_p2), %v2575_v2 }
   0xd   : > { %s3433_s15 = smov (!%p345_p3, %s2309_s15), 15  ;;  %2424 = vmatprep.subr.bf16.mxu1 %v2576_v3  ;;  %s3435_s10 = smov (!%p358_p4, %s2697_s10), 1 }
   0xe   : > { %s2369_s18 = sshll.u32 %s3433_s15, 5  ;;  %s2370_s22 = sshll.u32 %s3433_s15, 4 }
   0xf   : > { %s2717_s21 = scalar_lea.vmem %s3416_s0, %s2369_s18  ;;  %s2727_s27 = scalar_lea.vmem %s3417_s1, %s2370_s22 }
  0x10   : > { %v366_v5 = vld [vmem:[%s2717_s21 + $0x10] sm:$0xff]  ;;  %v364_v6 = vld [vmem:[%s2717_s21] sm:$0xff]  ;;  %v365_v8 = vld [vmem:[%s2717_s21 + $0x8] sm:$0xff]  ;;  %2425 = vmatpush3.bf16.msra.mxu1 %v2576_v3 }
  0x11   : > { %650 = vperm.xlu0 %2529, %v366_v5   ;;  %642 = vperm.xlu1 %2527, %v364_v6   ;;  %v2582_v9 = vld [vmem:[%s2727_s27] sm:$0xff]   ;;  %v367_v13 = vld [vmem:[%s2717_s21 + $0x18] sm:$0xff]  ;;  %v2747_v17 = vld [vmem:[%s2717_s21 + $0x48] sm:$0xff] }
  0x12   : > { %2426 = vmatprep.subr.bf16.mxu1 %v2577_v7  ;;  %v368_v12 = vld [vmem:[%s2717_s21 + $0x20] sm:$0xff]  ;;  %2436 = vmatprep.mubr.bf16.mxu1 %v2582_v9  ;;  %v371_v15 = vld [vmem:[%s2717_s21 + $0x38] sm:$0xff]  ;;  %v2583_v19 = vld [vmem:[%s2727_s27 + $0x8] sm:$0xff]  }
  0x13   : > { %v2584_v20 = vld [vmem:[%s2727_s27 + $0x10] sm:$0xff]   ;;  %v369_v21 = vld [vmem:[%s2717_s21 + $0x28] sm:$0xff]  ;;  %v2585_v22 = vld [vmem:[%s2727_s27 + $0x18] sm:$0xff]  }
  0x14   : > { %2427 = vmatpush3.bf16.msra.mxu1 %v2577_v7  ;;  %v2586_v23 = vld [vmem:[%s2727_s27 + $0x20] sm:$0xff]   ;;  %v2587_v24 = vld [vmem:[%s2727_s27 + $0x28] sm:$0xff]   ;;  %v2765_v25 = vld [vmem:[%s2717_s21 + $0x50] sm:$0xff] }
  0x15   : > { %2532 = vset.pattern.permute.xlu0 %v3428_v11  ;;  %646 = vperm.xlu1 %2527, %v365_v8   ;;  %v370_v26 = vld [vmem:[%s2717_s21 + $0x30] sm:$0xff]  ;;  %v2772_v28 = vld [vmem:[%s2717_s21 + $0x60] sm:$0xff]  ;;  %v2589_v29 = vld [vmem:[%s2727_s27 + $0x38] sm:$0xff]  }
  0x16   : > { %842 = vperm.xlu0 %2532, %v365_v8   ;;  %2428 = vmatprep.subr.bf16.mxu1 %v2578_v10  ;;  %v2588_v27 = vld [vmem:[%s2727_s27 + $0x30] sm:$0xff]   ;;  %v2777_v30 = vld [vmem:[%s2717_s21 + $0x88] sm:$0xff]  ;;  %v2590_v31 = vld [vmem:[%s2727_s27 + $0x40] sm:$0xff]  }
  0x17   : > { %v2783_v32 = vld [vmem:[%s2717_s21 + $0x90] sm:$0xff]  ;;  %v2591_v33 = vld [vmem:[%s2727_s27 + $0x48] sm:$0xff]   ;;  %v2593_v35 = vld [vmem:[%s2727_s27 + $0x58] sm:$0xff]  }
  0x18   : > { %2429 = vmatpush3.bf16.msra.mxu1 %v2578_v10  ;;  %v2592_v34 = vld [vmem:[%s2727_s27 + $0x50] sm:$0xff]   ;;  %v372_v36 = vld [vmem:[%s2717_s21 + $0x40] sm:$0xff]  ;;  %v2796_v38 = vld [vmem:[%s2717_s21 + $0x68] sm:$0xff] }
  0x19   : > { %2528 = vset.pattern.permute.xlu1 %v2639_v4  ;;  %2430 = vmatprep.subr.bf16.mxu1 %v2579_v14  ;;  %v2594_v37 = vld [vmem:[%s2727_s27 + $0x60] sm:$0xff]   ;;  %v2595_v39 = vld [vmem:[%s2727_s27 + $0x68] sm:$0xff]   ;;  %v2596_v40 = vld [vmem:[%s2727_s27 + $0x70] sm:$0xff]  }
  0x1a   : > { %854 = vperm.xlu0 %2532, %v368_v12   ;;  %462 = vperm.xlu1 %2528, %v367_v13   ;;  %v2803_v41 = vld [vmem:[%s2717_s21 + $0x70] sm:$0xff]  ;;  %v375_v42 = vld [vmem:[%s2717_s21 + $0x58] sm:$0xff]  ;;  %v2812_v44 = vld [vmem:[%s2717_s21 + $0xa8] sm:$0xff] }
  0x1b   : > { %v2597_v43 = vld [vmem:[%s2727_s27 + $0x78] sm:$0xff]   ;;  %v2817_v45 = vld [vmem:[%s2717_s21 + $0xb0] sm:$0xff]  ;;  %v2840_v51 = vld [vmem:[%s2717_s21 + $0xa0] sm:$0xff] }
  0x1c   : > { %2431 = vmatpush3.bf16.msra.mxu1 %v2579_v14  ;;  %v379_v48 = vld [vmem:[%s2717_s21 + $0x78] sm:$0xff]  ;;  %v2857_v55 = vld [vmem:[%s2717_s21 + $0xc8] sm:$0xff]  ;;  %v2873_v58 = vld [vmem:[%s2717_s21 + $0xd0] sm:$0xff] }
  0x1d   : > { %2432 = vmatprep.subr.bf16.mxu1 %v2580_v16  ;;  %v2848_v53 = vld [vmem:[%s2717_s21 + $0xb8] sm:$0xff]  ;;  %v2879_v59 = vld [vmem:[%s2717_s21 + $0xe0] sm:$0xff]  ;;  %v2896_v2 = vld [vmem:[%s2717_s21 + $0xe8] sm:$0xff] }
  0x1e   : > { %866 = vperm.xlu0 %2532, %v371_v15   ;;  %2530 = vset.pattern.permute.xlu1 %v2638_v1  ;;  %v380_v0 = vld [vmem:[%s2717_s21 + $0x80] sm:$0xff] }
  0x1f   : > { %654 = vperm.xlu1 %2530, %v367_v13  }
  0x20   : > { %2433 = vmatpush3.bf16.msra.mxu1 %v2580_v16 }
  0x21   : > { %2434 = vmatprep.subr.bf16.mxu1 %v2581_v18 }
  0x22   : > { %874 = vperm.xlu0 %2532, %v2747_v17  }
  0x23   : > { %2531 = vset.pattern.permute.xlu1 %v3428_v11 }
  0x24   : > { %838 = vperm.xlu1 %2531, %v364_v6   ;;  %2435 = vmatpush3.bf16.msra.mxu1 %v2581_v18 }
  0x25   : > { %2468 = vmatprep.subr.bf16.mxu1 %v2598_v46 }
  0x26   : > { %2543 = vset.pattern.permute.xlu0 %v2639_v4 }
  0x27   : > { %447 = vperm.xlu0 %2543, %v364_v6   ;;  %2437 = vmatmul.mubr.bf16.vlgmr.msra.gmra.mrb[0].mxu1 %v2583_v19  ;;  %v2905_v6 = vld [vmem:[%s2717_s21 + $0xf0] sm:$0xff] }
  0x28   : > { %846 = vperm.xlu1 %2531, %v366_v5   ;;  %2440 = vmatprep.mubr.bf16.mxu1 %v2584_v20 }
  0x29   : > { %2469 = vmatpush3.bf16.msra.mxu1 %v2598_v46 }
  0x2a   : > { %2470 = vmatprep.subr.bf16.mxu1 %v2599_v47 }
  0x2b   : > { %452 = vperm.xlu0 %2543, %v365_v8  }
  0x2c   : > { %850 = vperm.xlu1 %2531, %v367_v13  }
  0x2d   : > { %2471 = vmatpush3.bf16.msra.mxu1 %v2599_v47 }
  0x2e   : > { %2472 = vmatprep.subr.bf16.mxu1 %v2600_v49 }
  0x2f   : > { %457 = vperm.xlu0 %2543, %v366_v5   ;;  %2441 = vmatmul.mubr.bf16.gmra.mrb[4].mxu1 %v2585_v22 }
  0x30   : > { %2533 = vset.pattern.permute.xlu1 %v2639_v4  ;;  %2444 = vmatprep.mubr.bf16.mxu1 %v2586_v23 }
  0x31   : > { %472 = vperm.xlu1 %2533, %v369_v21   ;;  %2473 = vmatpush3.bf16.msra.mxu1 %v2600_v49  ;;  %v444_v49 = vld [vmem:[%s3418_s2] sm:$0x7] }
  0x32   : > { %2474 = vmatprep.subr.bf16.mxu1 %v2601_v50 }
  0x33   : > { %467 = vperm.xlu0 %2543, %v368_v12  }
  0x35   : > { %2534 = vset.pattern.permute.xlu1 %v2638_v1  ;;  %2475 = vmatpush3.bf16.msra.mxu1 %v2601_v50 }
  0x36   : > { %658 = vperm.xlu1 %2534, %v368_v12   ;;  %2476 = vmatprep.subr.bf16.mxu1 %v2602_v52  ;;  %v383_v12 = vld [vmem:[%s2717_s21 + $0x98] sm:$0xff] }
  0x37   : > { %492 = vperm.xlu0 %2543, %v2747_v17   ;;  %2445 = vmatmul.mubr.bf16.gmra.mrb[8].mxu1 %v2587_v24 }
  0x38   : > { %2448 = vmatprep.mubr.bf16.mxu1 %v2588_v27 }
  0x39   : > { %2477 = vmatpush3.bf16.msra.mxu1 %v2602_v52 }
  0x3a   : > { %2535 = vset.pattern.permute.xlu1 %v2639_v4  ;;  %2478 = vmatprep.subr.bf16.mxu1 %v2603_v54 }
  0x3b   : > { %497 = vperm.xlu0 %2543, %v2765_v25   ;;  %477 = vperm.xlu1 %2535, %v370_v26  }
  0x3d   : > { %2479 = vmatpush3.bf16.msra.mxu1 %v2603_v54 }
  0x3e   : > { %2480 = vmatprep.subr.bf16.mxu1 %v2604_v56 }
  0x3f   : > { %507 = vperm.xlu0 %2543, %v2772_v28   ;;  %482 = vperm.xlu1 %2535, %v371_v15  }
  0x40   : > { %2449 = vmatmul.mubr.bf16.gmra.mrb[12].mxu1 %v2589_v29 }
  0x41   : > { %2452 = vmatprep.mubr.bf16.mxu1 %v2590_v31  ;;  %2481 = vmatpush3.bf16.msra.mxu1 %v2604_v56 }
  0x42   : > { %2482 = vmatprep.subr.bf16.mxu1 %v2605_v57 }
  0x43   : > { %532 = vperm.xlu0 %2543, %v2777_v30   ;;  %2536 = vset.pattern.permute.xlu1 %v2638_v1 }
  0x44   : > { %670 = vperm.xlu1 %2536, %v371_v15   ;;  %v2926_v15 = vld [vmem:[%s2717_s21 + $0xf8] sm:$0xff] }
  0x45   : > { %2483 = vmatpush3.bf16.msra.mxu1 %v2605_v57 }
  0x47   : > { %537 = vperm.xlu0 %2543, %v2783_v32  }
  0x48   : > { %2537 = vset.pattern.permute.xlu1 %v3428_v11  ;;  %2453 = vmatmul.mubr.bf16.gmra.mrb[16].mxu1 %v2591_v33 }
  0x49   : > { %858 = vperm.xlu1 %2537, %v369_v21   ;;  %2456 = vmatprep.mubr.bf16.mxu1 %v2592_v34 }
  0x4b   : > { %2551 = vset.pattern.permute.xlu0 %v2638_v1 }
  0x4c   : > { %662 = vperm.xlu0 %2551, %v369_v21  }
  0x4d   : > { %862 = vperm.xlu1 %2537, %v370_v26  }
  0x50   : > { %666 = vperm.xlu0 %2551, %v370_v26   ;;  %2457 = vmatmul.mubr.bf16.gmra.mrb[20].mxu1 %v2593_v35  ;;  %v388_v35 = vld [vmem:[%s2717_s21 + $0xc0] sm:$0xff] }
  0x51   : > { %2538 = vset.pattern.permute.xlu1 %v2639_v4  ;;  %2460 = vmatprep.mubr.bf16.mxu1 %v2594_v37 }
  0x52   : > { %487 = vperm.xlu1 %2538, %v372_v36  }
  0x54   : > { %682 = vperm.xlu0 %2551, %v2765_v25  }
  0x56   : > { %2539 = vset.pattern.permute.xlu1 %v2638_v1 }
  0x57   : > { %674 = vperm.xlu1 %2539, %v372_v36  }
  0x58   : > { %694 = vperm.xlu0 %2551, %v2796_v38   ;;  %2461 = vmatmul.mubr.bf16.gmra.mrb[24].mxu1 %v2595_v39 }
  0x59   : > { %2464 = vmatprep.mubr.bf16.mxu1 %v2596_v40  ;;  %v605_v40 = vlaneseq }
  0x5b   : > { %678 = vperm.xlu1 %2539, %v2747_v17  }
  0x5c   : > { %698 = vperm.xlu0 %2551, %v2803_v41  }
  0x5f   : > { %2540 = vset.pattern.permute.xlu1 %v2639_v4 }
  0x60   : > { %502 = vperm.xlu1 %2540, %v375_v42   ;;  %714 = vperm.xlu0 %2551, %v2783_v32  }
  0x61   : > { %2465 = vmatmul.mubr.bf16.gmra.mrb[28].mxu1 %v2597_v43  ;;  %v391_v43 = vld [vmem:[%s2717_s21 + $0xd8] sm:$0xff]  ;;  %s2371_s21 = sshll.u32 %s3435_s10, 4 }
  0x62   : > { %s362_s19 = scalar_lea.vmem %s3425_s9, %s2371_s21 }
  0x64   : > { %2541 = vset.pattern.permute.xlu1 %v2638_v1  ;;  %726 = vperm.xlu0 %2551, %v2812_v44  }
  0x65   : > { %686 = vperm.xlu1 %2541, %v375_v42  }
  0x68   : > { %730 = vperm.xlu0 %2551, %v2817_v45  }
  0x69   : > { %2542 = vset.pattern.permute.xlu1 %v3428_v11 }
  0x6a   : > { %870 = vperm.xlu1 %2542, %v372_v36  }
  0x6c   : > { %2558 = vset.pattern.permute.xlu0 %v3428_v11 }
  0x6d   : > { %886 = vperm.xlu0 %2558, %v2772_v28  }
  0x6e   : > { %878 = vperm.xlu1 %2542, %v2765_v25  }
  0x71   : > { %898 = vperm.xlu0 %2558, %v379_v48  }
  0x72   : > { %882 = vperm.xlu1 %2542, %v375_v42  }
  0x75   : > { %906 = vperm.xlu0 %2558, %v2777_v30  }
  0x76   : > { %2544 = vset.pattern.permute.xlu1 %v2639_v4 }
  0x77   : > { %512 = vperm.xlu1 %2544, %v2796_v38  }
  0x79   : > { %918 = vperm.xlu0 %2558, %v2840_v51  }
  0x7b   : > { %2545 = vset.pattern.permute.xlu1 %v2638_v1 }
  0x7c   : > { %690 = vperm.xlu1 %2545, %v2772_v28  }
  0x7d   : > { %930 = vperm.xlu0 %2558, %v2848_v53  }
  0x80   : > { %2546 = vset.pattern.permute.xlu1 %v2639_v4 }
  0x81   : > { %517 = vperm.xlu1 %2546, %v2803_v41   ;;  %938 = vperm.xlu0 %2558, %v2857_v55  }
  0x85   : > { %522 = vperm.xlu1 %2546, %v379_v48   ;;  %2566 = vset.pattern.permute.xlu0 %v2639_v4 }
  0x86   : > { %547 = vperm.xlu0 %2566, %v2840_v51  }
  0x89   : > { %2547 = vset.pattern.permute.xlu1 %v2638_v1 }
  0x8a   : > { %702 = vperm.xlu1 %2547, %v379_v48   ;;  %572 = vperm.xlu0 %2566, %v2857_v55  }
  0x8e   : > { %2548 = vset.pattern.permute.xlu1 %v3428_v11  ;;  %577 = vperm.xlu0 %2566, %v2873_v58  }
  0x8f   : > { %890 = vperm.xlu1 %2548, %v2796_v38  }
  0x90   : > { %v2881_v60 = vpop.permute.xlu1 %642  ;;  %v2883_v61 = vpop.permute.xlu0 %650 }
  0x92   : > { %587 = vperm.xlu0 %2566, %v2879_v59  }
  0x93   : > { %894 = vperm.xlu1 %2548, %v2803_v41  }
  0x94   : > { %v2887_v62 = vpop.permute.xlu1 %646 }
  0x95   : > { %v2889_v63 = vpop.permute.xlu0 %842 }
  0x96   : > { %2567 = vset.pattern.permute.xlu0 %v2638_v1 }
  0x97   : > { %2549 = vset.pattern.permute.xlu1 %v2639_v4  ;;  %746 = vperm.xlu0 %2567, %v2873_v58  }
  0x98   : > { %527 = vperm.xlu1 %2549, %v380_v0  }
  0x99   : > { %v2898_v3 = vpop.permute.xlu1 %462  ;;  %v2900_v5 = vpop.permute.xlu0 %854 }
  0x9b   : > { %758 = vperm.xlu0 %2567, %v2896_v2  }
  0x9c   : > { %2550 = vset.pattern.permute.xlu1 %v2638_v1 }
  0x9d   : > { %706 = vperm.xlu1 %2550, %v380_v0   ;;  %v2907_v7 = vpop.permute.xlu0 %866 }
  0x9e   : > { %v2909_v8 = vpop.permute.xlu1 %654 }
  0x9f   : > { %762 = vperm.xlu0 %2567, %v2905_v6  }
  0xa1   : > { %710 = vperm.xlu1 %2550, %v2777_v30   ;;  %v2913_v9 = vpop.permute.xlu0 %874 }
  0xa3   : > { %v2915_v10 = vpop.permute.xlu1 %838  ;;  %2572 = vset.pattern.permute.xlu0 %v3428_v11 }
  0xa4   : > { %950 = vperm.xlu0 %2572, %v2879_v59  }
  0xa5   : > { %2552 = vset.pattern.permute.xlu1 %v2639_v4 }
  0xa6   : > { %542 = vperm.xlu1 %2552, %v383_v12   ;;  %v2921_v13 = vpop.permute.xlu0 %447 }
  0xa7   : > { %v2923_v14 = vpop.permute.xlu1 %846 }
  0xa8   : > { %962 = vperm.xlu0 %2572, %v2926_v15  }
  0xaa   : > { %2553 = vset.pattern.permute.xlu1 %v2638_v1  ;;  %v2932_v17 = vpop.permute.xlu0 %452 }
  0xab   : > { %718 = vperm.xlu1 %2553, %v383_v12   ;;  %v2930_v16 = vpop.permute.xlu1 %850 }
  0xae   : > { %v458_v19 = vpop.permute.xlu0 %457 }
  0xaf   : > { %2554 = vset.pattern.permute.xlu1 %v3428_v11 }
  0xb0   : > { %902 = vperm.xlu1 %2554, %v380_v0   ;;  %v2935_v18 = vpop.permute.xlu1 %472 }
  0xb2   : > { %v2940_v21 = vpop.permute.xlu0 %467 }
  0xb4   : > { %910 = vperm.xlu1 %2554, %v2783_v32  }
  0xb5   : > { %v2938_v20 = vpop.permute.xlu1 %658 }
  0xb6   : > { %v2948_v24 = vpop.permute.xlu0 %492 }
  0xb8   : > { %914 = vperm.xlu1 %2554, %v383_v12  }
  0xba   : > { %v2942_v22 = vpop.permute.xlu1 %477  ;;  %v2954_v26 = vpop.permute.xlu0 %497 }
  0xbc   : > { %2555 = vset.pattern.permute.xlu1 %v2639_v4 }
  0xbd   : > { %552 = vperm.xlu1 %2555, %v2812_v44  }
  0xbe   : > { %v2946_v23 = vpop.permute.xlu1 %482  ;;  %v2960_v28 = vpop.permute.xlu0 %507 }
  0xc1   : > { %2556 = vset.pattern.permute.xlu1 %v2638_v1 }
  0xc2   : > { %722 = vperm.xlu1 %2556, %v2840_v51   ;;  %v2967_v30 = vpop.permute.xlu0 %532 }
  0xc3   : > { %v2952_v25 = vpop.permute.xlu1 %670 }
  0xc6   : > { %2557 = vset.pattern.permute.xlu1 %v2639_v4  ;;  %v2975_v33 = vpop.permute.xlu0 %537 }
  0xc7   : > { %557 = vperm.xlu1 %2557, %v2817_v45  }
  0xc8   : > { %v2958_v27 = vpop.permute.xlu1 %858 }
  0xcb   : > { %562 = vperm.xlu1 %2557, %v2848_v53   ;;  %v2981_v36 = vpop.permute.xlu0 %662 }
  0xcc   : > { %v2963_v29 = vpop.permute.xlu1 %862 }
  0xcf   : > { %2559 = vset.pattern.permute.xlu1 %v2638_v1  ;;  %v667_v38 = vpop.permute.xlu0 %666 }
  0xd0   : > { %734 = vperm.xlu1 %2559, %v2848_v53  }
  0xd1   : > { %v2969_v31 = vpop.permute.xlu1 %487 }
  0xd3   : > { %v2989_v41 = vpop.permute.xlu0 %682 }
  0xd4   : > { %2560 = vset.pattern.permute.xlu1 %v3428_v11 }
  0xd5   : > { %922 = vperm.xlu1 %2560, %v2812_v44   ;;  %v2995_v44 = vshrl.u32 %v605_v40, 7 }
  0xd6   : > { %v2973_v32 = vpop.permute.xlu1 %674 }
  0xd7   : > { %v3426_v47 = vsub.s32 1, %v2995_v44  ;;  %v3427_v48 = vsub.s32 0, %v2995_v44  ;;  %v967_v53 = vsub.s32 2, %v2995_v44 }
  0xd9   : > { %926 = vperm.xlu1 %2560, %v2817_v45   ;;  %v2998_v45 = vpop.permute.xlu0 %694  ;;  %v3012_v51 = vrot.slane %v444_v49, %v3426_v47  ;;  %v3016_v52 = vrot.slane %v444_v49, %v3427_v48  ;;  %v3031_v40 = vrot.slane %v444_v49, %v967_v53 }
  0xda   : > { %v2978_v34 = vpop.permute.xlu1 %678 }
  0xdb   : > { %v611_v56 = vmul.f32 %v3016_v52, %v458_v19  ;;  %v609_v57 = vmul.f32 %v3016_v52, %v2921_v13  ;;  %v773_v12 = vmul.f32 %v3012_v51, %v2881_v60  ;;  %v610_v47 = vmul.f32 %v3016_v52, %v2932_v17 }
  0xdc   : > { %v774_v13 = vmul.f32 %v3012_v51, %v2887_v62  ;;  %v612_v60 = vmul.f32 %v3016_v52, %v2898_v3  ;;  %v971_v49 = vmul.f32 %v3031_v40, %v2923_v14  ;;  %v972_v17 = vmul.f32 %v3031_v40, %v2930_v16 }
  0xdd   : > { %2561 = vset.pattern.permute.xlu1 %v2639_v4  ;;  %v3019_v54 = vpop.permute.xlu0 %698  ;;  %v805_v48 = vadd.f32 %v773_v12, %v609_v57  ;;  %v969_v62 = vmul.f32 %v3031_v40, %v2915_v10  ;;  %v613_v53 = vmul.f32 %v3016_v52, %v2940_v21  ;;  %v973_v3 = vmul.f32 %v3031_v40, %v2900_v5 }
  0xde   : > { %567 = vperm.xlu1 %2561, %v388_v35   ;;  %v779_v16 = vmul.f32 %v3012_v51, %v667_v38  ;;  %v3065_v10 = vmul.f32 %v3031_v40, %v2913_v9  ;;  %v780_v21 = vmul.f32 %v3012_v51, %v2952_v25  ;;  %v615_v38 = vmul.f32 %v3016_v52, %v2942_v22 }
  0xdf   : > { %v2984_v37 = vpop.permute.xlu1 %502  ;;  %v1001_v5 = vadd.f32 %v969_v62, %v805_v48  ;;  %v616_v25 = vmul.f32 %v3016_v52, %v2946_v23  ;;  %v614_v48 = vmul.f32 %v3016_v52, %v2935_v18  ;;  %v783_v18 = vmul.f32 %v3012_v51, %v2989_v41 }
  0xe0   : > { %v811_v22 = vadd.f32 %v779_v16, %v615_v38  ;;  %v618_v16 = vmul.f32 %v3016_v52, %v2948_v24 }
  0xe2   : > { %2562 = vset.pattern.permute.xlu1 %v2638_v1 }
  0xe3   : > { %738 = vperm.xlu1 %2562, %v388_v35  }
  0xe4   : > { %v2987_v39 = vpop.permute.xlu1 %686 }
  0xe7   : > { %742 = vperm.xlu1 %2562, %v2857_v55   ;;  %v775_v55 = vmul.f32 %v3012_v51, %v2883_v61  ;;  %v776_v61 = vmul.f32 %v3012_v51, %v2909_v8  ;;  %v806_v8 = vadd.f32 %v774_v13, %v610_v47  ;;  %v3072_v47 = vld [vmem:[%s3420_s4] ss:$0 sm:$0xff] }
  0xe9   : > { %v2992_v42 = vpop.permute.xlu1 %870  ;;  %v807_v19 = vadd.f32 %v775_v55, %v611_v56  ;;  %v808_v14 = vadd.f32 %v776_v61, %v612_v60 }
  0xeb   : > { %2563 = vset.pattern.permute.xlu1 %v2639_v4  ;;  %v1003_v56 = vadd.f32 %v971_v49, %v807_v19  ;;  %v1004_v12 = vadd.f32 %v972_v17, %v808_v14  ;;  %v619_v17 = vmul.f32 %v3016_v52, %v2954_v26  ;;  %v782_v26 = vmul.f32 %v3012_v51, %v2978_v34 }
  0xec   : > { %582 = vperm.xlu1 %2563, %v391_v43  }
  0xed   : > { %v3000_v46 = vpop.permute.xlu1 %878 }
  0xf0   : > { %2564 = vset.pattern.permute.xlu1 %v2638_v1 }
  0xf1   : > { %750 = vperm.xlu1 %2564, %v391_v43   ;;  %v3008_v50 = vpop.permute.xlu1 %882 }
  0xf5   : > { %2565 = vset.pattern.permute.xlu1 %v3428_v11  ;;  %v3039_v11 = vpop.permute.xlu0 %714 }
  0xf6   : > { %934 = vperm.xlu1 %2565, %v388_v35   ;;  %v3027_v0 = vpop.permute.xlu1 %512  ;;  %v970_v35 = vmul.f32 %v3031_v40, %v2889_v63  ;;  %v777_v63 = vmul.f32 %v3012_v51, %v2938_v20 }
  0xf8   : > { %v809_v61 = vadd.f32 %v777_v63, %v613_v53  ;;  %v1002_v49 = vadd.f32 %v970_v35, %v806_v8  ;;  %v812_v53 = vadd.f32 %v780_v21, %v616_v25  ;;  %v975_v35 = vmul.f32 %v3031_v40, %v2963_v29 }
  0xf9   : > { %v3080_v19 = vpop.permute.xlu0 %726  ;;  %v974_v29 = vmul.f32 %v3031_v40, %v2958_v27 }
  0xfa   : > { %942 = vperm.xlu1 %2565, %v2873_v58   ;;  %v976_v58 = vmul.f32 %v3031_v40, %v2907_v7  ;;  %v2438_v20 = vpop.f32.mrb[0].mxu1  ;;  %v778_v7 = vmul.f32 %v3012_v51, %v2981_v36 }
  0xfb   : > { %v3056_v55 = vpop.permute.xlu1 %690  ;;  %v1220_v57 = vadd.f32 %v2438_v20, %v1003_v56  ;;  %v1211_v9 = vpop.f32.mrb[1].mxu1  ;;  %v1005_v20 = vadd.f32 %v973_v3, %v809_v61 }
  0xfc   : > { %v1212_v13 = vadd.f32 %v1211_v9, %v1001_v5  ;;  %v2439_v60 = vpop.f32.mrb[2].mxu1  ;;  %v810_v14 = vadd.f32 %v778_v7, %v614_v48  ;;  %v1007_v7 = vadd.f32 %v975_v35, %v811_v22  ;;  %v1008_v25 = vadd.f32 %v976_v58, %v812_v53 }
  0xfd   : > { %v1347_v62 = vadd.f32 %v3072_v47, %v1220_v57  ;;  %v1214_v56 = vpop.f32.mrb[3].mxu1  ;;  %v3108_v57 = vmul.f32 %v3016_v52, %v2960_v28  ;;  %v3110_v24 = vpop.permute.xlu0 %730  ;;  %v814_v48 = vadd.f32 %v782_v26, %v618_v16  ;;  %v979_v58 = vmul.f32 %v3031_v40, %v3000_v46 }
  0xfe   : > { %946 = vperm.xlu1 %2565, %v391_v43   ;;  %v1223_v43 = vadd.f32 %v2439_v60, %v1004_v12  ;;  %v1345_v23 = vadd.f32 %v3072_v47, %v1212_v13  ;;  %v1215_v63 = vadd.f32 %v1214_v56, %v1002_v49  ;;  %v815_v13 = vadd.f32 %v783_v18, %v619_v17 }
  0xff   : > { %v1379_v5 = vmax.f32 %v1347_v62, 0.0  ;;  %v1006_v27 = vadd.f32 %v974_v29, %v810_v14  ;;  %v781_v49 = vmul.f32 %v3012_v51, %v2973_v32  ;;  %v617_v32 = vmul.f32 %v3016_v52, %v2969_v31 }
 0x100   : > { %v3085_v36 = vpop.permute.xlu1 %517  ;;  %v1348_v8 = vadd.f32 %v3072_v47, %v1223_v43  ;;  %v1346_v21 = vadd.f32 %v3072_v47, %v1215_v63  ;;  %v1377_v34 = vmax.f32 %v1345_v23, 0.0  ;;  %v784_v43 = vmul.f32 %v3012_v51, %v2987_v39 }
 0x101   : > { %v977_v23 = vmul.f32 %v3031_v40, %v2992_v42  ;;  %v620_v39 = vmul.f32 %v3016_v52, %v2984_v37  ;;  %v786_v46 = vmul.f32 %v3012_v51, %v2998_v45  ;;  %v813_v31 = vadd.f32 %v781_v49, %v617_v32 }
 0x102   : > { %2568 = vset.pattern.permute.xlu1 %v2639_v4  ;;  %v1380_v41 = vmax.f32 %v1348_v8, 0.0  ;;  %v1378_v9 = vmax.f32 %v1346_v21, 0.0  ;;  %v2442_v12 = vpop.f32.mrb[4].mxu1  ;;  %v787_v42 = vmul.f32 %v3012_v51, %v3019_v54  ;;  %v887_v8 = vpop.permute.xlu0 %886  ;;  %v1010_v26 = vadd.f32 %v3065_v10, %v814_v48 }
 0x103   : > { %592 = vperm.xlu1 %2568, %v2896_v2   ;;  %v1236_v61 = vadd.f32 %v2442_v12, %v1007_v7  ;;  %v1227_v60 = vpop.f32.mrb[5].mxu1  ;;  %v816_v21 = vadd.f32 %v784_v43, %v620_v39  ;;  %v1011_v45 = vadd.f32 %v979_v58, %v815_v13  ;;  %v1009_v54 = vadd.f32 %v977_v23, %v813_v31 }
 0x104   : > { %v3104_v38 = vpop.permute.xlu1 %522  ;;  %v1410_v3 = vpack.c.bf16 %v1380_v41, %v1379_v5  ;;  %v1228_v22 = vadd.f32 %v1227_v60, %v1005_v20  ;;  %v2443_v28 = vpop.f32.mrb[6].mxu1  ;;  %v1409_v62 = vpack.c.bf16 %v1378_v9, %v1377_v34  ;;  %v623_v13 = vmul.f32 %v3016_v52, %v3085_v36 }
 0x105   : > { %v1351_v56 = vadd.f32 %v3072_v47, %v1236_v61  ;;  %v1239_v17 = vadd.f32 %v2443_v28, %v1008_v25  ;;  %v1230_v53 = vpop.f32.mrb[7].mxu1  ;;  %v622_v49 = vmul.f32 %v3016_v52, %v3027_v0  ;;  %v624_v48 = vmul.f32 %v3016_v52, %v3104_v38 }
 0x106   : > { %v1349_v63 = vadd.f32 %v3072_v47, %v1228_v22  ;;  %v1231_v35 = vadd.f32 %v1230_v53, %v1006_v27  ;;  %2484 = vmatprep.mubr.bf16.mxu1 %v1409_v62  ;;  %v899_v61 = vpop.permute.xlu0 %898  ;;  %v819_v38 = vadd.f32 %v787_v42, %v623_v13 }
 0x107   : > { %2569 = vset.pattern.permute.xlu1 %v2638_v1  ;;  %v1352_v18 = vadd.f32 %v3072_v47, %v1239_v17  ;;  %2485 = vmatmul.mubr.bf16.vlgmr.msra.gmra.mrb[32].mxu1 %v1410_v3  ;;  %v1383_v37 = vmax.f32 %v1351_v56, 0.0  ;;  %v981_v3 = vmul.f32 %v3031_v40, %v887_v8  ;;  %v984_v17 = vmul.f32 %v3031_v40, %v899_v61 }
 0x108   : > { %754 = vperm.xlu1 %2569, %v2879_v59   ;;  %v980_v59 = vmul.f32 %v3031_v40, %v3008_v50  ;;  %v1350_v16 = vadd.f32 %v3072_v47, %v1231_v35  ;;  %v785_v50 = vmul.f32 %v3012_v51, %v3056_v55  ;;  %v1381_v29 = vmax.f32 %v1349_v63, 0.0 }
 0x109   : > { %v703_v14 = vpop.permute.xlu1 %702  ;;  %v1384_v20 = vmax.f32 %v1352_v18, 0.0  ;;  %v818_v63 = vadd.f32 %v786_v46, %v622_v49 }
 0x10a   : > { %v1382_v5 = vmax.f32 %v1350_v16, 0.0  ;;  %v2446_v41 = vpop.f32.mrb[8].mxu1  ;;  %v788_v7 = vmul.f32 %v3012_v51, %v703_v14  ;;  %v1012_v12 = vadd.f32 %v980_v59, %v816_v21  ;;  %v817_v43 = vadd.f32 %v785_v50, %v3108_v57  ;;  %v907_v61 = vpop.permute.xlu0 %906 }
 0x10b   : > { %v1252_v9 = vadd.f32 %v2446_v41, %v1011_v45  ;;  %v1243_v10 = vpop.f32.mrb[9].mxu1  ;;  %v1412_v25 = vpack.c.bf16 %v1384_v20, %v1383_v37 }
 0x10c   : > { %2570 = vset.pattern.permute.xlu1 %v2639_v4  ;;  %v1244_v55 = vadd.f32 %v1243_v10, %v1009_v54  ;;  %v2447_v60 = vpop.f32.mrb[10].mxu1  ;;  %v1411_v27 = vpack.c.bf16 %v1382_v5, %v1381_v29  ;;  %v820_v56 = vadd.f32 %v788_v7, %v624_v48  ;;  %v1013_v8 = vadd.f32 %v981_v3, %v817_v43 }
 0x10d   : > { %597 = vperm.xlu1 %2570, %v2905_v6   ;;  %v1355_v22 = vadd.f32 %v3072_v47, %v1252_v9  ;;  %v1255_v28 = vadd.f32 %v2447_v60, %v1012_v12  ;;  %v1246_v62 = vpop.f32.mrb[11].mxu1 }
 0x10e   : > { %v891_v34 = vpop.permute.xlu1 %890  ;;  %v1353_v58 = vadd.f32 %v3072_v47, %v1244_v55  ;;  %v1247_v36 = vadd.f32 %v1246_v62, %v1010_v26  ;;  %2488 = vmatprep.mubr.bf16.mxu1 %v1411_v27  ;;  %v1016_v42 = vadd.f32 %v984_v17, %v820_v56  ;;  %v986_v62 = vmul.f32 %v3031_v40, %v907_v61 }
 0x10f   : > { %v1356_v0 = vadd.f32 %v3072_v47, %v1255_v28  ;;  %2489 = vmatmul.mubr.bf16.gmra.mrb[36].mxu1 %v1412_v25  ;;  %v982_v32 = vmul.f32 %v3031_v40, %v891_v34  ;;  %v1387_v14 = vmax.f32 %v1355_v22, 0.0 }
 0x110   : > { %v1354_v23 = vadd.f32 %v3072_v47, %v1247_v36  ;;  %v1385_v39 = vmax.f32 %v1353_v58, 0.0 }
 0x111   : > { %602 = vperm.xlu1 %2570, %v2926_v15   ;;  %v1388_v35 = vmax.f32 %v1356_v0, 0.0  ;;  %v1014_v50 = vadd.f32 %v982_v32, %v818_v63  ;;  %v2608_v32 = vld [vmem:[%s3423_s7] ss:$8 sps:$4 sm:$0xff]  }
 0x112   : > { %v895_v53 = vpop.permute.xlu1 %894  ;;  %v1386_v59 = vmax.f32 %v1354_v23, 0.0 }
 0x113   : > { %v983_v57 = vmul.f32 %v3031_v40, %v895_v53  ;;  %v2450_v31 = vpop.f32.mrb[12].mxu1  ;;  %v1414_v26 = vpack.c.bf16 %v1388_v35, %v1387_v14 }
 0x114   : > { %v1259_v16 = vpop.f32.mrb[13].mxu1  ;;  %v1413_v46 = vpack.c.bf16 %v1386_v59, %v1385_v39  ;;  %v2611_v39 = vld [vmem:[%s3423_s7 + $0x10] ss:$8 sps:$4 sm:$0xff]  }
 0x115   : > { %2571 = vset.pattern.permute.xlu1 %v2638_v1  ;;  %v1015_v18 = vadd.f32 %v983_v57, %v819_v38  ;;  %v1260_v20 = vadd.f32 %v1259_v16, %v1013_v8  ;;  %v2451_v45 = vpop.f32.mrb[14].mxu1  ;;  %v2609_v57 = vld [vmem:[%s3423_s7 + $0x14] ss:$8 sps:$4 sm:$0xff]   ;;  %v627_v8 = vmul.f32 %v3016_v52, %v2975_v33  ;;  %v791_v16 = vmul.f32 %v3012_v51, %v3039_v11 }
 0x116   : > { %766 = vperm.xlu1 %2571, %v2926_v15   ;;  %v1271_v29 = vadd.f32 %v2451_v45, %v1016_v42  ;;  %v1262_v5 = vpop.f32.mrb[15].mxu1  ;;  %2492 = vmatprep.mubr.bf16.mxu1 %v1413_v46  ;;  %v3429_v15 = vmov 2   ;;  %v2615_v33 = vld [vmem:[%s3423_s7 + $0x34] ss:$8 sps:$4 sm:$0xff]  }
 0x117   : > { %v1268_v21 = vadd.f32 %v2450_v31, %v1015_v18  ;;  %v528_v37 = vpop.permute.xlu1 %527  ;;  %v1357_v1 = vadd.f32 %v3072_v47, %v1260_v20  ;;  %v1263_v54 = vadd.f32 %v1262_v5, %v1014_v50  ;;  %2493 = vmatmul.mubr.bf16.gmra.mrb[40].mxu1 %v1414_v26  ;;  %v2612_v31 = vld [vmem:[%s3423_s7 + $0x24] ss:$8 sps:$4 sm:$0xff]   ;;  %v2614_v20 = vld [vmem:[%s3423_s7 + $0x20] ss:$8 sps:$4 sm:$0xff]   ;;  %v823_v11 = vadd.f32 %v791_v16, %v627_v8 }
 0x118   : > { %v1360_v7 = vadd.f32 %v3072_v47, %v1271_v29  ;;  %v625_v14 = vmul.f32 %v3016_v52, %v528_v37 }
 0x119   : > { %v1359_v41 = vadd.f32 %v3072_v47, %v1268_v21  ;;  %v1358_v34 = vadd.f32 %v3072_v47, %v1263_v54  ;;  %v1389_v25 = vmax.f32 %v1357_v1, 0.0 }
 0x11a   : > { %2573 = vset.pattern.permute.xlu1 %v3429_v15  ;;  %v1392_v10 = vmax.f32 %v1360_v7, 0.0 }
 0x11b   : > { %954 = vperm.xlu1 %2573, %v2896_v2   ;;  %v1391_v9 = vmax.f32 %v1359_v41, 0.0  ;;  %v1390_v3 = vmax.f32 %v1358_v34, 0.0  ;;  %v3166_v13 = vpop.f32.mrb[16].mxu1  ;;  %v626_v2 = vmul.f32 %v3016_v52, %v2967_v30  ;;  %v2606_v30 = vld [vmem:[%s3423_s7 + $0x4] ss:$8 sps:$4 sm:$0xff]   ;;  %v919_v41 = vpop.permute.xlu0 %918 }
 0x11c   : > { %v707_v12 = vpop.permute.xlu1 %706  ;;  %v1275_v55 = vpop.f32.mrb[17].mxu1  ;;  %1801 = vmatprep.subr.bf16.mxu0 %v2606_v30  ;;  %v989_v16 = vmul.f32 %v3031_v40, %v919_v41 }
 0x11d   : > { %v1416_v60 = vpack.c.bf16 %v1392_v10, %v1391_v9  ;;  %v1415_v27 = vpack.c.bf16 %v1390_v3, %v1389_v25  ;;  %v3169_v49 = vpop.f32.mrb[18].mxu1  ;;  %v789_v23 = vmul.f32 %v3012_v51, %v707_v12  ;;  %1802 = vmatpush1.bf16.msra.mxu0 %v2608_v32  ;;  %v2617_v9 = vld [vmem:[%s3423_s7 + $0x30] ss:$8 sps:$4 sm:$0xff]   ;;  %v2618_v3 = vld [vmem:[%s3423_s7 + $0x44] ss:$8 sps:$4 sm:$0xff]  }
 0x11e   : > { %v1278_v22 = vpop.f32.mrb[19].mxu1  ;;  %1803 = vmatprep.subr.bf16.mxu0 %v2609_v57 }
 0x11f   : > { %958 = vperm.xlu1 %2573, %v2905_v6   ;;  %2496 = vmatprep.mubr.bf16.mxu1 %v1415_v27  ;;  %v821_v42 = vadd.f32 %v789_v23, %v625_v14 }
 0x120   : > { %v711_v48 = vpop.permute.xlu1 %710  ;;  %2497 = vmatmul.mubr.bf16.gmra.mrb[44].mxu1 %v1416_v60 }
 0x121   : > { %v790_v28 = vmul.f32 %v3012_v51, %v711_v48  ;;  %1804 = vmatpush1.bf16.msra.mxu0 %v2611_v39 }
 0x122   : > { %1805 = vmatprep.subr.bf16.mxu0 %v2612_v31 }
 0x123   : > { %v822_v43 = vadd.f32 %v790_v28, %v626_v2  ;;  %v3175_v56 = vpop.f32.mrb[20].mxu1  ;;  %v931_v2 = vpop.permute.xlu0 %930 }
 0x124   : > { %v3177_v6 = vpop.f32.mrb[21].mxu1 }
 0x125   : > { %v543_v58 = vpop.permute.xlu1 %542  ;;  %v1018_v36 = vadd.f32 %v986_v62, %v822_v43  ;;  %v3179_v0 = vpop.f32.mrb[22].mxu1  ;;  %1806 = vmatpush1.bf16.msra.mxu0 %v2614_v20  ;;  %v2620_v62 = vld [vmem:[%s3423_s7 + $0x40] ss:$8 sps:$4 sm:$0xff]   ;;  %v2621_v43 = vld [vmem:[%s3423_s7 + $0x54] ss:$8 sps:$4 sm:$0xff]  }
 0x126   : > { %v3181_v53 = vpop.f32.mrb[23].mxu1  ;;  %v628_v54 = vmul.f32 %v3016_v52, %v543_v58  ;;  %1807 = vmatprep.subr.bf16.mxu0 %v2615_v33 }
 0x127   : > { %v1279_v17 = vadd.f32 %v1278_v22, %v1018_v36  ;;  %v3252_v30 = vpop.permute.xlu0 %938 }
 0x129   : > { %v1362_v45 = vadd.f32 %v3072_v47, %v1279_v17  ;;  %1808 = vmatpush1.bf16.msra.mxu0 %v2617_v9  ;;  %v795_v9 = vmul.f32 %v3012_v51, %v3110_v24 }
 0x12a   : > { %v719_v38 = vpop.permute.xlu1 %718  ;;  %1809 = vmatprep.subr.bf16.mxu0 %v2618_v3 }
 0x12b   : > { %v3193_v63 = vpop.f32.mrb[24].mxu1  ;;  %v792_v46 = vmul.f32 %v3012_v51, %v719_v38  ;;  %v1394_v10 = vmax.f32 %v1362_v45, 0.0  ;;  %v2623_v38 = vld [vmem:[%s3423_s7 + $0x50] ss:$8 sps:$4 sm:$0xff]   ;;  %v992_v45 = vmul.f32 %v3031_v40, %v931_v2 }
 0x12c   : > { %v3196_v35 = vpop.f32.mrb[25].mxu1 }
 0x12d   : > { %v3201_v18 = vpop.f32.mrb[26].mxu1  ;;  %v824_v61 = vadd.f32 %v792_v46, %v628_v54  ;;  %1810 = vmatpush1.bf16.msra.mxu0 %v2620_v62  ;;  %v794_v46 = vmul.f32 %v3012_v51, %v3080_v19 }
 0x12e   : > { %v3211_v21 = vpop.f32.mrb[27].mxu1  ;;  %1811 = vmatprep.subr.bf16.mxu0 %v2621_v43  ;;  %v2624_v43 = vld [vmem:[%s3423_s7 + $0x64] ss:$8 sps:$4 sm:$0xff]  }
 0x12f   : > { %v903_v59 = vpop.permute.xlu1 %902 }
 0x130   : > { %v985_v26 = vmul.f32 %v3031_v40, %v903_v59 }
 0x131   : > { %1812 = vmatpush1.bf16.msra.mxu0 %v2623_v38 }
 0x132   : > { %v1017_v37 = vadd.f32 %v985_v26, %v821_v42  ;;  %1813 = vmatprep.subr.bf16.mxu0 %v2624_v43 }
 0x133   : > { %v911_v50 = vpop.permute.xlu1 %910 }
 0x134   : > { %v1276_v29 = vadd.f32 %v1275_v55, %v1017_v37  ;;  %v987_v5 = vmul.f32 %v3031_v40, %v911_v50  ;;  %v3222_v1 = vpop.f32.mrb[28].mxu1 }
 0x135   : > { %v3226_v34 = vpop.f32.mrb[29].mxu1 }
 0x136   : > { %v1019_v7 = vadd.f32 %v987_v5, %v823_v11  ;;  %v1361_v15 = vadd.f32 %v3072_v47, %v1276_v29  ;;  %v3231_v25 = vpop.f32.mrb[30].mxu1 }
 0x137   : > { %v915_v12 = vpop.permute.xlu1 %914  ;;  %v3238_v48 = vpop.f32.mrb[31].mxu1 }
 0x138   : > { %v1284_v55 = vadd.f32 %v3166_v13, %v1019_v7  ;;  %v988_v60 = vmul.f32 %v3031_v40, %v915_v12  ;;  %v1393_v27 = vmax.f32 %v1361_v15, 0.0 }
 0x13a   : > { %v1020_v22 = vadd.f32 %v988_v60, %v824_v61  ;;  %v1417_v28 = vpack.c.bf16 %v1394_v10, %v1393_v27  ;;  %v1363_v36 = vadd.f32 %v3072_v47, %v1284_v55 }
 0x13c   : > { %v1287_v13 = vadd.f32 %v3169_v49, %v1020_v22  ;;  %2500 = vmatprep.mubr.bf16.mxu1 %v1417_v28  ;;  %v553_v58 = vpop.permute.xlu1 %552  ;;  %v1395_v32 = vmax.f32 %v1363_v36, 0.0  ;;  %v548_v49 = vpop.permute.xlu0 %547 }
 0x13d   : > { %v629_v59 = vmul.f32 %v3016_v52, %v548_v49  ;;  %v630_v50 = vmul.f32 %v3016_v52, %v553_v58 }
 0x13e   : > { %v1364_v17 = vadd.f32 %v3072_v47, %v1287_v13 }
 0x13f   : > { %v826_v54 = vadd.f32 %v794_v46, %v630_v50 }
 0x140   : > { %v1396_v23 = vmax.f32 %v1364_v17, 0.0  ;;  %v573_v17 = vpop.permute.xlu0 %572 }
 0x141   : > { %v723_v57 = vpop.permute.xlu1 %722  ;;  %v634_v49 = vmul.f32 %v3016_v52, %v573_v17 }
 0x142   : > { %v1418_v14 = vpack.c.bf16 %v1396_v23, %v1395_v32  ;;  %v793_v31 = vmul.f32 %v3012_v51, %v723_v57  ;;  %v2629_v23 = vld [vmem:[%s3423_s7 + $0x70] ss:$8 sps:$4 sm:$0xff]  }
 0x144   : > { %2501 = vmatmul.mubr.bf16.gmra.mrb[48].mxu1 %v1418_v14  ;;  %v825_v42 = vadd.f32 %v793_v31, %v629_v59  ;;  %v578_v57 = vpop.permute.xlu0 %577 }
 0x145   : > { %v635_v50 = vmul.f32 %v3016_v52, %v578_v57 }
 0x146   : > { %v558_v39 = vpop.permute.xlu1 %557  ;;  %v1021_v33 = vadd.f32 %v989_v16, %v825_v42  ;;  %v994_v16 = vmul.f32 %v3031_v40, %v3252_v30 }
 0x147   : > { %v631_v29 = vmul.f32 %v3016_v52, %v558_v39 }
 0x148   : > { %v1292_v41 = vadd.f32 %v3177_v6, %v1021_v33  ;;  %v588_v31 = vpop.permute.xlu0 %587 }
 0x149   : > { %v827_v12 = vadd.f32 %v795_v9, %v631_v29 }
 0x14a   : > { %v563_v8 = vpop.permute.xlu1 %562  ;;  %v1365_v61 = vadd.f32 %v3072_v47, %v1292_v41 }
 0x14b   : > { %v632_v37 = vmul.f32 %v3016_v52, %v563_v8 }
 0x14c   : > { %v1397_v22 = vmax.f32 %v1365_v61, 0.0 }
 0x14f   : > { %v735_v26 = vpop.permute.xlu1 %734 }
 0x150   : > { %v796_v20 = vmul.f32 %v3012_v51, %v735_v26 }
 0x152   : > { %v828_v11 = vadd.f32 %v796_v20, %v632_v37  ;;  %v747_v37 = vpop.permute.xlu0 %746 }
 0x153   : > { %v799_v33 = vmul.f32 %v3012_v51, %v747_v37 }
 0x154   : > { %v923_v5 = vpop.permute.xlu1 %922  ;;  %v1024_v15 = vadd.f32 %v992_v45, %v828_v11 }
 0x155   : > { %v990_v7 = vmul.f32 %v3031_v40, %v923_v5  ;;  %v831_v41 = vadd.f32 %v799_v33, %v635_v50 }
 0x156   : > { %v1303_v55 = vadd.f32 %v3179_v0, %v1024_v15 }
 0x157   : > { %v1022_v10 = vadd.f32 %v990_v7, %v826_v54 }
 0x158   : > { %v927_v3 = vpop.permute.xlu1 %926  ;;  %v1368_v2 = vadd.f32 %v3072_v47, %v1303_v55 }
 0x159   : > { %v1295_v19 = vadd.f32 %v3181_v53, %v1022_v10  ;;  %v991_v60 = vmul.f32 %v3031_v40, %v927_v3  ;;  %v2626_v53 = vld [vmem:[%s3423_s7 + $0x60] ss:$8 sps:$4 sm:$0xff]  }
 0x15a   : > { %v1400_v58 = vmax.f32 %v1368_v2, 0.0  ;;  %1814 = vmatpush1.bf16.msra.mxu0 %v2626_v53 }
 0x15b   : > { %v1366_v27 = vadd.f32 %v3072_v47, %v1295_v19  ;;  %v1023_v6 = vadd.f32 %v991_v60, %v827_v12 }
 0x15d   : > { %v1398_v28 = vmax.f32 %v1366_v27, 0.0  ;;  %v1300_v24 = vadd.f32 %v3175_v56, %v1023_v6  ;;  %v568_v62 = vpop.permute.xlu1 %567  ;;  %v2627_v56 = vld [vmem:[%s3423_s7 + $0x74] ss:$8 sps:$4 sm:$0xff]  }
 0x15e   : > { %1815 = vmatprep.subr.bf16.mxu0 %v2627_v56  ;;  %v633_v45 = vmul.f32 %v3016_v52, %v568_v62  ;;  %v759_v62 = vpop.permute.xlu0 %758 }
 0x15f   : > { %v1419_v13 = vpack.c.bf16 %v1398_v28, %v1397_v22  ;;  %v1367_v0 = vadd.f32 %v3072_v47, %v1300_v24  ;;  %1816 = vmatpush1.bf16.msra.mxu0 %v2629_v23 }
 0x161   : > { %2504 = vmatprep.mubr.bf16.mxu1 %v1419_v13  ;;  %v1399_v36 = vmax.f32 %v1367_v0, 0.0 }
 0x162   : > { %v739_v38 = vpop.permute.xlu1 %738 }
 0x163   : > { %v1420_v32 = vpack.c.bf16 %v1400_v58, %v1399_v36  ;;  %v797_v20 = vmul.f32 %v3012_v51, %v739_v38  ;;  %v763_v36 = vpop.permute.xlu0 %762 }
 0x164   : > { %v803_v37 = vmul.f32 %v3012_v51, %v763_v36 }
 0x165   : > { %2505 = vmatmul.mubr.bf16.gmra.mrb[52].mxu1 %v1420_v32  ;;  %v829_v29 = vadd.f32 %v797_v20, %v633_v45 }
 0x166   : > { %v743_v14 = vpop.permute.xlu1 %742 }
 0x167   : > { %v798_v39 = vmul.f32 %v3012_v51, %v743_v14  ;;  %v951_v38 = vpop.permute.xlu0 %950 }
 0x168   : > { %v997_v23 = vmul.f32 %v3031_v40, %v951_v38 }
 0x169   : > { %v830_v8 = vadd.f32 %v798_v39, %v634_v49 }
 0x16b   : > { %v583_v59 = vpop.permute.xlu1 %582  ;;  %v1026_v26 = vadd.f32 %v994_v16, %v830_v8  ;;  %v963_v57 = vpop.permute.xlu0 %962 }
 0x16c   : > { %v636_v12 = vmul.f32 %v3016_v52, %v583_v59  ;;  %v802_v59 = vmul.f32 %v3012_v51, %v759_v62 }
 0x16d   : > { %v1311_v11 = vadd.f32 %v3211_v21, %v1026_v26 }
 0x16f   : > { %v1370_v30 = vadd.f32 %v3072_v47, %v1311_v11 }
 0x170   : > { %v751_v42 = vpop.permute.xlu1 %750 }
 0x171   : > { %v800_v15 = vmul.f32 %v3012_v51, %v751_v42  ;;  %v1402_v61 = vmax.f32 %v1370_v30, 0.0  ;;  %v1000_v42 = vmul.f32 %v3031_v40, %v963_v57 }
 0x173   : > { %v832_v19 = vadd.f32 %v800_v15, %v636_v12 }
 0x175   : > { %v935_v46 = vpop.permute.xlu1 %934 }
 0x176   : > { %v993_v5 = vmul.f32 %v3031_v40, %v935_v46 }
 0x178   : > { %v1025_v54 = vadd.f32 %v993_v5, %v829_v29 }
 0x179   : > { %v943_v7 = vpop.permute.xlu1 %942 }
 0x17a   : > { %v1308_v9 = vadd.f32 %v3196_v35, %v1025_v54  ;;  %v995_v10 = vmul.f32 %v3031_v40, %v943_v7 }
 0x17c   : > { %v1027_v3 = vadd.f32 %v995_v10, %v831_v41  ;;  %v1369_v21 = vadd.f32 %v3072_v47, %v1308_v9 }
 0x17d   : > { %v947_v55 = vpop.permute.xlu1 %946 }
 0x17e   : > { %v1316_v60 = vadd.f32 %v3193_v63, %v1027_v3  ;;  %v996_v27 = vmul.f32 %v3031_v40, %v947_v55  ;;  %v1401_v6 = vmax.f32 %v1369_v21, 0.0 }
 0x180   : > { %v1028_v22 = vadd.f32 %v996_v27, %v832_v19  ;;  %v1421_v2 = vpack.c.bf16 %v1402_v61, %v1401_v6  ;;  %v1371_v24 = vadd.f32 %v3072_v47, %v1316_v60 }
 0x182   : > { %v1319_v28 = vadd.f32 %v3201_v18, %v1028_v22  ;;  %2508 = vmatprep.mubr.bf16.mxu1 %v1421_v2  ;;  %v593_v35 = vpop.permute.xlu1 %592  ;;  %v1403_v13 = vmax.f32 %v1371_v24, 0.0  ;;  %v637_v18 = vmul.f32 %v3016_v52, %v588_v31 }
 0x183   : > { %v638_v8 = vmul.f32 %v3016_v52, %v593_v35 }
 0x184   : > { %v1372_v43 = vadd.f32 %v3072_v47, %v1319_v28 }
 0x185   : > { %v834_v45 = vadd.f32 %v802_v59, %v638_v8 }
 0x186   : > { %v1404_v0 = vmax.f32 %v1372_v43, 0.0 }
 0x187   : > { %v755_v53 = vpop.permute.xlu1 %754 }
 0x188   : > { %v1422_v58 = vpack.c.bf16 %v1404_v0, %v1403_v13  ;;  %v801_v17 = vmul.f32 %v3012_v51, %v755_v53 }
 0x18a   : > { %2509 = vmatmul.mubr.bf16.gmra.mrb[56].mxu1 %v1422_v58  ;;  %v833_v32 = vadd.f32 %v801_v17, %v637_v18 }
 0x18c   : > { %v598_v63 = vpop.permute.xlu1 %597  ;;  %v1029_v16 = vadd.f32 %v997_v23, %v833_v32 }
 0x18d   : > { %v639_v31 = vmul.f32 %v3016_v52, %v598_v63 }
 0x18e   : > { %v1324_v50 = vadd.f32 %v3226_v34, %v1029_v16 }
 0x18f   : > { %v835_v29 = vadd.f32 %v803_v37, %v639_v31 }
 0x190   : > { %v603_v56 = vpop.permute.xlu1 %602  ;;  %v1373_v54 = vadd.f32 %v3072_v47, %v1324_v50 }
 0x191   : > { %v640_v49 = vmul.f32 %v3016_v52, %v603_v56 }
 0x192   : > { %v1405_v15 = vmax.f32 %v1373_v54, 0.0 }
 0x195   : > { %v767_v14 = vpop.permute.xlu1 %766 }
 0x196   : > { %v804_v39 = vmul.f32 %v3012_v51, %v767_v14 }
 0x198   : > { %v836_v26 = vadd.f32 %v804_v39, %v640_v49 }
 0x19a   : > { %v955_v20 = vpop.permute.xlu1 %954  ;;  %v1032_v11 = vadd.f32 %v1000_v42, %v836_v26 }
 0x19b   : > { %v998_v33 = vmul.f32 %v3031_v40, %v955_v20 }
 0x19c   : > { %v1335_v41 = vadd.f32 %v3231_v25, %v1032_v11 }
 0x19d   : > { %v1030_v46 = vadd.f32 %v998_v33, %v834_v45 }
 0x19e   : > { %v959_v5 = vpop.permute.xlu1 %958  ;;  %v1376_v34 = vadd.f32 %v3072_v47, %v1335_v41 }
 0x19f   : > { %v1327_v30 = vadd.f32 %v3238_v48, %v1030_v46  ;;  %v999_v51 = vmul.f32 %v3031_v40, %v959_v5  ;;  %v3332_v40 = vld [vmem:[%s3422_s6] ss:$0 sm:$0xff] }
 0x1a0   : > { %v1408_v21 = vmax.f32 %v1376_v34, 0.0 }
 0x1a1   : > { %v1374_v52 = vadd.f32 %v3072_v47, %v1327_v30  ;;  %v1031_v7 = vadd.f32 %v999_v51, %v835_v29 }
 0x1a3   : > { %v1406_v9 = vmax.f32 %v1374_v52, 0.0  ;;  %v1332_v10 = vadd.f32 %v3222_v1, %v1031_v7 }
 0x1a5   : > { %v1423_v12 = vpack.c.bf16 %v1406_v9, %v1405_v15  ;;  %v1375_v3 = vadd.f32 %v3072_v47, %v1332_v10 }
 0x1a7   : > { %2512 = vmatprep.mubr.bf16.mxu1 %v1423_v12  ;;  %v1407_v61 = vmax.f32 %v1375_v3, 0.0 }
 0x1a9   : > { %v1424_v25 = vpack.c.bf16 %v1408_v21, %v1407_v61 }
 0x1ab   : > { %2513 = vmatmul.mubr.bf16.gmra.mrb[60].mxu1 %v1424_v25 }
 0x1da   : > { %v2486_v48 = vpop.f32.mrb[32].mxu1 }
 0x1db   : > { %v1539_v55 = vadd.f32 %v2486_v48, %v3332_v40  ;;  %v1530_v19 = vpop.f32.mrb[33].mxu1 }
 0x1dc   : > { %v1531_v60 = vadd.f32 %v3332_v40, %v1530_v19  ;;  %v2487_v1 = vpop.f32.mrb[34].mxu1 }
 0x1dd   : > { %v1542_v27 = vadd.f32 %v2487_v1, %v3332_v40  ;;  %v1533_v47 = vpop.f32.mrb[35].mxu1  ;;  %v1659_v22 = vmax.f32 %v1539_v55, 0.0 }
 0x1de   : > { %v1534_v6 = vadd.f32 %v3332_v40, %v1533_v47  ;;  %v1657_v28 = vmax.f32 %v1531_v60, 0.0 }
 0x1df   : > { %v1660_v2 = vmax.f32 %v1542_v27, 0.0 }
 0x1e0   : > { %v1658_v35 = vmax.f32 %v1534_v6, 0.0 }
 0x1e1   : > { %v1690_v24 = vpack.c.bf16 %v1660_v2, %v1659_v22 }
 0x1e2   : > { %v1689_v62 = vpack.c.bf16 %v1658_v35, %v1657_v28  ;;  %v2490_v43 = vpop.f32.mrb[36].mxu1 }
 0x1e3   : > { %v1555_v13 = vadd.f32 %v2490_v43, %v3332_v40  ;;  %v1546_v0 = vpop.f32.mrb[37].mxu1 }
 0x1e4   : > { %v1547_v53 = vadd.f32 %v3332_v40, %v1546_v0  ;;  %v2491_v58 = vpop.f32.mrb[38].mxu1  ;;  %1834 = vmatmul.mubr.bf16.vlgmr.msra.gmra.mrb[0].mxu0 %v1689_v62 }
 0x1e5   : > { %v1558_v36 = vadd.f32 %v2491_v58, %v3332_v40  ;;  %v1549_v63 = vpop.f32.mrb[39].mxu1  ;;  %1843 = vmatprep.mubr.bf16.mxu0 %v2639_v4  ;;  %v1663_v38 = vmax.f32 %v1555_v13, 0.0 }
 0x1e6   : > { %v1550_v17 = vadd.f32 %v3332_v40, %v1549_v63  ;;  %v1661_v18 = vmax.f32 %v1547_v53, 0.0 }
 0x1e7   : > { %v1664_v56 = vmax.f32 %v1558_v36, 0.0 }
 0x1e8   : > { %v1662_v32 = vmax.f32 %v1550_v17, 0.0 }
 0x1e9   : > { %v1692_v23 = vpack.c.bf16 %v1664_v56, %v1663_v38 }
 0x1ea   : > { %v1691_v57 = vpack.c.bf16 %v1662_v32, %v1661_v18  ;;  %v2494_v14 = vpop.f32.mrb[40].mxu1 }
 0x1eb   : > { %v1571_v49 = vadd.f32 %v2494_v14, %v3332_v40  ;;  %v1562_v39 = vpop.f32.mrb[41].mxu1 }
 0x1ec   : > { %v1563_v59 = vadd.f32 %v3332_v40, %v1562_v39  ;;  %v2495_v8 = vpop.f32.mrb[42].mxu1  ;;  %1844 = vmatmul.mubr.bf16.gmra.mrb[4].mxu0 %v1690_v24 }
 0x1ed   : > { %v1574_v16 = vadd.f32 %v2495_v8, %v3332_v40  ;;  %v1565_v42 = vpop.f32.mrb[43].mxu1  ;;  %1853 = vmatprep.mubr.bf16.mxu0 %v2639_v4  ;;  %v1667_v37 = vmax.f32 %v1571_v49, 0.0 }
 0x1ee   : > { %v1566_v26 = vadd.f32 %v3332_v40, %v1565_v42  ;;  %v1665_v20 = vmax.f32 %v1563_v59, 0.0 }
 0x1ef   : > { %v1668_v31 = vmax.f32 %v1574_v16, 0.0 }
 0x1f0   : > { %v1666_v45 = vmax.f32 %v1566_v26, 0.0 }
 0x1f1   : > { %v1694_v50 = vpack.c.bf16 %v1668_v31, %v1667_v37 }
 0x1f2   : > { %v1693_v33 = vpack.c.bf16 %v1666_v45, %v1665_v20 }
 0x1f3   : > { %v2498_v11 = vpop.f32.mrb[44].mxu1 }
 0x1f4   : > { %v1587_v46 = vadd.f32 %v2498_v11, %v3332_v40  ;;  %v1578_v29 = vpop.f32.mrb[45].mxu1  ;;  %1854 = vmatmul.mubr.bf16.gmra.mrb[8].mxu0 %v1691_v57 }
 0x1f5   : > { %v1579_v5 = vadd.f32 %v3332_v40, %v1578_v29  ;;  %v2499_v54 = vpop.f32.mrb[46].mxu1  ;;  %1863 = vmatprep.mubr.bf16.mxu0 %v2639_v4 }
 0x1f6   : > { %v1590_v41 = vadd.f32 %v2499_v54, %v3332_v40  ;;  %v1581_v30 = vpop.f32.mrb[47].mxu1  ;;  %v1671_v52 = vmax.f32 %v1587_v46, 0.0 }
 0x1f7   : > { %v1582_v51 = vadd.f32 %v3332_v40, %v1581_v30  ;;  %v1669_v15 = vmax.f32 %v1579_v5, 0.0 }
 0x1f8   : > { %v1672_v7 = vmax.f32 %v1590_v41, 0.0 }
 0x1f9   : > { %v1670_v34 = vmax.f32 %v1582_v51, 0.0 }
 0x1fa   : > { %v1696_v9 = vpack.c.bf16 %v1672_v7, %v1671_v52 }
 0x1fb   : > { %v1695_v10 = vpack.c.bf16 %v1670_v34, %v1669_v15 }
 0x1fc   : > { %1864 = vmatmul.mubr.bf16.gmra.mrb[12].mxu0 %v1692_v23 }
 0x1fd   : > { %1873 = vmatprep.mubr.bf16.mxu0 %v2639_v4 }
 0x204   : > { %1874 = vmatmul.mubr.bf16.gmra.mrb[16].mxu0 %v1693_v33 }
 0x205   : > { %1883 = vmatprep.mubr.bf16.mxu0 %v2639_v4 }
 0x20c   : > { %1884 = vmatmul.mubr.bf16.gmra.mrb[20].mxu0 %v1694_v50 }
 0x20d   : > { %1893 = vmatprep.mubr.bf16.mxu0 %v2639_v4 }
 0x214   : > { %1894 = vmatmul.mubr.bf16.gmra.mrb[24].mxu0 %v1695_v10 }
 0x215   : > { %1903 = vmatprep.mubr.bf16.mxu0 %v2639_v4 }
 0x217   : > { %v2502_v12 = vpop.f32.mrb[48].mxu1 }
 0x218   : > { %v1603_v3 = vadd.f32 %v2502_v12, %v3332_v40  ;;  %v1594_v21 = vpop.f32.mrb[49].mxu1 }
 0x219   : > { %v1595_v61 = vadd.f32 %v3332_v40, %v1594_v21  ;;  %v2503_v25 = vpop.f32.mrb[50].mxu1 }
 0x21a   : > { %v1606_v48 = vadd.f32 %v2503_v25, %v3332_v40  ;;  %v1597_v55 = vpop.f32.mrb[51].mxu1  ;;  %v1675_v60 = vmax.f32 %v1603_v3, 0.0 }
 0x21b   : > { %v1598_v19 = vadd.f32 %v3332_v40, %v1597_v55  ;;  %v1673_v27 = vmax.f32 %v1595_v61, 0.0 }
 0x21c   : > { %v1676_v1 = vmax.f32 %v1606_v48, 0.0  ;;  %1904 = vmatmul.mubr.bf16.gmra.mrb[28].mxu0 %v1696_v9 }
 0x21d   : > { %v1674_v47 = vmax.f32 %v1598_v19, 0.0  ;;  %1913 = vmatprep.mubr.bf16.mxu0 %v2639_v4 }
 0x21e   : > { %v1698_v6 = vpack.c.bf16 %v1676_v1, %v1675_v60 }
 0x21f   : > { %v1697_v22 = vpack.c.bf16 %v1674_v47, %v1673_v27 }
 0x224   : > { %1914 = vmatmul.mubr.bf16.gmra.mrb[32].mxu0 %v1697_v22 }
 0x225   : > { %1923 = vmatprep.mubr.bf16.mxu0 %v2639_v4 }
 0x22c   : > { %1924 = vmatmul.mubr.bf16.gmra.mrb[36].mxu0 %v1698_v6 }
 0x22d   : > { %1933 = vmatprep.mubr.bf16.mxu0 %v2639_v4 }
 0x238   : > { %v2506_v2 = vpop.f32.mrb[52].mxu1 }
 0x239   : > { %v1619_v28 = vadd.f32 %v2506_v2, %v3332_v40  ;;  %v1610_v35 = vpop.f32.mrb[53].mxu1 }
 0x23a   : > { %v1611_v24 = vadd.f32 %v3332_v40, %v1610_v35  ;;  %v2507_v62 = vpop.f32.mrb[54].mxu1 }
 0x23b   : > { %v1622_v43 = vadd.f32 %v2507_v62, %v3332_v40  ;;  %v1613_v13 = vpop.f32.mrb[55].mxu1  ;;  %v1679_v53 = vmax.f32 %v1619_v28, 0.0 }
 0x23c   : > { %v1614_v0 = vadd.f32 %v3332_v40, %v1613_v13  ;;  %v1677_v36 = vmax.f32 %v1611_v24, 0.0 }
 0x23d   : > { %v1680_v58 = vmax.f32 %v1622_v43, 0.0 }
 0x23e   : > { %v1678_v63 = vmax.f32 %v1614_v0, 0.0 }
 0x23f   : > { %v1700_v17 = vpack.c.bf16 %v1680_v58, %v1679_v53 }
 0x240   : > { %v1699_v38 = vpack.c.bf16 %v1678_v63, %v1677_v36 }
 0x242   : > { %1934 = vmatmul.mubr.bf16.gmra.mrb[40].mxu0 %v1699_v38 }
 0x243   : > { %1943 = vmatprep.mubr.bf16.mxu0 %v2639_v4 }
 0x24a   : > { %1944 = vmatmul.mubr.bf16.gmra.mrb[44].mxu0 %v1700_v17 }
 0x24b   : > { %1953 = vmatprep.mubr.bf16.mxu0 %v2639_v4 }
 0x25d   : > { %v2510_v56 = vpop.f32.mrb[56].mxu1 }
 0x25e   : > { %v1635_v18 = vadd.f32 %v2510_v56, %v3332_v40  ;;  %v1626_v32 = vpop.f32.mrb[57].mxu1 }
 0x25f   : > { %v1627_v23 = vadd.f32 %v3332_v40, %v1626_v32  ;;  %v2511_v57 = vpop.f32.mrb[58].mxu1 }
 0x260   : > { %v1638_v14 = vadd.f32 %v2511_v57, %v3332_v40  ;;  %v1629_v49 = vpop.f32.mrb[59].mxu1  ;;  %v1683_v59 = vmax.f32 %v1635_v18, 0.0 }
 0x261   : > { %v1630_v39 = vadd.f32 %v3332_v40, %v1629_v49  ;;  %v1681_v16 = vmax.f32 %v1627_v23, 0.0 }
 0x262   : > { %v1684_v8 = vmax.f32 %v1638_v14, 0.0 }
 0x263   : > { %v1682_v42 = vmax.f32 %v1630_v39, 0.0 }
 0x264   : > { %v1702_v26 = vpack.c.bf16 %v1684_v8, %v1683_v59  ;;  %v2138_v8 = vld [vmem:[%s3424_s8] sm:$0x3] }
 0x265   : > { %v1701_v37 = vpack.c.bf16 %v1682_v42, %v1681_v16 }
 0x267   : > { %1954 = vmatmul.mubr.bf16.gmra.mrb[48].mxu0 %v1701_v37 }
 0x268   : > { %1963 = vmatprep.mubr.bf16.mxu0 %v2639_v4 }
 0x26f   : > { %1964 = vmatmul.mubr.bf16.gmra.mrb[52].mxu0 %v1702_v26 }
 0x270   : > { %1973 = vmatprep.mubr.bf16.mxu0 %v2639_v4 }
 0x27e   : > { %v2514_v31 = vpop.f32.mrb[60].mxu1 }
 0x27f   : > { %v1651_v20 = vadd.f32 %v2514_v31, %v3332_v40  ;;  %v1642_v45 = vpop.f32.mrb[61].mxu1 }
 0x280   : > { %v1643_v50 = vadd.f32 %v3332_v40, %v1642_v45  ;;  %v2515_v33 = vpop.f32.mrb[62].mxu1 }
 0x281   : > { %v1654_v11 = vadd.f32 %v2515_v33, %v3332_v40  ;;  %v1645_v46 = vpop.f32.mrb[63].mxu1  ;;  %v1687_v5 = vmax.f32 %v1651_v20, 0.0 }
 0x282   : > { %v1646_v29 = vadd.f32 %v3332_v40, %v1645_v46  ;;  %v1685_v41 = vmax.f32 %v1643_v50, 0.0 }
 0x283   : > { %v1688_v54 = vmax.f32 %v1654_v11, 0.0  ;;  %v3430_v11 = vsub.s32 0, %v2995_v44 }
 0x284   : > { %v1686_v30 = vmax.f32 %v1646_v29, 0.0 }
 0x285   : > { %v1704_v51 = vpack.c.bf16 %v1688_v54, %v1687_v5  ;;  %v3386_v46 = vrot.slane %v2138_v8, %v3430_v11  ;;  %v3431_v54 = vsub.s32 1, %v2995_v44 }
 0x286   : > { %v1703_v52 = vpack.c.bf16 %v1686_v30, %v1685_v41 }
 0x287   : > { %v3390_v41 = vrot.slane %v2138_v8, %v3431_v54 }
 0x288   : > { %1974 = vmatmul.mubr.bf16.gmra.mrb[56].mxu0 %v1703_v52 }
 0x289   : > { %1983 = vmatprep.mubr.bf16.mxu0 %v2639_v4 }
 0x290   : > { %1984 = vmatmul.mubr.bf16.gmra.mrb[60].mxu0 %v1704_v51 }
 0x2b7   : > { %v1835_v7 = vpop.f32.mrb[0].mxu0 }
 0x2b8   : > { %v1837_v15 = vpop.f32.mrb[1].mxu0 }
 0x2b9   : > { %v1839_v34 = vpop.f32.mrb[2].mxu0 }
 0x2ba   : > { %v1994_v9 = vmax.f32 %v1835_v7, %v1839_v34  ;;  %v1841_v10 = vpop.f32.mrb[3].mxu0 }
 0x2bb   : > { %v2003_v12 = vmax.f32 %v1837_v15, %v1841_v10 }
 0x2bf   : > { %v1845_v3 = vpop.f32.mrb[4].mxu0 }
 0x2c0   : > { %v1995_v21 = vmax.f32 %v1994_v9, %v1845_v3  ;;  %v1847_v61 = vpop.f32.mrb[5].mxu0 }
 0x2c1   : > { %v2004_v40 = vmax.f32 %v2003_v12, %v1847_v61  ;;  %v1849_v25 = vpop.f32.mrb[6].mxu0 }
 0x2c2   : > { %v1996_v48 = vmax.f32 %v1995_v21, %v1849_v25  ;;  %v1851_v55 = vpop.f32.mrb[7].mxu0 }
 0x2c3   : > { %v2005_v19 = vmax.f32 %v2004_v40, %v1851_v55 }
 0x2c4   : > { %v1997_v1 = vrot.slane %v1996_v48, 4 }
 0x2c5   : > { %v2006_v47 = vrot.slane %v2005_v19, 4 }
 0x2c6   : > { %v1998_v28 = vmax.f32 %v1996_v48, %v1997_v1 }
 0x2c7   : > { %v1855_v60 = vpop.f32.mrb[8].mxu0  ;;  %v2007_v35 = vmax.f32 %v2005_v19, %v2006_v47 }
 0x2c8   : > { %v1857_v27 = vpop.f32.mrb[9].mxu0  ;;  %v1999_v62 = vrot.slane %v1998_v28, 2 }
 0x2c9   : > { %v1859_v4 = vpop.f32.mrb[10].mxu0  ;;  %v2008_v0 = vrot.slane %v2007_v35, 2 }
 0x2ca   : > { %v2012_v6 = vmax.f32 %v1855_v60, %v1859_v4  ;;  %v1861_v22 = vpop.f32.mrb[11].mxu0  ;;  %v2000_v38 = vmax.f32 %v1998_v28, %v1999_v62 }
 0x2cb   : > { %v2021_v2 = vmax.f32 %v1857_v27, %v1861_v22  ;;  %v2009_v18 = vmax.f32 %v2007_v35, %v2008_v0 }
 0x2cc   : > { %v2001_v49 = vrot.slane %v2000_v38, 1 }
 0x2cd   : > { %v2010_v16 = vrot.slane %v2009_v18, 1 }
 0x2ce   : > { %v2002_v33 = vmax.f32 %v2000_v38, %v2001_v49 }
 0x2cf   : > { %v1865_v24 = vpop.f32.mrb[12].mxu0  ;;  %v2011_v5 = vmax.f32 %v2009_v18, %v2010_v16 }
 0x2d0   : > { %v2013_v43 = vmax.f32 %v2012_v6, %v1865_v24  ;;  %v1867_v13 = vpop.f32.mrb[13].mxu0  ;;  %v2150_v15 = vadd.f32 %v3386_v46, %v2002_v33 }
 0x2d1   : > { %v2022_v53 = vmax.f32 %v2021_v2, %v1867_v13  ;;  %v1869_v58 = vpop.f32.mrb[14].mxu0  ;;  %v2151_v12 = vadd.f32 %v3390_v41, %v2011_v5 }
 0x2d2   : > { %v2014_v36 = vmax.f32 %v2013_v43, %v1869_v58  ;;  %v1871_v63 = vpop.f32.mrb[15].mxu0  ;;  %v2166_v19 = vmax.f32 %v2150_v15, 0.0 }
 0x2d3   : > { %v2023_v17 = vmax.f32 %v2022_v53, %v1871_v63  ;;  %v2167_v27 = vmax.f32 %v2151_v12, 0.0 }
 0x2d4   : > { %v2015_v56 = vrot.slane %v2014_v36, 4 }
 0x2d5   : > { %v2024_v32 = vrot.slane %v2023_v17, 4 }
 0x2d6   : > { %v2016_v23 = vmax.f32 %v2014_v36, %v2015_v56 }
 0x2d7   : > { %v2025_v57 = vmax.f32 %v2023_v17, %v2024_v32  ;;  %v1875_v14 = vpop.f32.mrb[16].mxu0 }
 0x2d8   : > { %v2017_v39 = vrot.slane %v2016_v23, 2  ;;  %v1877_v59 = vpop.f32.mrb[17].mxu0 }
 0x2d9   : > { %v2026_v42 = vrot.slane %v2025_v57, 2  ;;  %v1879_v26 = vpop.f32.mrb[18].mxu0 }
 0x2da   : > { %v2018_v37 = vmax.f32 %v2016_v23, %v2017_v39  ;;  %v2030_v31 = vmax.f32 %v1875_v14, %v1879_v26  ;;  %v1881_v20 = vpop.f32.mrb[19].mxu0 }
 0x2db   : > { %v2027_v45 = vmax.f32 %v2025_v57, %v2026_v42  ;;  %v2039_v50 = vmax.f32 %v1877_v59, %v1881_v20 }
 0x2dc   : > { %v2019_v29 = vrot.slane %v2018_v37, 1 }
 0x2dd   : > { %v2028_v30 = vrot.slane %v2027_v45, 1 }
 0x2de   : > { %v2020_v51 = vmax.f32 %v2018_v37, %v2019_v29 }
 0x2df   : > { %v2029_v52 = vmax.f32 %v2027_v45, %v2028_v30  ;;  %v1885_v7 = vpop.f32.mrb[20].mxu0 }
 0x2e0   : > { %v2152_v34 = vadd.f32 %v3386_v46, %v2020_v51  ;;  %v2031_v9 = vmax.f32 %v2030_v31, %v1885_v7  ;;  %v1887_v10 = vpop.f32.mrb[21].mxu0 }
 0x2e1   : > { %v2153_v3 = vadd.f32 %v3390_v41, %v2029_v52  ;;  %v2040_v21 = vmax.f32 %v2039_v50, %v1887_v10  ;;  %v1889_v61 = vpop.f32.mrb[22].mxu0 }
 0x2e2   : > { %v2168_v40 = vmax.f32 %v2152_v34, 0.0  ;;  %v2032_v44 = vmax.f32 %v2031_v9, %v1889_v61  ;;  %v1891_v25 = vpop.f32.mrb[23].mxu0 }
 0x2e3   : > { %v2169_v48 = vmax.f32 %v2153_v3, 0.0  ;;  %v2041_v55 = vmax.f32 %v2040_v21, %v1891_v25 }
 0x2e4   : > { %v2198_v60 = vrot.slane %v2168_v40, 7  ;;  %v2033_v1 = vrot.slane %v2032_v44, 4 }
 0x2e5   : > { %v2219_v47 = vrot.slane %v2169_v48, 7  ;;  %v2042_v4 = vrot.slane %v2041_v55, 4 }
 0x2e6   : > { %v2200_v6 = vsel %vm2199_vm0, %v2198_v60, %v2166_v19  ;;  %v2034_v22 = vmax.f32 %v2032_v44, %v2033_v1 }
 0x2e7   : > { %v2220_v2 = vsel %vm2199_vm0, %v2219_v47, %v2167_v27  ;;  %v2043_v28 = vmax.f32 %v2041_v55, %v2042_v4  ;;  %v1895_v35 = vpop.f32.mrb[24].mxu0 }
 0x2e8   : > { %v2035_v24 = vrot.slane %v2034_v22, 2  ;;  %v1897_v62 = vpop.f32.mrb[25].mxu0 }
 0x2e9   : > { %v2044_v43 = vrot.slane %v2043_v28, 2  ;;  %v1899_v13 = vpop.f32.mrb[26].mxu0 }
 0x2ea   : > { %v2036_v0 = vmax.f32 %v2034_v22, %v2035_v24  ;;  %v2048_v53 = vmax.f32 %v1895_v35, %v1899_v13  ;;  %v1901_v58 = vpop.f32.mrb[27].mxu0 }
 0x2eb   : > { %v2045_v36 = vmax.f32 %v2043_v28, %v2044_v43  ;;  %v2057_v63 = vmax.f32 %v1897_v62, %v1901_v58 }
 0x2ec   : > { %v2037_v17 = vrot.slane %v2036_v0, 1 }
 0x2ed   : > { %v2046_v38 = vrot.slane %v2045_v36, 1 }
 0x2ee   : > { %v2038_v56 = vmax.f32 %v2036_v0, %v2037_v17 }
 0x2ef   : > { %v2047_v18 = vmax.f32 %v2045_v36, %v2046_v38  ;;  %v1905_v32 = vpop.f32.mrb[28].mxu0 }
 0x2f0   : > { %v2154_v23 = vadd.f32 %v3386_v46, %v2038_v56  ;;  %v2049_v57 = vmax.f32 %v2048_v53, %v1905_v32  ;;  %v1907_v14 = vpop.f32.mrb[29].mxu0 }
 0x2f1   : > { %v2155_v49 = vadd.f32 %v3390_v41, %v2047_v18  ;;  %v2058_v39 = vmax.f32 %v2057_v63, %v1907_v14  ;;  %v1909_v59 = vpop.f32.mrb[30].mxu0 }
 0x2f2   : > { %v2170_v8 = vmax.f32 %v2154_v23, 0.0  ;;  %v2050_v16 = vmax.f32 %v2049_v57, %v1909_v59  ;;  %v1911_v42 = vpop.f32.mrb[31].mxu0 }
 0x2f3   : > { %v2171_v26 = vmax.f32 %v2155_v49, 0.0  ;;  %v2059_v37 = vmax.f32 %v2058_v39, %v1911_v42 }
 0x2f4   : > { %v2201_v31 = vrot.slane %v2170_v8, 6  ;;  %v2051_v20 = vrot.slane %v2050_v16, 4 }
 0x2f5   : > { %v2221_v45 = vrot.slane %v2171_v26, 6  ;;  %v2060_v50 = vrot.slane %v2059_v37, 4 }
 0x2f6   : > { %v2203_v33 = vsel %vm2202_vm1, %v2201_v31, %v2200_v6  ;;  %v2052_v11 = vmax.f32 %v2050_v16, %v2051_v20 }
 0x2f7   : > { %v2222_v29 = vsel %vm2202_vm1, %v2221_v45, %v2220_v2  ;;  %v2061_v5 = vmax.f32 %v2059_v37, %v2060_v50  ;;  %v1915_v54 = vpop.f32.mrb[32].mxu0 }
 0x2f8   : > { %v2053_v30 = vrot.slane %v2052_v11, 2  ;;  %v1917_v51 = vpop.f32.mrb[33].mxu0 }
 0x2f9   : > { %v2062_v52 = vrot.slane %v2061_v5, 2  ;;  %v1919_v7 = vpop.f32.mrb[34].mxu0 }
 0x2fa   : > { %v2054_v15 = vmax.f32 %v2052_v11, %v2053_v30  ;;  %v2066_v34 = vmax.f32 %v1915_v54, %v1919_v7  ;;  %v1921_v9 = vpop.f32.mrb[35].mxu0 }
 0x2fb   : > { %v2063_v10 = vmax.f32 %v2061_v5, %v2062_v52  ;;  %v2075_v12 = vmax.f32 %v1917_v51, %v1921_v9 }
 0x2fc   : > { %v2055_v3 = vrot.slane %v2054_v15, 1 }
 0x2fd   : > { %v2064_v21 = vrot.slane %v2063_v10, 1 }
 0x2fe   : > { %v2056_v61 = vmax.f32 %v2054_v15, %v2055_v3 }
 0x2ff   : > { %v2065_v40 = vmax.f32 %v2063_v10, %v2064_v21  ;;  %v1925_v44 = vpop.f32.mrb[36].mxu0 }
 0x300   : > { %v2156_v25 = vadd.f32 %v3386_v46, %v2056_v61  ;;  %v2067_v48 = vmax.f32 %v2066_v34, %v1925_v44  ;;  %v1927_v55 = vpop.f32.mrb[37].mxu0 }
 0x301   : > { %v2157_v19 = vadd.f32 %v3390_v41, %v2065_v40  ;;  %v2076_v60 = vmax.f32 %v2075_v12, %v1927_v55  ;;  %v1929_v1 = vpop.f32.mrb[38].mxu0 }
 0x302   : > { %v2172_v27 = vmax.f32 %v2156_v25, 0.0  ;;  %v2068_v47 = vmax.f32 %v2067_v48, %v1929_v1  ;;  %v1931_v4 = vpop.f32.mrb[39].mxu0 }
 0x303   : > { %v2173_v6 = vmax.f32 %v2157_v19, 0.0  ;;  %v2077_v22 = vmax.f32 %v2076_v60, %v1931_v4 }
 0x304   : > { %v2204_v2 = vrot.slane %v2172_v27, 5  ;;  %v2069_v28 = vrot.slane %v2068_v47, 4 }
 0x305   : > { %v2223_v35 = vrot.slane %v2173_v6, 5  ;;  %v2078_v24 = vrot.slane %v2077_v22, 4 }
 0x306   : > { %v2206_v62 = vsel %vm2205_vm2, %v2204_v2, %v2203_v33  ;;  %v2070_v43 = vmax.f32 %v2068_v47, %v2069_v28 }
 0x307   : > { %v2224_v13 = vsel %vm2205_vm2, %v2223_v35, %v2222_v29  ;;  %v2079_v0 = vmax.f32 %v2077_v22, %v2078_v24 }
 0x308   : > { %v2071_v53 = vrot.slane %v2070_v43, 2 }
 0x309   : > { %v2080_v58 = vrot.slane %v2079_v0, 2 }
 0x30a   : > { %v2072_v36 = vmax.f32 %v2070_v43, %v2071_v53 }
 0x30b   : > { %v2081_v63 = vmax.f32 %v2079_v0, %v2080_v58 }
 0x30c   : > { %v2073_v17 = vrot.slane %v2072_v36, 1 }
 0x30d   : > { %v2082_v38 = vrot.slane %v2081_v63, 1 }
 0x30e   : > { %v2074_v56 = vmax.f32 %v2072_v36, %v2073_v17 }
 0x30f   : > { %v2083_v18 = vmax.f32 %v2081_v63, %v2082_v38 }
 0x310   : > { %v2158_v32 = vadd.f32 %v3386_v46, %v2074_v56 }
 0x311   : > { %v2159_v23 = vadd.f32 %v3390_v41, %v2083_v18 }
 0x312   : > { %v2174_v57 = vmax.f32 %v2158_v32, 0.0 }
 0x313   : > { %v2175_v49 = vmax.f32 %v2159_v23, 0.0 }
 0x314   : > { %v2207_v59 = vrot.slane %v2174_v57, 4 }
 0x315   : > { %v1935_v14 = vpop.f32.mrb[40].mxu0  ;;  %v2225_v16 = vrot.slane %v2175_v49, 4 }
 0x316   : > { %v1937_v39 = vpop.f32.mrb[41].mxu0  ;;  %v2209_v37 = vsel %vm2208_vm3, %v2207_v59, %v2206_v62 }
 0x317   : > { %v1939_v8 = vpop.f32.mrb[42].mxu0  ;;  %v2226_v20 = vsel %vm2208_vm3, %v2225_v16, %v2224_v13 }
 0x318   : > { %v2084_v42 = vmax.f32 %v1935_v14, %v1939_v8  ;;  %v1941_v26 = vpop.f32.mrb[43].mxu0 }
 0x319   : > { %v2093_v31 = vmax.f32 %v1937_v39, %v1941_v26 }
 0x31d   : > { %v1945_v45 = vpop.f32.mrb[44].mxu0 }
 0x31e   : > { %v2085_v50 = vmax.f32 %v2084_v42, %v1945_v45  ;;  %v1947_v33 = vpop.f32.mrb[45].mxu0 }
 0x31f   : > { %v2094_v11 = vmax.f32 %v2093_v31, %v1947_v33  ;;  %v1949_v29 = vpop.f32.mrb[46].mxu0 }
 0x320   : > { %v2086_v5 = vmax.f32 %v2085_v50, %v1949_v29  ;;  %v1951_v54 = vpop.f32.mrb[47].mxu0 }
 0x321   : > { %v2095_v30 = vmax.f32 %v2094_v11, %v1951_v54 }
 0x322   : > { %v2087_v51 = vrot.slane %v2086_v5, 4 }
 0x323   : > { %v2096_v52 = vrot.slane %v2095_v30, 4 }
 0x324   : > { %v2088_v7 = vmax.f32 %v2086_v5, %v2087_v51 }
 0x325   : > { %v2097_v15 = vmax.f32 %v2095_v30, %v2096_v52 }
 0x326   : > { %v2089_v34 = vrot.slane %v2088_v7, 2 }
 0x327   : > { %v2098_v9 = vrot.slane %v2097_v15, 2 }
 0x328   : > { %v2090_v10 = vmax.f32 %v2088_v7, %v2089_v34 }
 0x329   : > { %v2099_v12 = vmax.f32 %v2097_v15, %v2098_v9 }
 0x32a   : > { %v2091_v3 = vrot.slane %v2090_v10, 1 }
 0x32b   : > { %v2100_v21 = vrot.slane %v2099_v12, 1 }
 0x32c   : > { %v2092_v61 = vmax.f32 %v2090_v10, %v2091_v3 }
 0x32d   : > { %v2101_v40 = vmax.f32 %v2099_v12, %v2100_v21 }
 0x32e   : > { %v2160_v44 = vadd.f32 %v3386_v46, %v2092_v61 }
 0x32f   : > { %v2161_v25 = vadd.f32 %v3390_v41, %v2101_v40 }
 0x330   : > { %v2176_v48 = vmax.f32 %v2160_v44, 0.0 }
 0x331   : > { %v2177_v55 = vmax.f32 %v2161_v25, 0.0 }
 0x332   : > { %v2210_v19 = vrot.slane %v2176_v48, 3 }
 0x333   : > { %v2227_v60 = vrot.slane %v2177_v55, 3 }
 0x334   : > { %v2212_v1 = vsel %vm2211_vm4, %v2210_v19, %v2209_v37 }
 0x335   : > { %v2228_v27 = vsel %vm2211_vm4, %v2227_v60, %v2226_v20 }
 0x33a   : > { %v1955_v47 = vpop.f32.mrb[48].mxu0 }
 0x33b   : > { %v1957_v4 = vpop.f32.mrb[49].mxu0 }
 0x33c   : > { %v1959_v6 = vpop.f32.mrb[50].mxu0 }
 0x33d   : > { %v2102_v22 = vmax.f32 %v1955_v47, %v1959_v6  ;;  %v1961_v2 = vpop.f32.mrb[51].mxu0 }
 0x33e   : > { %v2111_v28 = vmax.f32 %v1957_v4, %v1961_v2 }
 0x342   : > { %v1965_v35 = vpop.f32.mrb[52].mxu0 }
 0x343   : > { %v2103_v24 = vmax.f32 %v2102_v22, %v1965_v35  ;;  %v1967_v62 = vpop.f32.mrb[53].mxu0 }
 0x344   : > { %v2112_v43 = vmax.f32 %v2111_v28, %v1967_v62  ;;  %v1969_v13 = vpop.f32.mrb[54].mxu0 }
 0x345   : > { %v2104_v0 = vmax.f32 %v2103_v24, %v1969_v13  ;;  %v1971_v53 = vpop.f32.mrb[55].mxu0 }
 0x346   : > { %v2113_v58 = vmax.f32 %v2112_v43, %v1971_v53 }
 0x347   : > { %v2105_v36 = vrot.slane %v2104_v0, 4 }
 0x348   : > { %v2114_v63 = vrot.slane %v2113_v58, 4 }
 0x349   : > { %v2106_v17 = vmax.f32 %v2104_v0, %v2105_v36 }
 0x34a   : > { %v2115_v38 = vmax.f32 %v2113_v58, %v2114_v63 }
 0x34b   : > { %v2107_v56 = vrot.slane %v2106_v17, 2 }
 0x34c   : > { %v2116_v18 = vrot.slane %v2115_v38, 2 }
 0x34d   : > { %v2108_v32 = vmax.f32 %v2106_v17, %v2107_v56 }
 0x34e   : > { %v2117_v23 = vmax.f32 %v2115_v38, %v2116_v18 }
 0x34f   : > { %v2109_v57 = vrot.slane %v2108_v32, 1 }
 0x350   : > { %v2118_v14 = vrot.slane %v2117_v23, 1 }
 0x351   : > { %v2110_v49 = vmax.f32 %v2108_v32, %v2109_v57 }
 0x352   : > { %v2119_v39 = vmax.f32 %v2117_v23, %v2118_v14 }
 0x353   : > { %v2162_v59 = vadd.f32 %v3386_v46, %v2110_v49 }
 0x354   : > { %v2163_v8 = vadd.f32 %v3390_v41, %v2119_v39 }
 0x355   : > { %v2178_v16 = vmax.f32 %v2162_v59, 0.0 }
 0x356   : > { %v2179_v42 = vmax.f32 %v2163_v8, 0.0 }
 0x357   : > { %v2213_v26 = vrot.slane %v2178_v16, 2 }
 0x358   : > { %v2229_v37 = vrot.slane %v2179_v42, 2 }
 0x359   : > { %v2215_v31 = vsel %vm2214_vm5, %v2213_v26, %v2212_v1 }
 0x35a   : > { %v2230_v20 = vsel %vm2214_vm5, %v2229_v37, %v2228_v27 }
 0x35b   : > { %v1975_v45 = vpop.f32.mrb[56].mxu0 }
 0x35c   : > { %v1977_v50 = vpop.f32.mrb[57].mxu0 }
 0x35d   : > { %v1979_v33 = vpop.f32.mrb[58].mxu0 }
 0x35e   : > { %v2120_v11 = vmax.f32 %v1975_v45, %v1979_v33  ;;  %v1981_v29 = vpop.f32.mrb[59].mxu0 }
 0x35f   : > { %v2129_v5 = vmax.f32 %v1977_v50, %v1981_v29 }
 0x363   : > { %v1985_v54 = vpop.f32.mrb[60].mxu0 }
 0x364   : > { %v2121_v30 = vmax.f32 %v2120_v11, %v1985_v54  ;;  %v1987_v51 = vpop.f32.mrb[61].mxu0 }
 0x365   : > { %v2130_v52 = vmax.f32 %v2129_v5, %v1987_v51  ;;  %v1989_v7 = vpop.f32.mrb[62].mxu0 }
 0x366   : > { %v2122_v15 = vmax.f32 %v2121_v30, %v1989_v7  ;;  %v1991_v34 = vpop.f32.mrb[63].mxu0 }
 0x367   : > { %v2131_v9 = vmax.f32 %v2130_v52, %v1991_v34 }
 0x368   : > { %v2123_v10 = vrot.slane %v2122_v15, 4 }
 0x369   : > { %v2132_v12 = vrot.slane %v2131_v9, 4 }
 0x36a   : > { %v2124_v3 = vmax.f32 %v2122_v15, %v2123_v10 }
 0x36b   : > { %v2133_v21 = vmax.f32 %v2131_v9, %v2132_v12 }
 0x36c   : > { %v2125_v61 = vrot.slane %v2124_v3, 2 }
 0x36d   : > { %v2134_v40 = vrot.slane %v2133_v21, 2 }
 0x36e   : > { %v2126_v44 = vmax.f32 %v2124_v3, %v2125_v61 }
 0x36f   : > { %v2135_v25 = vmax.f32 %v2133_v21, %v2134_v40 }
 0x370   : > { %v2127_v48 = vrot.slane %v2126_v44, 1 }
 0x371   : > { %v2136_v55 = vrot.slane %v2135_v25, 1 }
 0x372   : > { %v2128_v19 = vmax.f32 %v2126_v44, %v2127_v48 }
 0x373   : > { %v2137_v60 = vmax.f32 %v2135_v25, %v2136_v55 }
 0x374   : > { %v2164_v1 = vadd.f32 %v3386_v46, %v2128_v19 }
 0x375   : > { %v2165_v27 = vadd.f32 %v3390_v41, %v2137_v60 }
 0x376   : > { %v2180_v47 = vmax.f32 %v2164_v1, 0.0 }
 0x377   : > { %v2181_v4 = vmax.f32 %v2165_v27, 0.0 }
 0x378   : > { %v2216_v6 = vrot.slane %v2180_v47, 1 }
 0x379   : > { %v2231_v22 = vrot.slane %v2181_v4, 1 }
 0x37a   : > { %v2218_v2 = vsel %vm2217_vm6, %v2216_v6, %v2215_v31 }
 0x37b   : > { %2235 = vst [vmem:[%s362_s19] sm:$0xff] %v2218_v2  ;;  %v2232_v28 = vsel %vm2217_vm6, %v2231_v22, %v2230_v20 }
 0x37c   : > { %2236 = vst [vmem:[%s362_s19 + $0x8] sm:$0xff] %v2232_v28 }
 0x37d PF: > { %s19_s30 = sadd.s32 1, %s2636_s30  }
 0x37e   : > { %p16_p5 = scmp.ge.s32.totalorder %s19_s30, 4  }
 0x380   :  { %18 = sbr.rel (!%p16_p5) target bundleno = 1 (0x1), region = 89 }

// kernel: pointnet_plus_plus_forward.3
= control target key start
LH: loop header
LB: loop body
LE: loop exit
PB: predicated region body
PF: predicated region fallthrough
CT: control target
= control target key end

     0   :  { %s3364_s24 = smov 0   ;;  %s4509_s0 = inlined_call_operand.vmem [shape: f32[32,32,3], index: 0, kind: input, shape index: {}]   ;;  %s4510_s1 = inlined_call_operand.vmem [shape: f32[3,64], index: 1, kind: input, shape index: {}]   ;;  %s4511_s2 = inlined_call_operand.vmem [shape: f32[1,64], index: 2, kind: input, shape index: {}]   ;;  %s4512_s3 = inlined_call_operand.vmem [shape: bf16[64,64], index: 3, kind: input, shape index: {}]   ;;  %s4513_s4 = inlined_call_operand.vmem [shape: f32[1,64], index: 4, kind: input, shape index: {}]   ;;  %s4514_s5 = inlined_call_operand.vmem [shape: bf16[64,128], index: 5, kind: input, shape index: {}]   ;;  %s4515_s6 = inlined_call_operand.vmem [shape: f32[1,128], index: 6, kind: input, shape index: {}]   ;;  %s4516_s7 = inlined_call_operand.vmem [shape: f32[32,128], index: 7, kind: output, shape index: {}]  }
   0x1 LB: > { %s2914_s25 = sadd.s32 4294967295, %s3319_s24   ;;  %p2918_p0 = scmp.ge.s32.totalorder %s3319_s24, 1  ;;  %s3319_s24 = sphi %s3364_s24, %s17_s24  }
   0x2   : > { %p239_p1 = scmp.lt.s32.totalorder %s3319_s24, 3 }
   0x4   : > { %p240_p2 = pnand %p2918_p0, %p239_p1 }
   0x6   : > { %243 = sbr.rel (%p240_p2) target bundleno = 1142 (0x476), region = 48 }
   0xd   : > { %s2919_s26 = sshll.u32 %s2914_s25, 4  ;;  %v4519_v0 = vmov 1   ;;  %v4521_v1 = vmov 0   ;;  %v4517_v23 = vmov 2   ;;  %v3296_v59 = vld [vmem:[%s4512_s3] sm:$0xff]   ;;  %v3297_v62 = vld [vmem:[%s4512_s3 + $0x8] sm:$0xff]  }
   0xe   : > { %3231 = vset.pattern.permute.xlu0 %v4519_v0  ;;  %3229 = vset.pattern.permute.xlu1 %v4521_v1  ;;  %p273_p3 = scmp.lt.s32.totalorder %s2919_s26, 31  ;;  %vm1721_vm0 = vcmask 523264   ;;  %vm2820_vm1 = vcmask 1041409   ;;  %vm2823_vm2 = vcmask 1042434   ;;  %vm2826_vm3 = vcmask 1043459   ;;  %s2922_s15 = sshll.u32 %s2914_s25, 1 }
   0xf   : > { %3074 = vmatprep.subr.bf16.mxu0 %v3296_v59  ;;  %vm2829_vm4 = vcmask 1044484   ;;  %vm2832_vm5 = vcmask 1045509   ;;  %vm2835_vm6 = vcmask 1046534   ;;  %p280_p4 = scmp.lt.s32.totalorder %s2922_s15, 3  ;;  %vm2838_vm7 = vcmask 1047559  }
  0x10   : > { %s4622_s26 = smov (!%p273_p3, %s2919_s26), 31  ;;  %3075 = vmatpush3.bf16.msra.mxu0 %v3296_v59 }
  0x11   : > { %s3001_s27 = sshll.u32 %s4622_s26, 5  ;;  %3076 = vmatprep.subr.bf16.mxu0 %v3297_v62  ;;  %s4624_s15 = smov (!%p280_p4, %s2922_s15), 3 }
  0x12   : > { %s3379_s30 = scalar_lea.vmem %s4509_s0, %s3001_s27  ;;  %s2923_s16 = sshll.u32 %s4624_s15, 3 }
  0x13   : > { %v288_v2 = vld [vmem:[%s3379_s30 + $0x10] sm:$0xff]  ;;  %v3383_v3 = vld [vmem:[%s3379_s30 + $0x8] sm:$0xff]  ;;  %v289_v4 = vld [vmem:[%s3379_s30 + $0x18] sm:$0xff]  ;;  %s4474_s19 = scalar_lea.vmem %s4516_s7, %s2923_s16 }
  0x14   : > { %363 = vperm.xlu1 %3229, %v288_v2   ;;  %744 = vperm.xlu0 %3231, %v3383_v3   ;;  %v3388_v5 = vld [vmem:[%s3379_s30 + $0x28] sm:$0xff]  ;;  %v293_v7 = vld [vmem:[%s3379_s30 + $0x38] sm:$0xff]  ;;  %v3433_v17 = vld [vmem:[%s3379_s30 + $0xf0] sm:$0xff] }
  0x15   : > { %v3392_v6 = vld [vmem:[%s3379_s30 + $0x48] sm:$0xff]  ;;  %v3407_v10 = vld [vmem:[%s3379_s30 + $0x58] sm:$0xff]  ;;  %v3438_v18 = vld [vmem:[%s3379_s30 + $0x110] sm:$0xff]  ;;  %3077 = vmatpush3.bf16.msra.mxu0 %v3297_v62 }
  0x16   : > { %v3398_v8 = vld [vmem:[%s3379_s30 + $0x68] sm:$0xff]  ;;  %v3417_v13 = vld [vmem:[%s3379_s30 + $0x78] sm:$0xff]  ;;  %v3451_v21 = vld [vmem:[%s3379_s30 + $0x130] sm:$0xff] }
  0x17   : > { %v3402_v9 = vld [vmem:[%s3379_s30 + $0x88] sm:$0xff]  ;;  %v3420_v14 = vld [vmem:[%s3379_s30 + $0xd8] sm:$0xff]  ;;  %v3455_v22 = vld [vmem:[%s3379_s30] sm:$0xff] }
  0x18   : > { %368 = vperm.xlu1 %3229, %v289_v4   ;;  %760 = vperm.xlu0 %3231, %v3388_v5   ;;  %v3410_v11 = vld [vmem:[%s3379_s30 + $0xa8] sm:$0xff]  ;;  %v3430_v16 = vld [vmem:[%s3379_s30 + $0x98] sm:$0xff]  ;;  %v3462_v24 = vld [vmem:[%s3379_s30 + $0x20] sm:$0xff] }
  0x19   : > { %v311_v12 = vld [vmem:[%s3379_s30 + $0xc8] sm:$0xff]  ;;  %v3443_v19 = vld [vmem:[%s3379_s30 + $0xb8] sm:$0xff]  ;;  %v3468_v25 = vld [vmem:[%s3379_s30 + $0x40] sm:$0xff] }
  0x1a   : > { %v3425_v15 = vld [vmem:[%s3379_s30 + $0xe8] sm:$0xff]  ;;  %v3474_v26 = vld [vmem:[%s3379_s30 + $0x60] sm:$0xff]  ;;  %v3478_v27 = vld [vmem:[%s3379_s30 + $0x30] sm:$0xff] }
  0x1b   : > { %v3446_v20 = vld [vmem:[%s3379_s30 + $0x128] sm:$0xff]  ;;  %v3484_v28 = vld [vmem:[%s3379_s30 + $0x80] sm:$0xff]  ;;  %v3499_v30 = vld [vmem:[%s3379_s30 + $0x50] sm:$0xff] }
  0x1c   : > { %378 = vperm.xlu1 %3229, %v3388_v5   ;;  %776 = vperm.xlu0 %3231, %v3392_v6   ;;  %v3491_v29 = vld [vmem:[%s3379_s30 + $0xa0] sm:$0xff]  ;;  %v3508_v32 = vld [vmem:[%s3379_s30 + $0xf8] sm:$0xff]  ;;  %v3514_v33 = vld [vmem:[%s3379_s30 + $0x108] sm:$0xff] }
  0x1d   : > { %v3503_v31 = vld [vmem:[%s3379_s30 + $0xe0] sm:$0xff]  ;;  %v3524_v35 = vld [vmem:[%s3379_s30 + $0x138] sm:$0xff]  ;;  %v3528_v36 = vld [vmem:[%s3379_s30 + $0x70] sm:$0xff] }
  0x1e   : > { %v3519_v34 = vld [vmem:[%s3379_s30 + $0x120] sm:$0xff]  ;;  %v3532_v37 = vld [vmem:[%s3379_s30 + $0x148] sm:$0xff]  ;;  %v333_v41 = vld [vmem:[%s3379_s30 + $0x178] sm:$0xff] }
  0x1f   : > { %4534 = vst [vmem:[#allocation2_spill] sm:$0xff] %v3532_v37  ;;  %v3537_v38 = vld [vmem:[%s3379_s30 + $0x160] sm:$0xff]  ;;  %v3553_v44 = vld [vmem:[%s3379_s30 + $0x188] sm:$0xff]  ;;  %v341_v50 = vld [vmem:[%s3379_s30 + $0x1b8] sm:$0xff] }
  0x20   : > { %388 = vperm.xlu1 %3229, %v293_v7   ;;  %792 = vperm.xlu0 %3231, %v3398_v8   ;;  %4535 = vst [vmem:[#allocation3_spill] sm:$0xff] %v3537_v38  ;;  %v3562_v47 = vld [vmem:[%s3379_s30 + $0x1a0] sm:$0xff]  ;;  %v3573_v51 = vld [vmem:[%s3379_s30 + $0x90] sm:$0xff]  ;;  %v3581_v54 = vld [vmem:[%s3379_s30 + $0x1c8] sm:$0xff] }
  0x24   : > { %398 = vperm.xlu1 %3229, %v3392_v6   ;;  %808 = vperm.xlu0 %3231, %v3402_v9  }
  0x28   : > { %408 = vperm.xlu1 %3229, %v3407_v10   ;;  %824 = vperm.xlu0 %3231, %v3410_v11  }
  0x2c   : > { %418 = vperm.xlu1 %3229, %v3398_v8   ;;  %840 = vperm.xlu0 %3231, %v311_v12  }
  0x30   : > { %428 = vperm.xlu1 %3229, %v3417_v13   ;;  %848 = vperm.xlu0 %3231, %v3420_v14  }
  0x34   : > { %438 = vperm.xlu1 %3229, %v3402_v9   ;;  %856 = vperm.xlu0 %3231, %v3425_v15  }
  0x38   : > { %448 = vperm.xlu1 %3229, %v3430_v16   ;;  %860 = vperm.xlu0 %3231, %v3433_v17  }
  0x3c   : > { %458 = vperm.xlu1 %3229, %v3410_v11   ;;  %876 = vperm.xlu0 %3231, %v3438_v18  }
  0x40   : > { %468 = vperm.xlu1 %3229, %v3443_v19   ;;  %888 = vperm.xlu0 %3231, %v3446_v20  }
  0x44   : > { %478 = vperm.xlu1 %3229, %v311_v12   ;;  %892 = vperm.xlu0 %3231, %v3451_v21  }
  0x48   : > { %3230 = vset.pattern.permute.xlu1 %v4519_v0  ;;  %3260 = vset.pattern.permute.xlu0 %v4517_v23 }
  0x49   : > { %1128 = vperm.xlu0 %3260, %v3455_v22   ;;  %740 = vperm.xlu1 %3230, %v3455_v22  }
  0x4d   : > { %1140 = vperm.xlu0 %3260, %v289_v4   ;;  %748 = vperm.xlu1 %3230, %v288_v2  }
  0x51   : > { %1144 = vperm.xlu0 %3260, %v3462_v24   ;;  %752 = vperm.xlu1 %3230, %v289_v4   ;;  %v3298_v4 = vld [vmem:[%s4512_s3 + $0x10] sm:$0xff]  }
  0x52   : > { %3078 = vmatprep.subr.bf16.mxu0 %v3298_v4 }
  0x53   : > { %3079 = vmatpush3.bf16.msra.mxu0 %v3298_v4 }
  0x55   : > { %1156 = vperm.xlu0 %3260, %v293_v7   ;;  %3232 = vset.pattern.permute.xlu1 %v4517_v23 }
  0x56   : > { %1132 = vperm.xlu1 %3232, %v3383_v3  }
  0x59   : > { %1160 = vperm.xlu0 %3260, %v3468_v25  }
  0x5a   : > { %1136 = vperm.xlu1 %3232, %v288_v2  }
  0x5d   : > { %1172 = vperm.xlu0 %3260, %v3407_v10  }
  0x5e   : > { %3233 = vset.pattern.permute.xlu1 %v4519_v0 }
  0x5f   : > { %756 = vperm.xlu1 %3233, %v3462_v24  }
  0x61   : > { %1176 = vperm.xlu0 %3260, %v3474_v26  }
  0x63   : > { %764 = vperm.xlu1 %3233, %v3478_v27  }
  0x65   : > { %1188 = vperm.xlu0 %3260, %v3417_v13  }
  0x67   : > { %768 = vperm.xlu1 %3233, %v293_v7   ;;  %v3299_v7 = vld [vmem:[%s4512_s3 + $0x18] sm:$0xff]  }
  0x68   : > { %3080 = vmatprep.subr.bf16.mxu0 %v3299_v7 }
  0x69   : > { %1192 = vperm.xlu0 %3260, %v3484_v28   ;;  %3081 = vmatpush3.bf16.msra.mxu0 %v3299_v7 }
  0x6b   : > { %3234 = vset.pattern.permute.xlu1 %v4517_v23 }
  0x6c   : > { %1148 = vperm.xlu1 %3234, %v3388_v5  }
  0x6d   : > { %1204 = vperm.xlu0 %3260, %v3430_v16  }
  0x70   : > { %1152 = vperm.xlu1 %3234, %v3478_v27  }
  0x71   : > { %1208 = vperm.xlu0 %3260, %v3491_v29  }
  0x74   : > { %3235 = vset.pattern.permute.xlu1 %v4519_v0 }
  0x75   : > { %1220 = vperm.xlu0 %3260, %v3443_v19   ;;  %772 = vperm.xlu1 %3235, %v3468_v25  }
  0x79   : > { %1228 = vperm.xlu0 %3260, %v311_v12   ;;  %780 = vperm.xlu1 %3235, %v3499_v30  }
  0x7d   : > { %1240 = vperm.xlu0 %3260, %v3503_v31   ;;  %784 = vperm.xlu1 %3235, %v3407_v10  }
  0x81   : > { %1252 = vperm.xlu0 %3260, %v3508_v32   ;;  %3236 = vset.pattern.permute.xlu1 %v4517_v23 }
  0x82   : > { %1164 = vperm.xlu1 %3236, %v3392_v6   ;;  %v308_v6 = vld [vmem:[%s3379_s30 + $0xb0] sm:$0xff] }
  0x85   : > { %1260 = vperm.xlu0 %3260, %v3514_v33  }
  0x86   : > { %1168 = vperm.xlu1 %3236, %v3499_v30  }
  0x89   : > { %1272 = vperm.xlu0 %3260, %v3519_v34  }
  0x8a   : > { %3237 = vset.pattern.permute.xlu1 %v4519_v0 }
  0x8b   : > { %788 = vperm.xlu1 %3237, %v3474_v26  }
  0x8d   : > { %1284 = vperm.xlu0 %3260, %v3524_v35  }
  0x8f   : > { %796 = vperm.xlu1 %3237, %v3528_v36  }
  0x91   : > { %1292 = vperm.xlu0 %3260, %v3532_v37  }
  0x93   : > { %v3539_v39 = vpop.permute.xlu1 %363  ;;  %800 = vperm.xlu1 %3237, %v3417_v13   ;;  %v3542_v40 = vpop.permute.xlu0 %744 }
  0x95   : > { %1304 = vperm.xlu0 %3260, %v3537_v38  }
  0x97   : > { %v3546_v42 = vpop.permute.xlu1 %368  ;;  %3238 = vset.pattern.permute.xlu1 %v4517_v23  ;;  %v3549_v43 = vpop.permute.xlu0 %760 }
  0x98   : > { %1180 = vperm.xlu1 %3238, %v3398_v8  }
  0x99   : > { %1316 = vperm.xlu0 %3260, %v333_v41  }
  0x9b   : > { %v3555_v45 = vpop.permute.xlu1 %378  ;;  %v3557_v46 = vpop.permute.xlu0 %776 }
  0x9c   : > { %1184 = vperm.xlu1 %3238, %v3528_v36  }
  0x9d   : > { %1324 = vperm.xlu0 %3260, %v3553_v44  }
  0x9f   : > { %v3564_v48 = vpop.permute.xlu1 %388  ;;  %v3566_v49 = vpop.permute.xlu0 %792 }
  0xa0   : > { %3239 = vset.pattern.permute.xlu1 %v4519_v0 }
  0xa1   : > { %1336 = vperm.xlu0 %3260, %v3562_v47   ;;  %804 = vperm.xlu1 %3239, %v3484_v28  }
  0xa3   : > { %v3575_v52 = vpop.permute.xlu1 %398  ;;  %v3577_v53 = vpop.permute.xlu0 %808 }
  0xa5   : > { %1348 = vperm.xlu0 %3260, %v341_v50   ;;  %812 = vperm.xlu1 %3239, %v3573_v51  }
  0xa7   : > { %v3583_v55 = vpop.permute.xlu1 %408  ;;  %v3585_v56 = vpop.permute.xlu0 %824 }
  0xa8   : > { %4536 = vst [vmem:[#allocation4_spill] sm:$0xff] %v3585_v56 }
  0xa9   : > { %1356 = vperm.xlu0 %3260, %v3581_v54   ;;  %816 = vperm.xlu1 %3239, %v3430_v16  }
  0xab   : > { %v3589_v57 = vpop.permute.xlu1 %418  ;;  %v3591_v58 = vpop.permute.xlu0 %840 }
  0xac   : > { %4537 = vst [vmem:[#allocation5_spill] sm:$0xff] %v3591_v58 }
  0xad   : > { %3288 = vset.pattern.permute.xlu0 %v4521_v1  ;;  %3240 = vset.pattern.permute.xlu1 %v4517_v23 }
  0xae   : > { %353 = vperm.xlu0 %3288, %v3455_v22   ;;  %1196 = vperm.xlu1 %3240, %v3402_v9  }
  0xaf   : > { %v3600_v60 = vpop.permute.xlu1 %428  ;;  %v3602_v61 = vpop.permute.xlu0 %848 }
  0xb0   : > { %4538 = vst [vmem:[#allocation6_spill] sm:$0xff] %v3602_v61  ;;  %v4556_v61 = vmov 2  }
  0xb2   : > { %358 = vperm.xlu0 %3288, %v3383_v3   ;;  %1200 = vperm.xlu1 %3240, %v3573_v51  }
  0xb3   : > { %v3609_v63 = vpop.permute.xlu1 %438  ;;  %v3611_v2 = vpop.permute.xlu0 %856 }
  0xb4   : > { %4539 = vst [vmem:[#allocation7_spill] sm:$0xff] %v3611_v2 }
  0xb6   : > { %373 = vperm.xlu0 %3288, %v3462_v24   ;;  %3241 = vset.pattern.permute.xlu1 %v4519_v0 }
  0xb7   : > { %v3618_v5 = vpop.permute.xlu1 %448  ;;  %820 = vperm.xlu1 %3241, %v3491_v29   ;;  %v3621_v3 = vpop.permute.xlu0 %860 }
  0xb8   : > { %4540 = vst [vmem:[#allocation8_spill] sm:$0xff] %v3618_v5  ;;  %4541 = vst [vmem:[#allocation9_spill] sm:$0xff] %v3621_v3 }
  0xba   : > { %383 = vperm.xlu0 %3288, %v3478_v27  }
  0xbb   : > { %v3628_v8 = vpop.permute.xlu1 %458  ;;  %828 = vperm.xlu1 %3241, %v308_v6   ;;  %v3630_v9 = vpop.permute.xlu0 %876 }
  0xbc   : > { %4542 = vst [vmem:[#allocation10_spill] sm:$0xff] %v3628_v8  ;;  %4543 = vst [vmem:[#allocation11_spill] sm:$0xff] %v3630_v9 }
  0xbe   : > { %393 = vperm.xlu0 %3288, %v3468_v25  }
  0xbf   : > { %v3633_v10 = vpop.permute.xlu1 %468  ;;  %832 = vperm.xlu1 %3241, %v3443_v19   ;;  %v3636_v12 = vpop.permute.xlu0 %888  ;;  %v310_v19 = vld [vmem:[%s3379_s30 + $0xc0] sm:$0xff] }
  0xc0   : > { %4544 = vst [vmem:[#allocation12_spill] sm:$0xff] %v3633_v10  ;;  %4545 = vst [vmem:[#allocation13_spill] sm:$0xff] %v3636_v12 }
  0xc2   : > { %403 = vperm.xlu0 %3288, %v3499_v30  }
  0xc3   : > { %v3639_v13 = vpop.permute.xlu1 %478  ;;  %3242 = vset.pattern.permute.xlu1 %v4517_v23  ;;  %v3642_v16 = vpop.permute.xlu0 %892 }
  0xc4   : > { %4546 = vst [vmem:[#allocation14_spill] sm:$0xff] %v3639_v13  ;;  %4547 = vst [vmem:[#allocation15_spill] sm:$0xff] %v3642_v16  ;;  %1212 = vperm.xlu1 %3242, %v3410_v11   ;;  %v3739_v13 = vld [vmem:[%s3379_s30 + $0x190] sm:$0xff] }
  0xc5   : > { %4558 = vst [vmem:[#allocation24_spill] sm:$0xff] %v3739_v13 }
  0xc6   : > { %413 = vperm.xlu0 %3288, %v3474_v26  }
  0xc8   : > { %v3646_v22 = vpop.permute.xlu0 %1128  ;;  %1216 = vperm.xlu1 %3242, %v308_v6   ;;  %v3648_v24 = vpop.permute.xlu1 %740 }
  0xca   : > { %423 = vperm.xlu0 %3288, %v3528_v36   ;;  %v312_v36 = vld [vmem:[%s3379_s30 + $0xd0] sm:$0xff] }
  0xcc   : > { %v3652_v25 = vpop.permute.xlu0 %1140  ;;  %3243 = vset.pattern.permute.xlu1 %v4519_v0  ;;  %v3655_v27 = vpop.permute.xlu1 %748 }
  0xcd   : > { %836 = vperm.xlu1 %3243, %v310_v19  }
  0xce   : > { %433 = vperm.xlu0 %3288, %v3484_v28  }
  0xd0   : > { %v3658_v11 = vpop.permute.xlu0 %1144  ;;  %v3660_v26 = vpop.permute.xlu1 %752 }
  0xd1   : > { %3244 = vset.pattern.permute.xlu1 %v4521_v1 }
  0xd2   : > { %443 = vperm.xlu0 %3288, %v3573_v51   ;;  %488 = vperm.xlu1 %3244, %v3420_v14  }
  0xd4   : > { %v3665_v30 = vpop.permute.xlu0 %1156 }
  0xd5   : > { %v3668_v41 = vpop.permute.xlu1 %1132 }
  0xd6   : > { %453 = vperm.xlu0 %3288, %v3491_v29   ;;  %3245 = vset.pattern.permute.xlu1 %v4519_v0 }
  0xd7   : > { %844 = vperm.xlu1 %3245, %v312_v36  }
  0xd8   : > { %v3672_v28 = vpop.permute.xlu0 %1160 }
  0xd9   : > { %v3674_v50 = vpop.permute.xlu1 %1136 }
  0xda   : > { %463 = vperm.xlu0 %3288, %v308_v6  }
  0xdb   : > { %3246 = vset.pattern.permute.xlu1 %v4517_v23 }
  0xdc   : > { %v3677_v51 = vpop.permute.xlu0 %1172  ;;  %1224 = vperm.xlu1 %3246, %v310_v19  }
  0xde   : > { %473 = vperm.xlu0 %3288, %v310_v19   ;;  %v3679_v59 = vpop.permute.xlu1 %756 }
  0xe0   : > { %v3681_v62 = vpop.permute.xlu0 %1176  ;;  %1232 = vperm.xlu1 %3246, %v312_v36  }
  0xe2   : > { %483 = vperm.xlu0 %3288, %v312_v36   ;;  %v3683_v29 = vpop.permute.xlu1 %764 }
  0xe4   : > { %v3685_v4 = vpop.permute.xlu0 %1188  ;;  %1236 = vperm.xlu1 %3246, %v3420_v14  }
  0xe6   : > { %493 = vperm.xlu0 %3288, %v3503_v31   ;;  %v3689_v6 = vpop.permute.xlu1 %768 }
  0xe8   : > { %v3691_v7 = vpop.permute.xlu0 %1192  ;;  %3247 = vset.pattern.permute.xlu1 %v4521_v1 }
  0xe9   : > { %4548 = vst [vmem:[#allocation16_spill] sm:$0xff] %v3691_v7  ;;  %498 = vperm.xlu1 %3247, %v3425_v15  }
  0xea   : > { %518 = vperm.xlu0 %3288, %v3514_v33  }
  0xeb   : > { %v3696_v19 = vpop.permute.xlu1 %1148 }
  0xec   : > { %v3698_v36 = vpop.permute.xlu0 %1204 }
  0xed   : > { %4549 = vst [vmem:[#allocation17_spill] sm:$0xff] %v3698_v36  ;;  %3248 = vset.pattern.permute.xlu1 %v4519_v0 }
  0xee   : > { %523 = vperm.xlu0 %3288, %v3438_v18   ;;  %852 = vperm.xlu1 %3248, %v3503_v31   ;;  %v3717_v31 = vld [vmem:[%s3379_s30 + $0x150] sm:$0xff] }
  0xef   : > { %v3703_v14 = vpop.permute.xlu1 %1152  ;;  %4552 = vst [vmem:[#allocation20_spill] sm:$0xff] %v3717_v31 }
  0xf0   : > { %v3705_v23 = vpop.permute.xlu0 %1208 }
  0xf1   : > { %4550 = vst [vmem:[#allocation18_spill] sm:$0xff] %v3705_v23  ;;  %v321_v23 = vld [vmem:[%s3379_s30 + $0x118] sm:$0xff] }
  0xf2   : > { %3249 = vset.pattern.permute.xlu1 %v4521_v1  ;;  %533 = vperm.xlu0 %3288, %v3519_v34   ;;  %v4554_v1 = vmov 1  }
  0xf3   : > { %503 = vperm.xlu1 %3249, %v3433_v17  }
  0xf4   : > { %v3710_v16 = vpop.permute.xlu0 %1220  ;;  %v3712_v12 = vpop.permute.xlu1 %772 }
  0xf5   : > { %4551 = vst [vmem:[#allocation19_spill] sm:$0xff] %v3710_v16 }
  0xf6   : > { %558 = vperm.xlu0 %3288, %v3532_v37  }
  0xf7   : > { %508 = vperm.xlu1 %3249, %v3508_v32  }
  0xf8   : > { %v3719_v0 = vpop.permute.xlu0 %1228  ;;  %v3721_v9 = vpop.permute.xlu1 %780 }
  0xf9   : > { %4553 = vst [vmem:[#allocation21_spill] sm:$0xff] %v3719_v0 }
  0xfa   : > { %563 = vperm.xlu0 %3288, %v3717_v31  }
  0xfb   : > { %3250 = vset.pattern.permute.xlu1 %v4554_v1 }
  0xfc   : > { %864 = vperm.xlu1 %3250, %v3508_v32   ;;  %v3726_v3 = vpop.permute.xlu1 %784  ;;  %v3728_v2 = vpop.permute.xlu0 %1240 }
  0xfd   : > { %4555 = vst [vmem:[#allocation22_spill] sm:$0xff] %v3728_v2 }
  0xfe   : > { %573 = vperm.xlu0 %3288, %v3537_v38   ;;  %v318_v38 = vld [vmem:[%s3379_s30 + $0x100] sm:$0xff] }
 0x100   : > { %3251 = vset.pattern.permute.xlu1 %v4556_v61  ;;  %v3732_v37 = vpop.permute.xlu0 %1252 }
 0x101   : > { %4557 = vst [vmem:[#allocation23_spill] sm:$0xff] %v3732_v37  ;;  %1244 = vperm.xlu1 %3251, %v3425_v15   ;;  %v3735_v0 = vpop.permute.xlu1 %1164  ;;  %v4561_v15 = vmov 0  }
 0x102   : > { %598 = vperm.xlu0 %3288, %v3553_v44  }
 0x104   : > { %v3741_v32 = vpop.permute.xlu0 %1260 }
 0x105   : > { %4559 = vst [vmem:[#allocation25_spill] sm:$0xff] %v3741_v32  ;;  %1248 = vperm.xlu1 %3251, %v3433_v17   ;;  %v3744_v2 = vpop.permute.xlu1 %1168  ;;  %v3761_v32 = vld [vmem:[%s3379_s30 + $0x1d0] sm:$0xff] }
 0x106   : > { %603 = vperm.xlu0 %3288, %v3739_v13  }
 0x108   : > { %v3748_v37 = vpop.permute.xlu0 %1272 }
 0x109   : > { %4560 = vst [vmem:[#allocation26_spill] sm:$0xff] %v3748_v37  ;;  %3252 = vset.pattern.permute.xlu1 %v4561_v15 }
 0x10a   : > { %513 = vperm.xlu1 %3252, %v318_v38   ;;  %v3751_v44 = vpop.permute.xlu1 %788  ;;  %613 = vperm.xlu0 %3288, %v3562_v47   ;;  %v3770_v47 = vld [vmem:[%s3379_s30 + $0x1e0] sm:$0xff] }
 0x10b   : > { %4565 = vst [vmem:[#allocation30_spill] sm:$0xff] %v3770_v47 }
 0x10c   : > { %v3754_v58 = vpop.permute.xlu0 %1284 }
 0x10d   : > { %4562 = vst [vmem:[#allocation27_spill] sm:$0xff] %v3754_v58 }
 0x10e   : > { %3253 = vset.pattern.permute.xlu1 %v4554_v1  ;;  %v3757_v17 = vpop.permute.xlu1 %796  ;;  %638 = vperm.xlu0 %3288, %v3581_v54  }
 0x10f   : > { %4563 = vst [vmem:[#allocation28_spill] sm:$0xff] %v3757_v17  ;;  %868 = vperm.xlu1 %3253, %v318_v38  }
 0x110   : > { %v3763_v37 = vpop.permute.xlu0 %1292 }
 0x111   : > { %4564 = vst [vmem:[#allocation29_spill] sm:$0xff] %v3763_v37 }
 0x112   : > { %v3765_v16 = vpop.permute.xlu1 %800  ;;  %643 = vperm.xlu0 %3288, %v3761_v32  }
 0x113   : > { %872 = vperm.xlu1 %3253, %v3514_v33  }
 0x114   : > { %v3772_v58 = vpop.permute.xlu0 %1304 }
 0x115   : > { %4566 = vst [vmem:[#allocation31_spill] sm:$0xff] %v3772_v58  ;;  %v3789_v58 = vld [vmem:[%s3379_s30 + $0x168] sm:$0xff] }
 0x116   : > { %653 = vperm.xlu0 %3288, %v3770_v47   ;;  %4570 = vst [vmem:[#allocation35_spill] sm:$0xff] %v3789_v58  ;;  %v671_v47 = vlaneseq }
 0x117   : > { %3254 = vset.pattern.permute.xlu1 %v4561_v15  ;;  %v3777_v54 = vpop.permute.xlu1 %1180 }
 0x118   : > { %528 = vperm.xlu1 %3254, %v321_v23   ;;  %v3779_v37 = vpop.permute.xlu0 %1316  ;;  %v672_v36 = vshrl.u32 %v671_v47, 7 }
 0x119   : > { %4567 = vst [vmem:[#allocation32_spill] sm:$0xff] %v3779_v37  ;;  %v3797_v37 = vld [vmem:[%s3379_s30 + $0x170] sm:$0xff] }
 0x11a   : > { %3289 = vset.pattern.permute.xlu0 %v4554_v1  ;;  %4573 = vst [vmem:[#allocation38_spill] sm:$0xff] %v3797_v37 }
 0x11b   : > { %v3782_v10 = vpop.permute.xlu1 %1184  ;;  %908 = vperm.xlu0 %3289, %v3717_v31  }
 0x11c   : > { %4568 = vst [vmem:[#allocation33_spill] sm:$0xff] %v3782_v10  ;;  %3255 = vset.pattern.permute.xlu1 %v4554_v1  ;;  %v3786_v33 = vpop.permute.xlu0 %1324  ;;  %v673_v10 = vsub.s32 0, %v672_v36 }
 0x11d   : > { %4569 = vst [vmem:[#allocation34_spill] sm:$0xff] %v3786_v33  ;;  %880 = vperm.xlu1 %3255, %v321_v23  }
 0x11f   : > { %920 = vperm.xlu0 %3289, %v3789_v58   ;;  %v997_v58 = vsub.s32 1, %v672_v36 }
 0x120   : > { %v3792_v8 = vpop.permute.xlu1 %804  ;;  %v3794_v56 = vpop.permute.xlu0 %1336 }
 0x121   : > { %4571 = vst [vmem:[#allocation36_spill] sm:$0xff] %v3792_v8  ;;  %4572 = vst [vmem:[#allocation37_spill] sm:$0xff] %v3794_v56  ;;  %3256 = vset.pattern.permute.xlu1 %v4556_v61  ;;  %v350_v56 = vld [vmem:[%s4510_s1] sm:$0x7]  ;;  %v1385_v8 = vsub.s32 2, %v672_v36  ;;  %v3829_v36 = vld [vmem:[%s3379_s30 + $0x1b0] sm:$0xff] }
 0x122   : > { %1256 = vperm.xlu1 %3256, %v318_v38  }
 0x123   : > { %924 = vperm.xlu0 %3289, %v3797_v37   ;;  %v3815_v37 = vld [vmem:[%s3379_s30 + $0x1a8] sm:$0xff]  ;;  %v3821_v7 = vrot.slane %v350_v56, %v1385_v8 }
 0x124   : > { %v3801_v33 = vpop.permute.xlu1 %812  ;;  %v3803_v31 = vpop.permute.xlu0 %1348  ;;  %4577 = vst [vmem:[#allocation42_spill] sm:$0xff] %v3815_v37 }
 0x125   : > { %4574 = vst [vmem:[#allocation39_spill] sm:$0xff] %v3801_v33  ;;  %4575 = vst [vmem:[#allocation40_spill] sm:$0xff] %v3803_v31  ;;  %v3817_v33 = vrot.slane %v350_v56, %v673_v10  ;;  %v3819_v31 = vrot.slane %v350_v56, %v997_v58  ;;  %v1389_v56 = vmul.f32 %v3821_v7, %v3674_v50 }
 0x126   : > { %1264 = vperm.xlu1 %3256, %v3438_v18  }
 0x127   : > { %940 = vperm.xlu0 %3289, %v3739_v13   ;;  %v1001_v5 = vmul.f32 %v3819_v31, %v3655_v27  ;;  %v1002_v18 = vmul.f32 %v3819_v31, %v3660_v26  ;;  %v678_v58 = vmul.f32 %v3817_v33, %v3546_v42  ;;  %v680_v27 = vmul.f32 %v3817_v33, %v3555_v45 }
 0x128   : > { %v3810_v47 = vpop.permute.xlu1 %816  ;;  %v3812_v38 = vpop.permute.xlu0 %1356  ;;  %v1387_v26 = vmul.f32 %v3821_v7, %v3646_v22  ;;  %v1000_v45 = vmul.f32 %v3819_v31, %v3542_v40  ;;  %v682_v40 = vmul.f32 %v3817_v33, %v3564_v48  ;;  %v1388_v48 = vmul.f32 %v3821_v7, %v3668_v41 }
 0x129   : > { %4576 = vst [vmem:[#allocation41_spill] sm:$0xff] %v3812_v38  ;;  %v677_v38 = vmul.f32 %v3817_v33, %v3539_v39  ;;  %v999_v39 = vmul.f32 %v3819_v31, %v3648_v24  ;;  %v1006_v24 = vmul.f32 %v3819_v31, %v3689_v6 }
 0x12a   : > { %1268 = vperm.xlu1 %3256, %v321_v23   ;;  %v1004_v23 = vmul.f32 %v3819_v31, %v3549_v43  ;;  %v1390_v43 = vmul.f32 %v3821_v7, %v3652_v25  ;;  %v1008_v25 = vmul.f32 %v3819_v31, %v3557_v46  ;;  %v1391_v46 = vmul.f32 %v3821_v7, %v3658_v11 }
 0x12b   : > { %952 = vperm.xlu0 %3289, %v3815_v37   ;;  %v1065_v50 = vadd.f32 %v1001_v5, %v677_v38  ;;  %v1066_v37 = vadd.f32 %v1002_v18, %v678_v58  ;;  %v684_v58 = vmul.f32 %v3817_v33, %v3575_v52  ;;  %v1003_v11 = vmul.f32 %v3819_v31, %v3679_v59 }
 0x12c   : > { %v1068_v5 = vadd.f32 %v1004_v23, %v680_v27 }
 0x12d   : > { %v354_v8 = vpop.permute.xlu0 %353  ;;  %v3839_v10 = vpop.permute.xlu1 %1196  ;;  %v1453_v13 = vadd.f32 %v1389_v56, %v1065_v50  ;;  %v1454_v6 = vadd.f32 %v1390_v43, %v1066_v37  ;;  %v1394_v37 = vmul.f32 %v3821_v7, %v3665_v30  ;;  %v688_v43 = vmul.f32 %v3817_v33, %v3589_v57 }
 0x12e   : > { %4578 = vst [vmem:[#allocation43_spill] sm:$0xff] %v3839_v10  ;;  %v675_v42 = vmul.f32 %v3817_v33, %v354_v8  ;;  %3257 = vset.pattern.permute.xlu1 %v4561_v15  ;;  %v1392_v8 = vmul.f32 %v3821_v7, %v3696_v19  ;;  %v1012_v19 = vmul.f32 %v3819_v31, %v3566_v49 }
 0x12f   : > { %538 = vperm.xlu1 %3257, %v3446_v20   ;;  %956 = vperm.xlu0 %3289, %v3829_v36   ;;  %v1070_v49 = vadd.f32 %v1006_v24, %v682_v40  ;;  %v1398_v40 = vmul.f32 %v3821_v7, %v3677_v51 }
 0x130   : > { %v1063_v22 = vadd.f32 %v999_v39, %v675_v42  ;;  %v1456_v23 = vadd.f32 %v1392_v8, %v1068_v5  ;;  %v1072_v42 = vadd.f32 %v1008_v25, %v684_v58 }
 0x131   : > { %v359_v17 = vpop.permute.xlu0 %358  ;;  %v3859_v10 = vpop.permute.xlu1 %1200  ;;  %v1458_v24 = vadd.f32 %v1394_v37, %v1070_v49  ;;  %v1395_v37 = vmul.f32 %v3821_v7, %v3672_v28  ;;  %v1016_v28 = vmul.f32 %v3819_v31, %v3577_v53  ;;  %v1400_v53 = vmul.f32 %v3821_v7, %v3777_v54 }
 0x132   : > { %v1451_v38 = vadd.f32 %v1387_v26, %v1063_v22  ;;  %v676_v18 = vmul.f32 %v3817_v33, %v359_v17  ;;  %v3877_v17 = vld [vmem:[%s4511_s2] ss:$0 sm:$0xff]  ;;  %v1005_v22 = vmul.f32 %v3819_v31, %v3683_v29  ;;  %v1396_v29 = vmul.f32 %v3821_v7, %v3735_v0 }
 0x133   : > { %3258 = vset.pattern.permute.xlu1 %v4554_v1  ;;  %972 = vperm.xlu0 %3289, %v3761_v32   ;;  %v1524_v32 = vadd.f32 %v3877_v17, %v1453_v13  ;;  %v1525_v30 = vadd.f32 %v3877_v17, %v1454_v6  ;;  %v1010_v13 = vmul.f32 %v3819_v31, %v3726_v3 }
 0x134   : > { %v1064_v52 = vadd.f32 %v1000_v45, %v676_v18  ;;  %884 = vperm.xlu1 %3258, %v3519_v34   ;;  %v1522_v41 = vadd.f32 %v3877_v17, %v1451_v38  ;;  %v686_v34 = vmul.f32 %v3817_v33, %v3583_v55  ;;  %v1527_v55 = vadd.f32 %v3877_v17, %v1456_v23 }
 0x135   : > { %v374_v56 = vpop.permute.xlu0 %373  ;;  %v1588_v45 = vmax.f32 %v1524_v32, 0.0  ;;  %v1589_v18 = vmax.f32 %v1525_v30, 0.0  ;;  %v1393_v6 = vmul.f32 %v3821_v7, %v3703_v14  ;;  %v1529_v32 = vadd.f32 %v3877_v17, %v1458_v24 }
 0x136   : > { %v1452_v27 = vadd.f32 %v1388_v48, %v1064_v52  ;;  %v679_v26 = vmul.f32 %v3817_v33, %v374_v56  ;;  %v3888_v39 = vpop.permute.xlu1 %820  ;;  %v1586_v25 = vmax.f32 %v1522_v41, 0.0  ;;  %v1074_v58 = vadd.f32 %v1010_v13, %v686_v34 }
 0x137   : > { %v1591_v49 = vmax.f32 %v1527_v55, 0.0  ;;  %v1651_v51 = vpack.c.bf16 %v1589_v18, %v1588_v45  ;;  %v1007_v0 = vmul.f32 %v3819_v31, %v3712_v12  ;;  %v1460_v41 = vadd.f32 %v1396_v29, %v1072_v42 }
 0x138   : > { %v1067_v59 = vadd.f32 %v1003_v11, %v679_v26  ;;  %3259 = vset.pattern.permute.xlu1 %v4561_v15  ;;  %v1523_v50 = vadd.f32 %v3877_v17, %v1452_v27  ;;  %v1462_v26 = vadd.f32 %v1398_v40, %v1074_v58  ;;  %v1014_v34 = vmul.f32 %v3819_v31, %v3765_v16 }
 0x139   : > { %v384_v8 = vpop.permute.xlu0 %383  ;;  %543 = vperm.xlu1 %3259, %v3451_v21   ;;  %v1076_v30 = vadd.f32 %v1012_v19, %v688_v43  ;;  %v692_v45 = vmul.f32 %v3817_v33, %v3609_v63  ;;  %v1009_v16 = vmul.f32 %v3819_v31, %v3721_v9  ;;  %v1531_v54 = vadd.f32 %v3877_v17, %v1460_v41 }
 0x13a   : > { %v1455_v3 = vadd.f32 %v1391_v46, %v1067_v59  ;;  %v681_v5 = vmul.f32 %v3817_v33, %v384_v8  ;;  %v3905_v57 = vpop.permute.xlu1 %828  ;;  %v1587_v38 = vmax.f32 %v1523_v50, 0.0  ;;  %v690_v50 = vmul.f32 %v3817_v33, %v3600_v60 }
 0x13b   : > { %v1402_v60 = vmul.f32 %v3821_v7, %v3685_v4  ;;  %v1533_v63 = vadd.f32 %v3877_v17, %v1462_v26  ;;  %v1397_v9 = vmul.f32 %v3821_v7, %v3744_v2  ;;  %v1011_v4 = vmul.f32 %v3819_v31, %v3751_v44  ;;  %v4581_v26 = vld [vmem:[#allocation8_spill] sm:$0xff] }
 0x13c   : > { %v1526_v48 = vadd.f32 %v3877_v17, %v1455_v3  ;;  %v1069_v46 = vadd.f32 %v1005_v22, %v681_v5  ;;  %v1650_v52 = vpack.c.bf16 %v1587_v38, %v1586_v25  ;;  %v1593_v22 = vmax.f32 %v1529_v32, 0.0 }
 0x13d   : > { %v394_v23 = vpop.permute.xlu0 %393  ;;  %548 = vperm.xlu1 %3259, %v3524_v35   ;;  %v1078_v55 = vadd.f32 %v1014_v34, %v690_v50  ;;  %v1464_v38 = vadd.f32 %v1400_v53, %v1076_v30  ;;  %v1018_v32 = vmul.f32 %v3819_v31, %v3810_v47  ;;  %v694_v41 = vmul.f32 %v3817_v33, %v4581_v26  ;;  %v4582_v34 = vld [vmem:[#allocation16_spill] sm:$0xff]  ;;  %v4584_v53 = vld [vmem:[#allocation17_spill] sm:$0xff] }
 0x13e   : > { %v1590_v56 = vmax.f32 %v1526_v48, 0.0  ;;  %v1457_v11 = vadd.f32 %v1393_v6, %v1069_v46  ;;  %v683_v14 = vmul.f32 %v3817_v33, %v394_v23  ;;  %3082 = vmatprep.mubr.msk.bf16.mxu0 %vm1721_vm0, %v1650_v52  ;;  %v3922_v27 = vpop.permute.xlu1 %832  ;;  %v1595_v6 = vmax.f32 %v1531_v54, 0.0 }
 0x13f   : > { %3083 = vmatmul.mubr.msk.bf16.vlgmr.msra.gmra.mrb[0].mxu0 %vm1721_vm0, %v1651_v51  ;;  %v1466_v2 = vadd.f32 %v1402_v60, %v1078_v55  ;;  %v1597_v46 = vmax.f32 %v1533_v63, 0.0  ;;  %v1535_v44 = vadd.f32 %v3877_v17, %v1464_v38  ;;  %v1403_v30 = vmul.f32 %v3821_v7, %v4582_v34  ;;  %v3985_v60 = vld [vmem:[%s3379_s30 + $0x140] sm:$0xff]  ;;  %v4585_v63 = vld [vmem:[#allocation36_spill] sm:$0xff] }
 0x140   : > { %v1528_v12 = vadd.f32 %v3877_v17, %v1457_v11  ;;  %v1071_v13 = vadd.f32 %v1007_v0, %v683_v14  ;;  %v1652_v59 = vpack.c.bf16 %v1591_v49, %v1590_v56  ;;  %v4579_v49 = vld [vmem:[#allocation43_spill] sm:$0xff] }
 0x141   : > { %v404_v42 = vpop.permute.xlu0 %403  ;;  %3261 = vset.pattern.permute.xlu1 %v4554_v1  ;;  %v1404_v23 = vmul.f32 %v3821_v7, %v4579_v49  ;;  %v1537_v47 = vadd.f32 %v3877_v17, %v1466_v2 }
 0x142   : > { %v1592_v19 = vmax.f32 %v1528_v12, 0.0  ;;  %v1459_v43 = vadd.f32 %v1395_v37, %v1071_v13  ;;  %v685_v24 = vmul.f32 %v3817_v33, %v404_v42  ;;  %896 = vperm.xlu1 %3261, %v3524_v35   ;;  %3086 = vmatprep.mubr.msk.bf16.mxu0 %vm1721_vm0, %v1652_v59  ;;  %v1399_v35 = vmul.f32 %v3821_v7, %v3681_v62  ;;  %v4583_v12 = vld [vmem:[#allocation33_spill] sm:$0xff] }
 0x143   : > { %v3946_v8 = vpop.permute.xlu1 %1212  ;;  %v1080_v62 = vadd.f32 %v1016_v28, %v692_v45  ;;  %v1401_v13 = vmul.f32 %v3821_v7, %v4583_v12  ;;  %v1406_v42 = vmul.f32 %v3821_v7, %v4584_v53  ;;  %v1601_v38 = vmax.f32 %v1537_v47, 0.0  ;;  %v4592_v53 = vld [vmem:[#allocation5_spill] sm:$0xff] }
 0x144   : > { %v1530_v3 = vadd.f32 %v3877_v17, %v1459_v43  ;;  %v1073_v5 = vadd.f32 %v1009_v16, %v685_v24  ;;  %v1653_v25 = vpack.c.bf16 %v1593_v22, %v1592_v19  ;;  %v1599_v16 = vmax.f32 %v1535_v44, 0.0 }
 0x145   : > { %v414_v18 = vpop.permute.xlu0 %413  ;;  %v1082_v19 = vadd.f32 %v1018_v32, %v694_v41  ;;  %v1468_v43 = vadd.f32 %v1404_v23, %v1080_v62  ;;  %v1408_v2 = vmul.f32 %v3821_v7, %v3946_v8 }
 0x146   : > { %v1594_v40 = vmax.f32 %v1530_v3, 0.0  ;;  %v1461_v58 = vadd.f32 %v1397_v9, %v1073_v5  ;;  %v687_v29 = vmul.f32 %v3817_v33, %v414_v18  ;;  %3262 = vset.pattern.permute.xlu1 %v4556_v61  ;;  %v4586_v3 = vld [vmem:[#allocation4_spill] sm:$0xff] }
 0x147   : > { %1276 = vperm.xlu1 %3262, %v3446_v20   ;;  %3087 = vmatmul.mubr.msk.bf16.gmra.mrb[4].mxu0 %vm1721_vm0, %v1653_v25  ;;  %v3959_v48 = vpop.permute.xlu1 %1216  ;;  %v4580_v20 = vld [vmem:[#allocation28_spill] sm:$0xff]  ;;  %v1020_v5 = vmul.f32 %v3819_v31, %v4586_v3  ;;  %v4587_v25 = vld [vmem:[#allocation10_spill] sm:$0xff] }
 0x148   : > { %v1532_v52 = vadd.f32 %v3877_v17, %v1461_v58  ;;  %v1075_v37 = vadd.f32 %v1011_v4, %v687_v29  ;;  %v1654_v0 = vpack.c.bf16 %v1595_v6, %v1594_v40  ;;  %v1013_v56 = vmul.f32 %v3819_v31, %v4580_v20  ;;  %v4590_v20 = vld [vmem:[#allocation18_spill] sm:$0xff] }
 0x149   : > { %v424_v51 = vpop.permute.xlu0 %423  ;;  %v1470_v58 = vadd.f32 %v1406_v42, %v1082_v19  ;;  %v1539_v29 = vadd.f32 %v3877_v17, %v1468_v43  ;;  %v1022_v6 = vmul.f32 %v3819_v31, %v3922_v27  ;;  %v1407_v27 = vmul.f32 %v3821_v7, %v4590_v20 }
 0x14a   : > { %v1596_v11 = vmax.f32 %v1532_v52, 0.0  ;;  %v1463_v14 = vadd.f32 %v1399_v35, %v1075_v37  ;;  %v689_v28 = vmul.f32 %v3817_v33, %v424_v51  ;;  %3090 = vmatprep.mubr.msk.bf16.mxu0 %vm1721_vm0, %v1654_v0  ;;  %v696_v35 = vmul.f32 %v3817_v33, %v4587_v25  ;;  %v4588_v52 = vld [vmem:[#allocation39_spill] sm:$0xff]  ;;  %v4589_v51 = vld [vmem:[#allocation12_spill] sm:$0xff] }
 0x14b   : > { %1280 = vperm.xlu1 %3262, %v3451_v21   ;;  %v1015_v21 = vmul.f32 %v3819_v31, %v4585_v63  ;;  %v1017_v37 = vmul.f32 %v3819_v31, %v4588_v52  ;;  %v698_v0 = vmul.f32 %v3817_v33, %v4589_v51  ;;  %v1541_v41 = vadd.f32 %v3877_v17, %v1470_v58  ;;  %v329_v58 = vld [vmem:[%s3379_s30 + $0x158] sm:$0xff] }
 0x14c   : > { %v1534_v59 = vadd.f32 %v3877_v17, %v1463_v14  ;;  %v1077_v50 = vadd.f32 %v1013_v56, %v689_v28  ;;  %v3980_v45 = vpop.permute.xlu1 %836  ;;  %v1655_v22 = vpack.c.bf16 %v1597_v46, %v1596_v11  ;;  %v1084_v23 = vadd.f32 %v1020_v5, %v696_v35  ;;  %v4591_v56 = vld [vmem:[#allocation19_spill] sm:$0xff]  ;;  %v4595_v5 = vld [vmem:[#allocation2_spill] sm:$0xff] }
 0x14d   : > { %v434_v24 = vpop.permute.xlu0 %433  ;;  %v1410_v8 = vmul.f32 %v3821_v7, %v4591_v56  ;;  %v1405_v11 = vmul.f32 %v3821_v7, %v3859_v10  ;;  %v1603_v34 = vmax.f32 %v1539_v29, 0.0  ;;  %v1024_v42 = vmul.f32 %v3819_v31, %v4592_v53 }
 0x14e   : > { %v1598_v54 = vmax.f32 %v1534_v59, 0.0  ;;  %v1465_v55 = vadd.f32 %v1401_v13, %v1077_v50  ;;  %v691_v9 = vmul.f32 %v3817_v33, %v434_v24  ;;  %v1472_v47 = vadd.f32 %v1408_v2, %v1084_v23 }
 0x14f   : > { %3263 = vset.pattern.permute.xlu1 %v4561_v15  ;;  %3091 = vmatmul.mubr.msk.bf16.gmra.mrb[8].mxu0 %vm1721_vm0, %v1655_v22  ;;  %v1019_v13 = vmul.f32 %v3819_v31, %v3888_v39  ;;  %v1021_v25 = vmul.f32 %v3819_v31, %v3905_v57  ;;  %v1409_v29 = vmul.f32 %v3821_v7, %v3959_v48  ;;  %v4596_v48 = vld [vmem:[#allocation6_spill] sm:$0xff] }
 0x150   : > { %v1536_v18 = vadd.f32 %v3877_v17, %v1465_v55  ;;  %v1079_v4 = vadd.f32 %v1015_v21, %v691_v9  ;;  %553 = vperm.xlu1 %3263, %v3985_v60   ;;  %v1656_v40 = vpack.c.bf16 %v1599_v16, %v1598_v54  ;;  %v4593_v16 = vld [vmem:[#allocation14_spill] sm:$0xff]  ;;  %v4594_v21 = vld [vmem:[#allocation21_spill] sm:$0xff]  ;;  %v1605_v54 = vmax.f32 %v1541_v41, 0.0 }
 0x151   : > { %v444_v62 = vpop.permute.xlu0 %443  ;;  %v489_v46 = vpop.permute.xlu1 %488  ;;  %v700_v19 = vmul.f32 %v3817_v33, %v4593_v16  ;;  %v1412_v39 = vmul.f32 %v3821_v7, %v4594_v21  ;;  %v1543_v9 = vadd.f32 %v3877_v17, %v1472_v47 }
 0x152   : > { %v1600_v44 = vmax.f32 %v1536_v18, 0.0  ;;  %v1467_v32 = vadd.f32 %v1403_v30, %v1079_v4  ;;  %v693_v49 = vmul.f32 %v3817_v33, %v444_v62  ;;  %3094 = vmatprep.mubr.msk.bf16.mxu0 %vm1721_vm0, %v1656_v40  ;;  %v1086_v30 = vadd.f32 %v1022_v6, %v698_v0 }
 0x153   : > { %v1088_v4 = vadd.f32 %v1024_v42, %v700_v19  ;;  %v1607_v57 = vmax.f32 %v1543_v9, 0.0  ;;  %v1026_v0 = vmul.f32 %v3819_v31, %v4596_v48  ;;  %v702_v20 = vmul.f32 %v3817_v33, %v489_v46 }
 0x154   : > { %v1538_v14 = vadd.f32 %v3877_v17, %v1467_v32  ;;  %v1081_v28 = vadd.f32 %v1017_v37, %v693_v49  ;;  %3264 = vset.pattern.permute.xlu1 %v4554_v1  ;;  %v1657_v26 = vpack.c.bf16 %v1601_v38, %v1600_v44  ;;  %v1474_v55 = vadd.f32 %v1410_v8, %v1086_v30 }
 0x155   : > { %v454_v12 = vpop.permute.xlu0 %453  ;;  %900 = vperm.xlu1 %3264, %v3985_v60   ;;  %v1476_v52 = vadd.f32 %v1412_v39, %v1088_v4  ;;  %v1023_v32 = vmul.f32 %v3819_v31, %v3980_v45  ;;  %v1090_v46 = vadd.f32 %v1026_v0, %v702_v20  ;;  %v4604_v20 = vld [vmem:[#allocation38_spill] sm:$0xff] }
 0x156   : > { %v1602_v59 = vmax.f32 %v1538_v14, 0.0  ;;  %v1469_v50 = vadd.f32 %v1405_v11, %v1081_v28  ;;  %v695_v10 = vmul.f32 %v3817_v33, %v454_v12  ;;  %v845_v22 = vpop.permute.xlu1 %844  ;;  %v1545_v37 = vadd.f32 %v3877_v17, %v1474_v55  ;;  %v4597_v55 = vld [vmem:[#allocation20_spill] sm:$0xff] }
 0x157   : > { %3095 = vmatmul.mubr.msk.bf16.gmra.mrb[12].mxu0 %vm1721_vm0, %v1657_v26  ;;  %v1547_v45 = vadd.f32 %v3877_v17, %v1476_v52  ;;  %v1025_v41 = vmul.f32 %v3819_v31, %v845_v22 }
 0x158   : > { %v1540_v43 = vadd.f32 %v3877_v17, %v1469_v50  ;;  %v1083_v24 = vadd.f32 %v1019_v13, %v695_v10  ;;  %v1658_v63 = vpack.c.bf16 %v1603_v34, %v1602_v59  ;;  %v1609_v28 = vmax.f32 %v1545_v37, 0.0 }
 0x159   : > { %v464_v3 = vpop.permute.xlu0 %463  ;;  %904 = vperm.xlu1 %3264, %v4595_v5   ;;  %v1611_v22 = vmax.f32 %v1547_v45, 0.0  ;;  %v4068_v5 = vld [vmem:[%s3379_s30 + $0x1e8] sm:$0xff] }
 0x15a   : > { %v1604_v35 = vmax.f32 %v1540_v43, 0.0  ;;  %v1471_v38 = vadd.f32 %v1407_v27, %v1083_v24  ;;  %v697_v18 = vmul.f32 %v3817_v33, %v464_v3  ;;  %3098 = vmatprep.mubr.msk.bf16.mxu0 %vm1721_vm0, %v1658_v63  ;;  %984 = vperm.xlu0 %3289, %v4068_v5  }
 0x15b   : > { %v1225_v40 = vpop.permute.xlu1 %1224 }
 0x15c   : > { %v1542_v6 = vadd.f32 %v3877_v17, %v1471_v38  ;;  %v1085_v2 = vadd.f32 %v1021_v25, %v697_v18  ;;  %v1659_v62 = vpack.c.bf16 %v1605_v54, %v1604_v35  ;;  %v1411_v8 = vmul.f32 %v3821_v7, %v1225_v40  ;;  %v4072_v35 = vld [vmem:[%s3379_s30 + $0x1f0] sm:$0xff] }
 0x15d   : > { %v474_v44 = vpop.permute.xlu0 %473  ;;  %3265 = vset.pattern.permute.xlu1 %v4561_v15 }
 0x15e   : > { %v1606_v49 = vmax.f32 %v1542_v6, 0.0  ;;  %v1473_v23 = vadd.f32 %v1409_v29, %v1085_v2  ;;  %v699_v51 = vmul.f32 %v3817_v33, %v474_v44  ;;  %568 = vperm.xlu1 %3265, %v329_v58   ;;  %988 = vperm.xlu0 %3289, %v4072_v35   ;;  %v4600_v29 = vld [vmem:[#allocation3_spill] sm:$0xff]  ;;  %v4601_v6 = vld [vmem:[#allocation22_spill] sm:$0xff] }
 0x15f   : > { %3099 = vmatmul.mubr.msk.bf16.gmra.mrb[16].mxu0 %vm1721_vm0, %v1659_v62  ;;  %v1233_v27 = vpop.permute.xlu1 %1232  ;;  %v1415_v2 = vmul.f32 %v3821_v7, %v4601_v6 }
 0x160   : > { %v1544_v56 = vadd.f32 %v3877_v17, %v1473_v23  ;;  %v1087_v11 = vadd.f32 %v1023_v32, %v699_v51  ;;  %v1660_v14 = vpack.c.bf16 %v1607_v57, %v1606_v49  ;;  %v1413_v12 = vmul.f32 %v3821_v7, %v1233_v27  ;;  %v4602_v57 = vld [vmem:[#allocation7_spill] sm:$0xff] }
 0x161   : > { %v484_v26 = vpop.permute.xlu0 %483  ;;  %v1028_v44 = vmul.f32 %v3819_v31, %v4602_v57  ;;  %v4603_v23 = vld [vmem:[#allocation23_spill] sm:$0xff] }
 0x162   : > { %v1608_v34 = vmax.f32 %v1544_v56, 0.0  ;;  %v1475_v30 = vadd.f32 %v1411_v8, %v1087_v11  ;;  %v701_v47 = vmul.f32 %v3817_v33, %v484_v26  ;;  %3266 = vset.pattern.permute.xlu1 %v4554_v1  ;;  %3102 = vmatprep.mubr.msk.bf16.mxu0 %vm1721_vm0, %v1660_v14  ;;  %v1418_v51 = vmul.f32 %v3821_v7, %v4603_v23  ;;  %v4605_v14 = vld [vmem:[#allocation9_spill] sm:$0xff] }
 0x163   : > { %912 = vperm.xlu1 %3266, %v329_v58   ;;  %v1237_v13 = vpop.permute.xlu1 %1236  ;;  %3294 = vset.pattern.permute.xlu0 %v4556_v61  ;;  %v1029_v45 = vmul.f32 %v3819_v31, %v4605_v14 }
 0x164   : > { %v1546_v59 = vadd.f32 %v3877_v17, %v1475_v30  ;;  %v1089_v50 = vadd.f32 %v1025_v41, %v701_v47  ;;  %v1414_v10 = vmul.f32 %v3821_v7, %v1237_v13  ;;  %v1661_v53 = vpack.c.bf16 %v1609_v28, %v1608_v34  ;;  %v3304_v34 = vld [vmem:[%s3379_s30 + $0x178] sm:$0xff] }
 0x165   : > { %v494_v38 = vpop.permute.xlu0 %493 }
 0x166   : > { %v1610_v42 = vmax.f32 %v1546_v59, 0.0  ;;  %v1477_v16 = vadd.f32 %v1413_v12, %v1089_v50  ;;  %v1478_v19 = vadd.f32 %v1414_v10, %v1090_v46  ;;  %v703_v4 = vmul.f32 %v3817_v33, %v494_v38 }
 0x167   : > { %3267 = vset.pattern.permute.xlu1 %v4556_v61  ;;  %3103 = vmatmul.mubr.msk.bf16.gmra.mrb[20].mxu0 %vm1721_vm0, %v1661_v53 }
 0x168   : > { %v1548_v43 = vadd.f32 %v3877_v17, %v1477_v16  ;;  %v1549_v24 = vadd.f32 %v3877_v17, %v1478_v19  ;;  %1288 = vperm.xlu1 %3267, %v3985_v60   ;;  %v499_v63 = vpop.permute.xlu1 %498  ;;  %v1662_v21 = vpack.c.bf16 %v1611_v22, %v1610_v42  ;;  %v4598_v60 = vld [vmem:[#allocation35_spill] sm:$0xff] }
 0x169   : > { %v704_v32 = vmul.f32 %v3817_v33, %v499_v63 }
 0x16a   : > { %v1612_v39 = vmax.f32 %v1548_v43, 0.0  ;;  %v1613_v54 = vmax.f32 %v1549_v24, 0.0  ;;  %3106 = vmatprep.mubr.msk.bf16.mxu0 %vm1721_vm0, %v1662_v21  ;;  %v3300_v43 = vld [vmem:[%s4514_s5] sm:$0xff]   ;;  %v4113_v21 = vld [vmem:[%s3379_s30 + $0x1f8] sm:$0xff] }
 0x16b   : > { %v1092_v56 = vadd.f32 %v1028_v44, %v704_v32  ;;  %3146 = vmatprep.subr.bf16.mxu1 %v3300_v43  ;;  %v337_v44 = vld [vmem:[%s3379_s30 + $0x198] sm:$0xff] }
 0x16c   : > { %1296 = vperm.xlu1 %3267, %v4597_v55   ;;  %v1663_v9 = vpack.c.bf16 %v1613_v54, %v1612_v39  ;;  %3147 = vmatpush3.bf16.msra.mxu1 %v3300_v43  ;;  %v3301_v39 = vld [vmem:[%s4514_s5 + $0x8] sm:$0xff]   ;;  %v334_v55 = vld [vmem:[%s3379_s30 + $0x180] sm:$0xff] }
 0x16d   : > { %v853_v3 = vpop.permute.xlu1 %852  ;;  %3148 = vmatprep.subr.bf16.mxu1 %v3301_v39 }
 0x16e   : > { %v1027_v40 = vmul.f32 %v3819_v31, %v853_v3  ;;  %v519_v3 = vpop.permute.xlu0 %518 }
 0x16f   : > { %3107 = vmatmul.mubr.msk.bf16.gmra.mrb[24].mxu0 %vm1721_vm0, %v1663_v9  ;;  %v3302_v9 = vld [vmem:[%s4514_s5 + $0x10] sm:$0xff]  }
 0x170   : > { %1300 = vperm.xlu1 %3267, %v329_v58   ;;  %v4599_v58 = vld [vmem:[#allocation30_spill] sm:$0xff]  ;;  %v1091_v62 = vadd.f32 %v1027_v40, %v703_v4  ;;  %3149 = vmatpush3.bf16.msra.mxu1 %v3301_v39  ;;  %v4606_v4 = vld [vmem:[#allocation25_spill] sm:$0xff] }
 0x171   : > { %1368 = vperm.xlu0 %3294, %v4599_v58   ;;  %3150 = vmatprep.subr.bf16.mxu1 %v3302_v9  ;;  %v1420_v40 = vmul.f32 %v3821_v7, %v4606_v4 }
 0x172   : > { %v504_v25 = vpop.permute.xlu1 %503  ;;  %v1479_v48 = vadd.f32 %v1415_v2, %v1091_v62  ;;  %v524_v2 = vpop.permute.xlu0 %523  ;;  %v3305_v62 = vld [vmem:[%s3379_s30 + $0x188] sm:$0xff] }
 0x173   : > { %v705_v8 = vmul.f32 %v3817_v33, %v504_v25  ;;  %v709_v32 = vmul.f32 %v3817_v33, %v524_v2  ;;  %v4611_v2 = vld [vmem:[#allocation13_spill] sm:$0xff] }
 0x174   : > { %3268 = vset.pattern.permute.xlu1 %v4561_v15  ;;  %v1550_v28 = vadd.f32 %v3877_v17, %v1479_v48  ;;  %3151 = vmatpush3.bf16.msra.mxu1 %v3302_v9 }
 0x175   : > { %578 = vperm.xlu1 %3268, %v4598_v60   ;;  %v1093_v47 = vadd.f32 %v1029_v45, %v705_v8  ;;  %1380 = vperm.xlu0 %3294, %v4113_v21  }
 0x176   : > { %v509_v18 = vpop.permute.xlu1 %508  ;;  %v1614_v13 = vmax.f32 %v1550_v28, 0.0 }
 0x177   : > { %v706_v49 = vmul.f32 %v3817_v33, %v509_v18  ;;  %v3303_v18 = vld [vmem:[%s4514_s5 + $0x18] sm:$0xff]  }
 0x178   : > { %3152 = vmatprep.subr.bf16.mxu1 %v3303_v18 }
 0x179   : > { %3269 = vset.pattern.permute.xlu1 %v4554_v1  ;;  %3153 = vmatpush3.bf16.msra.mxu1 %v3303_v18 }
 0x17a   : > { %916 = vperm.xlu1 %3269, %v4600_v29  }
 0x17b   : > { %v865_v52 = vpop.permute.xlu1 %864 }
 0x17c   : > { %v1030_v37 = vmul.f32 %v3819_v31, %v865_v52 }
 0x17e   : > { %3270 = vset.pattern.permute.xlu1 %v4561_v15  ;;  %v1094_v0 = vadd.f32 %v1030_v37, %v706_v49 }
 0x17f   : > { %583 = vperm.xlu1 %3270, %v4604_v20  }
 0x180   : > { %v1245_v27 = vpop.permute.xlu1 %1244  ;;  %v1482_v26 = vadd.f32 %v1418_v51, %v1094_v0  ;;  %v4607_v51 = vld [vmem:[#allocation11_spill] sm:$0xff] }
 0x181   : > { %v1416_v11 = vmul.f32 %v3821_v7, %v1245_v27  ;;  %v1033_v48 = vmul.f32 %v3819_v31, %v4607_v51 }
 0x182   : > { %v1553_v59 = vadd.f32 %v3877_v17, %v1482_v26 }
 0x183   : > { %v1480_v41 = vadd.f32 %v1416_v11, %v1092_v56  ;;  %588 = vperm.xlu1 %3270, %v3304_v34   ;;  %v1097_v56 = vadd.f32 %v1033_v48, %v709_v32  ;;  %v4612_v32 = vld [vmem:[#allocation27_spill] sm:$0xff] }
 0x184   : > { %v1249_v30 = vpop.permute.xlu1 %1248  ;;  %v1617_v16 = vmax.f32 %v1553_v59, 0.0 }
 0x185   : > { %v1551_v46 = vadd.f32 %v3877_v17, %v1480_v41  ;;  %v1417_v12 = vmul.f32 %v3821_v7, %v1249_v30  ;;  %v534_v30 = vpop.permute.xlu0 %533 }
 0x186   : > { %v711_v9 = vmul.f32 %v3817_v33, %v534_v30 }
 0x187   : > { %v1615_v50 = vmax.f32 %v1551_v46, 0.0  ;;  %v1481_v10 = vadd.f32 %v1417_v12, %v1093_v47  ;;  %3271 = vset.pattern.permute.xlu1 %v4554_v1 }
 0x188   : > { %928 = vperm.xlu1 %3271, %v3304_v34  }
 0x189   : > { %v1552_v53 = vadd.f32 %v3877_v17, %v1481_v10  ;;  %v514_v22 = vpop.permute.xlu1 %513  ;;  %v1664_v42 = vpack.c.bf16 %v1615_v50, %v1614_v13  ;;  %v4152_v50 = vpop.permute.xlu0 %558 }
 0x18a   : > { %v707_v52 = vmul.f32 %v3817_v33, %v514_v22 }
 0x18b   : > { %v1616_v19 = vmax.f32 %v1552_v53, 0.0  ;;  %3110 = vmatprep.mubr.msk.bf16.mxu0 %vm1721_vm0, %v1664_v42 }
 0x18c   : > { %3272 = vset.pattern.permute.xlu1 %v4556_v61 }
 0x18d   : > { %1308 = vperm.xlu1 %3272, %v4598_v60   ;;  %v1665_v24 = vpack.c.bf16 %v1617_v16, %v1616_v19  ;;  %v708_v60 = vmul.f32 %v3817_v33, %v519_v3  ;;  %v4608_v16 = vld [vmem:[#allocation24_spill] sm:$0xff] }
 0x18e   : > { %v869_v63 = vpop.permute.xlu1 %868 }
 0x18f   : > { %3111 = vmatmul.mubr.msk.bf16.gmra.mrb[28].mxu0 %vm1721_vm0, %v1665_v24  ;;  %v1031_v6 = vmul.f32 %v3819_v31, %v869_v63  ;;  %v4156_v24 = vpop.permute.xlu0 %563 }
 0x191   : > { %1312 = vperm.xlu1 %3272, %v4604_v20   ;;  %v1095_v49 = vadd.f32 %v1031_v6, %v707_v52 }
 0x192   : > { %v873_v54 = vpop.permute.xlu1 %872 }
 0x193   : > { %v1032_v38 = vmul.f32 %v3819_v31, %v873_v54  ;;  %v4159_v39 = vpop.permute.xlu0 %573  ;;  %v4609_v54 = vld [vmem:[#allocation42_spill] sm:$0xff] }
 0x195   : > { %3273 = vset.pattern.permute.xlu1 %v4561_v15  ;;  %v1096_v58 = vadd.f32 %v1032_v38, %v708_v60  ;;  %v3306_v60 = vld [vmem:[%s3379_s30 + $0x1a0] sm:$0xff] }
 0x196   : > { %593 = vperm.xlu1 %3273, %v334_v55  }
 0x197   : > { %v529_v25 = vpop.permute.xlu1 %528  ;;  %v1484_v37 = vadd.f32 %v1420_v40, %v1096_v58  ;;  %v4610_v40 = vld [vmem:[#allocation26_spill] sm:$0xff] }
 0x198   : > { %v710_v28 = vmul.f32 %v3817_v33, %v529_v25  ;;  %v4166_v25 = vpop.permute.xlu0 %598  ;;  %v1423_v58 = vmul.f32 %v3821_v7, %v4610_v40 }
 0x199   : > { %v1555_v0 = vadd.f32 %v3877_v17, %v1484_v37 }
 0x19a   : > { %3274 = vset.pattern.permute.xlu1 %v4554_v1 }
 0x19b   : > { %932 = vperm.xlu1 %3274, %v334_v55   ;;  %v1619_v45 = vmax.f32 %v1555_v0, 0.0  ;;  %v4613_v0 = vld [vmem:[#allocation15_spill] sm:$0xff] }
 0x19c   : > { %v881_v29 = vpop.permute.xlu1 %880 }
 0x19d   : > { %v1034_v8 = vmul.f32 %v3819_v31, %v881_v29 }
 0x19f   : > { %936 = vperm.xlu1 %3274, %v3305_v62   ;;  %v1098_v47 = vadd.f32 %v1034_v8, %v710_v28  ;;  %v1036_v62 = vmul.f32 %v3819_v31, %v4611_v2 }
 0x1a1   : > { %v1257_v57 = vpop.permute.xlu1 %1256 }
 0x1a2   : > { %v1419_v23 = vmul.f32 %v3821_v7, %v1257_v57  ;;  %v4178_v57 = vpop.permute.xlu0 %603 }
 0x1a3   : > { %3275 = vset.pattern.permute.xlu1 %v4561_v15 }
 0x1a4   : > { %v1483_v20 = vadd.f32 %v1419_v23, %v1095_v49  ;;  %608 = vperm.xlu1 %3275, %v337_v44   ;;  %v1426_v49 = vmul.f32 %v3821_v7, %v4612_v32 }
 0x1a5   : > { %v1265_v27 = vpop.permute.xlu1 %1264 }
 0x1a6   : > { %v1554_v11 = vadd.f32 %v3877_v17, %v1483_v20  ;;  %v1421_v14 = vmul.f32 %v3821_v7, %v1265_v27  ;;  %v1037_v20 = vmul.f32 %v3819_v31, %v4613_v0 }
 0x1a8   : > { %v1618_v26 = vmax.f32 %v1554_v11, 0.0  ;;  %v1485_v41 = vadd.f32 %v1421_v14, %v1097_v56  ;;  %3276 = vset.pattern.permute.xlu1 %v4554_v1  ;;  %v3307_v11 = vld [vmem:[%s3379_s30 + $0x1b8] sm:$0xff] }
 0x1a9   : > { %944 = vperm.xlu1 %3276, %v337_v44   ;;  %v1269_v34 = vpop.permute.xlu1 %1268 }
 0x1aa   : > { %v1422_v46 = vmul.f32 %v3821_v7, %v1269_v34  ;;  %v1666_v12 = vpack.c.bf16 %v1619_v45, %v1618_v26  ;;  %v1556_v13 = vadd.f32 %v3877_v17, %v1485_v41  ;;  %v4190_v41 = vpop.permute.xlu0 %613 }
 0x1ac   : > { %v1486_v59 = vadd.f32 %v1422_v46, %v1098_v47  ;;  %3114 = vmatprep.mubr.msk.bf16.mxu0 %vm1721_vm0, %v1666_v12  ;;  %v1620_v22 = vmax.f32 %v1556_v13, 0.0 }
 0x1ad   : > { %3277 = vset.pattern.permute.xlu1 %v4556_v61 }
 0x1ae   : > { %v1557_v10 = vadd.f32 %v3877_v17, %v1486_v59  ;;  %1320 = vperm.xlu1 %3277, %v334_v55   ;;  %v539_v53 = vpop.permute.xlu1 %538 }
 0x1af   : > { %v712_v29 = vmul.f32 %v3817_v33, %v539_v53 }
 0x1b0   : > { %v1621_v42 = vmax.f32 %v1557_v10, 0.0 }
 0x1b1   : > { %v1100_v23 = vadd.f32 %v1036_v62, %v712_v29  ;;  %v717_v29 = vmul.f32 %v3817_v33, %v4156_v24 }
 0x1b2   : > { %1328 = vperm.xlu1 %3277, %v4608_v16   ;;  %v1667_v19 = vpack.c.bf16 %v1621_v42, %v1620_v22  ;;  %v4196_v22 = vpop.permute.xlu0 %638 }
 0x1b3   : > { %v885_v43 = vpop.permute.xlu1 %884 }
 0x1b4   : > { %3115 = vmatmul.mubr.msk.bf16.gmra.mrb[32].mxu0 %vm1721_vm0, %v1667_v19  ;;  %v1035_v3 = vmul.f32 %v3819_v31, %v885_v43 }
 0x1b6   : > { %1332 = vperm.xlu1 %3277, %v337_v44   ;;  %v1099_v38 = vadd.f32 %v1035_v3, %v711_v9  ;;  %v4202_v19 = vpop.permute.xlu0 %643  ;;  %v716_v3 = vmul.f32 %v3817_v33, %v4152_v50 }
 0x1b8   : > { %v544_v63 = vpop.permute.xlu1 %543  ;;  %v1487_v52 = vadd.f32 %v1423_v58, %v1099_v38  ;;  %v3308_v58 = vld [vmem:[%s3379_s30 + $0x1c8] sm:$0xff] }
 0x1b9   : > { %v713_v51 = vmul.f32 %v3817_v33, %v544_v63  ;;  %v342_v63 = vld [vmem:[%s3379_s30 + $0x1c0] sm:$0xff] }
 0x1ba   : > { %3278 = vset.pattern.permute.xlu1 %v4561_v15  ;;  %v1558_v27 = vadd.f32 %v3877_v17, %v1487_v52  ;;  %v4206_v9 = vpop.permute.xlu0 %653  ;;  %v345_v52 = vld [vmem:[%s3379_s30 + $0x1d8] sm:$0xff] }
 0x1bb   : > { %618 = vperm.xlu1 %3278, %v4609_v54   ;;  %v1101_v45 = vadd.f32 %v1037_v20, %v713_v51 }
 0x1bc   : > { %v549_v55 = vpop.permute.xlu1 %548  ;;  %v1622_v34 = vmax.f32 %v1558_v27, 0.0 }
 0x1bd   : > { %v714_v6 = vmul.f32 %v3817_v33, %v549_v55 }
 0x1be   : > { %v909_v38 = vpop.permute.xlu0 %908 }
 0x1bf   : > { %3279 = vset.pattern.permute.xlu1 %v4554_v1  ;;  %v1041_v2 = vmul.f32 %v3819_v31, %v909_v38 }
 0x1c0   : > { %948 = vperm.xlu1 %3279, %v3306_v60  }
 0x1c1   : > { %v897_v18 = vpop.permute.xlu1 %896 }
 0x1c2   : > { %v1038_v4 = vmul.f32 %v3819_v31, %v897_v18  ;;  %v4614_v18 = vld [vmem:[#allocation29_spill] sm:$0xff] }
 0x1c4   : > { %3280 = vset.pattern.permute.xlu1 %v4561_v15  ;;  %v1102_v37 = vadd.f32 %v1038_v4, %v714_v6  ;;  %v1428_v4 = vmul.f32 %v3821_v7, %v4614_v18 }
 0x1c5   : > { %623 = vperm.xlu1 %3280, %v3829_v36  }
 0x1c6   : > { %v1277_v44 = vpop.permute.xlu1 %1276  ;;  %v1490_v56 = vadd.f32 %v1426_v49, %v1102_v37 }
 0x1c7   : > { %v1424_v48 = vmul.f32 %v3821_v7, %v1277_v44 }
 0x1c8   : > { %v1561_v30 = vadd.f32 %v3877_v17, %v1490_v56 }
 0x1c9   : > { %v1488_v8 = vadd.f32 %v1424_v48, %v1100_v23  ;;  %628 = vperm.xlu1 %3280, %v3307_v11   ;;  %v1105_v23 = vadd.f32 %v1041_v2, %v717_v29 }
 0x1ca   : > { %v1281_v14 = vpop.permute.xlu1 %1280  ;;  %v1625_v10 = vmax.f32 %v1561_v30, 0.0 }
 0x1cb   : > { %v1559_v28 = vadd.f32 %v3877_v17, %v1488_v8  ;;  %v1425_v26 = vmul.f32 %v3821_v7, %v1281_v14 }
 0x1cd   : > { %v1623_v47 = vmax.f32 %v1559_v28, 0.0  ;;  %v1489_v46 = vadd.f32 %v1425_v26, %v1101_v45  ;;  %3281 = vset.pattern.permute.xlu1 %v4554_v1 }
 0x1ce   : > { %960 = vperm.xlu1 %3281, %v3307_v11  }
 0x1cf   : > { %v1668_v12 = vpack.c.bf16 %v1623_v47, %v1622_v34  ;;  %v1560_v13 = vadd.f32 %v3877_v17, %v1489_v46  ;;  %v554_v59 = vpop.permute.xlu1 %553 }
 0x1d0   : > { %v715_v50 = vmul.f32 %v3817_v33, %v554_v59  ;;  %v3309_v59 = vld [vmem:[%s3379_s30 + $0x1d0] sm:$0xff] }
 0x1d1   : > { %v1624_v53 = vmax.f32 %v1560_v13, 0.0  ;;  %3118 = vmatprep.mubr.msk.bf16.mxu0 %vm1721_vm0, %v1668_v12 }
 0x1d2   : > { %3282 = vset.pattern.permute.xlu1 %v4556_v61 }
 0x1d3   : > { %v1669_v42 = vpack.c.bf16 %v1625_v10, %v1624_v53  ;;  %1340 = vperm.xlu1 %3282, %v4609_v54  }
 0x1d4   : > { %v901_v16 = vpop.permute.xlu1 %900 }
 0x1d5   : > { %3119 = vmatmul.mubr.msk.bf16.gmra.mrb[36].mxu0 %vm1721_vm0, %v1669_v42  ;;  %v1039_v40 = vmul.f32 %v3819_v31, %v901_v16 }
 0x1d7   : > { %1344 = vperm.xlu1 %3282, %v3829_v36   ;;  %v1103_v37 = vadd.f32 %v1039_v40, %v715_v50 }
 0x1d8   : > { %v905_v43 = vpop.permute.xlu1 %904 }
 0x1d9   : > { %v1040_v54 = vmul.f32 %v3819_v31, %v905_v43  ;;  %v921_v43 = vpop.permute.xlu0 %920 }
 0x1da   : > { %v1044_v38 = vmul.f32 %v3819_v31, %v921_v43 }
 0x1db   : > { %3283 = vset.pattern.permute.xlu1 %v4561_v15  ;;  %v1104_v36 = vadd.f32 %v1040_v54, %v716_v3  ;;  %v4615_v54 = vld [vmem:[#allocation31_spill] sm:$0xff] }
 0x1dc   : > { %633 = vperm.xlu1 %3283, %v342_v63  }
 0x1dd   : > { %v569_v55 = vpop.permute.xlu1 %568  ;;  %v1492_v6 = vadd.f32 %v1428_v4, %v1104_v36  ;;  %v1431_v36 = vmul.f32 %v3821_v7, %v4615_v54  ;;  %v925_v50 = vpop.permute.xlu0 %924 }
 0x1de   : > { %v718_v27 = vmul.f32 %v3817_v33, %v569_v55  ;;  %v3310_v55 = vld [vmem:[%s3379_s30 + $0x1e0] sm:$0xff] }
 0x1df   : > { %v1563_v32 = vadd.f32 %v3877_v17, %v1492_v6 }
 0x1e0   : > { %3284 = vset.pattern.permute.xlu1 %v4554_v1 }
 0x1e1   : > { %964 = vperm.xlu1 %3284, %v342_v63   ;;  %v1627_v20 = vmax.f32 %v1563_v32, 0.0 }
 0x1e2   : > { %v913_v60 = vpop.permute.xlu1 %912 }
 0x1e3   : > { %v1042_v24 = vmul.f32 %v3819_v31, %v913_v60 }
 0x1e5   : > { %968 = vperm.xlu1 %3284, %v3308_v58   ;;  %v1106_v14 = vadd.f32 %v1042_v24, %v718_v27  ;;  %v4616_v58 = vld [vmem:[#allocation32_spill] sm:$0xff] }
 0x1e6   : > { %v1434_v29 = vmul.f32 %v3821_v7, %v4616_v58 }
 0x1e7   : > { %v1289_v62 = vpop.permute.xlu1 %1288 }
 0x1e8   : > { %v1427_v44 = vmul.f32 %v3821_v7, %v1289_v62  ;;  %v1045_v62 = vmul.f32 %v3819_v31, %v925_v50 }
 0x1e9   : > { %3285 = vset.pattern.permute.xlu1 %v4561_v15 }
 0x1ea   : > { %v1491_v49 = vadd.f32 %v1427_v44, %v1103_v37  ;;  %648 = vperm.xlu1 %3285, %v345_v52   ;;  %v4259_v44 = vld [vmem:[%s4511_s2] ss:$0 sm:$0xff] }
 0x1eb   : > { %v1297_v51 = vpop.permute.xlu1 %1296 }
 0x1ec   : > { %v1562_v48 = vadd.f32 %v3877_v17, %v1491_v49  ;;  %v1429_v0 = vmul.f32 %v3821_v7, %v1297_v51  ;;  %v4266_v51 = vld [vmem:[%s4513_s4] ss:$0 sm:$0xff] }
 0x1ee   : > { %v1626_v56 = vmax.f32 %v1562_v48, 0.0  ;;  %v1493_v8 = vadd.f32 %v1429_v0, %v1105_v23  ;;  %3286 = vset.pattern.permute.xlu1 %v4554_v1 }
 0x1ef   : > { %976 = vperm.xlu1 %3286, %v345_v52   ;;  %v1301_v11 = vpop.permute.xlu1 %1300 }
 0x1f0   : > { %v1670_v45 = vpack.c.bf16 %v1627_v20, %v1626_v56  ;;  %v1430_v28 = vmul.f32 %v3821_v7, %v1301_v11  ;;  %v1564_v26 = vadd.f32 %v3877_v17, %v1493_v8 }
 0x1f2   : > { %v1494_v34 = vadd.f32 %v1430_v28, %v1106_v14  ;;  %3122 = vmatprep.mubr.msk.bf16.mxu0 %vm1721_vm0, %v1670_v45  ;;  %v1628_v46 = vmax.f32 %v1564_v26, 0.0 }
 0x1f3   : > { %3287 = vset.pattern.permute.xlu1 %v4556_v61 }
 0x1f4   : > { %v1565_v30 = vadd.f32 %v3877_v17, %v1494_v34  ;;  %1352 = vperm.xlu1 %3287, %v342_v63   ;;  %v579_v47 = vpop.permute.xlu1 %578  ;;  %v719_v17 = vmul.f32 %v3817_v33, %v4159_v39 }
 0x1f5   : > { %v720_v18 = vmul.f32 %v3817_v33, %v579_v47 }
 0x1f6   : > { %v1629_v12 = vmax.f32 %v1565_v30, 0.0 }
 0x1f7   : > { %v1108_v2 = vadd.f32 %v1044_v38, %v720_v18 }
 0x1f8   : > { %v1671_v13 = vpack.c.bf16 %v1629_v12, %v1628_v46  ;;  %1360 = vperm.xlu1 %3287, %v3309_v59  }
 0x1f9   : > { %v917_v10 = vpop.permute.xlu1 %916 }
 0x1fa   : > { %3123 = vmatmul.mubr.msk.bf16.gmra.mrb[40].mxu0 %vm1721_vm0, %v1671_v13  ;;  %v1043_v42 = vmul.f32 %v3819_v31, %v917_v10 }
 0x1fc   : > { %1364 = vperm.xlu1 %3287, %v345_v52   ;;  %v1107_v63 = vadd.f32 %v1043_v42, %v719_v17 }
 0x1fe   : > { %v584_v53 = vpop.permute.xlu1 %583  ;;  %v1495_v4 = vadd.f32 %v1431_v36, %v1107_v63 }
 0x1ff   : > { %v721_v52 = vmul.f32 %v3817_v33, %v584_v53 }
 0x200   : > { %3290 = vset.pattern.permute.xlu1 %v4561_v15 }
 0x201   : > { %658 = vperm.xlu1 %3290, %v4068_v5   ;;  %v1109_v24 = vadd.f32 %v1045_v62, %v721_v52 }
 0x202   : > { %v589_v16 = vpop.permute.xlu1 %588 }
 0x203   : > { %v722_v39 = vmul.f32 %v3817_v33, %v589_v16 }
 0x205   : > { %3291 = vset.pattern.permute.xlu1 %v4554_v1 }
 0x206   : > { %980 = vperm.xlu1 %3291, %v3310_v55  }
 0x207   : > { %v929_v3 = vpop.permute.xlu1 %928 }
 0x208   : > { %v1046_v60 = vmul.f32 %v3819_v31, %v929_v3 }
 0x20a   : > { %3292 = vset.pattern.permute.xlu1 %v4561_v15  ;;  %v1110_v40 = vadd.f32 %v1046_v60, %v722_v39  ;;  %v1566_v15 = vadd.f32 %v4259_v44, %v1495_v4  ;;  %v724_v39 = vmul.f32 %v3817_v33, %v4166_v25 }
 0x20b   : > { %663 = vperm.xlu1 %3292, %v4072_v35  }
 0x20c   : > { %v1309_v6 = vpop.permute.xlu1 %1308  ;;  %v1498_v32 = vadd.f32 %v1434_v29, %v1110_v40  ;;  %v1630_v20 = vmax.f32 %v1566_v15, 0.0 }
 0x20d   : > { %v1432_v37 = vmul.f32 %v3821_v7, %v1309_v6  ;;  %v4617_v6 = vld [vmem:[#allocation34_spill] sm:$0xff] }
 0x20e   : > { %v1569_v56 = vadd.f32 %v4259_v44, %v1498_v32 }
 0x20f   : > { %v1496_v49 = vadd.f32 %v1432_v37, %v1108_v2  ;;  %668 = vperm.xlu1 %3292, %v4113_v21   ;;  %v1436_v2 = vmul.f32 %v3821_v7, %v4617_v6 }
 0x210   : > { %v1313_v23 = vpop.permute.xlu1 %1312  ;;  %v1633_v59 = vmax.f32 %v1569_v56, 0.0 }
 0x211   : > { %v1567_v48 = vadd.f32 %v4259_v44, %v1496_v49  ;;  %v1433_v0 = vmul.f32 %v3821_v7, %v1313_v23 }
 0x212   : > { %v3084_v27 = vpop.f32.mrb[0].mxu0 }
 0x213   : > { %v1631_v8 = vmax.f32 %v1567_v48, 0.0  ;;  %v1497_v11 = vadd.f32 %v1433_v0, %v1109_v24  ;;  %v1861_v14 = vadd.f32 %v3084_v27, %v4266_v51  ;;  %v1852_v45 = vpop.f32.mrb[1].mxu0  ;;  %3293 = vset.pattern.permute.xlu1 %v4554_v1 }
 0x214   : > { %v1853_v28 = vadd.f32 %v4266_v51, %v1852_v45  ;;  %v3085_v26 = vpop.f32.mrb[2].mxu0  ;;  %992 = vperm.xlu1 %3293, %v4113_v21  }
 0x215   : > { %v1672_v34 = vpack.c.bf16 %v1631_v8, %v1630_v20  ;;  %v1568_v30 = vadd.f32 %v4259_v44, %v1497_v11  ;;  %v1864_v47 = vadd.f32 %v3085_v26, %v4266_v51  ;;  %v1855_v46 = vpop.f32.mrb[3].mxu0  ;;  %v594_v12 = vpop.permute.xlu1 %593  ;;  %v2109_v53 = vmax.f32 %v1861_v14, 0.0 }
 0x216   : > { %v1856_v13 = vadd.f32 %v4266_v51, %v1855_v46  ;;  %v2107_v1 = vmax.f32 %v1853_v28, 0.0  ;;  %v723_v46 = vmul.f32 %v3817_v33, %v594_v12  ;;  %v725_v12 = vmul.f32 %v3817_v33, %v4178_v57 }
 0x217   : > { %v1632_v10 = vmax.f32 %v1568_v30, 0.0  ;;  %v2110_v17 = vmax.f32 %v1864_v47, 0.0  ;;  %3126 = vmatprep.mubr.msk.bf16.mxu0 %vm1721_vm0, %v1672_v34 }
 0x218   : > { %v2108_v42 = vmax.f32 %v1856_v13, 0.0  ;;  %3295 = vset.pattern.permute.xlu1 %v4556_v61 }
 0x219   : > { %v1673_v21 = vpack.c.bf16 %v1633_v59, %v1632_v10  ;;  %v2172_v16 = vpack.c.bf16 %v2110_v17, %v2109_v53  ;;  %1372 = vperm.xlu1 %3295, %v4068_v5  }
 0x21a   : > { %v3088_v43 = vpop.f32.mrb[4].mxu0  ;;  %v933_v63 = vpop.permute.xlu1 %932  ;;  %v2171_v55 = vpack.c.bf16 %v2108_v42, %v2107_v1 }
 0x21b   : > { %v1877_v3 = vadd.f32 %v3088_v43, %v4266_v51  ;;  %v1868_v54 = vpop.f32.mrb[5].mxu0  ;;  %3127 = vmatmul.mubr.msk.bf16.gmra.mrb[44].mxu0 %vm1721_vm0, %v1673_v21  ;;  %v1047_v28 = vmul.f32 %v3819_v31, %v933_v63  ;;  %v941_v1 = vpop.permute.xlu0 %940 }
 0x21c   : > { %v1869_v36 = vadd.f32 %v4266_v51, %v1868_v54  ;;  %v3089_v60 = vpop.f32.mrb[6].mxu0  ;;  %3154 = vmatprep.mubr.msk.bf16.mxu1 %vm1721_vm0, %v2171_v55  ;;  %v1049_v43 = vmul.f32 %v3819_v31, %v941_v1 }
 0x21d   : > { %v1880_v38 = vadd.f32 %v3089_v60, %v4266_v51  ;;  %v1871_v61 = vpop.f32.mrb[7].mxu0  ;;  %3155 = vmatmul.mubr.msk.bf16.vlgmr.msra.gmra.mrb[0].mxu1 %vm1721_vm0, %v2172_v16  ;;  %1376 = vperm.xlu1 %3295, %v4072_v35   ;;  %v2113_v4 = vmax.f32 %v1877_v3, 0.0  ;;  %v1111_v42 = vadd.f32 %v1047_v28, %v723_v46 }
 0x21e   : > { %v1872_v5 = vadd.f32 %v4266_v51, %v1871_v61  ;;  %v937_v18 = vpop.permute.xlu1 %936  ;;  %v2111_v29 = vmax.f32 %v1869_v36, 0.0 }
 0x21f   : > { %v2114_v40 = vmax.f32 %v1880_v38, 0.0  ;;  %v1048_v58 = vmul.f32 %v3819_v31, %v937_v18 }
 0x220   : > { %v2112_v50 = vmax.f32 %v1872_v5, 0.0 }
 0x221   : > { %v2174_v62 = vpack.c.bf16 %v2114_v40, %v2113_v4  ;;  %v1112_v52 = vadd.f32 %v1048_v58, %v724_v39  ;;  %v1113_v40 = vadd.f32 %v1049_v43, %v725_v12  ;;  %v727_v12 = vmul.f32 %v3817_v33, %v4190_v41 }
 0x222   : > { %v2173_v37 = vpack.c.bf16 %v2112_v50, %v2111_v29  ;;  %v3092_v15 = vpop.f32.mrb[8].mxu0 }
 0x223   : > { %v1500_v35 = vadd.f32 %v1436_v2, %v1112_v52  ;;  %v1893_v32 = vadd.f32 %v3092_v15, %v4266_v51  ;;  %v1884_v49 = vpop.f32.mrb[9].mxu0  ;;  %v609_v23 = vpop.permute.xlu1 %608 }
 0x224   : > { %v1885_v25 = vadd.f32 %v4266_v51, %v1884_v49  ;;  %v3093_v24 = vpop.f32.mrb[10].mxu0  ;;  %3158 = vmatprep.mubr.msk.bf16.mxu1 %vm1721_vm0, %v2173_v37  ;;  %v726_v52 = vmul.f32 %v3817_v33, %v609_v23 }
 0x225   : > { %v1896_v48 = vadd.f32 %v3093_v24, %v4266_v51  ;;  %v1887_v0 = vpop.f32.mrb[11].mxu0  ;;  %3159 = vmatmul.mubr.msk.bf16.gmra.mrb[4].mxu1 %vm1721_vm0, %v2174_v62  ;;  %v2117_v27 = vmax.f32 %v1893_v32, 0.0  ;;  %v1571_v3 = vadd.f32 %v4259_v44, %v1500_v35 }
 0x226   : > { %v1888_v20 = vadd.f32 %v4266_v51, %v1887_v0  ;;  %v2115_v8 = vmax.f32 %v1885_v25, 0.0 }
 0x227   : > { %v2118_v56 = vmax.f32 %v1896_v48, 0.0  ;;  %v1635_v50 = vmax.f32 %v1571_v3, 0.0 }
 0x228   : > { %v2116_v11 = vmax.f32 %v1888_v20, 0.0  ;;  %v945_v14 = vpop.permute.xlu1 %944 }
 0x229   : > { %v2176_v45 = vpack.c.bf16 %v2118_v56, %v2117_v27  ;;  %v1050_v57 = vmul.f32 %v3819_v31, %v945_v14 }
 0x22a   : > { %v2175_v26 = vpack.c.bf16 %v2116_v11, %v2115_v8  ;;  %v3096_v34 = vpop.f32.mrb[12].mxu0 }
 0x22b   : > { %v1909_v30 = vadd.f32 %v3096_v34, %v4266_v51  ;;  %v1900_v47 = vpop.f32.mrb[13].mxu0  ;;  %v1114_v24 = vadd.f32 %v1050_v57, %v726_v52 }
 0x22c   : > { %v1901_v13 = vadd.f32 %v4266_v51, %v1900_v47  ;;  %v3097_v59 = vpop.f32.mrb[14].mxu0  ;;  %3162 = vmatprep.mubr.msk.bf16.mxu1 %vm1721_vm0, %v2175_v26 }
 0x22d   : > { %v1912_v10 = vadd.f32 %v3097_v59, %v4266_v51  ;;  %v1903_v53 = vpop.f32.mrb[15].mxu0  ;;  %3163 = vmatmul.mubr.msk.bf16.gmra.mrb[8].mxu1 %vm1721_vm0, %v2176_v45  ;;  %v1321_v17 = vpop.permute.xlu1 %1320  ;;  %v2121_v63 = vmax.f32 %v1909_v30, 0.0 }
 0x22e   : > { %v1904_v21 = vadd.f32 %v4266_v51, %v1903_v53  ;;  %v1435_v16 = vmul.f32 %v3821_v7, %v1321_v17  ;;  %v2119_v54 = vmax.f32 %v1901_v13, 0.0 }
 0x22f   : > { %v2122_v55 = vmax.f32 %v1912_v10, 0.0 }
 0x230   : > { %v2120_v36 = vmax.f32 %v1904_v21, 0.0  ;;  %v1499_v60 = vadd.f32 %v1435_v16, %v1111_v42 }
 0x231   : > { %v2178_v38 = vpack.c.bf16 %v2122_v55, %v2121_v63  ;;  %v1329_v61 = vpop.permute.xlu1 %1328 }
 0x232   : > { %v2177_v5 = vpack.c.bf16 %v2120_v36, %v2119_v54  ;;  %v1570_v18 = vadd.f32 %v4259_v44, %v1499_v60  ;;  %v1437_v39 = vmul.f32 %v3821_v7, %v1329_v61  ;;  %v3100_v4 = vpop.f32.mrb[16].mxu0  ;;  %v4618_v54 = vld [vmem:[#allocation37_spill] sm:$0xff] }
 0x233   : > { %v1925_v58 = vadd.f32 %v3100_v4, %v4266_v51  ;;  %v1916_v29 = vpop.f32.mrb[17].mxu0  ;;  %v1439_v36 = vmul.f32 %v3821_v7, %v4618_v54 }
 0x234   : > { %v1634_v6 = vmax.f32 %v1570_v18, 0.0  ;;  %v1917_v2 = vadd.f32 %v4266_v51, %v1916_v29  ;;  %v3101_v62 = vpop.f32.mrb[18].mxu0  ;;  %3166 = vmatprep.mubr.msk.bf16.mxu1 %vm1721_vm0, %v2177_v5  ;;  %v1501_v37 = vadd.f32 %v1437_v39, %v1113_v40 }
 0x235   : > { %v1928_v15 = vadd.f32 %v3101_v62, %v4266_v51  ;;  %v1919_v35 = vpop.f32.mrb[19].mxu0  ;;  %3167 = vmatmul.mubr.msk.bf16.gmra.mrb[12].mxu1 %vm1721_vm0, %v2178_v38  ;;  %v1333_v32 = vpop.permute.xlu1 %1332  ;;  %v2125_v48 = vmax.f32 %v1925_v58, 0.0 }
 0x236   : > { %v1674_v49 = vpack.c.bf16 %v1635_v50, %v1634_v6  ;;  %v1920_v25 = vadd.f32 %v4266_v51, %v1919_v35  ;;  %v1438_v20 = vmul.f32 %v3821_v7, %v1333_v32  ;;  %v2123_v27 = vmax.f32 %v1917_v2, 0.0  ;;  %v953_v35 = vpop.permute.xlu0 %952 }
 0x237   : > { %v2126_v0 = vmax.f32 %v1928_v15, 0.0  ;;  %v1572_v23 = vadd.f32 %v4259_v44, %v1501_v37 }
 0x238   : > { %v2124_v56 = vmax.f32 %v1920_v25, 0.0  ;;  %3130 = vmatprep.mubr.msk.bf16.mxu0 %vm1721_vm0, %v1674_v49  ;;  %v1502_v11 = vadd.f32 %v1438_v20, %v1114_v24  ;;  %v1052_v25 = vmul.f32 %v3819_v31, %v953_v35  ;;  %v4619_v20 = vld [vmem:[#allocation40_spill] sm:$0xff] }
 0x239   : > { %v2180_v8 = vpack.c.bf16 %v2126_v0, %v2125_v48  ;;  %v1636_v13 = vmax.f32 %v1572_v23, 0.0 }
 0x23a   : > { %v2179_v14 = vpack.c.bf16 %v2124_v56, %v2123_v27  ;;  %v3104_v45 = vpop.f32.mrb[20].mxu0  ;;  %v619_v28 = vpop.permute.xlu1 %618  ;;  %v1573_v26 = vadd.f32 %v4259_v44, %v1502_v11  ;;  %v1442_v27 = vmul.f32 %v3821_v7, %v4619_v20 }
 0x23b   : > { %v1941_v34 = vadd.f32 %v3104_v45, %v4266_v51  ;;  %v1932_v30 = vpop.f32.mrb[21].mxu0  ;;  %v728_v24 = vmul.f32 %v3817_v33, %v619_v28  ;;  %v957_v56 = vpop.permute.xlu0 %956 }
 0x23c   : > { %v1933_v47 = vadd.f32 %v4266_v51, %v1932_v30  ;;  %v3105_v46 = vpop.f32.mrb[22].mxu0  ;;  %3170 = vmatprep.mubr.msk.bf16.mxu1 %vm1721_vm0, %v2179_v14  ;;  %v1637_v59 = vmax.f32 %v1573_v26, 0.0 }
 0x23d   : > { %v1944_v10 = vadd.f32 %v3105_v46, %v4266_v51  ;;  %v1935_v53 = vpop.f32.mrb[23].mxu0  ;;  %3171 = vmatmul.mubr.msk.bf16.gmra.mrb[16].mxu1 %vm1721_vm0, %v2180_v8  ;;  %v2129_v42 = vmax.f32 %v1941_v34, 0.0  ;;  %v1053_v8 = vmul.f32 %v3819_v31, %v957_v56  ;;  %v1116_v11 = vadd.f32 %v1052_v25, %v728_v24 }
 0x23e   : > { %v1936_v17 = vadd.f32 %v4266_v51, %v1935_v53  ;;  %v1675_v1 = vpack.c.bf16 %v1637_v59, %v1636_v13  ;;  %v2127_v43 = vmax.f32 %v1933_v47, 0.0  ;;  %v733_v25 = vmul.f32 %v3817_v33, %v4202_v19 }
 0x23f   : > { %v2130_v21 = vmax.f32 %v1944_v10, 0.0  ;;  %v949_v16 = vpop.permute.xlu1 %948  ;;  %v973_v35 = vpop.permute.xlu0 %972 }
 0x240   : > { %v2128_v63 = vmax.f32 %v1936_v17, 0.0  ;;  %v1051_v55 = vmul.f32 %v3819_v31, %v949_v16  ;;  %3131 = vmatmul.mubr.msk.bf16.gmra.mrb[48].mxu0 %vm1721_vm0, %v1675_v1  ;;  %v1057_v24 = vmul.f32 %v3819_v31, %v973_v35 }
 0x241   : > { %v2182_v3 = vpack.c.bf16 %v2130_v21, %v2129_v42 }
 0x242   : > { %v2181_v60 = vpack.c.bf16 %v2128_v63, %v2127_v43  ;;  %v1115_v38 = vadd.f32 %v1051_v55, %v727_v12  ;;  %v3108_v61 = vpop.f32.mrb[24].mxu0 }
 0x243   : > { %v1957_v5 = vadd.f32 %v3108_v61, %v4266_v51  ;;  %v1948_v18 = vpop.f32.mrb[25].mxu0  ;;  %v732_v61 = vmul.f32 %v3817_v33, %v4196_v22 }
 0x244   : > { %v1503_v39 = vadd.f32 %v1439_v36, %v1115_v38  ;;  %v1949_v4 = vadd.f32 %v4266_v51, %v1948_v18  ;;  %v3109_v41 = vpop.f32.mrb[26].mxu0  ;;  %3174 = vmatprep.mubr.msk.bf16.mxu1 %vm1721_vm0, %v2181_v60  ;;  %v624_v40 = vpop.permute.xlu1 %623 }
 0x245   : > { %v1960_v57 = vadd.f32 %v3109_v41, %v4266_v51  ;;  %v1951_v58 = vpop.f32.mrb[27].mxu0  ;;  %3175 = vmatmul.mubr.msk.bf16.gmra.mrb[20].mxu1 %vm1721_vm0, %v2182_v3  ;;  %v2133_v50 = vmax.f32 %v1957_v5, 0.0  ;;  %v729_v14 = vmul.f32 %v3817_v33, %v624_v40  ;;  %v4620_v41 = vld [vmem:[#allocation41_spill] sm:$0xff] }
 0x246   : > { %v1952_v29 = vadd.f32 %v4266_v51, %v1951_v58  ;;  %v2131_v2 = vmax.f32 %v1949_v4, 0.0  ;;  %v1574_v26 = vadd.f32 %v4259_v44, %v1503_v39  ;;  %v1444_v40 = vmul.f32 %v3821_v7, %v4620_v41 }
 0x247   : > { %v2134_v6 = vmax.f32 %v1960_v57, 0.0  ;;  %v1117_v47 = vadd.f32 %v1053_v8, %v729_v14 }
 0x248   : > { %v2132_v62 = vmax.f32 %v1952_v29, 0.0  ;;  %v629_v52 = vpop.permute.xlu1 %628  ;;  %v1638_v59 = vmax.f32 %v1574_v26, 0.0 }
 0x249   : > { %v2184_v37 = vpack.c.bf16 %v2134_v6, %v2133_v50  ;;  %v730_v48 = vmul.f32 %v3817_v33, %v629_v52 }
 0x24a   : > { %v2183_v15 = vpack.c.bf16 %v2132_v62, %v2131_v2 }
 0x24c   : > { %3178 = vmatprep.mubr.msk.bf16.mxu1 %vm1721_vm0, %v2183_v15 }
 0x24d   : > { %3179 = vmatmul.mubr.msk.bf16.gmra.mrb[24].mxu1 %vm1721_vm0, %v2184_v37  ;;  %v961_v32 = vpop.permute.xlu1 %960 }
 0x24e   : > { %v1054_v49 = vmul.f32 %v3819_v31, %v961_v32 }
 0x250   : > { %v1118_v0 = vadd.f32 %v1054_v49, %v730_v48 }
 0x252   : > { %v1341_v23 = vpop.permute.xlu1 %1340  ;;  %v1506_v34 = vadd.f32 %v1442_v27, %v1118_v0 }
 0x253   : > { %v1440_v45 = vmul.f32 %v3821_v7, %v1341_v23  ;;  %v1121_v23 = vadd.f32 %v1057_v24, %v733_v25 }
 0x254   : > { %v1577_v10 = vadd.f32 %v4259_v44, %v1506_v34 }
 0x255   : > { %v1504_v30 = vadd.f32 %v1440_v45, %v1116_v11 }
 0x256   : > { %v1345_v28 = vpop.permute.xlu1 %1344  ;;  %v1641_v16 = vmax.f32 %v1577_v10, 0.0 }
 0x257   : > { %v1575_v46 = vadd.f32 %v4259_v44, %v1504_v30  ;;  %v1441_v13 = vmul.f32 %v3821_v7, %v1345_v28 }
 0x259   : > { %v1639_v53 = vmax.f32 %v1575_v46, 0.0  ;;  %v1505_v17 = vadd.f32 %v1441_v13, %v1117_v47 }
 0x25b   : > { %v1676_v1 = vpack.c.bf16 %v1639_v53, %v1638_v59  ;;  %v1576_v42 = vadd.f32 %v4259_v44, %v1505_v17  ;;  %v634_v21 = vpop.permute.xlu1 %633 }
 0x25c   : > { %v731_v32 = vmul.f32 %v3817_v33, %v634_v21 }
 0x25d   : > { %v1640_v12 = vmax.f32 %v1576_v42, 0.0  ;;  %3134 = vmatprep.mubr.msk.bf16.mxu0 %vm1721_vm0, %v1676_v1 }
 0x25f   : > { %v1677_v43 = vpack.c.bf16 %v1641_v16, %v1640_v12  ;;  %v985_v16 = vpop.permute.xlu0 %984 }
 0x260   : > { %v965_v63 = vpop.permute.xlu1 %964  ;;  %v1060_v35 = vmul.f32 %v3819_v31, %v985_v16 }
 0x261   : > { %3135 = vmatmul.mubr.msk.bf16.gmra.mrb[52].mxu0 %vm1721_vm0, %v1677_v43  ;;  %v1055_v15 = vmul.f32 %v3819_v31, %v965_v63 }
 0x262   : > { %v3112_v55 = vpop.f32.mrb[28].mxu0 }
 0x263   : > { %v1973_v3 = vadd.f32 %v3112_v55, %v4266_v51  ;;  %v1964_v54 = vpop.f32.mrb[29].mxu0  ;;  %v1119_v48 = vadd.f32 %v1055_v15, %v731_v32 }
 0x264   : > { %v1965_v36 = vadd.f32 %v4266_v51, %v1964_v54  ;;  %v3113_v60 = vpop.f32.mrb[30].mxu0  ;;  %v969_v38 = vpop.permute.xlu1 %968 }
 0x265   : > { %v1976_v5 = vadd.f32 %v3113_v60, %v4266_v51  ;;  %v1056_v18 = vmul.f32 %v3819_v31, %v969_v38  ;;  %v1967_v39 = vpop.f32.mrb[31].mxu0  ;;  %v2137_v57 = vmax.f32 %v1973_v3, 0.0 }
 0x266   : > { %v1968_v4 = vadd.f32 %v4266_v51, %v1967_v39  ;;  %v2135_v50 = vmax.f32 %v1965_v36, 0.0 }
 0x267   : > { %v2138_v58 = vmax.f32 %v1976_v5, 0.0  ;;  %v1120_v29 = vadd.f32 %v1056_v18, %v732_v61  ;;  %v989_v61 = vpop.permute.xlu0 %988 }
 0x268   : > { %v2136_v6 = vmax.f32 %v1968_v4, 0.0 }
 0x269   : > { %v2186_v2 = vpack.c.bf16 %v2138_v58, %v2137_v57  ;;  %v1508_v62 = vadd.f32 %v1444_v40, %v1120_v29  ;;  %v649_v52 = vpop.permute.xlu1 %648 }
 0x26a   : > { %v2185_v37 = vpack.c.bf16 %v2136_v6, %v2135_v50  ;;  %v734_v26 = vmul.f32 %v3817_v33, %v649_v52  ;;  %v735_v50 = vmul.f32 %v3817_v33, %v4206_v9 }
 0x26b   : > { %v1579_v20 = vadd.f32 %v4259_v44, %v1508_v62  ;;  %v1369_v29 = vpop.permute.xlu0 %1368 }
 0x26c   : > { %3182 = vmatprep.mubr.msk.bf16.mxu1 %vm1721_vm0, %v2185_v37 }
 0x26d   : > { %3183 = vmatmul.mubr.msk.bf16.gmra.mrb[28].mxu1 %vm1721_vm0, %v2186_v2  ;;  %v1643_v45 = vmax.f32 %v1579_v20, 0.0  ;;  %v1447_v2 = vmul.f32 %v3821_v7, %v1369_v29  ;;  %v1061_v20 = vmul.f32 %v3819_v31, %v989_v61 }
 0x26e   : > { %v977_v22 = vpop.permute.xlu1 %976 }
 0x26f   : > { %v1058_v8 = vmul.f32 %v3819_v31, %v977_v22  ;;  %v1381_v37 = vpop.permute.xlu0 %1380 }
 0x270   : > { %v1450_v9 = vmul.f32 %v3821_v7, %v1381_v37 }
 0x271   : > { %v1122_v28 = vadd.f32 %v1058_v8, %v734_v26 }
 0x273   : > { %v1353_v49 = vpop.permute.xlu1 %1352 }
 0x274   : > { %v1443_v0 = vmul.f32 %v3821_v7, %v1353_v49 }
 0x276   : > { %v1507_v27 = vadd.f32 %v1443_v0, %v1119_v48 }
 0x277   : > { %v1361_v56 = vpop.permute.xlu1 %1360 }
 0x278   : > { %v1578_v11 = vadd.f32 %v4259_v44, %v1507_v27  ;;  %v1445_v14 = vmul.f32 %v3821_v7, %v1361_v56 }
 0x27a   : > { %v1642_v19 = vmax.f32 %v1578_v11, 0.0  ;;  %v1509_v34 = vadd.f32 %v1445_v14, %v1121_v23 }
 0x27b   : > { %v1365_v30 = vpop.permute.xlu1 %1364 }
 0x27c   : > { %v1678_v47 = vpack.c.bf16 %v1643_v45, %v1642_v19  ;;  %v1446_v46 = vmul.f32 %v3821_v7, %v1365_v30  ;;  %v1580_v13 = vadd.f32 %v4259_v44, %v1509_v34 }
 0x27e   : > { %v1510_v59 = vadd.f32 %v1446_v46, %v1122_v28  ;;  %3138 = vmatprep.mubr.msk.bf16.mxu0 %vm1721_vm0, %v1678_v47  ;;  %v1644_v17 = vmax.f32 %v1580_v13, 0.0 }
 0x280   : > { %v1581_v10 = vadd.f32 %v4259_v44, %v1510_v59  ;;  %v659_v53 = vpop.permute.xlu1 %658 }
 0x281   : > { %v736_v22 = vmul.f32 %v3817_v33, %v659_v53 }
 0x282   : > { %v1645_v1 = vmax.f32 %v1581_v10, 0.0 }
 0x283   : > { %v1124_v24 = vadd.f32 %v1060_v35, %v736_v22 }
 0x284   : > { %v1679_v42 = vpack.c.bf16 %v1645_v1, %v1644_v17 }
 0x285   : > { %v981_v21 = vpop.permute.xlu1 %980 }
 0x286   : > { %3139 = vmatmul.mubr.msk.bf16.gmra.mrb[56].mxu0 %vm1721_vm0, %v1679_v42  ;;  %v1059_v57 = vmul.f32 %v3819_v31, %v981_v21 }
 0x287   : > { %v3116_v12 = vpop.f32.mrb[32].mxu0 }
 0x288   : > { %v1989_v43 = vadd.f32 %v3116_v12, %v4266_v51  ;;  %v1980_v63 = vpop.f32.mrb[33].mxu0  ;;  %v1123_v6 = vadd.f32 %v1059_v57, %v735_v50 }
 0x289   : > { %v1981_v55 = vadd.f32 %v4266_v51, %v1980_v63  ;;  %v3117_v3 = vpop.f32.mrb[34].mxu0 }
 0x28a   : > { %v1992_v54 = vadd.f32 %v3117_v3, %v4266_v51  ;;  %v1983_v36 = vpop.f32.mrb[35].mxu0  ;;  %v664_v60 = vpop.permute.xlu1 %663  ;;  %v2141_v5 = vmax.f32 %v1989_v43, 0.0  ;;  %v1511_v32 = vadd.f32 %v1447_v2, %v1123_v6 }
 0x28b   : > { %v1984_v38 = vadd.f32 %v4266_v51, %v1983_v36  ;;  %v2139_v39 = vmax.f32 %v1981_v55, 0.0  ;;  %v737_v48 = vmul.f32 %v3817_v33, %v664_v60 }
 0x28c   : > { %v2142_v18 = vmax.f32 %v1992_v54, 0.0  ;;  %v1582_v27 = vadd.f32 %v4259_v44, %v1511_v32 }
 0x28d   : > { %v2140_v4 = vmax.f32 %v1984_v38, 0.0  ;;  %v1125_v11 = vadd.f32 %v1061_v20, %v737_v48 }
 0x28e   : > { %v2188_v41 = vpack.c.bf16 %v2142_v18, %v2141_v5  ;;  %v669_v40 = vpop.permute.xlu1 %668  ;;  %v1646_v26 = vmax.f32 %v1582_v27, 0.0 }
 0x28f   : > { %v2187_v58 = vpack.c.bf16 %v2140_v4, %v2139_v39  ;;  %v738_v15 = vmul.f32 %v3817_v33, %v669_v40 }
 0x291   : > { %3186 = vmatprep.mubr.msk.bf16.mxu1 %vm1721_vm0, %v2187_v58 }
 0x292   : > { %3187 = vmatmul.mubr.msk.bf16.gmra.mrb[32].mxu1 %vm1721_vm0, %v2188_v41 }
 0x293   : > { %v993_v62 = vpop.permute.xlu1 %992 }
 0x294   : > { %v1062_v52 = vmul.f32 %v3819_v31, %v993_v62 }
 0x296   : > { %v1126_v49 = vadd.f32 %v1062_v52, %v738_v15 }
 0x298   : > { %v1373_v25 = vpop.permute.xlu1 %1372  ;;  %v1514_v56 = vadd.f32 %v1450_v9, %v1126_v49 }
 0x299   : > { %v1448_v0 = vmul.f32 %v3821_v7, %v1373_v25 }
 0x29a   : > { %v1585_v19 = vadd.f32 %v4259_v44, %v1514_v56 }
 0x29b   : > { %v1512_v23 = vadd.f32 %v1448_v0, %v1124_v24 }
 0x29c   : > { %v1377_v8 = vpop.permute.xlu1 %1376  ;;  %v1649_v47 = vmax.f32 %v1585_v19, 0.0 }
 0x29d   : > { %v1583_v14 = vadd.f32 %v4259_v44, %v1512_v23  ;;  %v1449_v45 = vmul.f32 %v3821_v7, %v1377_v8 }
 0x29f   : > { %v1647_v34 = vmax.f32 %v1583_v14, 0.0  ;;  %v1513_v30 = vadd.f32 %v1449_v45, %v1125_v11 }
 0x2a1   : > { %v1680_v33 = vpack.c.bf16 %v1647_v34, %v1646_v26  ;;  %v1584_v28 = vadd.f32 %v4259_v44, %v1513_v30 }
 0x2a3   : > { %v1648_v31 = vmax.f32 %v1584_v28, 0.0  ;;  %3142 = vmatprep.mubr.msk.bf16.mxu0 %vm1721_vm0, %v1680_v33 }
 0x2a5   : > { %v1681_v46 = vpack.c.bf16 %v1649_v47, %v1648_v31 }
 0x2a7   : > { %3143 = vmatmul.mubr.msk.bf16.gmra.mrb[60].mxu0 %vm1721_vm0, %v1681_v46 }
 0x2a8   : > { %v3120_v13 = vpop.f32.mrb[36].mxu0 }
 0x2a9   : > { %v2005_v59 = vadd.f32 %v3120_v13, %v4266_v51  ;;  %v1996_v10 = vpop.f32.mrb[37].mxu0 }
 0x2aa   : > { %v1997_v7 = vadd.f32 %v4266_v51, %v1996_v10  ;;  %v3121_v53 = vpop.f32.mrb[38].mxu0 }
 0x2ab   : > { %v2008_v17 = vadd.f32 %v3121_v53, %v4266_v51  ;;  %v1999_v1 = vpop.f32.mrb[39].mxu0  ;;  %v2145_v44 = vmax.f32 %v2005_v59, 0.0 }
 0x2ac   : > { %v2000_v42 = vadd.f32 %v4266_v51, %v1999_v1  ;;  %v2143_v16 = vmax.f32 %v1997_v7, 0.0 }
 0x2ad   : > { %v2146_v21 = vmax.f32 %v2008_v17, 0.0 }
 0x2ae   : > { %v2144_v12 = vmax.f32 %v2000_v42, 0.0 }
 0x2af   : > { %v2190_v43 = vpack.c.bf16 %v2146_v21, %v2145_v44 }
 0x2b0   : > { %v2189_v63 = vpack.c.bf16 %v2144_v12, %v2143_v16 }
 0x2b2   : > { %3190 = vmatprep.mubr.msk.bf16.mxu1 %vm1721_vm0, %v2189_v63 }
 0x2b3   : > { %3191 = vmatmul.mubr.msk.bf16.gmra.mrb[36].mxu1 %vm1721_vm0, %v2190_v43 }
 0x2cd   : > { %v3124_v55 = vpop.f32.mrb[40].mxu0 }
 0x2ce   : > { %v2021_v3 = vadd.f32 %v3124_v55, %v4266_v51  ;;  %v2012_v54 = vpop.f32.mrb[41].mxu0 }
 0x2cf   : > { %v2013_v36 = vadd.f32 %v4266_v51, %v2012_v54  ;;  %v3125_v60 = vpop.f32.mrb[42].mxu0 }
 0x2d0   : > { %v2024_v38 = vadd.f32 %v3125_v60, %v4266_v51  ;;  %v2015_v61 = vpop.f32.mrb[43].mxu0  ;;  %v2149_v18 = vmax.f32 %v2021_v3, 0.0  ;;  %v4436_v3 = vld [vmem:[%s4515_s6] ss:$0 sm:$0xff] }
 0x2d1   : > { %v2016_v5 = vadd.f32 %v4266_v51, %v2015_v61  ;;  %v2147_v4 = vmax.f32 %v2013_v36, 0.0 }
 0x2d2   : > { %v2150_v39 = vmax.f32 %v2024_v38, 0.0 }
 0x2d3   : > { %v2148_v41 = vmax.f32 %v2016_v5, 0.0 }
 0x2d4   : > { %v2192_v40 = vpack.c.bf16 %v2150_v39, %v2149_v18 }
 0x2d5   : > { %v2191_v57 = vpack.c.bf16 %v2148_v41, %v2147_v4 }
 0x2d7   : > { %3194 = vmatprep.mubr.msk.bf16.mxu1 %vm1721_vm0, %v2191_v57 }
 0x2d8   : > { %3195 = vmatmul.mubr.msk.bf16.gmra.mrb[40].mxu1 %vm1721_vm0, %v2192_v40 }
 0x2ee   : > { %v3128_v58 = vpop.f32.mrb[44].mxu0 }
 0x2ef   : > { %v2037_v29 = vadd.f32 %v3128_v58, %v4266_v51  ;;  %v2028_v50 = vpop.f32.mrb[45].mxu0 }
 0x2f0   : > { %v2029_v6 = vadd.f32 %v4266_v51, %v2028_v50  ;;  %v3129_v2 = vpop.f32.mrb[46].mxu0  ;;  %v3156_v62 = vpop.f32.mrb[0].mxu1 }
 0x2f1   : > { %v2040_v52 = vadd.f32 %v3129_v2, %v4266_v51  ;;  %v2031_v37 = vpop.f32.mrb[47].mxu0  ;;  %v2365_v22 = vpop.f32.mrb[1].mxu1  ;;  %v2153_v32 = vmax.f32 %v2037_v29, 0.0 }
 0x2f2   : > { %v2032_v15 = vadd.f32 %v4266_v51, %v2031_v37  ;;  %v3157_v35 = vpop.f32.mrb[2].mxu1  ;;  %v2151_v25 = vmax.f32 %v2029_v6, 0.0 }
 0x2f3   : > { %v2154_v49 = vmax.f32 %v2040_v52, 0.0  ;;  %v2368_v9 = vpop.f32.mrb[3].mxu1 }
 0x2f4   : > { %v2152_v24 = vmax.f32 %v2032_v15, 0.0  ;;  %v2620_v48 = vmax.f32 %v2365_v22, %v2368_v9 }
 0x2f5   : > { %v2194_v0 = vpack.c.bf16 %v2154_v49, %v2153_v32 }
 0x2f6   : > { %v2193_v20 = vpack.c.bf16 %v2152_v24, %v2151_v25  ;;  %v2621_v27 = vmax.f32 %v2620_v48, %v3156_v62 }
 0x2f8   : > { %v2622_v56 = vmax.f32 %v2621_v27, %v3157_v35  ;;  %v3160_v23 = vpop.f32.mrb[4].mxu1  ;;  %3198 = vmatprep.mubr.msk.bf16.mxu1 %vm1721_vm0, %v2193_v20 }
 0x2f9   : > { %v2381_v8 = vpop.f32.mrb[5].mxu1  ;;  %3199 = vmatmul.mubr.msk.bf16.gmra.mrb[44].mxu1 %vm1721_vm0, %v2194_v0 }
 0x2fa   : > { %v2623_v11 = vrot.slane %v2622_v56, 4  ;;  %v3161_v14 = vpop.f32.mrb[6].mxu1 }
 0x2fb   : > { %v2384_v45 = vpop.f32.mrb[7].mxu1 }
 0x2fc   : > { %v2624_v26 = vmax.f32 %v2622_v56, %v2623_v11  ;;  %v2629_v19 = vmax.f32 %v2381_v8, %v2384_v45 }
 0x2fe   : > { %v2625_v34 = vrot.slane %v2624_v26, 2  ;;  %v2630_v30 = vmax.f32 %v2629_v19, %v3160_v23 }
 0x300   : > { %v2631_v33 = vmax.f32 %v2630_v30, %v3161_v14  ;;  %v3164_v28 = vpop.f32.mrb[8].mxu1  ;;  %v2626_v31 = vmax.f32 %v2624_v26, %v2625_v34 }
 0x301   : > { %v2397_v47 = vpop.f32.mrb[9].mxu1 }
 0x302   : > { %v2632_v46 = vrot.slane %v2631_v33, 4  ;;  %v3165_v13 = vpop.f32.mrb[10].mxu1  ;;  %v2627_v53 = vrot.slane %v2626_v31, 1 }
 0x303   : > { %v2400_v59 = vpop.f32.mrb[11].mxu1 }
 0x304   : > { %v2633_v10 = vmax.f32 %v2631_v33, %v2632_v46  ;;  %v2638_v7 = vmax.f32 %v2397_v47, %v2400_v59  ;;  %v2628_v12 = vmax.f32 %v2626_v31, %v2627_v53 }
 0x306   : > { %v2634_v17 = vrot.slane %v2633_v10, 2  ;;  %v2639_v1 = vmax.f32 %v2638_v7, %v3164_v28  ;;  %v2771_v61 = vadd.f32 %v4436_v3, %v2628_v12 }
 0x308   : > { %v2635_v42 = vmax.f32 %v2633_v10, %v2634_v17  ;;  %v2640_v44 = vmax.f32 %v2639_v1, %v3165_v13  ;;  %v3168_v21 = vpop.f32.mrb[12].mxu1  ;;  %v2787_v29 = vmax.f32 %v2771_v61, 0.0 }
 0x309   : > { %v2413_v16 = vpop.f32.mrb[13].mxu1 }
 0x30a   : > { %v2636_v43 = vrot.slane %v2635_v42, 1  ;;  %v2641_v63 = vrot.slane %v2640_v44, 4  ;;  %v3169_v55 = vpop.f32.mrb[14].mxu1 }
 0x30b   : > { %v2416_v54 = vpop.f32.mrb[15].mxu1 }
 0x30c   : > { %v2637_v36 = vmax.f32 %v2635_v42, %v2636_v43  ;;  %v2642_v60 = vmax.f32 %v2640_v44, %v2641_v63  ;;  %v2647_v38 = vmax.f32 %v2413_v16, %v2416_v54 }
 0x30e   : > { %v2772_v5 = vadd.f32 %v4436_v3, %v2637_v36  ;;  %v2643_v18 = vrot.slane %v2642_v60, 2  ;;  %v2648_v39 = vmax.f32 %v2647_v38, %v3168_v21 }
 0x310   : > { %v2788_v4 = vmax.f32 %v2772_v5, 0.0  ;;  %v2644_v41 = vmax.f32 %v2642_v60, %v2643_v18  ;;  %v2649_v40 = vmax.f32 %v2648_v39, %v3169_v55  ;;  %v3172_v57 = vpop.f32.mrb[16].mxu1 }
 0x311   : > { %v2429_v58 = vpop.f32.mrb[17].mxu1 }
 0x312   : > { %v2819_v50 = vrot.slane %v2788_v4, 7  ;;  %v2645_v6 = vrot.slane %v2644_v41, 1  ;;  %v2650_v2 = vrot.slane %v2649_v40, 4  ;;  %v3173_v62 = vpop.f32.mrb[18].mxu1 }
 0x313   : > { %v2432_v52 = vpop.f32.mrb[19].mxu1  ;;  %v3132_v35 = vpop.f32.mrb[48].mxu0 }
 0x314   : > { %v2821_v37 = vsel %vm2820_vm1, %v2819_v50, %v2787_v29  ;;  %v2646_v22 = vmax.f32 %v2644_v41, %v2645_v6  ;;  %v2651_v15 = vmax.f32 %v2649_v40, %v2650_v2  ;;  %v2656_v32 = vmax.f32 %v2429_v58, %v2432_v52  ;;  %v2044_v9 = vpop.f32.mrb[49].mxu0 }
 0x315   : > { %v2053_v49 = vadd.f32 %v3132_v35, %v4266_v51  ;;  %v3133_v0 = vpop.f32.mrb[50].mxu0  ;;  %v2045_v20 = vadd.f32 %v4266_v51, %v2044_v9 }
 0x316   : > { %v2773_v25 = vadd.f32 %v4436_v3, %v2646_v22  ;;  %v2652_v24 = vrot.slane %v2651_v15, 2  ;;  %v2657_v48 = vmax.f32 %v2656_v32, %v3172_v57  ;;  %v2056_v27 = vadd.f32 %v3133_v0, %v4266_v51  ;;  %v2047_v56 = vpop.f32.mrb[51].mxu0  ;;  %v4458_v0 = vld [vmem:[%s4513_s4] ss:$0 sm:$0xff] }
 0x317   : > { %v2157_v45 = vmax.f32 %v2053_v49, 0.0  ;;  %v2048_v19 = vadd.f32 %v4266_v51, %v2047_v56  ;;  %v2155_v31 = vmax.f32 %v2045_v20, 0.0 }
 0x318   : > { %v2789_v23 = vmax.f32 %v2773_v25, 0.0  ;;  %v2653_v8 = vmax.f32 %v2651_v15, %v2652_v24  ;;  %v2658_v11 = vmax.f32 %v2657_v48, %v3173_v62  ;;  %v3176_v14 = vpop.f32.mrb[20].mxu1  ;;  %v2158_v26 = vmax.f32 %v2056_v27, 0.0 }
 0x319   : > { %v2445_v34 = vpop.f32.mrb[21].mxu1  ;;  %v2156_v13 = vmax.f32 %v2048_v19, 0.0 }
 0x31a   : > { %v2822_v30 = vrot.slane %v2789_v23, 6  ;;  %v2654_v33 = vrot.slane %v2653_v8, 1  ;;  %v2659_v28 = vrot.slane %v2658_v11, 4  ;;  %v3177_v47 = vpop.f32.mrb[22].mxu1  ;;  %v2196_v46 = vpack.c.bf16 %v2158_v26, %v2157_v45 }
 0x31b   : > { %v2448_v59 = vpop.f32.mrb[23].mxu1  ;;  %v2195_v1 = vpack.c.bf16 %v2156_v13, %v2155_v31 }
 0x31c   : > { %v2824_v10 = vsel %vm2823_vm2, %v2822_v30, %v2821_v37  ;;  %v2655_v7 = vmax.f32 %v2653_v8, %v2654_v33  ;;  %v2660_v53 = vmax.f32 %v2658_v11, %v2659_v28  ;;  %v2665_v17 = vmax.f32 %v2445_v34, %v2448_v59 }
 0x31d   : > { %3202 = vmatprep.mubr.msk.bf16.mxu1 %vm1721_vm0, %v2195_v1 }
 0x31e   : > { %v2774_v42 = vadd.f32 %v4436_v3, %v2655_v7  ;;  %v2661_v44 = vrot.slane %v2660_v53, 2  ;;  %v2666_v21 = vmax.f32 %v2665_v17, %v3176_v14  ;;  %3203 = vmatmul.mubr.msk.bf16.gmra.mrb[48].mxu1 %vm1721_vm0, %v2196_v46 }
 0x320   : > { %v2790_v51 = vmax.f32 %v2774_v42, 0.0  ;;  %v2662_v16 = vmax.f32 %v2660_v53, %v2661_v44  ;;  %v2667_v12 = vmax.f32 %v2666_v21, %v3177_v47  ;;  %v3180_v43 = vpop.f32.mrb[24].mxu1 }
 0x321   : > { %v2461_v63 = vpop.f32.mrb[25].mxu1 }
 0x322   : > { %v2825_v55 = vrot.slane %v2790_v51, 5  ;;  %v2663_v54 = vrot.slane %v2662_v16, 1  ;;  %v2668_v36 = vrot.slane %v2667_v12, 4  ;;  %v3181_v60 = vpop.f32.mrb[26].mxu1 }
 0x323   : > { %v2464_v38 = vpop.f32.mrb[27].mxu1 }
 0x324   : > { %v2827_v61 = vsel %vm2826_vm3, %v2825_v55, %v2824_v10  ;;  %v2664_v5 = vmax.f32 %v2662_v16, %v2663_v54  ;;  %v2669_v18 = vmax.f32 %v2667_v12, %v2668_v36  ;;  %v2674_v39 = vmax.f32 %v2461_v63, %v2464_v38 }
 0x326   : > { %v2775_v4 = vadd.f32 %v4436_v3, %v2664_v5  ;;  %v2670_v41 = vrot.slane %v2669_v18, 2  ;;  %v2675_v40 = vmax.f32 %v2674_v39, %v3180_v43 }
 0x328   : > { %v2791_v57 = vmax.f32 %v2775_v4, 0.0  ;;  %v2671_v58 = vmax.f32 %v2669_v18, %v2670_v41  ;;  %v2676_v29 = vmax.f32 %v2675_v40, %v3181_v60 }
 0x32a   : > { %v2828_v50 = vrot.slane %v2791_v57, 4  ;;  %v2672_v6 = vrot.slane %v2671_v58, 1  ;;  %v2677_v2 = vrot.slane %v2676_v29, 4 }
 0x32c   : > { %v2830_v62 = vsel %vm2829_vm4, %v2828_v50, %v2827_v61  ;;  %v2673_v52 = vmax.f32 %v2671_v58, %v2672_v6  ;;  %v2678_v37 = vmax.f32 %v2676_v29, %v2677_v2 }
 0x32e   : > { %v2776_v22 = vadd.f32 %v4436_v3, %v2673_v52  ;;  %v2679_v15 = vrot.slane %v2678_v37, 2 }
 0x330   : > { %v2792_v35 = vmax.f32 %v2776_v22, 0.0  ;;  %v2680_v32 = vmax.f32 %v2678_v37, %v2679_v15 }
 0x332   : > { %v2831_v49 = vrot.slane %v2792_v35, 3  ;;  %v2681_v9 = vrot.slane %v2680_v32, 1 }
 0x334   : > { %v2833_v25 = vsel %vm2832_vm5, %v2831_v49, %v2830_v62  ;;  %v2682_v24 = vmax.f32 %v2680_v32, %v2681_v9  ;;  %v3136_v48 = vpop.f32.mrb[52].mxu0 }
 0x335   : > { %v2069_v20 = vadd.f32 %v4458_v0, %v3136_v48  ;;  %v2060_v27 = vpop.f32.mrb[53].mxu0 }
 0x336   : > { %v2777_v56 = vadd.f32 %v4436_v3, %v2682_v24  ;;  %v2061_v23 = vadd.f32 %v4458_v0, %v2060_v27  ;;  %v3137_v8 = vpop.f32.mrb[54].mxu0 }
 0x337   : > { %v2072_v11 = vadd.f32 %v4458_v0, %v3137_v8  ;;  %v2063_v14 = vpop.f32.mrb[55].mxu0  ;;  %v2161_v19 = vmax.f32 %v2069_v20, 0.0 }
 0x338   : > { %v2793_v45 = vmax.f32 %v2777_v56, 0.0  ;;  %v2064_v26 = vadd.f32 %v4458_v0, %v2063_v14  ;;  %v2159_v33 = vmax.f32 %v2061_v23, 0.0 }
 0x339   : > { %v2162_v34 = vmax.f32 %v2072_v11, 0.0 }
 0x33a   : > { %v2834_v30 = vrot.slane %v2793_v45, 2  ;;  %v2160_v28 = vmax.f32 %v2064_v26, 0.0 }
 0x33b   : > { %v2198_v47 = vpack.c.bf16 %v2162_v34, %v2161_v19 }
 0x33c   : > { %v2836_v31 = vsel %vm2835_vm6, %v2834_v30, %v2833_v25  ;;  %v2197_v46 = vpack.c.bf16 %v2160_v28, %v2159_v33 }
 0x33e   : > { %3206 = vmatprep.mubr.msk.bf16.mxu1 %vm1721_vm0, %v2197_v46 }
 0x33f   : > { %3207 = vmatmul.mubr.msk.bf16.gmra.mrb[52].mxu1 %vm1721_vm0, %v2198_v47 }
 0x340   : > { %v3184_v13 = vpop.f32.mrb[28].mxu1 }
 0x341   : > { %v2477_v59 = vpop.f32.mrb[29].mxu1 }
 0x342   : > { %v3185_v10 = vpop.f32.mrb[30].mxu1 }
 0x343   : > { %v2480_v7 = vpop.f32.mrb[31].mxu1 }
 0x344   : > { %v2683_v53 = vmax.f32 %v2477_v59, %v2480_v7 }
 0x346   : > { %v2684_v17 = vmax.f32 %v2683_v53, %v3184_v13 }
 0x348   : > { %v2685_v1 = vmax.f32 %v2684_v17, %v3185_v10 }
 0x34a   : > { %v2686_v42 = vrot.slane %v2685_v1, 4 }
 0x34c   : > { %v2687_v44 = vmax.f32 %v2685_v1, %v2686_v42 }
 0x34e   : > { %v2688_v21 = vrot.slane %v2687_v44, 2 }
 0x350   : > { %v2689_v51 = vmax.f32 %v2687_v44, %v2688_v21 }
 0x352   : > { %v2690_v16 = vrot.slane %v2689_v51, 1 }
 0x354   : > { %v2691_v12 = vmax.f32 %v2689_v51, %v2690_v16 }
 0x356   : > { %v2778_v43 = vadd.f32 %v4436_v3, %v2691_v12 }
 0x358   : > { %v2794_v63 = vmax.f32 %v2778_v43, 0.0 }
 0x359   : > { %v3140_v55 = vpop.f32.mrb[56].mxu0 }
 0x35a   : > { %v2837_v54 = vrot.slane %v2794_v63, 1  ;;  %v2085_v36 = vadd.f32 %v4458_v0, %v3140_v55  ;;  %v2076_v60 = vpop.f32.mrb[57].mxu0 }
 0x35b   : > { %v2077_v38 = vadd.f32 %v4458_v0, %v2076_v60  ;;  %v3141_v61 = vpop.f32.mrb[58].mxu0 }
 0x35c   : > { %v2839_v5 = vsel %vm2838_vm7, %v2837_v54, %v2836_v31  ;;  %v2088_v18 = vadd.f32 %v4458_v0, %v3141_v61  ;;  %v2079_v39 = vpop.f32.mrb[59].mxu0  ;;  %v2165_v41 = vmax.f32 %v2085_v36, 0.0 }
 0x35d   : > { %2856 = vst [vmem:[%s4474_s19] sm:$0xff] %v2839_v5  ;;  %v2080_v4 = vadd.f32 %v4458_v0, %v2079_v39  ;;  %v2163_v57 = vmax.f32 %v2077_v38, 0.0 }
 0x35e   : > { %v2166_v40 = vmax.f32 %v2088_v18, 0.0 }
 0x35f   : > { %v2164_v58 = vmax.f32 %v2080_v4, 0.0 }
 0x360   : > { %v2200_v29 = vpack.c.bf16 %v2166_v40, %v2165_v41 }
 0x361   : > { %v2199_v50 = vpack.c.bf16 %v2164_v58, %v2163_v57 }
 0x363   : > { %3210 = vmatprep.mubr.msk.bf16.mxu1 %vm1721_vm0, %v2199_v50 }
 0x364   : > { %3211 = vmatmul.mubr.msk.bf16.gmra.mrb[56].mxu1 %vm1721_vm0, %v2200_v29 }
 0x365   : > { %v3188_v6 = vpop.f32.mrb[32].mxu1 }
 0x366   : > { %v2493_v2 = vpop.f32.mrb[33].mxu1 }
 0x367   : > { %v3189_v62 = vpop.f32.mrb[34].mxu1 }
 0x368   : > { %v2496_v52 = vpop.f32.mrb[35].mxu1 }
 0x369   : > { %v2692_v37 = vmax.f32 %v2493_v2, %v2496_v52 }
 0x36b   : > { %v2693_v22 = vmax.f32 %v2692_v37, %v3188_v6 }
 0x36d   : > { %v2694_v15 = vmax.f32 %v2693_v22, %v3189_v62 }
 0x36f   : > { %v2695_v45 = vrot.slane %v2694_v15, 4 }
 0x371   : > { %v2696_v34 = vmax.f32 %v2694_v15, %v2695_v45 }
 0x373   : > { %v2697_v47 = vrot.slane %v2696_v34, 2 }
 0x375   : > { %v2698_v46 = vmax.f32 %v2696_v34, %v2697_v47 }
 0x377   : > { %v2699_v10 = vrot.slane %v2698_v46, 1 }
 0x379   : > { %v2700_v17 = vmax.f32 %v2698_v46, %v2699_v10 }
 0x37a   : > { %v3144_v35 = vpop.f32.mrb[60].mxu0 }
 0x37b   : > { %v2101_v32 = vadd.f32 %v4458_v0, %v3144_v35  ;;  %v2092_v49 = vpop.f32.mrb[61].mxu0  ;;  %v2779_v44 = vadd.f32 %v4436_v3, %v2700_v17 }
 0x37c   : > { %v2093_v9 = vadd.f32 %v4458_v0, %v2092_v49  ;;  %v3145_v25 = vpop.f32.mrb[62].mxu0 }
 0x37d   : > { %v2104_v24 = vadd.f32 %v4458_v0, %v3145_v25  ;;  %v2095_v48 = vpop.f32.mrb[63].mxu0  ;;  %v2169_v27 = vmax.f32 %v2101_v32, 0.0  ;;  %v2795_v16 = vmax.f32 %v2779_v44, 0.0 }
 0x37e   : > { %v2096_v20 = vadd.f32 %v4458_v0, %v2095_v48  ;;  %v2167_v23 = vmax.f32 %v2093_v9, 0.0 }
 0x37f   : > { %v2170_v56 = vmax.f32 %v2104_v24, 0.0 }
 0x380   : > { %v2168_v8 = vmax.f32 %v2096_v20, 0.0 }
 0x381   : > { %v2202_v11 = vpack.c.bf16 %v2170_v56, %v2169_v27 }
 0x382   : > { %v2201_v14 = vpack.c.bf16 %v2168_v8, %v2167_v23 }
 0x384   : > { %3214 = vmatprep.mubr.msk.bf16.mxu1 %vm1721_vm0, %v2201_v14 }
 0x385   : > { %3215 = vmatmul.mubr.msk.bf16.gmra.mrb[60].mxu1 %vm1721_vm0, %v2202_v11 }
 0x386   : > { %v3192_v26 = vpop.f32.mrb[36].mxu1 }
 0x387   : > { %v2509_v19 = vpop.f32.mrb[37].mxu1 }
 0x388   : > { %v3193_v30 = vpop.f32.mrb[38].mxu1 }
 0x389   : > { %v2512_v33 = vpop.f32.mrb[39].mxu1 }
 0x38a   : > { %v2701_v28 = vmax.f32 %v2509_v19, %v2512_v33 }
 0x38c   : > { %v2702_v31 = vmax.f32 %v2701_v28, %v3192_v26 }
 0x38e   : > { %v2703_v0 = vmax.f32 %v2702_v31, %v3193_v30 }
 0x390   : > { %v2704_v13 = vrot.slane %v2703_v0, 4 }
 0x392   : > { %v2705_v59 = vmax.f32 %v2703_v0, %v2704_v13 }
 0x394   : > { %v2706_v7 = vrot.slane %v2705_v59, 2 }
 0x396   : > { %v2707_v53 = vmax.f32 %v2705_v59, %v2706_v7 }
 0x398   : > { %v2708_v1 = vrot.slane %v2707_v53, 1 }
 0x39a   : > { %v2709_v42 = vmax.f32 %v2707_v53, %v2708_v1 }
 0x39c   : > { %v2780_v21 = vadd.f32 %v4436_v3, %v2709_v42 }
 0x39e   : > { %v2796_v51 = vmax.f32 %v2780_v21, 0.0 }
 0x3a0   : > { %v2840_v12 = vrot.slane %v2796_v51, 7 }
 0x3a2   : > { %v2841_v43 = vsel %vm2820_vm1, %v2840_v12, %v2795_v16 }
 0x3ab   : > { %v3196_v63 = vpop.f32.mrb[40].mxu1 }
 0x3ac   : > { %v2525_v55 = vpop.f32.mrb[41].mxu1 }
 0x3ad   : > { %v3197_v54 = vpop.f32.mrb[42].mxu1 }
 0x3ae   : > { %v2528_v36 = vpop.f32.mrb[43].mxu1 }
 0x3af   : > { %v2710_v60 = vmax.f32 %v2525_v55, %v2528_v36 }
 0x3b1   : > { %v2711_v38 = vmax.f32 %v2710_v60, %v3196_v63 }
 0x3b3   : > { %v2712_v61 = vmax.f32 %v2711_v38, %v3197_v54 }
 0x3b5   : > { %v2713_v5 = vrot.slane %v2712_v61, 4 }
 0x3b7   : > { %v2714_v18 = vmax.f32 %v2712_v61, %v2713_v5 }
 0x3b9   : > { %v2715_v39 = vrot.slane %v2714_v18, 2 }
 0x3bb   : > { %v2716_v4 = vmax.f32 %v2714_v18, %v2715_v39 }
 0x3bd   : > { %v2717_v41 = vrot.slane %v2716_v4, 1 }
 0x3bf   : > { %v2718_v40 = vmax.f32 %v2716_v4, %v2717_v41 }
 0x3c1   : > { %v2781_v57 = vadd.f32 %v4436_v3, %v2718_v40 }
 0x3c3   : > { %v2797_v58 = vmax.f32 %v2781_v57, 0.0 }
 0x3c5   : > { %v2842_v29 = vrot.slane %v2797_v58, 6 }
 0x3c7   : > { %v2843_v50 = vsel %vm2823_vm2, %v2842_v29, %v2841_v43 }
 0x3cc   : > { %v3200_v6 = vpop.f32.mrb[44].mxu1 }
 0x3cd   : > { %v2541_v2 = vpop.f32.mrb[45].mxu1 }
 0x3ce   : > { %v3201_v62 = vpop.f32.mrb[46].mxu1 }
 0x3cf   : > { %v2544_v52 = vpop.f32.mrb[47].mxu1 }
 0x3d0   : > { %v2719_v37 = vmax.f32 %v2541_v2, %v2544_v52 }
 0x3d2   : > { %v2720_v22 = vmax.f32 %v2719_v37, %v3200_v6 }
 0x3d4   : > { %v2721_v15 = vmax.f32 %v2720_v22, %v3201_v62 }
 0x3d6   : > { %v2722_v35 = vrot.slane %v2721_v15, 4 }
 0x3d8   : > { %v2723_v32 = vmax.f32 %v2721_v15, %v2722_v35 }
 0x3da   : > { %v2724_v49 = vrot.slane %v2723_v32, 2 }
 0x3dc   : > { %v2725_v9 = vmax.f32 %v2723_v32, %v2724_v49 }
 0x3de   : > { %v2726_v25 = vrot.slane %v2725_v9, 1 }
 0x3e0   : > { %v2727_v24 = vmax.f32 %v2725_v9, %v2726_v25 }
 0x3e2   : > { %v2782_v48 = vadd.f32 %v4436_v3, %v2727_v24 }
 0x3e4   : > { %v2798_v20 = vmax.f32 %v2782_v48, 0.0 }
 0x3e6   : > { %v2844_v27 = vrot.slane %v2798_v20, 5 }
 0x3e8   : > { %v2845_v56 = vsel %vm2826_vm3, %v2844_v27, %v2843_v50 }
 0x3f1   : > { %v3204_v23 = vpop.f32.mrb[48].mxu1 }
 0x3f2   : > { %v2557_v8 = vpop.f32.mrb[49].mxu1 }
 0x3f3   : > { %v3205_v11 = vpop.f32.mrb[50].mxu1 }
 0x3f4   : > { %v2560_v14 = vpop.f32.mrb[51].mxu1 }
 0x3f5   : > { %v2728_v45 = vmax.f32 %v2557_v8, %v2560_v14 }
 0x3f7   : > { %v2729_v26 = vmax.f32 %v2728_v45, %v3204_v23 }
 0x3f9   : > { %v2730_v19 = vmax.f32 %v2729_v26, %v3205_v11 }
 0x3fb   : > { %v2731_v34 = vrot.slane %v2730_v19, 4 }
 0x3fd   : > { %v2732_v30 = vmax.f32 %v2730_v19, %v2731_v34 }
 0x3ff   : > { %v2733_v33 = vrot.slane %v2732_v30, 2 }
 0x401   : > { %v2734_v28 = vmax.f32 %v2732_v30, %v2733_v33 }
 0x403   : > { %v2735_v47 = vrot.slane %v2734_v28, 1 }
 0x405   : > { %v2736_v31 = vmax.f32 %v2734_v28, %v2735_v47 }
 0x407   : > { %v2783_v0 = vadd.f32 %v4436_v3, %v2736_v31 }
 0x409   : > { %v2799_v46 = vmax.f32 %v2783_v0, 0.0 }
 0x40b   : > { %v2846_v13 = vrot.slane %v2799_v46, 4 }
 0x40d   : > { %v2847_v59 = vsel %vm2829_vm4, %v2846_v13, %v2845_v56 }
 0x412   : > { %v3208_v10 = vpop.f32.mrb[52].mxu1 }
 0x413   : > { %v2573_v7 = vpop.f32.mrb[53].mxu1 }
 0x414   : > { %v3209_v53 = vpop.f32.mrb[54].mxu1 }
 0x415   : > { %v2576_v17 = vpop.f32.mrb[55].mxu1 }
 0x416   : > { %v2737_v1 = vmax.f32 %v2573_v7, %v2576_v17 }
 0x418   : > { %v2738_v42 = vmax.f32 %v2737_v1, %v3208_v10 }
 0x41a   : > { %v2739_v44 = vmax.f32 %v2738_v42, %v3209_v53 }
 0x41c   : > { %v2740_v21 = vrot.slane %v2739_v44, 4 }
 0x41e   : > { %v2741_v51 = vmax.f32 %v2739_v44, %v2740_v21 }
 0x420   : > { %v2742_v16 = vrot.slane %v2741_v51, 2 }
 0x422   : > { %v2743_v12 = vmax.f32 %v2741_v51, %v2742_v16 }
 0x424   : > { %v2744_v43 = vrot.slane %v2743_v12, 1 }
 0x426   : > { %v2745_v63 = vmax.f32 %v2743_v12, %v2744_v43 }
 0x428   : > { %v2784_v55 = vadd.f32 %v4436_v3, %v2745_v63 }
 0x42a   : > { %v2800_v54 = vmax.f32 %v2784_v55, 0.0 }
 0x42c   : > { %v2848_v36 = vrot.slane %v2800_v54, 3 }
 0x42e   : > { %v2849_v60 = vsel %vm2832_vm5, %v2848_v36, %v2847_v59 }
 0x437   : > { %v3212_v38 = vpop.f32.mrb[56].mxu1 }
 0x438   : > { %v2589_v61 = vpop.f32.mrb[57].mxu1 }
 0x439   : > { %v3213_v5 = vpop.f32.mrb[58].mxu1 }
 0x43a   : > { %v2592_v18 = vpop.f32.mrb[59].mxu1 }
 0x43b   : > { %v2746_v39 = vmax.f32 %v2589_v61, %v2592_v18 }
 0x43d   : > { %v2747_v4 = vmax.f32 %v2746_v39, %v3212_v38 }
 0x43f   : > { %v2748_v41 = vmax.f32 %v2747_v4, %v3213_v5 }
 0x441   : > { %v2749_v40 = vrot.slane %v2748_v41, 4 }
 0x443   : > { %v2750_v57 = vmax.f32 %v2748_v41, %v2749_v40 }
 0x445   : > { %v2751_v58 = vrot.slane %v2750_v57, 2 }
 0x447   : > { %v2752_v29 = vmax.f32 %v2750_v57, %v2751_v58 }
 0x449   : > { %v2753_v50 = vrot.slane %v2752_v29, 1 }
 0x44b   : > { %v2754_v6 = vmax.f32 %v2752_v29, %v2753_v50 }
 0x44d   : > { %v2785_v2 = vadd.f32 %v4436_v3, %v2754_v6 }
 0x44f   : > { %v2801_v62 = vmax.f32 %v2785_v2, 0.0 }
 0x451   : > { %v2850_v52 = vrot.slane %v2801_v62, 2 }
 0x453   : > { %v2851_v37 = vsel %vm2835_vm6, %v2850_v52, %v2849_v60 }
 0x458   : > { %v3216_v22 = vpop.f32.mrb[60].mxu1 }
 0x459   : > { %v2605_v15 = vpop.f32.mrb[61].mxu1 }
 0x45a   : > { %v3217_v35 = vpop.f32.mrb[62].mxu1 }
 0x45b   : > { %v2608_v32 = vpop.f32.mrb[63].mxu1 }
 0x45c   : > { %v2755_v49 = vmax.f32 %v2605_v15, %v2608_v32 }
 0x45e   : > { %v2756_v9 = vmax.f32 %v2755_v49, %v3216_v22 }
 0x460   : > { %v2757_v25 = vmax.f32 %v2756_v9, %v3217_v35 }
 0x462   : > { %v2758_v24 = vrot.slane %v2757_v25, 4 }
 0x464   : > { %v2759_v48 = vmax.f32 %v2757_v25, %v2758_v24 }
 0x466   : > { %v2760_v20 = vrot.slane %v2759_v48, 2 }
 0x468   : > { %v2761_v27 = vmax.f32 %v2759_v48, %v2760_v20 }
 0x46a   : > { %v2762_v56 = vrot.slane %v2761_v27, 1 }
 0x46c   : > { %v2763_v23 = vmax.f32 %v2761_v27, %v2762_v56 }
 0x46e   : > { %v2786_v8 = vadd.f32 %v4436_v3, %v2763_v23 }
 0x470   : > { %v2802_v11 = vmax.f32 %v2786_v8, 0.0 }
 0x472   : > { %v2852_v14 = vrot.slane %v2802_v11, 1 }
 0x474   : > { %v2853_v45 = vsel %vm2838_vm7, %v2852_v14, %v2851_v37 }
 0x475   : > { %2857 = vst [vmem:[%s4474_s19 + $0x8] sm:$0xff] %v2853_v45 }
 0x476 PF: > { %s17_s24 = sadd.s32 1, %s3319_s24  }
 0x477   : > { %p14_p5 = scmp.ge.s32.totalorder %s17_s24, 4  }
 0x479   :  { %16 = sbr.rel (!%p14_p5) target bundleno = 1 (0x1), region = 78 }

// kernel: pointnet_plus_plus_forward.5
= control target key start
LH: loop header
LB: loop body
LE: loop exit
PB: predicated region body
PF: predicated region fallthrough
CT: control target
= control target key end

     0   :  { %14 = vsyncpa [#allocation3], 0  ;;  %s5275_s0 = inlined_call_operand.vmem [shape: f32[16,32,3], index: 0, kind: input, shape index: {}]   ;;  %s5276_s1 = inlined_call_operand.vmem [shape: bf16[16,32,256], index: 1, kind: input, shape index: {}]   ;;  %s5277_s2 = inlined_call_operand.vmem [shape: f32[3,256], index: 2, kind: input, shape index: {}]   ;;  %s5278_s3 = inlined_call_operand.vmem [shape: bf16[256,256], index: 3, kind: input, shape index: {}]   ;;  %s5279_s4 = inlined_call_operand.vmem [shape: f32[1,256], index: 4, kind: input, shape index: {}]   ;;  %s5280_s5 = inlined_call_operand.vmem [shape: bf16[256,256], index: 5, kind: input, shape index: {}]   ;;  %s5281_s6 = inlined_call_operand.vmem [shape: f32[1,256], index: 6, kind: input, shape index: {}]   ;;  %s5282_s7 = inlined_call_operand.vmem [shape: bf16[256,256], index: 7, kind: input, shape index: {}]   ;;  %s5283_s8 = inlined_call_operand.vmem [shape: f32[1,256], index: 8, kind: input, shape index: {}]   ;;  %s5284_s9 = inlined_call_operand.hbm [shape: f32[16,256], index: 9, kind: output, shape index: {}]  }
   0x1   :  { %16 = vsyncpa [#allocation3 + $0x1], 0  ;;  %s3726_s30 = smov 0   ;;  %s3728_s10 = smov 0  }
   0x2   :  { %s3730_s11 = smov 0   ;;  %s3732_s12 = smov 0  }
   0x3 LB: > { %s3747_s13 = sadd.s32 4294967295, %s3670_s12   ;;  %s3141_s14 = sadd.s32 4294967294, %s3670_s12   ;;  %s3670_s12 = sphi %s3732_s12, %s5406_s12   ;;  %s3666_s11 = sphi %s3730_s11, %s5405_s11   ;;  %s3662_s10 = sphi %s3728_s10, %s5404_s10   ;;  %s3658_s30 = sphi %s3726_s30, %s5403_s30  }
   0x4   : > { %s3751_s15 = sadd.s32 1, %s3670_s12   ;;  %s228_s16 = sadd.s32 1, %s3666_s11 }
   0x5   : > { %s225_s17 = ssub.s32 %s3670_s12, %s3751_s15  ;;  %p238_p0 = scmp.ne.s32.totalorder %s3666_s11, %s3662_s10 }
   0x6   : > { %p226_p1 = scmp.eq.s32.totalorder %s225_s17, 0  ;;  %p239_p2 = scmp.eq.s32.totalorder %s3747_s13, 1 }
   0x7   : > { %p244_p3 = scmp.ne.s32.totalorder %s3662_s10, %s3658_s30  ;;  %p245_p4 = scmp.eq.s32.totalorder %s3141_s14, 1 }
   0x8   : > { %s3762_s18 = scalar_select %p226_p1, %s3666_s11, %s228_s16  }
   0x9   : > { %p3764_p5 = por %p239_p2, %p238_p0  ;;  %p3768_p6 = por %p245_p4, %p244_p3 }
   0xa   : > { %p3144_p7 = scmp.ge.s32.totalorder %s3670_s12, 1  ;;  %p304_p8 = scmp.lt.s32.totalorder %s3670_s12, 3 }
   0xc   : > { %p305_p9 = pnand %p3144_p7, %p304_p8 }
   0xe   : > { %308 = sbr.rel (%p305_p9) target bundleno = 937 (0x3a9), region = 56 }
  0x15   : > { %v3416_v0 = vld [vmem:[%s5278_s3 + $0x4] ss:$8 sps:$4 sm:$0xff]   ;;  %v3418_v1 = vld [vmem:[%s5278_s3] ss:$8 sps:$4 sm:$0xff]   ;;  %v5289_v2 = vmov 2   ;;  %v5285_v3 = vmov 1  }
  0x16   : > { %3363 = vset.pattern.permute.xlu0 %v5289_v2  ;;  %3362 = vset.pattern.permute.xlu1 %v5285_v3  ;;  %s3146_s25 = sshll.u32 %s3747_s13, 3  ;;  %v3419_v4 = vld [vmem:[%s5278_s3 + $0x14] ss:$8 sps:$4 sm:$0xff]   ;;  %v3421_v5 = vld [vmem:[%s5278_s3 + $0x10] ss:$8 sps:$4 sm:$0xff]   ;;  %v5291_v19 = vmov 0  }
  0x17   : > { %1569 = vmatprep.subr.bf16.mxu0 %v3416_v0  ;;  %p348_p10 = scmp.lt.s32.totalorder %s3146_s25, 15  ;;  %3288 = vmatprep.subr.bf16.mxu1 %v3416_v0  ;;  %v3422_v6 = vld [vmem:[%s5278_s3 + $0x24] ss:$8 sps:$4 sm:$0xff]   ;;  %v3424_v7 = vld [vmem:[%s5278_s3 + $0x20] ss:$8 sps:$4 sm:$0xff]   ;;  %vm3017_vm0 = vcmask 1041409  }
  0x18   : > { %1570 = vmatpush1.bf16.msra.mxu0 %v3418_v1  ;;  %3304 = vmatpush1.bf16.msra.mxu1 %v3418_v1  ;;  %v3425_v9 = vld [vmem:[%s5278_s3 + $0x34] ss:$8 sps:$4 sm:$0xff]   ;;  %v3427_v12 = vld [vmem:[%s5278_s3 + $0x30] ss:$8 sps:$4 sm:$0xff]   ;;  %v3428_v13 = vld [vmem:[%s5278_s3 + $0x44] ss:$8 sps:$4 sm:$0xff]  }
  0x19   : > { %1571 = vmatprep.subr.bf16.mxu0 %v3419_v4  ;;  %s5408_s25 = smov (!%p348_p10, %s3146_s25), 15  ;;  %3289 = vmatprep.subr.bf16.mxu1 %v3419_v4  ;;  %v3430_v15 = vld [vmem:[%s5278_s3 + $0x40] ss:$8 sps:$4 sm:$0xff]   ;;  %v3431_v16 = vld [vmem:[%s5278_s3 + $0x54] ss:$8 sps:$4 sm:$0xff]   ;;  %vm3020_vm1 = vcmask 1042434  }
  0x1a   : > { %s3285_s17 = sshll.u32 %s5408_s25, 5  ;;  %v3433_v17 = vld [vmem:[%s5278_s3 + $0x50] ss:$8 sps:$4 sm:$0xff]   ;;  %v3434_v18 = vld [vmem:[%s5278_s3 + $0x64] ss:$8 sps:$4 sm:$0xff]   ;;  %vm3023_vm2 = vcmask 1043459  }
  0x1b   : > { %s3800_s23 = scalar_lea.vmem %s5275_s0, %s3285_s17  ;;  %v3436_v20 = vld [vmem:[%s5278_s3 + $0x60] ss:$8 sps:$4 sm:$0xff]   ;;  %s3844_s27 = scalar_lea.vmem %s5276_s1, %s3285_s17  ;;  %v3437_v21 = vld [vmem:[%s5278_s3 + $0x74] ss:$8 sps:$4 sm:$0xff]   ;;  %v3439_v24 = vld [vmem:[%s5278_s3 + $0x70] ss:$8 sps:$4 sm:$0xff]  }
  0x1c   : > { %1572 = vmatpush1.bf16.msra.mxu0 %v3421_v5  ;;  %3305 = vmatpush1.bf16.msra.mxu1 %v3421_v5  ;;  %v361_v8 = vld [vmem:[%s3800_s23] sm:$0xff]  ;;  %v363_v10 = vld [vmem:[%s3800_s23 + $0x10] sm:$0xff]  ;;  %v362_v11 = vld [vmem:[%s3800_s23 + $0x8] sm:$0xff]  ;;  %vm3026_vm3 = vcmask 1044484   ;;  %vm3029_vm4 = vcmask 1045509   ;;  %vm3032_vm5 = vcmask 1046534  }
  0x1d   : > { %1573 = vmatprep.subr.bf16.mxu0 %v3422_v6  ;;  %3290 = vmatprep.subr.bf16.mxu1 %v3422_v6  ;;  %v3818_v14 = vld [vmem:[%s3800_s23 + $0x20] sm:$0xff]  ;;  %v364_v23 = vld [vmem:[%s3800_s23 + $0x18] sm:$0xff]  ;;  %v366_v28 = vld [vmem:[%s3800_s23 + $0x28] sm:$0xff]  ;;  %vm3035_vm6 = vcmask 1047559   ;;  %s3287_s22 = sshll.u32 %s3747_s13, 8  ;;  %s3675_s14 = smov [#allocation2]  }
  0x1e   : > { %976 = vperm.xlu0 %3363, %v361_v8   ;;  %702 = vperm.xlu1 %3362, %v361_v8   ;;  %v3466_v22 = vld [vmem:[%s3844_s27 + $0x4] ss:$8 sps:$4 sm:$0xff]   ;;  %v3442_v27 = vld [vmem:[%s5278_s3 + $0x80] ss:$8 sps:$4 sm:$0xff]   ;;  %v3443_v29 = vld [vmem:[%s5278_s3 + $0x94] ss:$8 sps:$4 sm:$0xff]  }
  0x1f   : > { %v3440_v25 = vld [vmem:[%s5278_s3 + $0x84] ss:$8 sps:$4 sm:$0xff]   ;;  %1601 = vmatprep.mubr.bf16.mxu0 %v3466_v22  ;;  %v3445_v30 = vld [vmem:[%s5278_s3 + $0x90] ss:$8 sps:$4 sm:$0xff]   ;;  %v3448_v33 = vld [vmem:[%s5278_s3 + $0xa0] ss:$8 sps:$4 sm:$0xff]  }
  0x20   : > { %1574 = vmatpush1.bf16.msra.mxu0 %v3424_v7  ;;  %3306 = vmatpush1.bf16.msra.mxu1 %v3424_v7  ;;  %v3472_v26 = vld [vmem:[%s3844_s27 + $0x84] ss:$8 sps:$4 sm:$0xff]   ;;  %v3870_v31 = vld [vmem:[%s3800_s23 + $0x38] sm:$0xff]  ;;  %v3454_v39 = vld [vmem:[%s5278_s3 + $0xc0] ss:$8 sps:$4 sm:$0xff]   ;;  %s3612_s17 = sshll.u32 %s3675_s14, 4  ;;  %s3613_s17 = int_to_ptr.vmem [resolvable:$false] %s3612_s17 }
  0x21   : > { %1575 = vmatprep.subr.bf16.mxu0 %v3425_v9  ;;  %3291 = vmatprep.subr.bf16.mxu1 %v3425_v9  ;;  %v3446_v32 = vld [vmem:[%s5278_s3 + $0xa4] ss:$8 sps:$4 sm:$0xff]   ;;  %v3449_v35 = vld [vmem:[%s5278_s3 + $0xb4] ss:$8 sps:$4 sm:$0xff]   ;;  %v3451_v36 = vld [vmem:[%s5278_s3 + $0xb0] ss:$8 sps:$4 sm:$0xff]  }
  0x22   : > { %984 = vperm.xlu0 %3363, %v363_v10   ;;  %706 = vperm.xlu1 %3362, %v362_v11   ;;  %v3881_v34 = vld [vmem:[%s3800_s23 + $0x48] sm:$0xff]  ;;  %v3893_v37 = vld [vmem:[%s3800_s23 + $0x58] sm:$0xff]  ;;  %v367_v47 = vld [vmem:[%s3800_s23 + $0x30] sm:$0xff]  ;;  %s3614_s16 = scalar_lea.vmem %s3613_s17, 512 }
  0x23   : > { %1681 = vmatprep.mubr.bf16.mxu1 %v3472_v26  ;;  %v3452_v38 = vld [vmem:[%s5278_s3 + $0xc4] ss:$8 sps:$4 sm:$0xff]   ;;  %v3455_v40 = vld [vmem:[%s5278_s3 + $0xd4] ss:$8 sps:$4 sm:$0xff]   ;;  %v3457_v42 = vld [vmem:[%s5278_s3 + $0xd0] ss:$8 sps:$4 sm:$0xff]  }
  0x24   : > { %1576 = vmatpush1.bf16.msra.mxu0 %v3427_v12  ;;  %3307 = vmatpush1.bf16.msra.mxu1 %v3427_v12  ;;  %v3908_v41 = vld [vmem:[%s3800_s23 + $0x68] sm:$0xff]  ;;  %v3914_v43 = vld [vmem:[%s3800_s23 + $0x78] sm:$0xff]  ;;  %v369_v50 = vld [vmem:[%s3800_s23 + $0x40] sm:$0xff] }
  0x25   : > { %1577 = vmatprep.subr.bf16.mxu0 %v3428_v13  ;;  %3292 = vmatprep.subr.bf16.mxu1 %v3428_v13  ;;  %v3458_v44 = vld [vmem:[%s5278_s3 + $0xe4] ss:$8 sps:$4 sm:$0xff]   ;;  %v3460_v45 = vld [vmem:[%s5278_s3 + $0xe0] ss:$8 sps:$4 sm:$0xff]   ;;  %v3461_v46 = vld [vmem:[%s5278_s3 + $0xf4] ss:$8 sps:$4 sm:$0xff]  }
  0x26   : > { %992 = vperm.xlu0 %3363, %v3818_v14   ;;  %3364 = vset.pattern.permute.xlu1 %v5289_v2  ;;  %v3463_v48 = vld [vmem:[%s5278_s3 + $0xf0] ss:$8 sps:$4 sm:$0xff]   ;;  %v3464_v49 = vld [vmem:[%s3844_s27] ss:$8 sps:$4 sm:$0xff]   ;;  %v3467_v51 = vld [vmem:[%s3844_s27 + $0x14] ss:$8 sps:$4 sm:$0xff]  }
  0x27   : > { %980 = vperm.xlu1 %3364, %v362_v11   ;;  %v3470_v52 = vld [vmem:[%s3844_s27 + $0x80] ss:$8 sps:$4 sm:$0xff]   ;;  %v3482_v53 = vld [vmem:[%s3844_s27 + $0x94] ss:$8 sps:$4 sm:$0xff]   ;;  %v3469_v55 = vld [vmem:[%s3844_s27 + $0x10] ss:$8 sps:$4 sm:$0xff]  }
  0x28   : > { %1578 = vmatpush1.bf16.msra.mxu0 %v3430_v15  ;;  %3308 = vmatpush1.bf16.msra.mxu1 %v3430_v15  ;;  %v3941_v54 = vld [vmem:[%s3800_s23 + $0x50] sm:$0xff]  ;;  %v3947_v56 = vld [vmem:[%s3800_s23 + $0x60] sm:$0xff]  ;;  %v3994_v15 = vld [vmem:[%s3800_s23 + $0x98] sm:$0xff] }
  0x29   : > { %1579 = vmatprep.subr.bf16.mxu0 %v3431_v16  ;;  %3293 = vmatprep.subr.bf16.mxu1 %v3431_v16  ;;  %v3473_v57 = vld [vmem:[%s3844_s27 + $0x24] ss:$8 sps:$4 sm:$0xff]   ;;  %v3484_v58 = vld [vmem:[%s3844_s27 + $0x90] ss:$8 sps:$4 sm:$0xff]   ;;  %v3475_v62 = vld [vmem:[%s3844_s27 + $0x20] ss:$8 sps:$4 sm:$0xff]  }
  0x2a   : > { %3370 = vset.pattern.permute.xlu0 %v5291_v19  ;;  %v3491_v59 = vld [vmem:[%s3844_s27 + $0xa4] ss:$8 sps:$4 sm:$0xff]   ;;  %v3956_v60 = vld [vmem:[%s3800_s23 + $0x70] sm:$0xff]  ;;  %v3493_v0 = vld [vmem:[%s3844_s27 + $0xa0] ss:$8 sps:$4 sm:$0xff]  }
  0x2b   : > { %460 = vperm.xlu0 %3370, %v361_v8   ;;  %3365 = vset.pattern.permute.xlu1 %v5291_v19  ;;  %v3960_v61 = vld [vmem:[%s3800_s23 + $0x80] sm:$0xff]  ;;  %v3476_v63 = vld [vmem:[%s3844_s27 + $0x34] ss:$8 sps:$4 sm:$0xff]   ;;  %v3478_v5 = vld [vmem:[%s3844_s27 + $0x30] ss:$8 sps:$4 sm:$0xff]  }
  0x2c   : > { %470 = vperm.xlu1 %3365, %v363_v10   ;;  %1580 = vmatpush1.bf16.msra.mxu0 %v3433_v17  ;;  %v3497_v1 = vld [vmem:[%s3844_s27 + $0xb4] ss:$8 sps:$4 sm:$0xff]   ;;  %v3479_v6 = vld [vmem:[%s3844_s27 + $0x44] ss:$8 sps:$4 sm:$0xff]   ;;  %v3499_v8 = vld [vmem:[%s3844_s27 + $0xb0] ss:$8 sps:$4 sm:$0xff]  }
  0x2d   : > { %1581 = vmatprep.subr.bf16.mxu0 %v3434_v18  ;;  %3309 = vmatpush1.bf16.msra.mxu1 %v3433_v17  ;;  %v3969_v4 = vld [vmem:[%s3800_s23 + $0x90] sm:$0xff]  ;;  %v3976_v7 = vld [vmem:[%s3800_s23 + $0xa0] sm:$0xff] }
  0x2e   : > { %3294 = vmatprep.subr.bf16.mxu1 %v3434_v18  ;;  %v3500_v9 = vld [vmem:[%s3844_s27 + $0xc4] ss:$8 sps:$4 sm:$0xff]   ;;  %v3485_v12 = vld [vmem:[%s3844_s27 + $0x54] ss:$8 sps:$4 sm:$0xff]   ;;  %v3502_v13 = vld [vmem:[%s3844_s27 + $0xc0] ss:$8 sps:$4 sm:$0xff]  }
  0x2f   : > { %465 = vperm.xlu0 %3370, %v362_v11   ;;  %v3481_v11 = vld [vmem:[%s3844_s27 + $0x40] ss:$8 sps:$4 sm:$0xff]   ;;  %v3514_v16 = vld [vmem:[%s5280_s5 + $0x4] ss:$8 sps:$4 sm:$0xff]   ;;  %v3515_v22 = vld [vmem:[%s5280_s5 + $0x10] ss:$8 sps:$4 sm:$0xff]  }
  0x30   : > { %3366 = vset.pattern.permute.xlu1 %v5285_v3  ;;  %1582 = vmatpush1.bf16.msra.mxu0 %v3436_v20  ;;  %v3512_v17 = vld [vmem:[%s5280_s5] ss:$8 sps:$4 sm:$0xff]   ;;  %v3520_v26 = vld [vmem:[%s5280_s5 + $0x24] ss:$8 sps:$4 sm:$0xff]  }
  0x31   : > { %710 = vperm.xlu1 %3366, %v363_v10   ;;  %1583 = vmatprep.subr.bf16.mxu0 %v3437_v21  ;;  %v3983_v10 = vld [vmem:[%s3800_s23 + $0x88] sm:$0xff] }
  0x32   : > { %3310 = vmatpush1.bf16.msra.mxu1 %v3436_v20  ;;  %v4006_v18 = vld [vmem:[%s3800_s23 + $0xa8] sm:$0xff]  ;;  %v3517_v20 = vld [vmem:[%s5280_s5 + $0x14] ss:$8 sps:$4 sm:$0xff]  }
  0x33   : > { %475 = vperm.xlu0 %3370, %v364_v23   ;;  %3295 = vmatprep.subr.bf16.mxu1 %v3437_v21  ;;  %v3487_v21 = vld [vmem:[%s3844_s27 + $0x50] ss:$8 sps:$4 sm:$0xff]  }
  0x34   : > { %1584 = vmatpush1.bf16.msra.mxu0 %v3439_v24 }
  0x35   : > { %714 = vperm.xlu1 %3366, %v364_v23   ;;  %1585 = vmatprep.subr.bf16.mxu0 %v3440_v25 }
  0x36   : > { %3311 = vmatpush1.bf16.msra.mxu1 %v3439_v24  ;;  %v3505_v24 = vld [vmem:[%s3844_s27 + $0xd0] ss:$8 sps:$4 sm:$0xff]  }
  0x37   : > { %485 = vperm.xlu0 %3370, %v366_v28   ;;  %3296 = vmatprep.subr.bf16.mxu1 %v3440_v25  ;;  %v3506_v25 = vld [vmem:[%s3844_s27 + $0xe4] ss:$8 sps:$4 sm:$0xff]  }
  0x38   : > { %1586 = vmatpush1.bf16.msra.mxu0 %v3442_v27 }
  0x39   : > { %3367 = vset.pattern.permute.xlu1 %v5289_v2  ;;  %1587 = vmatprep.subr.bf16.mxu0 %v3443_v29 }
  0x3a   : > { %988 = vperm.xlu1 %3367, %v364_v23   ;;  %3312 = vmatpush1.bf16.msra.mxu1 %v3442_v27  ;;  %v3488_v23 = vld [vmem:[%s3844_s27 + $0x64] ss:$8 sps:$4 sm:$0xff]   ;;  %v4025_v27 = vld [vmem:[%s3800_s23 + $0xb8] sm:$0xff] }
  0x3b   : > { %495 = vperm.xlu0 %3370, %v3870_v31   ;;  %3297 = vmatprep.subr.bf16.mxu1 %v3443_v29  ;;  %v3523_v29 = vld [vmem:[%s5280_s5 + $0x34] ss:$8 sps:$4 sm:$0xff]  }
  0x3c   : > { %1588 = vmatpush1.bf16.msra.mxu0 %v3445_v30 }
  0x3d   : > { %1589 = vmatprep.subr.bf16.mxu0 %v3446_v32 }
  0x3e   : > { %3368 = vset.pattern.permute.xlu1 %v5291_v19  ;;  %3313 = vmatpush1.bf16.msra.mxu1 %v3445_v30  ;;  %v3490_v30 = vld [vmem:[%s3844_s27 + $0x60] ss:$8 sps:$4 sm:$0xff]  }
  0x3f   : > { %480 = vperm.xlu1 %3368, %v3818_v14   ;;  %505 = vperm.xlu0 %3370, %v3881_v34  }
  0x40   : > { %1590 = vmatpush1.bf16.msra.mxu0 %v3448_v33  ;;  %3298 = vmatprep.subr.bf16.mxu1 %v3446_v32  ;;  %v3521_v32 = vld [vmem:[%s5280_s5 + $0x30] ss:$8 sps:$4 sm:$0xff]  }
  0x41   : > { %1591 = vmatprep.subr.bf16.mxu0 %v3449_v35 }
  0x42   : > { %3314 = vmatpush1.bf16.msra.mxu1 %v3448_v33  ;;  %v3494_v33 = vld [vmem:[%s3844_s27 + $0x74] ss:$8 sps:$4 sm:$0xff]  }
  0x43   : > { %3369 = vset.pattern.permute.xlu1 %v5285_v3  ;;  %515 = vperm.xlu0 %3370, %v3893_v37  }
  0x44   : > { %718 = vperm.xlu1 %3369, %v3818_v14   ;;  %1592 = vmatpush1.bf16.msra.mxu0 %v3451_v36  ;;  %v3503_v14 = vld [vmem:[%s3844_s27 + $0xd4] ss:$8 sps:$4 sm:$0xff]  }
  0x45   : > { %1593 = vmatprep.subr.bf16.mxu0 %v3452_v38  ;;  %3299 = vmatprep.subr.bf16.mxu1 %v3449_v35  ;;  %v3509_v35 = vld [vmem:[%s3844_s27 + $0xf4] ss:$8 sps:$4 sm:$0xff]  }
  0x46   : > { %3315 = vmatpush1.bf16.msra.mxu1 %v3451_v36  ;;  %v3526_v36 = vld [vmem:[%s5280_s5 + $0x44] ss:$8 sps:$4 sm:$0xff]  }
  0x47   : > { %525 = vperm.xlu0 %3370, %v3908_v41   ;;  %3300 = vmatprep.subr.bf16.mxu1 %v3452_v38  ;;  %v4052_v38 = vld [vmem:[%s3800_s23 + $0xd8] sm:$0xff] }
  0x48   : > { %722 = vperm.xlu1 %3369, %v366_v28   ;;  %1594 = vmatpush1.bf16.msra.mxu0 %v3454_v39 }
  0x49   : > { %1595 = vmatprep.subr.bf16.mxu0 %v3455_v40 }
  0x4a   : > { %3316 = vmatpush1.bf16.msra.mxu1 %v3454_v39  ;;  %v3524_v39 = vld [vmem:[%s5280_s5 + $0x40] ss:$8 sps:$4 sm:$0xff]  }
  0x4b   : > { %535 = vperm.xlu0 %3370, %v3914_v43   ;;  %3301 = vmatprep.subr.bf16.mxu1 %v3455_v40  ;;  %v3496_v40 = vld [vmem:[%s3844_s27 + $0x70] ss:$8 sps:$4 sm:$0xff]  }
  0x4c   : > { %3371 = vset.pattern.permute.xlu1 %v5289_v2  ;;  %1596 = vmatpush1.bf16.msra.mxu0 %v3457_v42 }
  0x4d   : > { %996 = vperm.xlu1 %3371, %v366_v28   ;;  %1597 = vmatprep.subr.bf16.mxu0 %v3458_v44  ;;  %v3518_v28 = vld [vmem:[%s5280_s5 + $0x20] ss:$8 sps:$4 sm:$0xff]  }
  0x4e   : > { %3317 = vmatpush1.bf16.msra.mxu1 %v3457_v42  ;;  %v3511_v42 = vld [vmem:[%s3844_s27 + $0xf0] ss:$8 sps:$4 sm:$0xff]  }
  0x4f   : > { %3385 = vset.pattern.permute.xlu0 %v5289_v2  ;;  %3302 = vmatprep.subr.bf16.mxu1 %v3458_v44  ;;  %v3527_v44 = vld [vmem:[%s5280_s5 + $0x50] ss:$8 sps:$4 sm:$0xff]  }
  0x50   : > { %1598 = vmatpush1.bf16.msra.mxu0 %v3460_v45  ;;  %1000 = vperm.xlu0 %3385, %v367_v47  }
  0x51   : > { %3372 = vset.pattern.permute.xlu1 %v5291_v19  ;;  %1599 = vmatprep.subr.bf16.mxu0 %v3461_v46 }
  0x52   : > { %490 = vperm.xlu1 %3372, %v367_v47   ;;  %3318 = vmatpush1.bf16.msra.mxu1 %v3460_v45  ;;  %v3532_v45 = vld [vmem:[%s5280_s5 + $0x64] ss:$8 sps:$4 sm:$0xff]  }
  0x53   : > { %3303 = vmatprep.subr.bf16.mxu1 %v3461_v46  ;;  %v4074_v46 = vld [vmem:[%s3800_s23 + $0xb0] sm:$0xff] }
  0x54   : > { %1600 = vmatpush1.bf16.msra.mxu0 %v3463_v48  ;;  %1008 = vperm.xlu0 %3385, %v369_v50  }
  0x56   : > { %3373 = vset.pattern.permute.xlu1 %v5285_v3  ;;  %3319 = vmatpush1.bf16.msra.mxu1 %v3463_v48  ;;  %v3535_v48 = vld [vmem:[%s5280_s5 + $0x74] ss:$8 sps:$4 sm:$0xff]  }
  0x57   : > { %726 = vperm.xlu1 %3373, %v367_v47   ;;  %1602 = vmatmul.mubr.bf16.vlgmr.msra.gmra.mrb[0].mxu0 %v3464_v49  ;;  %v3530_v47 = vld [vmem:[%s5280_s5 + $0x60] ss:$8 sps:$4 sm:$0xff]  }
  0x58   : > { %1611 = vmatprep.mubr.bf16.mxu0 %v3467_v51  ;;  %1016 = vperm.xlu0 %3385, %v3941_v54   ;;  %v4086_v49 = vld [vmem:[%s3800_s23 + $0xc0] sm:$0xff] }
  0x59   : > { %1682 = vmatmul.mubr.bf16.vlgmr.msra.gmra.mrb[0].mxu1 %v3470_v52  ;;  %2138 = vmatprep.subr.bf16.mxu1 %v3514_v16  ;;  %v3538_v51 = vld [vmem:[%s5280_s5 + $0x84] ss:$8 sps:$4 sm:$0xff]   ;;  %v4097_v52 = vld [vmem:[%s3800_s23 + $0xd0] sm:$0xff] }
  0x5a   : > { %1691 = vmatprep.mubr.bf16.mxu1 %v3482_v53  ;;  %2139 = vmatpush1.bf16.msra.mxu1 %v3512_v17  ;;  %v3536_v53 = vld [vmem:[%s5280_s5 + $0x80] ss:$8 sps:$4 sm:$0xff]   ;;  %v3557_v16 = vld [vmem:[%s5280_s5 + $0xf0] ss:$8 sps:$4 sm:$0xff]  }
  0x5b   : > { %730 = vperm.xlu1 %3373, %v3870_v31   ;;  %2140 = vmatprep.subr.bf16.mxu1 %v3517_v20  ;;  %v4181_v20 = vld [vmem:[%s3800_s23 + $0xf8] sm:$0xff] }
  0x5c   : > { %1024 = vperm.xlu0 %3385, %v3947_v56   ;;  %5317 = vst [vmem:[#allocation6_spill] sm:$0xff] %v4181_v20 }
  0x5e   : > { %2141 = vmatpush1.bf16.msra.mxu1 %v3515_v22  ;;  %v4188_v22 = vld [vmem:[%s3800_s23 + $0xf0] sm:$0xff] }
  0x5f   : > { %3374 = vset.pattern.permute.xlu1 %v5289_v2  ;;  %1612 = vmatmul.mubr.bf16.gmra.mrb[4].mxu0 %v3469_v55  ;;  %5318 = vst [vmem:[#allocation7_spill] sm:$0xff] %v4188_v22 }
  0x60   : > { %1004 = vperm.xlu1 %3374, %v3870_v31   ;;  %1621 = vmatprep.mubr.bf16.mxu0 %v3473_v57  ;;  %v4037_v31 = vld [vmem:[%s3800_s23 + $0xc8] sm:$0xff] }
  0x61   : > { %1692 = vmatmul.mubr.bf16.gmra.mrb[4].mxu1 %v3484_v58  ;;  %1032 = vperm.xlu0 %3385, %v3956_v60   ;;  %v4121_v58 = vld [vmem:[%s3800_s23 + $0xe0] sm:$0xff] }
  0x62   : > { %1701 = vmatprep.mubr.bf16.mxu1 %v3491_v59  ;;  %2142 = vmatprep.subr.bf16.mxu1 %v3520_v26  ;;  %v3542_v59 = vld [vmem:[%s5280_s5 + $0xa0] ss:$8 sps:$4 sm:$0xff]  }
  0x63   : > { %2143 = vmatpush1.bf16.msra.mxu1 %v3518_v28 }
  0x64   : > { %3375 = vset.pattern.permute.xlu1 %v5291_v19  ;;  %2144 = vmatprep.subr.bf16.mxu1 %v3523_v29 }
  0x65   : > { %500 = vperm.xlu1 %3375, %v369_v50   ;;  %1040 = vperm.xlu0 %3385, %v3960_v61  }
  0x67   : > { %1622 = vmatmul.mubr.bf16.gmra.mrb[8].mxu0 %v3475_v62  ;;  %2145 = vmatpush1.bf16.msra.mxu1 %v3521_v32  ;;  %v3547_v62 = vld [vmem:[%s5280_s5 + $0xb4] ss:$8 sps:$4 sm:$0xff]  }
  0x68   : > { %1631 = vmatprep.mubr.bf16.mxu0 %v3476_v63  ;;  %2146 = vmatprep.subr.bf16.mxu1 %v3526_v36 }
  0x69   : > { %3376 = vset.pattern.permute.xlu1 %v5285_v3  ;;  %1702 = vmatmul.mubr.bf16.gmra.mrb[8].mxu1 %v3493_v0  ;;  %v3550_v0 = vld [vmem:[%s5280_s5 + $0xc4] ss:$8 sps:$4 sm:$0xff]  }
  0x6a   : > { %734 = vperm.xlu1 %3376, %v369_v50   ;;  %1711 = vmatprep.mubr.bf16.mxu1 %v3497_v1  ;;  %v3533_v50 = vld [vmem:[%s5280_s5 + $0x70] ss:$8 sps:$4 sm:$0xff]  }
  0x6b   : > { %1048 = vperm.xlu0 %3385, %v3969_v4   ;;  %2147 = vmatpush1.bf16.msra.mxu1 %v3524_v39 }
  0x6e   : > { %738 = vperm.xlu1 %3376, %v3881_v34  }
  0x6f   : > { %1632 = vmatmul.mubr.bf16.gmra.mrb[12].mxu0 %v3478_v5  ;;  %1056 = vperm.xlu0 %3385, %v3976_v7   ;;  %v3548_v5 = vld [vmem:[%s5280_s5 + $0xc0] ss:$8 sps:$4 sm:$0xff]  }
  0x70   : > { %1641 = vmatprep.mubr.bf16.mxu0 %v3479_v6  ;;  %v4148_v6 = vld [vmem:[%s3800_s23 + $0xe8] sm:$0xff]  ;;  %s344_s23 = sand.u32 1, %s3662_s10  }
  0x71   : > { %1712 = vmatmul.mubr.bf16.gmra.mrb[12].mxu1 %v3499_v8  ;;  %5316 = vst [vmem:[#allocation5_spill] sm:$0xff] %v4148_v6  ;;  %v3553_v8 = vld [vmem:[%s5280_s5 + $0xd4] ss:$8 sps:$4 sm:$0xff]   ;;  %s3145_s21 = sshll.u32 %s344_s23, 4  ;;  %s3056_s25 = scalar_lea.sflag [#allocation3], %s344_s23 }
  0x72   : > { %3377 = vset.pattern.permute.xlu1 %v5289_v2  ;;  %1721 = vmatprep.mubr.bf16.mxu1 %v3500_v9  ;;  %v3551_v9 = vld [vmem:[%s5280_s5 + $0xd0] ss:$8 sps:$4 sm:$0xff]   ;;  %s346_s24 = scalar_lea.vmem [#allocation2], %s3145_s21 }
  0x73   : > { %1012 = vperm.xlu1 %3377, %v3881_v34   ;;  %3396 = vset.pattern.permute.xlu0 %v5291_v19  ;;  %v3508_v34 = vld [vmem:[%s3844_s27 + $0xe0] ss:$8 sps:$4 sm:$0xff]   ;;  %s3070_s26 = sshll.u32 %s346_s24, 4  ;;  %s5233_s27 = scalar_lea.hbm %s5284_s9, %s3287_s22  ;;  %s5235_s26 = int_to_ptr.vmem [resolvable:$true] %s3070_s26 }
  0x74   : > { %545 = vperm.xlu0 %3396, %v3983_v10   ;;  %s3608_s13 = scalar_lea.vmem %s5235_s26, 256  ;;  %p3615_p0 = scmp.lt.s32.totalorder %s5235_s26, %s3613_s17 }
  0x75   : > { %p3609_p11 = scmp.ne.s32.totalorder %s5235_s26, %s3608_s13  ;;  %p3616_p1 = scmp.lt.s32.totalorder %s3614_s16, %s3608_s13 }
  0x77   : > { %3378 = vset.pattern.permute.xlu1 %v5291_v19  ;;  %1642 = vmatmul.mubr.bf16.gmra.mrb[16].mxu0 %v3481_v11  ;;  %p3610_p12 = pnand %p3609_p11, %p3764_p5  ;;  %p3617_p2 = por %p3616_p1, %p3615_p0 }
  0x78   : > { %510 = vperm.xlu1 %3378, %v3941_v54   ;;  %1651 = vmatprep.mubr.bf16.mxu0 %v3485_v12  ;;  %v3554_v12 = vld [vmem:[%s5280_s5 + $0xe0] ss:$8 sps:$4 sm:$0xff]  }
  0x79   : > { %1722 = vmatmul.mubr.bf16.gmra.mrb[16].mxu1 %v3502_v13  ;;  %555 = vperm.xlu0 %3396, %v3994_v15   ;;  %p3611_p13 = pneg %p3610_p12 }
  0x7a   : > { %1731 = vmatprep.mubr.bf16.mxu1 %v3503_v14  ;;  %v3559_v14 = vld [vmem:[%s5280_s5 + $0xf4] ss:$8 sps:$4 sm:$0xff]  }
  0x7b   : > { %p3618_p3 = pnand %p3617_p2, %p3611_p13 }
  0x7c   : > { %3379 = vset.pattern.permute.xlu1 %v5285_v3 }
  0x7d   : > { %742 = vperm.xlu1 %3379, %v3941_v54   ;;  %565 = vperm.xlu0 %3396, %v4006_v18   ;;  %v3541_v54 = vld [vmem:[%s5280_s5 + $0x94] ss:$8 sps:$4 sm:$0xff]  }
  0x7f   : > { %1652 = vmatmul.mubr.bf16.gmra.mrb[20].mxu0 %v3487_v21 }
  0x80   : > { %1661 = vmatprep.mubr.bf16.mxu0 %v3488_v23 }
  0x81   : > { %746 = vperm.xlu1 %3379, %v3893_v37   ;;  %1732 = vmatmul.mubr.bf16.gmra.mrb[20].mxu1 %v3505_v24 }
  0x82   : > { %1741 = vmatprep.mubr.bf16.mxu1 %v3506_v25  ;;  %575 = vperm.xlu0 %3396, %v4025_v27  }
  0x85   : > { %3380 = vset.pattern.permute.xlu1 %v5289_v2 }
  0x86   : > { %1020 = vperm.xlu1 %3380, %v3893_v37   ;;  %585 = vperm.xlu0 %3396, %v4037_v31   ;;  %v3529_v37 = vld [vmem:[%s5280_s5 + $0x54] ss:$8 sps:$4 sm:$0xff]  }
  0x87   : > { %1662 = vmatmul.mubr.bf16.gmra.mrb[24].mxu0 %v3490_v30  ;;  %2148 = vmatprep.subr.bf16.mxu1 %v3529_v37 }
  0x88   : > { %1671 = vmatprep.mubr.bf16.mxu0 %v3494_v33  ;;  %2149 = vmatpush1.bf16.msra.mxu1 %v3527_v44 }
  0x89   : > { %1742 = vmatmul.mubr.bf16.gmra.mrb[24].mxu1 %v3508_v34  ;;  %2150 = vmatprep.subr.bf16.mxu1 %v3532_v45 }
  0x8a   : > { %3381 = vset.pattern.permute.xlu1 %v5291_v19  ;;  %1751 = vmatprep.mubr.bf16.mxu1 %v3509_v35 }
  0x8b   : > { %520 = vperm.xlu1 %3381, %v3947_v56   ;;  %595 = vperm.xlu0 %3396, %v4052_v38  }
  0x8c   : > { %2151 = vmatpush1.bf16.msra.mxu1 %v3530_v47 }
  0x8d   : > { %2152 = vmatprep.subr.bf16.mxu1 %v3535_v48 }
  0x8f   : > { %3382 = vset.pattern.permute.xlu1 %v5285_v3  ;;  %1672 = vmatmul.mubr.bf16.gmra.mrb[28].mxu0 %v3496_v40 }
  0x90   : > { %750 = vperm.xlu1 %3382, %v3947_v56   ;;  %3405 = vset.pattern.permute.xlu0 %v5289_v2  ;;  %v3544_v56 = vld [vmem:[%s5280_s5 + $0xa4] ss:$8 sps:$4 sm:$0xff]  }
  0x91   : > { %1752 = vmatmul.mubr.bf16.gmra.mrb[28].mxu1 %v3511_v42  ;;  %1064 = vperm.xlu0 %3405, %v4074_v46  }
  0x92   : > { %2153 = vmatpush1.bf16.msra.mxu1 %v3533_v50 }
  0x93   : > { %2154 = vmatprep.subr.bf16.mxu1 %v3538_v51 }
  0x94   : > { %754 = vperm.xlu1 %3382, %v3908_v41  }
  0x95   : > { %1072 = vperm.xlu0 %3405, %v4086_v49  }
  0x96   : > { %2155 = vmatpush1.bf16.msra.mxu1 %v3536_v53 }
  0x97   : > { %2156 = vmatprep.subr.bf16.mxu1 %v3541_v54 }
  0x98   : > { %3383 = vset.pattern.permute.xlu1 %v5289_v2 }
  0x99   : > { %1028 = vperm.xlu1 %3383, %v3908_v41   ;;  %1080 = vperm.xlu0 %3405, %v4097_v52   ;;  %v3539_v41 = vld [vmem:[%s5280_s5 + $0x90] ss:$8 sps:$4 sm:$0xff]  }
  0x9a   : > { %2157 = vmatpush1.bf16.msra.mxu1 %v3539_v41 }
  0x9b   : > { %2158 = vmatprep.subr.bf16.mxu1 %v3544_v56 }
  0x9d   : > { %3384 = vset.pattern.permute.xlu1 %v5291_v19  ;;  %v4108_v55 = vpop.permute.xlu1 %702  ;;  %1088 = vperm.xlu0 %3405, %v4121_v58   ;;  %v4178_v17 = vpop.permute.xlu0 %976 }
  0x9e   : > { %530 = vperm.xlu1 %3384, %v3956_v60   ;;  %2159 = vmatpush1.bf16.msra.mxu1 %v3542_v59 }
  0x9f   : > { %2160 = vmatprep.subr.bf16.mxu1 %v3547_v62 }
  0xa1   : > { %v4117_v57 = vpop.permute.xlu1 %706  ;;  %3410 = vset.pattern.permute.xlu0 %v5291_v19 }
  0xa2   : > { %3386 = vset.pattern.permute.xlu1 %v5285_v3  ;;  %605 = vperm.xlu0 %3410, %v4148_v6  }
  0xa3   : > { %758 = vperm.xlu1 %3386, %v3956_v60   ;;  %v3545_v60 = vld [vmem:[%s5280_s5 + $0xb0] ss:$8 sps:$4 sm:$0xff]  }
  0xa4   : > { %2161 = vmatpush1.bf16.msra.mxu1 %v3545_v60 }
  0xa5   : > { %2162 = vmatprep.subr.bf16.mxu1 %v3550_v0 }
  0xa6   : > { %v4131_v63 = vpop.permute.xlu1 %980  ;;  %615 = vperm.xlu0 %3410, %v4181_v20  }
  0xa7   : > { %762 = vperm.xlu1 %3386, %v3914_v43  }
  0xa8   : > { %2163 = vmatpush1.bf16.msra.mxu1 %v3548_v5 }
  0xa9   : > { %2164 = vmatprep.subr.bf16.mxu1 %v3553_v8 }
  0xaa   : > { %3414 = vset.pattern.permute.xlu0 %v5289_v2 }
  0xab   : > { %3387 = vset.pattern.permute.xlu1 %v5289_v2  ;;  %v4142_v1 = vpop.permute.xlu1 %470  ;;  %1096 = vperm.xlu0 %3414, %v4188_v22  }
  0xac   : > { %1036 = vperm.xlu1 %3387, %v3914_v43   ;;  %v3556_v43 = vld [vmem:[%s5280_s5 + $0xe4] ss:$8 sps:$4 sm:$0xff]   ;;  %2165 = vmatpush1.bf16.msra.mxu1 %v3551_v9 }
  0xad   : > { %2166 = vmatprep.subr.bf16.mxu1 %v3556_v43 }
  0xb0   : > { %3388 = vset.pattern.permute.xlu1 %v5291_v19  ;;  %v4159_v11 = vpop.permute.xlu1 %710  ;;  %2167 = vmatpush1.bf16.msra.mxu1 %v3554_v12 }
  0xb1   : > { %540 = vperm.xlu1 %3388, %v3960_v61   ;;  %2168 = vmatprep.subr.bf16.mxu1 %v3559_v14 }
  0xb4   : > { %v4168_v13 = vpop.permute.xlu1 %714  ;;  %2169 = vmatpush1.bf16.msra.mxu1 %v3557_v16 }
  0xb5   : > { %3389 = vset.pattern.permute.xlu1 %v5285_v3 }
  0xb6   : > { %766 = vperm.xlu1 %3389, %v3960_v61   ;;  %v4191_v61 = vpop.permute.xlu0 %984 }
  0xb9   : > { %v4183_v21 = vpop.permute.xlu1 %988 }
  0xba   : > { %770 = vperm.xlu1 %3389, %v3983_v10   ;;  %v4201_v25 = vpop.permute.xlu0 %992 }
  0xbe   : > { %3390 = vset.pattern.permute.xlu1 %v5289_v2  ;;  %v4194_v23 = vpop.permute.xlu1 %480  ;;  %v4208_v28 = vpop.permute.xlu0 %460 }
  0xbf   : > { %1044 = vperm.xlu1 %3390, %v3983_v10  }
  0xc2   : > { %v4213_v10 = vpop.permute.xlu0 %465 }
  0xc3   : > { %3391 = vset.pattern.permute.xlu1 %v5291_v19  ;;  %v4199_v24 = vpop.permute.xlu1 %718 }
  0xc4   : > { %550 = vperm.xlu1 %3391, %v3969_v4  }
  0xc6   : > { %v4219_v32 = vpop.permute.xlu0 %475 }
  0xc7   : > { %v4204_v26 = vpop.permute.xlu1 %722 }
  0xc8   : > { %3392 = vset.pattern.permute.xlu1 %v5285_v3 }
  0xc9   : > { %774 = vperm.xlu1 %3392, %v3969_v4   ;;  %v619_v4 = vlaneseq }
  0xca   : > { %v4225_v34 = vpop.permute.xlu0 %485 }
  0xcb   : > { %v4230_v36 = vshrl.u32 %v619_v4, 7 }
  0xcc   : > { %v4210_v29 = vpop.permute.xlu1 %996 }
  0xcd   : > { %778 = vperm.xlu1 %3392, %v3994_v15   ;;  %v4238_v37 = vsub.s32 1, %v4230_v36  ;;  %v835_v40 = vsub.s32 5, %v4230_v36  ;;  %v4242_v42 = vsub.s32 0, %v4230_v36  ;;  %v625_v44 = vsub.s32 4, %v4230_v36 }
  0xce   : > { %v1105_v62 = vsub.s32 2, %v4230_v36 }
  0xcf   : > { %5319 = vst [vmem:[#allocation8_spill] sm:$0xff] %v4238_v37  ;;  %5320 = vst [vmem:[#allocation9_spill] sm:$0xff] %v4242_v42 }
  0xd1   : > { %3393 = vset.pattern.permute.xlu1 %v5289_v2  ;;  %v4216_v30 = vpop.permute.xlu1 %490 }
  0xd2   : > { %1052 = vperm.xlu1 %3393, %v3994_v15   ;;  %v4233_v15 = vpop.permute.xlu0 %495 }
  0xd6   : > { %3394 = vset.pattern.permute.xlu1 %v5291_v19  ;;  %v4222_v33 = vpop.permute.xlu1 %726  ;;  %v4251_v51 = vpop.permute.xlu0 %505 }
  0xd7   : > { %560 = vperm.xlu1 %3394, %v3976_v7  }
  0xda   : > { %v4227_v35 = vpop.permute.xlu1 %730  ;;  %v4269_v0 = vpop.permute.xlu0 %515 }
  0xdb   : > { %3395 = vset.pattern.permute.xlu1 %v5285_v3 }
  0xdc   : > { %782 = vperm.xlu1 %3395, %v3976_v7   ;;  %v457_v7 = vld [vmem:[%s5277_s2] sm:$0x77] }
  0xdd   : > { %v832_v45 = vrot.slane %v457_v7, %v4238_v37  ;;  %v836_v47 = vrot.slane %v457_v7, %v835_v40  ;;  %v622_v48 = vrot.slane %v457_v7, %v4242_v42  ;;  %v626_v50 = vrot.slane %v457_v7, %v625_v44 }
  0xde   : > { %v1106_v14 = vrot.slane %v457_v7, %v1105_v62  ;;  %v4288_v44 = vpop.permute.xlu0 %525 }
  0xdf   : > { %v4235_v39 = vpop.permute.xlu1 %1004  ;;  %v4256_v54 = vrot.slane %v832_v45, %v4238_v37  ;;  %v4259_v41 = vrot.slane %v836_v47, %v4238_v37  ;;  %v4262_v56 = vrot.slane %v622_v48, %v4242_v42  ;;  %v4265_v59 = vrot.slane %v626_v50, %v4242_v42 }
  0xe0   : > { %786 = vperm.xlu1 %3395, %v4006_v18   ;;  %v4290_v45 = vrot.slane %v1106_v14, %v1105_v62 }
  0xe1   : > { %v655_v4 = vmul.f32 %v4262_v56, %v4251_v51  ;;  %v850_v22 = vmul.f32 %v4259_v41, %v4117_v57 }
  0xe4   : > { %3397 = vset.pattern.permute.xlu1 %v5289_v2  ;;  %v501_v53 = vpop.permute.xlu1 %500 }
  0xe5   : > { %1060 = vperm.xlu1 %3397, %v4006_v18   ;;  %v653_v18 = vmul.f32 %v4262_v56, %v501_v53  ;;  %v654_v5 = vmul.f32 %v4265_v59, %v501_v53 }
  0xe9   : > { %3398 = vset.pattern.permute.xlu1 %v5291_v19  ;;  %v735_v60 = vpop.permute.xlu1 %734 }
  0xea   : > { %v863_v8 = vmul.f32 %v4256_v54, %v735_v60  ;;  %v864_v9 = vmul.f32 %v4259_v41, %v735_v60  ;;  %570 = vperm.xlu1 %3398, %v4074_v46   ;;  %v4299_v60 = vpop.permute.xlu0 %535 }
  0xec   : > { %v4276_v43 = vadd.f32 %v863_v8, %v653_v18  ;;  %v4278_v12 = vadd.f32 %v864_v9, %v654_v5 }
  0xed   : > { %v4280_v16 = vpop.permute.xlu1 %738 }
  0xee   : > { %5321 = vst [vmem:[#allocation10_spill] sm:$0xff] %v4276_v43  ;;  %5322 = vst [vmem:[#allocation11_spill] sm:$0xff] %v4278_v12  ;;  %3399 = vset.pattern.permute.xlu1 %v5285_v3  ;;  %v865_v40 = vmul.f32 %v4256_v54, %v4280_v16 }
  0xef   : > { %790 = vperm.xlu1 %3399, %v4074_v46   ;;  %v4305_v46 = vpop.permute.xlu0 %1000 }
  0xf0   : > { %v929_v48 = vadd.f32 %v865_v40, %v655_v4 }
  0xf2   : > { %v4292_v47 = vpop.permute.xlu1 %1012 }
  0xf3   : > { %5323 = vst [vmem:[#allocation12_spill] sm:$0xff] %v4292_v47  ;;  %v1139_v50 = vmul.f32 %v4290_v45, %v4292_v47  ;;  %794 = vperm.xlu1 %3399, %v4025_v27   ;;  %v4311_v8 = vpop.permute.xlu0 %1008  ;;  %v642_v47 = vmul.f32 %v4265_v59, %v4142_v1 }
  0xf5   : > { %v4297_v53 = vadd.f32 %v1139_v50, %v929_v48 }
  0xf7   : > { %5324 = vst [vmem:[#allocation13_spill] sm:$0xff] %v4297_v53  ;;  %3400 = vset.pattern.permute.xlu1 %v5289_v2  ;;  %v4302_v18 = vpop.permute.xlu1 %510  ;;  %v4317_v14 = vpop.permute.xlu0 %1016  ;;  %v847_v53 = vmul.f32 %v4256_v54, %v4108_v55 }
  0xf8   : > { %5325 = vst [vmem:[#allocation14_spill] sm:$0xff] %v4302_v18  ;;  %1068 = vperm.xlu1 %3400, %v4025_v27   ;;  %v1109_v27 = vsub.s32 6, %v4230_v36  ;;  %v637_v36 = vmul.f32 %v4262_v56, %v4208_v28  ;;  %v641_v18 = vmul.f32 %v4262_v56, %v4142_v1  ;;  %v854_v1 = vmul.f32 %v4259_v41, %v4168_v13 }
  0xfa   : > { %v1110_v50 = vrot.slane %v457_v7, %v1109_v27  ;;  %v1121_v7 = vmul.f32 %v4290_v45, %v4178_v17  ;;  %v638_v27 = vmul.f32 %v4265_v59, %v4208_v28  ;;  %v1125_v28 = vmul.f32 %v4290_v45, %v4191_v61 }
  0xfb   : > { %v4323_v40 = vpop.permute.xlu0 %1024  ;;  %v911_v6 = vadd.f32 %v847_v53, %v637_v36 }
  0xfc   : > { %3401 = vset.pattern.permute.xlu1 %v5291_v19  ;;  %v4308_v5 = vpop.permute.xlu1 %742  ;;  %v4336_v20 = vrot.slane %v1110_v50, %v1105_v62  ;;  %v639_v62 = vmul.f32 %v4262_v56, %v4213_v10 }
  0xfd   : > { %5326 = vst [vmem:[#allocation15_spill] sm:$0xff] %v4308_v5  ;;  %580 = vperm.xlu1 %3401, %v4086_v49   ;;  %v643_v5 = vmul.f32 %v4262_v56, %v4219_v32 }
  0xfe   : > { %v1122_v50 = vmul.f32 %v4336_v20, %v4178_v17  ;;  %v852_v17 = vmul.f32 %v4259_v41, %v4159_v11  ;;  %v1124_v43 = vmul.f32 %v4336_v20, %v4131_v63 }
 0x100   : > { %v4313_v9 = vpop.permute.xlu1 %746 }
 0x101   : > { %5327 = vst [vmem:[#allocation16_spill] sm:$0xff] %v4313_v9  ;;  %3402 = vset.pattern.permute.xlu1 %v5285_v3  ;;  %v4329_v3 = vpop.permute.xlu0 %1032  ;;  %v1129_v9 = vmul.f32 %v4290_v45, %v4201_v25 }
 0x102   : > { %798 = vperm.xlu1 %3402, %v4086_v49  }
 0x105   : > { %v4319_v4 = vpop.permute.xlu1 %1020 }
 0x106   : > { %5328 = vst [vmem:[#allocation17_spill] sm:$0xff] %v4319_v4  ;;  %802 = vperm.xlu1 %3402, %v4037_v31  }
 0x10a   : > { %3403 = vset.pattern.permute.xlu1 %v5289_v2  ;;  %v4326_v48 = vpop.permute.xlu1 %520  ;;  %v4341_v2 = vpop.permute.xlu0 %1040 }
 0x10b   : > { %5329 = vst [vmem:[#allocation18_spill] sm:$0xff] %v4326_v48  ;;  %1076 = vperm.xlu1 %3403, %v4037_v31   ;;  %5331 = vst [vmem:[#allocation20_spill] sm:$0xff] %v4341_v2  ;;  %v848_v31 = vmul.f32 %v4259_v41, %v4108_v55  ;;  %v640_v48 = vmul.f32 %v4265_v59, %v4213_v10  ;;  %v851_v55 = vmul.f32 %v4256_v54, %v4159_v11  ;;  %v1762_v10 = vld [vmem:[%s5279_s4] sm:$0x3] }
 0x10c   : > { %v1123_v11 = vmul.f32 %v4290_v45, %v4131_v63  ;;  %v4387_v53 = vrot.slane %v1762_v10, %v4242_v42  ;;  %v644_v63 = vmul.f32 %v4265_v59, %v4219_v32  ;;  %v4539_v42 = vmul.f32 %v4336_v20, %v4323_v40 }
 0x10d   : > { %v915_v2 = vadd.f32 %v851_v55, %v641_v18  ;;  %v645_v55 = vmul.f32 %v4262_v56, %v4194_v23 }
 0x10e   : > { %v4389_v36 = vpop.permute.xlu0 %1048 }
 0x10f   : > { %3404 = vset.pattern.permute.xlu1 %v5291_v19  ;;  %v4332_v49 = vpop.permute.xlu1 %750  ;;  %v849_v19 = vmul.f32 %v4256_v54, %v4117_v57  ;;  %v1130_v57 = vmul.f32 %v4336_v20, %v4201_v25  ;;  %v914_v25 = vadd.f32 %v850_v22, %v640_v48  ;;  %v855_v22 = vmul.f32 %v4256_v54, %v4199_v24 }
 0x110   : > { %5330 = vst [vmem:[#allocation19_spill] sm:$0xff] %v4332_v49  ;;  %590 = vperm.xlu1 %3404, %v4097_v52   ;;  %v1126_v49 = vmul.f32 %v4336_v20, %v4191_v61  ;;  %v5333_v61 = vmov 1   ;;  %v4406_v48 = vadd.f32 %v1121_v7, %v911_v6  ;;  %v4423_v7 = vadd.f32 %v1125_v28, %v915_v2 }
 0x111   : > { %v913_v12 = vadd.f32 %v849_v19, %v639_v62  ;;  %v4396_v19 = vrot.slane %v1762_v10, %v4238_v37  ;;  %v856_v62 = vmul.f32 %v4259_v41, %v4199_v24  ;;  %v4421_v6 = vadd.f32 %v1124_v43, %v914_v25 }
 0x112   : > { %v647_v24 = vmul.f32 %v4262_v56, %v4225_v34  ;;  %v4435_v10 = vpop.permute.xlu0 %1056  ;;  %v918_v43 = vadd.f32 %v854_v1, %v644_v63  ;;  %v919_v2 = vadd.f32 %v855_v22, %v645_v55  ;;  %v652_v28 = vmul.f32 %v4265_v59, %v4233_v15 }
 0x113   : > { %v4367_v4 = vpop.permute.xlu1 %754  ;;  %v4415_v32 = vadd.f32 %v1123_v11, %v913_v12  ;;  %v5334_v11 = vmov 2   ;;  %v4448_v25 = vmul.f32 %v4265_v59, %v4251_v51  ;;  %v858_v63 = vmul.f32 %v4259_v41, %v4204_v26 }
 0x114   : > { %5332 = vst [vmem:[#allocation21_spill] sm:$0xff] %v4367_v4  ;;  %3406 = vset.pattern.permute.xlu1 %v5333_v61  ;;  %v912_v4 = vadd.f32 %v848_v31, %v638_v27  ;;  %v853_v31 = vmul.f32 %v4256_v54, %v4168_v13  ;;  %v1127_v27 = vmul.f32 %v4290_v45, %v4183_v21 }
 0x115   : > { %806 = vperm.xlu1 %3406, %v4097_v52   ;;  %v916_v52 = vadd.f32 %v852_v17, %v642_v47  ;;  %v1128_v13 = vmul.f32 %v4336_v20, %v4183_v21  ;;  %v646_v17 = vmul.f32 %v4265_v59, %v4194_v23  ;;  %v651_v21 = vmul.f32 %v4262_v56, %v4233_v15 }
 0x116   : > { %v4413_v47 = vadd.f32 %v1122_v50, %v912_v4  ;;  %v917_v12 = vadd.f32 %v853_v31, %v643_v5  ;;  %v648_v50 = vmul.f32 %v4265_v59, %v4225_v34  ;;  %v857_v23 = vmul.f32 %v4256_v54, %v4204_v26 }
 0x117   : > { %v4429_v4 = vadd.f32 %v1126_v49, %v916_v52  ;;  %v920_v34 = vadd.f32 %v856_v62, %v646_v17  ;;  %v4452_v31 = vmul.f32 %v4262_v56, %v4269_v0  ;;  %v859_v15 = vmul.f32 %v4256_v54, %v4222_v33 }
 0x118   : > { %v4404_v18 = vpop.permute.xlu1 %1028  ;;  %v4444_v5 = vadd.f32 %v1127_v27, %v917_v12  ;;  %v4457_v52 = vadd.f32 %v1128_v13, %v918_v43  ;;  %v4463_v1 = vmul.f32 %v4265_v59, %v4269_v0  ;;  %v4467_v51 = vmul.f32 %v4262_v56, %v4288_v44 }
 0x119   : > { %810 = vperm.xlu1 %3406, %v4052_v38   ;;  %v860_v22 = vmul.f32 %v4259_v41, %v4222_v33  ;;  %v1131_v27 = vmul.f32 %v4290_v45, %v4210_v29  ;;  %v649_v26 = vmul.f32 %v4262_v56, %v4216_v30  ;;  %v4479_v62 = vadd.f32 %v1129_v9, %v919_v2 }
 0x11a   : > { %v1132_v0 = vmul.f32 %v4336_v20, %v4210_v29  ;;  %v650_v13 = vmul.f32 %v4265_v59, %v4216_v30  ;;  %v4485_v55 = vadd.f32 %v1130_v57, %v920_v34  ;;  %v921_v33 = vadd.f32 %v857_v23, %v647_v24  ;;  %v4496_v29 = vpop.permute.xlu0 %545 }
 0x11b   : > { %v1133_v17 = vmul.f32 %v4290_v45, %v4305_v46  ;;  %v862_v12 = vmul.f32 %v4259_v41, %v4227_v35  ;;  %v5336_v9 = vmov 0   ;;  %v923_v2 = vadd.f32 %v859_v15, %v649_v26 }
 0x11c   : > { %v4500_v30 = vmul.f32 %v4262_v56, %v4299_v60  ;;  %v1134_v57 = vmul.f32 %v4336_v20, %v4305_v46  ;;  %v922_v24 = vadd.f32 %v858_v63, %v648_v50  ;;  %v924_v23 = vadd.f32 %v860_v22, %v650_v13 }
 0x11d   : > { %3407 = vset.pattern.permute.xlu1 %v5334_v11  ;;  %v4442_v49 = vpop.permute.xlu1 %530  ;;  %v1135_v34 = vmul.f32 %v4290_v45, %v4235_v39  ;;  %v1136_v15 = vmul.f32 %v4336_v20, %v4235_v39  ;;  %v4513_v26 = vadd.f32 %v1131_v27, %v921_v33  ;;  %v1137_v37 = vmul.f32 %v4290_v45, %v4311_v8 }
 0x11e   : > { %5335 = vst [vmem:[#allocation22_spill] sm:$0xff] %v4442_v49  ;;  %1084 = vperm.xlu1 %3407, %v4052_v38   ;;  %v4475_v38 = vmul.f32 %v4265_v59, %v4288_v44  ;;  %v861_v44 = vmul.f32 %v4256_v54, %v4227_v35  ;;  %5338 = vst [vmem:[#allocation24_spill] sm:$0xff] %v4500_v30  ;;  %v4507_v35 = vmul.f32 %v4265_v59, %v4299_v60  ;;  %v556_v33 = vpop.permute.xlu0 %555  ;;  %v5350_v30 = vld [vmem:[#allocation14_spill] sm:$0xff] }
 0x11f   : > { %v1138_v46 = vmul.f32 %v4336_v20, %v4311_v8  ;;  %v4521_v50 = vmul.f32 %v4290_v45, %v4317_v14  ;;  %v4523_v60 = vadd.f32 %v1132_v0, %v922_v24  ;;  %v4527_v63 = vmul.f32 %v4336_v20, %v4317_v14 }
 0x120   : > { %5339 = vst [vmem:[#allocation25_spill] sm:$0xff] %v4507_v35  ;;  %v4531_v39 = vadd.f32 %v1133_v17, %v923_v2  ;;  %v925_v27 = vadd.f32 %v861_v44, %v651_v21  ;;  %v926_v13 = vadd.f32 %v862_v12, %v652_v28  ;;  %v4535_v8 = vmul.f32 %v4290_v45, %v4323_v40  ;;  %v5343_v44 = vld [vmem:[#allocation15_spill] sm:$0xff]  ;;  %v5344_v2 = vld [vmem:[#allocation20_spill] sm:$0xff] }
 0x121   : > { %v4543_v0 = vmul.f32 %v4290_v45, %v4329_v3  ;;  %v4546_v14 = vadd.f32 %v1134_v57, %v924_v23  ;;  %v866_v21 = vmul.f32 %v4259_v41, %v4280_v16  ;;  %v4552_v28 = vmul.f32 %v4336_v20, %v4329_v3 }
 0x122   : > { %3408 = vset.pattern.permute.xlu1 %v5336_v9  ;;  %v4494_v43 = vpop.permute.xlu1 %758  ;;  %v4555_v17 = vadd.f32 %v1135_v34, %v925_v27  ;;  %v4557_v40 = vadd.f32 %v1136_v15, %v926_v13  ;;  %v867_v12 = vmul.f32 %v4256_v54, %v5343_v44  ;;  %v4563_v57 = vmul.f32 %v4290_v45, %v5344_v2  ;;  %v5347_v34 = vld [vmem:[#allocation10_spill] sm:$0xff]  ;;  %v5348_v27 = vld [vmem:[#allocation11_spill] sm:$0xff] }
 0x123   : > { %5337 = vst [vmem:[#allocation23_spill] sm:$0xff] %v4494_v43  ;;  %600 = vperm.xlu1 %3408, %v4121_v58   ;;  %5341 = vst [vmem:[#allocation27_spill] sm:$0xff] %v4543_v0  ;;  %v4567_v16 = vmul.f32 %v4336_v20, %v5344_v2  ;;  %v4571_v3 = vmul.f32 %v4290_v45, %v4389_v36  ;;  %v4577_v23 = vmul.f32 %v4336_v20, %v4389_v36  ;;  %v566_v2 = vpop.permute.xlu0 %565 }
 0x124   : > { %5342 = vst [vmem:[#allocation28_spill] sm:$0xff] %v4552_v28  ;;  %v4580_v15 = vadd.f32 %v1137_v37, %v5347_v34  ;;  %v4583_v13 = vadd.f32 %v1138_v46, %v5348_v27  ;;  %v5349_v28 = vld [vmem:[#allocation12_spill] sm:$0xff]  ;;  %v657_v0 = vmul.f32 %v4262_v56, %v5350_v30  ;;  %v4594_v36 = vmul.f32 %v4290_v45, %v4435_v10  ;;  %v5353_v34 = vld [vmem:[#allocation5_spill] sm:$0xff] }
 0x125   : > { %5345 = vst [vmem:[#allocation15_spill] sm:$0xff] %v4571_v3  ;;  %5346 = vst [vmem:[#allocation20_spill] sm:$0xff] %v4577_v23  ;;  %v1140_v35 = vmul.f32 %v4336_v20, %v5349_v28  ;;  %v930_v37 = vadd.f32 %v866_v21, %v4448_v25  ;;  %v658_v46 = vmul.f32 %v4265_v59, %v5350_v30 }
 0x126   : > { %v4529_v22 = vpop.permute.xlu1 %762  ;;  %5352 = vst [vmem:[#allocation11_spill] sm:$0xff] %v4594_v36  ;;  %v4611_v30 = vmul.f32 %v4262_v56, %v4496_v29 }
 0x127   : > { %5340 = vst [vmem:[#allocation26_spill] sm:$0xff] %v4529_v22  ;;  %3409 = vset.pattern.permute.xlu1 %v5333_v61 }
 0x128   : > { %814 = vperm.xlu1 %3409, %v4121_v58   ;;  %v868_v58 = vmul.f32 %v4259_v41, %v5343_v44 }
 0x12a   : > { %v1603_v24 = vpop.f32.mrb[0].mxu0 }
 0x12b   : > { %v4589_v22 = vpop.permute.xlu1 %1036  ;;  %v1604_v44 = vadd.f32 %v1603_v24, %v4406_v48  ;;  %v1605_v49 = vpop.f32.mrb[1].mxu0  ;;  %v931_v24 = vadd.f32 %v867_v12, %v657_v0 }
 0x12c   : > { %5351 = vst [vmem:[#allocation10_spill] sm:$0xff] %v4589_v22  ;;  %818 = vperm.xlu1 %3409, %v5353_v34   ;;  %v1606_v28 = vadd.f32 %v1605_v49, %v4413_v47  ;;  %v1607_v27 = vpop.f32.mrb[2].mxu0  ;;  %v4603_v22 = vmul.f32 %v4336_v20, %v4435_v10  ;;  %v4605_v48 = vpop.f32.mrb[0].mxu1  ;;  %v932_v47 = vadd.f32 %v868_v58, %v658_v46  ;;  %v5355_v49 = vld [vmem:[#allocation16_spill] sm:$0xff] }
 0x12d   : > { %v1774_v23 = vadd.f32 %v4387_v53, %v1604_v44  ;;  %v1608_v36 = vadd.f32 %v1607_v27, %v4415_v32  ;;  %v1609_v25 = vpop.f32.mrb[3].mxu0  ;;  %v4613_v21 = vpop.f32.mrb[1].mxu1  ;;  %v869_v3 = vmul.f32 %v4256_v54, %v5355_v49  ;;  %v870_v32 = vmul.f32 %v4259_v41, %v5355_v49 }
 0x12e   : > { %5354 = vst [vmem:[#allocation12_spill] sm:$0xff] %v4603_v22  ;;  %v1775_v10 = vadd.f32 %v4396_v19, %v1606_v28  ;;  %v1610_v22 = vadd.f32 %v1609_v25, %v4421_v6  ;;  %v4619_v0 = vpop.f32.mrb[2].mxu1  ;;  %v4626_v44 = vmul.f32 %v4265_v59, %v4496_v29  ;;  %v4630_v58 = vadd.f32 %v1140_v35, %v930_v37 }
 0x12f   : > { %v1776_v12 = vadd.f32 %v4387_v53, %v1608_v36  ;;  %v4628_v27 = vpop.f32.mrb[3].mxu1  ;;  %v4635_v28 = vmul.f32 %v4262_v56, %v556_v33  ;;  %v4638_v25 = vmul.f32 %v4265_v59, %v556_v33  ;;  %v4641_v36 = vmul.f32 %v4262_v56, %v566_v2 }
 0x130   : > { %5356 = vst [vmem:[#allocation14_spill] sm:$0xff] %v4630_v58  ;;  %v1777_v46 = vadd.f32 %v4396_v19, %v1610_v22  ;;  %3411 = vset.pattern.permute.xlu1 %v5334_v11  ;;  %v541_v6 = vpop.permute.xlu1 %540  ;;  %v1838_v29 = vmax.f32 %v1774_v23, 0.0  ;;  %v4645_v35 = vadd.f32 %v4521_v50, %v931_v24  ;;  %v4648_v22 = vmul.f32 %v4265_v59, %v566_v2  ;;  %v5363_v23 = vld [vmem:[#allocation17_spill] sm:$0xff] }
 0x131   : > { %5357 = vst [vmem:[#allocation5_spill] sm:$0xff] %v4635_v28  ;;  %5358 = vst [vmem:[#allocation16_spill] sm:$0xff] %v4638_v25  ;;  %v1840_v49 = vmax.f32 %v1776_v12, 0.0  ;;  %1092 = vperm.xlu1 %3411, %v5353_v34   ;;  %v933_v37 = vadd.f32 %v869_v3, %v4452_v31  ;;  %v1839_v58 = vmax.f32 %v1775_v10, 0.0  ;;  %v4652_v33 = vadd.f32 %v4527_v63, %v932_v47 }
 0x132   : > { %5359 = vst [vmem:[#allocation29_spill] sm:$0xff] %v4641_v36  ;;  %5360 = vst [vmem:[#allocation30_spill] sm:$0xff] %v4645_v35  ;;  %v1841_v28 = vmax.f32 %v1777_v46, 0.0  ;;  %v1613_v43 = vpop.f32.mrb[4].mxu0  ;;  %v934_v36 = vadd.f32 %v870_v32, %v4463_v1  ;;  %v1143_v12 = vmul.f32 %v4290_v45, %v5363_v23  ;;  %v1144_v2 = vmul.f32 %v4336_v20, %v5363_v23 }
 0x133   : > { %5361 = vst [vmem:[#allocation31_spill] sm:$0xff] %v4648_v22  ;;  %5362 = vst [vmem:[#allocation32_spill] sm:$0xff] %v4652_v33  ;;  %v1902_v34 = vpack.c.bf16 %v1840_v49, %v1838_v29  ;;  %v1614_v50 = vadd.f32 %v1613_v43, %v4423_v7  ;;  %v1615_v24 = vpop.f32.mrb[5].mxu0  ;;  %v5364_v22 = vld [vmem:[#allocation19_spill] sm:$0xff]  ;;  %v669_v32 = vmul.f32 %v4262_v56, %v541_v6 }
 0x134   : > { %v871_v31 = vmul.f32 %v4256_v54, %v5364_v22  ;;  %v1616_v3 = vadd.f32 %v1615_v24, %v4429_v4  ;;  %v1617_v10 = vpop.f32.mrb[6].mxu0  ;;  %v1903_v63 = vpack.c.bf16 %v1841_v28, %v1839_v58  ;;  %v4663_v47 = vpop.f32.mrb[4].mxu1  ;;  %v872_v1 = vmul.f32 %v4259_v41, %v5364_v22  ;;  %v5366_v28 = vld [vmem:[#allocation7_spill] sm:$0xff]  ;;  %v5368_v24 = vld [vmem:[#allocation18_spill] sm:$0xff] }
 0x135   : > { %5365 = vst [vmem:[#allocation17_spill] sm:$0xff] %v4663_v47  ;;  %v1778_v7 = vadd.f32 %v4387_v53, %v1614_v50  ;;  %3412 = vset.pattern.permute.xlu1 %v5336_v9  ;;  %v767_v43 = vpop.permute.xlu1 %766  ;;  %v1618_v46 = vadd.f32 %v1617_v10, %v4444_v5  ;;  %v1619_v29 = vpop.f32.mrb[7].mxu0  ;;  %v670_v49 = vmul.f32 %v4265_v59, %v541_v6 }
 0x136   : > { %v879_v4 = vmul.f32 %v4256_v54, %v767_v43  ;;  %v880_v58 = vmul.f32 %v4259_v41, %v767_v43  ;;  %610 = vperm.xlu1 %3412, %v5366_v28   ;;  %v1620_v22 = vadd.f32 %v1619_v29, %v4457_v52  ;;  %v4676_v23 = vpop.f32.mrb[5].mxu1  ;;  %v661_v50 = vmul.f32 %v4262_v56, %v5368_v24 }
 0x137   : > { %5367 = vst [vmem:[#allocation19_spill] sm:$0xff] %v4676_v23  ;;  %v1779_v9 = vadd.f32 %v4396_v19, %v1616_v3  ;;  %v1780_v5 = vadd.f32 %v4387_v53, %v1618_v46  ;;  %2170 = vmatprep.mubr.bf16.mxu1 %v1903_v63  ;;  %v4682_v10 = vpop.f32.mrb[6].mxu1  ;;  %v4684_v6 = vadd.f32 %v1143_v12, %v933_v37  ;;  %v1842_v23 = vmax.f32 %v1778_v7, 0.0 }
 0x138   : > { %5369 = vst [vmem:[#allocation7_spill] sm:$0xff] %v4682_v10  ;;  %v662_v43 = vmul.f32 %v4265_v59, %v5368_v24  ;;  %v943_v33 = vadd.f32 %v879_v4, %v669_v32  ;;  %v944_v35 = vadd.f32 %v880_v58, %v670_v49  ;;  %v1781_v52 = vadd.f32 %v4396_v19, %v1620_v22  ;;  %v4689_v29 = vpop.f32.mrb[7].mxu1 }
 0x139   : > { %2171 = vmatmul.mubr.bf16.vlgmr.msra.gmra.mrb[32].mxu1 %v1902_v34  ;;  %v935_v25 = vadd.f32 %v871_v31, %v661_v50  ;;  %v1844_v3 = vmax.f32 %v1780_v5, 0.0  ;;  %v771_v47 = vpop.permute.xlu1 %770  ;;  %v4691_v46 = vadd.f32 %v1144_v2, %v934_v36  ;;  %v1843_v49 = vmax.f32 %v1779_v9, 0.0  ;;  %v5370_v36 = vld [vmem:[#allocation21_spill] sm:$0xff] }
 0x13a   : > { %v936_v63 = vadd.f32 %v872_v1, %v662_v43  ;;  %v1845_v10 = vmax.f32 %v1781_v52, 0.0  ;;  %v881_v37 = vmul.f32 %v4256_v54, %v771_v47  ;;  %v1217_v12 = vadd.f32 %v4563_v57, %v943_v33  ;;  %3413 = vset.pattern.permute.xlu1 %v5333_v61  ;;  %v1623_v32 = vpop.f32.mrb[8].mxu0 }
 0x13b   : > { %v1218_v34 = vadd.f32 %v4567_v16, %v944_v35  ;;  %822 = vperm.xlu1 %3413, %v5366_v28   ;;  %v1624_v31 = vadd.f32 %v1623_v32, %v4479_v62  ;;  %v1625_v7 = vpop.f32.mrb[9].mxu0  ;;  %v1904_v4 = vpack.c.bf16 %v1844_v3, %v1842_v23  ;;  %v873_v2 = vmul.f32 %v4256_v54, %v5370_v36 }
 0x13c   : > { %v4703_v1 = vmul.f32 %v4259_v41, %v5370_v36  ;;  %v882_v57 = vmul.f32 %v4259_v41, %v771_v47  ;;  %v1626_v61 = vadd.f32 %v1625_v7, %v4485_v55  ;;  %v1627_v33 = vpop.f32.mrb[10].mxu0  ;;  %v4707_v58 = vpop.f32.mrb[8].mxu1  ;;  %v1905_v28 = vpack.c.bf16 %v1845_v10, %v1843_v49 }
 0x13d   : > { %v1782_v16 = vadd.f32 %v4387_v53, %v1624_v31  ;;  %v1628_v62 = vadd.f32 %v1627_v33, %v4513_v26  ;;  %v1629_v35 = vpop.f32.mrb[11].mxu0  ;;  %v4712_v22 = vadd.f32 %v4535_v8, %v935_v25  ;;  %v4714_v23 = vpop.f32.mrb[9].mxu1  ;;  %v945_v24 = vadd.f32 %v881_v37, %v4611_v30  ;;  %v5371_v25 = vld [vmem:[#allocation6_spill] sm:$0xff] }
 0x13e   : > { %v1684_v47 = vadd.f32 %v4605_v48, %v1217_v12  ;;  %v1686_v55 = vadd.f32 %v4613_v21, %v1218_v34  ;;  %v1045_v50 = vpop.permute.xlu1 %1044  ;;  %v1630_v9 = vadd.f32 %v1629_v35, %v4523_v60  ;;  %v4720_v5 = vpop.f32.mrb[10].mxu1  ;;  %v1783_v26 = vadd.f32 %v4396_v19, %v1626_v61  ;;  %2180 = vmatprep.mubr.bf16.mxu1 %v1905_v28 }
 0x13f   : > { %v1784_v10 = vadd.f32 %v4387_v53, %v1628_v62  ;;  %v1155_v8 = vmul.f32 %v4290_v45, %v1045_v50  ;;  %826 = vperm.xlu1 %3413, %v5371_v25   ;;  %v4726_v43 = vpop.f32.mrb[11].mxu1  ;;  %v946_v48 = vadd.f32 %v882_v57, %v4626_v44  ;;  %v1156_v30 = vmul.f32 %v4336_v20, %v1045_v50 }
 0x140   : > { %v1785_v21 = vadd.f32 %v4396_v19, %v1630_v9  ;;  %v4732_v60 = vadd.f32 %v4539_v42, %v936_v63  ;;  %v4735_v52 = vadd.f32 %v873_v2, %v4467_v51  ;;  %v1846_v3 = vmax.f32 %v1782_v16, 0.0 }
 0x141   : > { %2181 = vmatmul.mubr.bf16.gmra.mrb[36].mxu1 %v1904_v4  ;;  %v1848_v37 = vmax.f32 %v1784_v10, 0.0  ;;  %v1219_v12 = vadd.f32 %v1155_v8, %v945_v24  ;;  %v1806_v32 = vadd.f32 %v4387_v53, %v1684_v47  ;;  %v1807_v49 = vadd.f32 %v4396_v19, %v1686_v55 }
 0x142   : > { %v1849_v34 = vmax.f32 %v1785_v21, 0.0  ;;  %v1220_v44 = vadd.f32 %v1156_v30, %v946_v48  ;;  %v1633_v31 = vpop.f32.mrb[12].mxu0  ;;  %v1847_v7 = vmax.f32 %v1783_v26, 0.0  ;;  %v1147_v2 = vmul.f32 %v4290_v45, %v4404_v18 }
 0x143   : > { %v1688_v36 = vadd.f32 %v4619_v0, %v1219_v12  ;;  %3415 = vset.pattern.permute.xlu1 %v5334_v11  ;;  %v551_v42 = vpop.permute.xlu1 %550  ;;  %v1634_v63 = vadd.f32 %v1633_v31, %v4531_v39  ;;  %v1635_v51 = vpop.f32.mrb[13].mxu0  ;;  %v1906_v4 = vpack.c.bf16 %v1848_v37, %v1846_v3  ;;  %v1148_v57 = vmul.f32 %v4336_v20, %v4404_v18 }
 0x144   : > { %v1690_v61 = vadd.f32 %v4628_v27, %v1220_v44  ;;  %1100 = vperm.xlu1 %3415, %v5371_v25   ;;  %v1636_v33 = vadd.f32 %v1635_v51, %v4546_v14  ;;  %v1637_v0 = vpop.f32.mrb[14].mxu0  ;;  %v4749_v16 = vpop.f32.mrb[12].mxu1  ;;  %v1907_v28 = vpack.c.bf16 %v1849_v34, %v1847_v7  ;;  %v1870_v18 = vmax.f32 %v1806_v32, 0.0 }
 0x145   : > { %v1808_v11 = vadd.f32 %v4387_v53, %v1688_v36  ;;  %v1786_v39 = vadd.f32 %v4387_v53, %v1634_v63  ;;  %v1638_v62 = vadd.f32 %v1637_v0, %v4555_v17  ;;  %v1639_v35 = vpop.f32.mrb[15].mxu0  ;;  %v4754_v24 = vpop.f32.mrb[13].mxu1  ;;  %v1871_v50 = vmax.f32 %v1807_v49, 0.0 }
 0x146   : > { %v1809_v27 = vadd.f32 %v4396_v19, %v1690_v61  ;;  %v1787_v47 = vadd.f32 %v4396_v19, %v1636_v33  ;;  %v1640_v14 = vadd.f32 %v1639_v35, %v4557_v40  ;;  %v4759_v55 = vpop.f32.mrb[14].mxu1  ;;  %v673_v26 = vmul.f32 %v4262_v56, %v551_v42  ;;  %2190 = vmatprep.mubr.bf16.mxu1 %v1907_v28 }
 0x147   : > { %v1872_v9 = vmax.f32 %v1808_v11, 0.0  ;;  %v1788_v10 = vadd.f32 %v4387_v53, %v1638_v62  ;;  %v4763_v17 = vpop.f32.mrb[15].mxu1  ;;  %v674_v25 = vmul.f32 %v4265_v59, %v551_v42  ;;  %v1850_v48 = vmax.f32 %v1786_v39, 0.0 }
 0x148   : > { %v1873_v8 = vmax.f32 %v1809_v27, 0.0  ;;  %v1789_v30 = vadd.f32 %v4396_v19, %v1640_v14  ;;  %v775_v21 = vpop.permute.xlu1 %774  ;;  %v938_v32 = vadd.f32 %v4703_v1, %v4475_v38  ;;  %v1851_v49 = vmax.f32 %v1787_v47, 0.0  ;;  %v5372_v1 = vld [vmem:[#allocation23_spill] sm:$0xff]  ;;  %v5374_v47 = vld [vmem:[#allocation13_spill] sm:$0xff] }
 0x149   : > { %2191 = vmatmul.mubr.bf16.gmra.mrb[40].mxu1 %v1906_v4  ;;  %v1852_v40 = vmax.f32 %v1788_v10, 0.0  ;;  %v883_v3 = vmul.f32 %v4256_v54, %v775_v21  ;;  %v884_v37 = vmul.f32 %v4259_v41, %v775_v21  ;;  %v4769_v12 = vpack.c.bf16 %v1872_v9, %v1870_v18 }
 0x14a   : > { %v1853_v34 = vmax.f32 %v1789_v30, 0.0  ;;  %v1643_v44 = vpop.f32.mrb[16].mxu0  ;;  %v4773_v31 = vpack.c.bf16 %v1873_v8, %v1871_v50  ;;  %v4778_v11 = vadd.f32 %v1147_v2, %v4735_v52  ;;  %v4780_v38 = vadd.f32 %v1148_v57, %v938_v32  ;;  %v5375_v52 = vld [vmem:[#allocation20_spill] sm:$0xff]  ;;  %v5376_v57 = vld [vmem:[#allocation14_spill] sm:$0xff] }
 0x14b   : > { %v947_v7 = vadd.f32 %v883_v3, %v673_v26  ;;  %v948_v36 = vadd.f32 %v884_v37, %v674_v25  ;;  %v1644_v42 = vadd.f32 %v1643_v44, %v4580_v15  ;;  %v1645_v63 = vpop.f32.mrb[17].mxu0  ;;  %v1908_v51 = vpack.c.bf16 %v1852_v40, %v1850_v48  ;;  %v5373_v15 = vld [vmem:[#allocation15_spill] sm:$0xff]  ;;  %v5377_v26 = vld [vmem:[#allocation22_spill] sm:$0xff]  ;;  %v5378_v48 = vld [vmem:[#allocation17_spill] sm:$0xff] }
 0x14c   : > { %v779_v4 = vpop.permute.xlu1 %778  ;;  %v1646_v61 = vadd.f32 %v1645_v63, %v4583_v13  ;;  %v1647_v33 = vpop.f32.mrb[18].mxu0  ;;  %v1909_v0 = vpack.c.bf16 %v1853_v34, %v1851_v49  ;;  %v875_v39 = vmul.f32 %v4256_v54, %v5372_v1  ;;  %v665_v10 = vmul.f32 %v4262_v56, %v5377_v26  ;;  %v5379_v37 = vld [vmem:[#allocation19_spill] sm:$0xff]  ;;  %v5381_v63 = vld [vmem:[#allocation5_spill] sm:$0xff] }
 0x14d   : > { %v1790_v62 = vadd.f32 %v4387_v53, %v1644_v42  ;;  %v885_v35 = vmul.f32 %v4256_v54, %v779_v4  ;;  %v1221_v28 = vadd.f32 %v5373_v15, %v947_v7  ;;  %v1649_v18 = vpop.f32.mrb[19].mxu0  ;;  %v4787_v27 = vpop.f32.mrb[16].mxu1  ;;  %v1648_v14 = vadd.f32 %v1647_v33, %v5374_v47  ;;  %v5380_v7 = vld [vmem:[#allocation26_spill] sm:$0xff] }
 0x14e   : > { %v1791_v13 = vadd.f32 %v4396_v19, %v1646_v61  ;;  %v1222_v2 = vadd.f32 %v5375_v52, %v948_v36  ;;  %v1650_v50 = vadd.f32 %v1649_v18, %v5376_v57  ;;  %2200 = vmatprep.mubr.bf16.mxu1 %v1909_v0  ;;  %v4793_v9 = vpop.f32.mrb[17].mxu1  ;;  %v666_v8 = vmul.f32 %v4265_v59, %v5377_v26  ;;  %v3560_v33 = vld [vmem:[%s5282_s7] ss:$8 sps:$4 sm:$0xff]   ;;  %v3562_v0 = vld [vmem:[%s5282_s7 + $0x4] ss:$8 sps:$4 sm:$0xff]  }
 0x14f   : > { %v886_v25 = vmul.f32 %v4259_v41, %v779_v4  ;;  %v1694_v30 = vadd.f32 %v5378_v48, %v1221_v28  ;;  %v4801_v21 = vpop.f32.mrb[18].mxu1  ;;  %v876_v40 = vmul.f32 %v4259_v41, %v5372_v1  ;;  %v1792_v3 = vadd.f32 %v4387_v53, %v1648_v14  ;;  %v5383_v52 = vld [vmem:[#allocation30_spill] sm:$0xff]  ;;  %2619 = vmatprep.subr.bf16.mxu0 %v3562_v0 }
 0x150   : > { %v1696_v32 = vadd.f32 %v5379_v37, %v1222_v2  ;;  %v1793_v49 = vadd.f32 %v4396_v19, %v1650_v50  ;;  %v4808_v34 = vpop.f32.mrb[19].mxu1  ;;  %v939_v44 = vadd.f32 %v875_v39, %v665_v10  ;;  %v877_v36 = vmul.f32 %v4256_v54, %v5380_v7  ;;  %v5384_v10 = vld [vmem:[#allocation32_spill] sm:$0xff]  ;;  %2620 = vmatpush1.bf16.msra.mxu0 %v3560_v33  ;;  %v5385_v33 = vld [vmem:[#allocation7_spill] sm:$0xff] }
 0x151   : > { %2201 = vmatmul.mubr.bf16.gmra.mrb[44].mxu1 %v1908_v51  ;;  %v1854_v42 = vmax.f32 %v1790_v62, 0.0  ;;  %v949_v4 = vadd.f32 %v885_v35, %v5381_v63  ;;  %v1053_v61 = vpop.permute.xlu1 %1052  ;;  %v1855_v1 = vmax.f32 %v1791_v13, 0.0  ;;  %v1856_v51 = vmax.f32 %v1792_v3, 0.0  ;;  %v3565_v62 = vld [vmem:[%s5282_s7 + $0x14] ss:$8 sps:$4 sm:$0xff]   ;;  %v4829_v13 = vpop.permute.xlu0 %575 }
 0x152   : > { %v1857_v15 = vmax.f32 %v1793_v49, 0.0  ;;  %v1159_v39 = vmul.f32 %v4290_v45, %v1053_v61  ;;  %v1653_v28 = vpop.f32.mrb[20].mxu0  ;;  %v5382_v35 = vld [vmem:[#allocation16_spill] sm:$0xff]  ;;  %v4825_v47 = vadd.f32 %v4387_v53, %v1694_v30  ;;  %v1160_v14 = vmul.f32 %v4336_v20, %v1053_v61  ;;  %2621 = vmatprep.subr.bf16.mxu0 %v3565_v62 }
 0x153   : > { %v950_v18 = vadd.f32 %v886_v25, %v5382_v35  ;;  %v1654_v2 = vadd.f32 %v1653_v28, %v5383_v52  ;;  %v1655_v57 = vpop.f32.mrb[21].mxu0  ;;  %v4832_v50 = vadd.f32 %v4396_v19, %v1696_v32  ;;  %v3563_v30 = vld [vmem:[%s5282_s7 + $0x10] ss:$8 sps:$4 sm:$0xff]   ;;  %v1910_v32 = vpack.c.bf16 %v1856_v51, %v1854_v42 }
 0x154   : > { %v1223_v26 = vadd.f32 %v1159_v39, %v949_v4  ;;  %v1656_v48 = vadd.f32 %v1655_v57, %v5384_v10  ;;  %v1657_v3 = vpop.f32.mrb[22].mxu0  ;;  %v1911_v37 = vpack.c.bf16 %v1857_v15, %v1855_v1  ;;  %v4835_v25 = vpop.f32.mrb[20].mxu1  ;;  %v3568_v4 = vld [vmem:[%s5282_s7 + $0x24] ss:$8 sps:$4 sm:$0xff]   ;;  %v4847_v1 = vadd.f32 %v876_v40, %v666_v8  ;;  %v5387_v52 = vld [vmem:[#allocation24_spill] sm:$0xff]  ;;  %2622 = vmatpush1.bf16.msra.mxu0 %v3563_v30 }
 0x155   : > { %v1794_v49 = vadd.f32 %v4387_v53, %v1654_v2  ;;  %v1224_v63 = vadd.f32 %v1160_v14, %v950_v18  ;;  %v1658_v61 = vadd.f32 %v1657_v3, %v4684_v6  ;;  %v1659_v0 = vpop.f32.mrb[23].mxu0  ;;  %v4842_v28 = vpop.f32.mrb[21].mxu1  ;;  %v878_v42 = vmul.f32 %v4259_v41, %v5380_v7  ;;  %v5386_v14 = vld [vmem:[#allocation27_spill] sm:$0xff]  ;;  %2623 = vmatprep.subr.bf16.mxu0 %v3568_v4 }
 0x156   : > { %v1698_v15 = vadd.f32 %v5385_v33, %v1223_v26  ;;  %v1795_v39 = vadd.f32 %v4396_v19, %v1656_v48  ;;  %v561_v35 = vpop.permute.xlu1 %560  ;;  %v1660_v18 = vadd.f32 %v1659_v0, %v4691_v46  ;;  %2210 = vmatprep.mubr.bf16.mxu1 %v1911_v37  ;;  %v4852_v6 = vpop.f32.mrb[22].mxu1  ;;  %v4859_v8 = vadd.f32 %v5386_v14, %v939_v44 }
 0x157   : > { %v1700_v51 = vadd.f32 %v4689_v29, %v1224_v63  ;;  %v1796_v62 = vadd.f32 %v4387_v53, %v1658_v61  ;;  %v4861_v40 = vpop.f32.mrb[23].mxu1  ;;  %v4864_v2 = vadd.f32 %v877_v36, %v5387_v52  ;;  %v1874_v46 = vmax.f32 %v4825_v47, 0.0  ;;  %v3566_v29 = vld [vmem:[%s5282_s7 + $0x20] ss:$8 sps:$4 sm:$0xff]   ;;  %v3571_v36 = vld [vmem:[%s5282_s7 + $0x34] ss:$8 sps:$4 sm:$0xff]   ;;  %v4878_v61 = vpop.permute.xlu0 %585 }
 0x158   : > { %v1812_v57 = vadd.f32 %v4387_v53, %v1698_v15  ;;  %v1797_v26 = vadd.f32 %v4396_v19, %v1660_v18  ;;  %v1875_v44 = vmax.f32 %v4832_v50, 0.0  ;;  %v1858_v7 = vmax.f32 %v1794_v49, 0.0  ;;  %2624 = vmatpush1.bf16.msra.mxu0 %v3566_v29 }
 0x159   : > { %2211 = vmatmul.mubr.bf16.gmra.mrb[48].mxu1 %v1910_v32  ;;  %v1813_v10 = vadd.f32 %v4396_v19, %v1700_v51  ;;  %v1860_v48 = vmax.f32 %v1796_v62, 0.0  ;;  %v1859_v3 = vmax.f32 %v1795_v39, 0.0  ;;  %v677_v37 = vmul.f32 %v4262_v56, %v561_v35  ;;  %2625 = vmatprep.subr.bf16.mxu0 %v3571_v36 }
 0x15a   : > { %v1876_v47 = vmax.f32 %v1812_v57, 0.0  ;;  %v1861_v30 = vmax.f32 %v1797_v26, 0.0  ;;  %v1663_v63 = vpop.f32.mrb[24].mxu0  ;;  %v678_v50 = vmul.f32 %v4265_v59, %v561_v35  ;;  %v3569_v35 = vld [vmem:[%s5282_s7 + $0x30] ss:$8 sps:$4 sm:$0xff]  }
 0x15b   : > { %v1877_v0 = vmax.f32 %v1813_v10, 0.0  ;;  %v783_v49 = vpop.permute.xlu1 %782  ;;  %v1664_v32 = vadd.f32 %v1663_v63, %v4712_v22  ;;  %v1665_v33 = vpop.f32.mrb[25].mxu0  ;;  %v1912_v4 = vpack.c.bf16 %v1860_v48, %v1858_v7 }
 0x15c   : > { %v887_v15 = vmul.f32 %v4256_v54, %v783_v49  ;;  %v888_v18 = vmul.f32 %v4259_v41, %v783_v49  ;;  %v1666_v39 = vadd.f32 %v1665_v33, %v4732_v60  ;;  %v1667_v51 = vpop.f32.mrb[26].mxu0  ;;  %v1913_v62 = vpack.c.bf16 %v1861_v30, %v1859_v3  ;;  %v4885_v14 = vpop.f32.mrb[24].mxu1  ;;  %v3574_v60 = vld [vmem:[%s5282_s7 + $0x44] ss:$8 sps:$4 sm:$0xff]   ;;  %2626 = vmatpush1.bf16.msra.mxu0 %v3569_v35 }
 0x15d   : > { %v1798_v52 = vadd.f32 %v4387_v53, %v1664_v32  ;;  %v1668_v22 = vadd.f32 %v1667_v51, %v4778_v11  ;;  %v1669_v57 = vpop.f32.mrb[27].mxu0  ;;  %v4892_v26 = vpack.c.bf16 %v1877_v0, %v1875_v44  ;;  %v4894_v7 = vpack.c.bf16 %v1876_v47, %v1874_v46  ;;  %v4896_v10 = vpop.f32.mrb[25].mxu1  ;;  %v5390_v44 = vld [vmem:[#allocation25_spill] sm:$0xff]  ;;  %v5391_v46 = vld [vmem:[#allocation10_spill] sm:$0xff]  ;;  %v5394_v51 = vld [vmem:[#allocation12_spill] sm:$0xff]  ;;  %2627 = vmatprep.subr.bf16.mxu0 %v3574_v60 }
 0x15e   : > { %5388 = vst [vmem:[#allocation18_spill] sm:$0xff] %v4896_v10  ;;  %v951_v29 = vadd.f32 %v887_v15, %v677_v37  ;;  %v952_v48 = vadd.f32 %v888_v18, %v678_v50  ;;  %v1799_v3 = vadd.f32 %v4396_v19, %v1666_v39  ;;  %v1670_v30 = vadd.f32 %v1669_v57, %v4780_v38  ;;  %v4903_v11 = vpop.f32.mrb[26].mxu1  ;;  %v5393_v18 = vld [vmem:[#allocation11_spill] sm:$0xff]  ;;  %v5396_v60 = vld [vmem:[#allocation29_spill] sm:$0xff] }
 0x15f   : > { %2220 = vmatprep.mubr.bf16.mxu1 %v1913_v62  ;;  %5389 = vst [vmem:[#allocation21_spill] sm:$0xff] %v4903_v11  ;;  %v942_v63 = vadd.f32 %v878_v42, %v5390_v44  ;;  %v1151_v47 = vmul.f32 %v4290_v45, %v5391_v46  ;;  %v1152_v36 = vmul.f32 %v4336_v20, %v5391_v46  ;;  %v787_v49 = vpop.permute.xlu1 %786  ;;  %v4911_v37 = vpop.f32.mrb[27].mxu1  ;;  %v3572_v42 = vld [vmem:[%s5282_s7 + $0x40] ss:$8 sps:$4 sm:$0xff]   ;;  %v1862_v33 = vmax.f32 %v1798_v52, 0.0 }
 0x160   : > { %v1800_v0 = vadd.f32 %v4387_v53, %v1668_v22  ;;  %5392 = vst [vmem:[#allocation6_spill] sm:$0xff] %v4911_v37  ;;  %v1801_v50 = vadd.f32 %v4396_v19, %v1670_v30  ;;  %v889_v38 = vmul.f32 %v4256_v54, %v787_v49  ;;  %v890_v32 = vmul.f32 %v4259_v41, %v787_v49  ;;  %v3577_v22 = vld [vmem:[%s5282_s7 + $0x54] ss:$8 sps:$4 sm:$0xff]  }
 0x161   : > { %2221 = vmatmul.mubr.bf16.gmra.mrb[52].mxu1 %v1912_v4  ;;  %v1225_v39 = vadd.f32 %v5393_v18, %v951_v29  ;;  %v1226_v62 = vadd.f32 %v5394_v51, %v952_v48  ;;  %v1863_v57 = vmax.f32 %v1799_v3, 0.0  ;;  %v5395_v4 = vld [vmem:[#allocation28_spill] sm:$0xff]  ;;  %v1215_v52 = vadd.f32 %v1151_v47, %v4864_v2  ;;  %v4928_v18 = vpop.permute.xlu0 %595  ;;  %v5397_v51 = vld [vmem:[#allocation31_spill] sm:$0xff]  ;;  %2628 = vmatpush1.bf16.msra.mxu0 %v3572_v42 }
 0x162   : > { %v1864_v15 = vmax.f32 %v1800_v0, 0.0  ;;  %v1865_v30 = vmax.f32 %v1801_v50, 0.0  ;;  %v1673_v44 = vpop.f32.mrb[28].mxu0  ;;  %v1214_v35 = vadd.f32 %v5395_v4, %v4847_v1  ;;  %v1216_v0 = vadd.f32 %v1152_v36, %v942_v63  ;;  %v3575_v1 = vld [vmem:[%s5282_s7 + $0x50] ss:$8 sps:$4 sm:$0xff]   ;;  %2629 = vmatprep.subr.bf16.mxu0 %v3577_v22 }
 0x163   : > { %v1674_v46 = vadd.f32 %v1673_v44, %v4859_v8  ;;  %v1675_v49 = vpop.f32.mrb[29].mxu0  ;;  %v953_v48 = vadd.f32 %v889_v38, %v5396_v60  ;;  %v954_v37 = vadd.f32 %v890_v32, %v5397_v51  ;;  %v1704_v8 = vadd.f32 %v4707_v58, %v1225_v39  ;;  %v3580_v32 = vld [vmem:[%s5282_s7 + $0x64] ss:$8 sps:$4 sm:$0xff]  }
 0x164   : > { %v1914_v29 = vpack.c.bf16 %v1864_v15, %v1862_v33  ;;  %v1061_v11 = vpop.permute.xlu1 %1060  ;;  %v1676_v3 = vadd.f32 %v1675_v49, %v1214_v35  ;;  %v1677_v50 = vpop.f32.mrb[30].mxu0  ;;  %v1915_v10 = vpack.c.bf16 %v1865_v30, %v1863_v57  ;;  %v1706_v2 = vadd.f32 %v4714_v23, %v1226_v62 }
 0x165   : > { %v1802_v63 = vadd.f32 %v4387_v53, %v1674_v46  ;;  %v1163_v47 = vmul.f32 %v4290_v45, %v1061_v11  ;;  %v1679_v36 = vpop.f32.mrb[31].mxu0  ;;  %v4939_v38 = vpop.f32.mrb[28].mxu1  ;;  %v1164_v42 = vmul.f32 %v4336_v20, %v1061_v11  ;;  %v1678_v15 = vadd.f32 %v1677_v50, %v1215_v52  ;;  %2630 = vmatpush1.bf16.msra.mxu0 %v3575_v1  ;;  %v3578_v11 = vld [vmem:[%s5282_s7 + $0x60] ss:$8 sps:$4 sm:$0xff]  }
 0x166   : > { %v1803_v33 = vadd.f32 %v4396_v19, %v1676_v3  ;;  %v1680_v58 = vadd.f32 %v1679_v36, %v1216_v0  ;;  %2230 = vmatprep.mubr.bf16.mxu1 %v1915_v10  ;;  %v4946_v23 = vpop.f32.mrb[29].mxu1  ;;  %v1814_v10 = vadd.f32 %v4387_v53, %v1704_v8  ;;  %v1815_v4 = vadd.f32 %v4396_v19, %v1706_v2  ;;  %v1065_v51 = vpop.permute.xlu0 %1064 }
 0x167   : > { %v1227_v39 = vadd.f32 %v1163_v47, %v953_v48  ;;  %v4948_v62 = vpop.f32.mrb[30].mxu1  ;;  %v1804_v57 = vadd.f32 %v4387_v53, %v1678_v15  ;;  %v1228_v30 = vadd.f32 %v1164_v42, %v954_v37  ;;  %v1866_v35 = vmax.f32 %v1802_v63, 0.0  ;;  %2631 = vmatprep.subr.bf16.mxu0 %v3580_v32  ;;  %v3583_v37 = vld [vmem:[%s5282_s7 + $0x74] ss:$8 sps:$4 sm:$0xff]   ;;  %v3586_v63 = vld [vmem:[%s5282_s7 + $0x84] ss:$8 sps:$4 sm:$0xff]  }
 0x168   : > { %v1805_v22 = vadd.f32 %v4396_v19, %v1680_v58  ;;  %v4952_v44 = vpop.f32.mrb[31].mxu1  ;;  %v1867_v52 = vmax.f32 %v1803_v33, 0.0  ;;  %v1878_v8 = vmax.f32 %v1814_v10, 0.0  ;;  %v1165_v42 = vmul.f32 %v4290_v45, %v1065_v51 }
 0x169   : > { %2231 = vmatmul.mubr.bf16.gmra.mrb[56].mxu1 %v1914_v29  ;;  %v1708_v46 = vadd.f32 %v4720_v5, %v1227_v39  ;;  %v571_v49 = vpop.permute.xlu1 %570  ;;  %v1868_v0 = vmax.f32 %v1804_v57, 0.0  ;;  %v1710_v60 = vadd.f32 %v4726_v43, %v1228_v30  ;;  %2632 = vmatpush1.bf16.msra.mxu0 %v3578_v11  ;;  %v3581_v5 = vld [vmem:[%s5282_s7 + $0x70] ss:$8 sps:$4 sm:$0xff]   ;;  %v1879_v43 = vmax.f32 %v1815_v4, 0.0  ;;  %v3584_v30 = vld [vmem:[%s5282_s7 + $0x80] ss:$8 sps:$4 sm:$0xff]  }
 0x16a   : > { %v1869_v29 = vmax.f32 %v1805_v22, 0.0  ;;  %2633 = vmatprep.subr.bf16.mxu0 %v3583_v37  ;;  %v681_v36 = vmul.f32 %v4262_v56, %v571_v49  ;;  %v682_v33 = vmul.f32 %v4265_v59, %v571_v49  ;;  %v1166_v57 = vmul.f32 %v4336_v20, %v1065_v51  ;;  %v3589_v4 = vld [vmem:[%s5282_s7 + $0x94] ss:$8 sps:$4 sm:$0xff]  }
 0x16b   : > { %v1816_v48 = vadd.f32 %v4387_v53, %v1708_v46  ;;  %v1817_v3 = vadd.f32 %v4396_v19, %v1710_v60  ;;  %v1916_v1 = vpack.c.bf16 %v1868_v0, %v1866_v35  ;;  %v683_v35 = vmul.f32 %v4262_v56, %v4829_v13  ;;  %v3592_v60 = vld [vmem:[%s5282_s7 + $0xa4] ss:$8 sps:$4 sm:$0xff]  }
 0x16c   : > { %v1917_v50 = vpack.c.bf16 %v1869_v29, %v1867_v52  ;;  %v684_v49 = vmul.f32 %v4265_v59, %v4829_v13 }
 0x16d   : > { %v1880_v2 = vmax.f32 %v1816_v48, 0.0  ;;  %v1881_v47 = vmax.f32 %v1817_v3, 0.0  ;;  %2634 = vmatpush1.bf16.msra.mxu0 %v3581_v5 }
 0x16e   : > { %v791_v32 = vpop.permute.xlu1 %790  ;;  %2240 = vmatprep.mubr.bf16.mxu1 %v1917_v50  ;;  %2635 = vmatprep.subr.bf16.mxu0 %v3586_v63 }
 0x16f   : > { %v891_v15 = vmul.f32 %v4256_v54, %v791_v32  ;;  %v892_v58 = vmul.f32 %v4259_v41, %v791_v32  ;;  %v4977_v39 = vpack.c.bf16 %v1880_v2, %v1878_v8  ;;  %v1923_v22 = vpack.c.bf16 %v1881_v47, %v1879_v43  ;;  %v3590_v8 = vld [vmem:[%s5282_s7 + $0xa0] ss:$8 sps:$4 sm:$0xff]   ;;  %v3598_v32 = vld [vmem:[%s5282_s7 + $0xc4] ss:$8 sps:$4 sm:$0xff]  }
 0x171   : > { %2241 = vmatmul.mubr.bf16.gmra.mrb[60].mxu1 %v1916_v1  ;;  %v955_v11 = vadd.f32 %v891_v15, %v681_v36  ;;  %v956_v10 = vadd.f32 %v892_v58, %v682_v33  ;;  %2636 = vmatpush1.bf16.msra.mxu0 %v3584_v30  ;;  %v3596_v30 = vld [vmem:[%s5282_s7 + $0xc0] ss:$8 sps:$4 sm:$0xff]  }
 0x172   : > { %2250 = vmatprep.mubr.bf16.mxu1 %v4773_v31  ;;  %v795_v46 = vpop.permute.xlu1 %794  ;;  %v3587_v31 = vld [vmem:[%s5282_s7 + $0x90] ss:$8 sps:$4 sm:$0xff]   ;;  %2637 = vmatprep.subr.bf16.mxu0 %v3589_v4 }
 0x173   : > { %v893_v37 = vmul.f32 %v4256_v54, %v795_v46  ;;  %v894_v52 = vmul.f32 %v4259_v41, %v795_v46  ;;  %v1229_v0 = vadd.f32 %v1165_v42, %v955_v11  ;;  %v1230_v29 = vadd.f32 %v1166_v57, %v956_v10 }
 0x175   : > { %v957_v48 = vadd.f32 %v893_v37, %v683_v35  ;;  %v958_v51 = vadd.f32 %v894_v52, %v684_v49  ;;  %v1714_v13 = vadd.f32 %v4749_v16, %v1229_v0  ;;  %v1716_v50 = vadd.f32 %v4754_v24, %v1230_v29  ;;  %2638 = vmatpush1.bf16.msra.mxu0 %v3587_v31  ;;  %v3595_v16 = vld [vmem:[%s5282_s7 + $0xb4] ss:$8 sps:$4 sm:$0xff]  }
 0x176   : > { %2639 = vmatprep.subr.bf16.mxu0 %v3592_v60  ;;  %v3601_v35 = vld [vmem:[%s5282_s7 + $0xd4] ss:$8 sps:$4 sm:$0xff]  }
 0x177   : > { %v1069_v3 = vpop.permute.xlu1 %1068  ;;  %v1818_v63 = vadd.f32 %v4387_v53, %v1714_v13  ;;  %v1819_v43 = vadd.f32 %v4396_v19, %v1716_v50 }
 0x178   : > { %v1167_v1 = vmul.f32 %v4290_v45, %v1069_v3  ;;  %v1168_v5 = vmul.f32 %v4336_v20, %v1069_v3 }
 0x179   : > { %2251 = vmatmul.mubr.bf16.gmra.mrb[64].mxu1 %v4769_v12  ;;  %2640 = vmatpush1.bf16.msra.mxu0 %v3590_v8  ;;  %v1882_v15 = vmax.f32 %v1818_v63, 0.0  ;;  %v1883_v58 = vmax.f32 %v1819_v43, 0.0 }
 0x17a   : > { %2260 = vmatprep.mubr.bf16.mxu1 %v4892_v26  ;;  %v1231_v2 = vadd.f32 %v1167_v1, %v957_v48  ;;  %v1232_v24 = vadd.f32 %v1168_v5, %v958_v51  ;;  %v3593_v26 = vld [vmem:[%s5282_s7 + $0xb0] ss:$8 sps:$4 sm:$0xff]   ;;  %2641 = vmatprep.subr.bf16.mxu0 %v3595_v16  ;;  %v687_v48 = vmul.f32 %v4262_v56, %v4878_v61 }
 0x17b   : > { %v688_v51 = vmul.f32 %v4265_v59, %v4878_v61 }
 0x17c   : > { %v1718_v12 = vadd.f32 %v4759_v55, %v1231_v2  ;;  %v1720_v47 = vadd.f32 %v4763_v17, %v1232_v24  ;;  %v581_v36 = vpop.permute.xlu1 %580  ;;  %v1073_v17 = vpop.permute.xlu0 %1072 }
 0x17d   : > { %2642 = vmatpush1.bf16.msra.mxu0 %v3593_v26  ;;  %v685_v11 = vmul.f32 %v4262_v56, %v581_v36  ;;  %v686_v10 = vmul.f32 %v4265_v59, %v581_v36  ;;  %v1169_v52 = vmul.f32 %v4290_v45, %v1073_v17  ;;  %v1170_v0 = vmul.f32 %v4336_v20, %v1073_v17 }
 0x17e   : > { %v1820_v42 = vadd.f32 %v4387_v53, %v1718_v12  ;;  %v1821_v33 = vadd.f32 %v4396_v19, %v1720_v47  ;;  %2643 = vmatprep.subr.bf16.mxu0 %v3598_v32  ;;  %v3604_v47 = vld [vmem:[%s5282_s7 + $0xe4] ss:$8 sps:$4 sm:$0xff]  }
 0x180   : > { %v1884_v55 = vmax.f32 %v1820_v42, 0.0  ;;  %v1885_v57 = vmax.f32 %v1821_v33, 0.0  ;;  %v1081_v17 = vpop.permute.xlu0 %1080 }
 0x181   : > { %2261 = vmatmul.mubr.bf16.gmra.mrb[68].mxu1 %v4894_v7  ;;  %v799_v4 = vpop.permute.xlu1 %798  ;;  %2644 = vmatpush1.bf16.msra.mxu0 %v3596_v30 }
 0x182   : > { %2270 = vmatprep.mubr.bf16.mxu1 %v1923_v22  ;;  %v895_v46 = vmul.f32 %v4256_v54, %v799_v4  ;;  %v896_v7 = vmul.f32 %v4259_v41, %v799_v4  ;;  %v1925_v49 = vpack.c.bf16 %v1885_v57, %v1883_v58  ;;  %v1924_v37 = vpack.c.bf16 %v1884_v55, %v1882_v15  ;;  %v3599_v22 = vld [vmem:[%s5282_s7 + $0xd0] ss:$8 sps:$4 sm:$0xff]   ;;  %v3607_v15 = vld [vmem:[%s5282_s7 + $0xf4] ss:$8 sps:$4 sm:$0xff]  }
 0x183   : > { %2645 = vmatprep.subr.bf16.mxu0 %v3601_v35  ;;  %v3605_v58 = vld [vmem:[%s5282_s7 + $0xf0] ss:$8 sps:$4 sm:$0xff]  }
 0x184   : > { %v959_v29 = vadd.f32 %v895_v46, %v685_v11  ;;  %v960_v31 = vadd.f32 %v896_v7, %v686_v10 }
 0x185   : > { %v803_v60 = vpop.permute.xlu1 %802  ;;  %2646 = vmatpush1.bf16.msra.mxu0 %v3599_v22 }
 0x186   : > { %v897_v13 = vmul.f32 %v4256_v54, %v803_v60  ;;  %v898_v3 = vmul.f32 %v4259_v41, %v803_v60  ;;  %v1233_v50 = vadd.f32 %v1169_v52, %v959_v29  ;;  %v1234_v1 = vadd.f32 %v1170_v0, %v960_v31  ;;  %2647 = vmatprep.subr.bf16.mxu0 %v3604_v47 }
 0x188   : > { %v961_v5 = vadd.f32 %v897_v13, %v687_v48  ;;  %v962_v8 = vadd.f32 %v898_v3, %v688_v51  ;;  %v1724_v2 = vadd.f32 %v4787_v27, %v1233_v50  ;;  %v1726_v24 = vadd.f32 %v4793_v9, %v1234_v1 }
 0x189   : > { %2271 = vmatmul.mubr.bf16.gmra.mrb[72].mxu1 %v4977_v39  ;;  %v3602_v39 = vld [vmem:[%s5282_s7 + $0xe0] ss:$8 sps:$4 sm:$0xff]   ;;  %v691_v51 = vmul.f32 %v4262_v56, %v4928_v18  ;;  %v692_v13 = vmul.f32 %v4265_v59, %v4928_v18 }
 0x18a   : > { %2280 = vmatprep.mubr.bf16.mxu1 %v1925_v49  ;;  %v1077_v16 = vpop.permute.xlu1 %1076  ;;  %v1822_v36 = vadd.f32 %v4387_v53, %v1724_v2  ;;  %v1823_v27 = vadd.f32 %v4396_v19, %v1726_v24  ;;  %2648 = vmatpush1.bf16.msra.mxu0 %v3602_v39  ;;  %v1173_v49 = vmul.f32 %v4290_v45, %v1081_v17 }
 0x18b   : > { %v1171_v63 = vmul.f32 %v4290_v45, %v1077_v16  ;;  %v1172_v61 = vmul.f32 %v4336_v20, %v1077_v16  ;;  %2649 = vmatprep.subr.bf16.mxu0 %v3607_v15 }
 0x18c   : > { %v1886_v55 = vmax.f32 %v1822_v36, 0.0 }
 0x18d   : > { %v1235_v43 = vadd.f32 %v1171_v63, %v961_v5  ;;  %v1236_v12 = vadd.f32 %v1172_v61, %v962_v8 }
 0x18e   : > { %2650 = vmatpush1.bf16.msra.mxu0 %v3605_v58 }
 0x18f   : > { %v1728_v9 = vadd.f32 %v4801_v21, %v1235_v43  ;;  %v1730_v26 = vadd.f32 %v4808_v34, %v1236_v12  ;;  %v591_v32 = vpop.permute.xlu1 %590  ;;  %v1887_v21 = vmax.f32 %v1823_v27, 0.0 }
 0x190   : > { %v689_v30 = vmul.f32 %v4262_v56, %v591_v32  ;;  %v690_v11 = vmul.f32 %v4265_v59, %v591_v32 }
 0x191   : > { %2281 = vmatmul.mubr.bf16.gmra.mrb[76].mxu1 %v1924_v37  ;;  %v1824_v42 = vadd.f32 %v4387_v53, %v1728_v9  ;;  %v1825_v33 = vadd.f32 %v4396_v19, %v1730_v26  ;;  %v1174_v37 = vmul.f32 %v4336_v20, %v1081_v17 }
 0x193   : > { %v1888_v57 = vmax.f32 %v1824_v42, 0.0  ;;  %v1889_v34 = vmax.f32 %v1825_v33, 0.0 }
 0x194   : > { %v807_v10 = vpop.permute.xlu1 %806 }
 0x195   : > { %v899_v4 = vmul.f32 %v4256_v54, %v807_v10  ;;  %v900_v35 = vmul.f32 %v4259_v41, %v807_v10  ;;  %v1927_v46 = vpack.c.bf16 %v1889_v34, %v1887_v21  ;;  %v1926_v7 = vpack.c.bf16 %v1888_v57, %v1886_v55 }
 0x197   : > { %v963_v52 = vadd.f32 %v899_v4, %v689_v30  ;;  %v964_v0 = vadd.f32 %v900_v35, %v690_v11  ;;  %2290 = vmatprep.mubr.bf16.mxu1 %v1927_v46 }
 0x198   : > { %v811_v29 = vpop.permute.xlu1 %810 }
 0x199   : > { %2291 = vmatmul.mubr.bf16.gmra.mrb[80].mxu1 %v1926_v7  ;;  %v901_v31 = vmul.f32 %v4256_v54, %v811_v29  ;;  %v902_v60 = vmul.f32 %v4259_v41, %v811_v29  ;;  %v1237_v22 = vadd.f32 %v1173_v49, %v963_v52  ;;  %v1238_v48 = vadd.f32 %v1174_v37, %v964_v0  ;;  %v5398_v29 = vld [vmem:[#allocation18_spill] sm:$0xff] }
 0x19b   : > { %v965_v3 = vadd.f32 %v901_v31, %v691_v51  ;;  %v966_v50 = vadd.f32 %v902_v60, %v692_v13  ;;  %v1734_v5 = vadd.f32 %v4835_v25, %v1237_v22  ;;  %v1736_v8 = vadd.f32 %v4842_v28, %v1238_v48  ;;  %v1089_v28 = vpop.permute.xlu0 %1088 }
 0x19c   : > { %v1177_v34 = vmul.f32 %v4290_v45, %v1089_v28  ;;  %v1178_v17 = vmul.f32 %v4336_v20, %v1089_v28 }
 0x19d   : > { %v1085_v1 = vpop.permute.xlu1 %1084  ;;  %v1826_v61 = vadd.f32 %v4387_v53, %v1734_v5  ;;  %v1827_v43 = vadd.f32 %v4396_v19, %v1736_v8  ;;  %v5400_v8 = vld [vmem:[#allocation6_spill] sm:$0xff] }
 0x19e   : > { %v1175_v16 = vmul.f32 %v4290_v45, %v1085_v1  ;;  %v1176_v2 = vmul.f32 %v4336_v20, %v1085_v1  ;;  %v5399_v1 = vld [vmem:[#allocation21_spill] sm:$0xff] }
 0x19f   : > { %v1890_v36 = vmax.f32 %v1826_v61, 0.0  ;;  %v1891_v27 = vmax.f32 %v1827_v43, 0.0  ;;  %v606_v55 = vpop.permute.xlu0 %605 }
 0x1a0   : > { %v1239_v24 = vadd.f32 %v1175_v16, %v965_v3  ;;  %v1240_v63 = vadd.f32 %v1176_v2, %v966_v50  ;;  %v695_v11 = vmul.f32 %v4262_v56, %v606_v55  ;;  %v696_v10 = vmul.f32 %v4265_v59, %v606_v55 }
 0x1a2   : > { %v1738_v12 = vadd.f32 %v4852_v6, %v1239_v24  ;;  %v1740_v18 = vadd.f32 %v4861_v40, %v1240_v63  ;;  %v601_v47 = vpop.permute.xlu1 %600 }
 0x1a3   : > { %v693_v32 = vmul.f32 %v4262_v56, %v601_v47  ;;  %v694_v42 = vmul.f32 %v4265_v59, %v601_v47  ;;  %v616_v13 = vpop.permute.xlu0 %615 }
 0x1a4   : > { %v1828_v39 = vadd.f32 %v4387_v53, %v1738_v12  ;;  %v1829_v25 = vadd.f32 %v4396_v19, %v1740_v18 }
 0x1a6   : > { %v1892_v9 = vmax.f32 %v1828_v39, 0.0  ;;  %v1893_v26 = vmax.f32 %v1829_v25, 0.0 }
 0x1a7   : > { %v815_v33 = vpop.permute.xlu1 %814  ;;  %v1097_v18 = vpop.permute.xlu0 %1096 }
 0x1a8   : > { %v903_v15 = vmul.f32 %v4256_v54, %v815_v33  ;;  %v904_v6 = vmul.f32 %v4259_v41, %v815_v33  ;;  %v1929_v40 = vpack.c.bf16 %v1893_v26, %v1891_v27  ;;  %v1928_v58 = vpack.c.bf16 %v1892_v9, %v1890_v36 }
 0x1a9   : > { %v1181_v26 = vmul.f32 %v4290_v45, %v1097_v18 }
 0x1aa   : > { %v967_v21 = vadd.f32 %v903_v15, %v693_v32  ;;  %v968_v57 = vadd.f32 %v904_v6, %v694_v42  ;;  %2300 = vmatprep.mubr.bf16.mxu1 %v1929_v40  ;;  %v1182_v32 = vmul.f32 %v4336_v20, %v1097_v18 }
 0x1ab   : > { %2301 = vmatmul.mubr.bf16.gmra.mrb[84].mxu1 %v1928_v58  ;;  %v819_v30 = vpop.permute.xlu1 %818 }
 0x1ac   : > { %v905_v4 = vmul.f32 %v4256_v54, %v819_v30  ;;  %v906_v35 = vmul.f32 %v4259_v41, %v819_v30  ;;  %v1241_v46 = vadd.f32 %v1177_v34, %v967_v21  ;;  %v1242_v7 = vadd.f32 %v1178_v17, %v968_v57 }
 0x1ad   : > { %v699_v21 = vmul.f32 %v4262_v56, %v616_v13  ;;  %v700_v57 = vmul.f32 %v4265_v59, %v616_v13 }
 0x1ae   : > { %v969_v49 = vadd.f32 %v905_v4, %v695_v11  ;;  %v970_v37 = vadd.f32 %v906_v35, %v696_v10  ;;  %v1744_v0 = vadd.f32 %v4885_v14, %v1241_v46  ;;  %v1746_v31 = vadd.f32 %v5398_v29, %v1242_v7  ;;  %v1966_v29 = vld [vmem:[%s5281_s6] sm:$0x3] }
 0x1b0   : > { %v1093_v52 = vpop.permute.xlu1 %1092  ;;  %v1830_v3 = vadd.f32 %v4387_v53, %v1744_v0  ;;  %v1831_v50 = vadd.f32 %v4396_v19, %v1746_v31  ;;  %v5401_v31 = vld [vmem:[#allocation9_spill] sm:$0xff] }
 0x1b1   : > { %v1179_v60 = vmul.f32 %v4290_v45, %v1093_v52  ;;  %v1180_v22 = vmul.f32 %v4336_v20, %v1093_v52 }
 0x1b2   : > { %v1894_v63 = vmax.f32 %v1830_v3, 0.0  ;;  %v1895_v61 = vmax.f32 %v1831_v50, 0.0 }
 0x1b3   : > { %v1243_v48 = vadd.f32 %v1179_v60, %v969_v49  ;;  %v1244_v51 = vadd.f32 %v1180_v22, %v970_v37 }
 0x1b5   : > { %v1748_v5 = vadd.f32 %v5399_v1, %v1243_v48  ;;  %v1750_v16 = vadd.f32 %v5400_v8, %v1244_v51  ;;  %v611_v2 = vpop.permute.xlu1 %610 }
 0x1b6   : > { %v697_v47 = vmul.f32 %v4262_v56, %v611_v2  ;;  %v698_v39 = vmul.f32 %v4265_v59, %v611_v2 }
 0x1b7   : > { %v1832_v14 = vadd.f32 %v4387_v53, %v1748_v5  ;;  %v1833_v24 = vadd.f32 %v4396_v19, %v1750_v16 }
 0x1b9   : > { %v1896_v43 = vmax.f32 %v1832_v14, 0.0  ;;  %v1897_v12 = vmax.f32 %v1833_v24, 0.0 }
 0x1ba   : > { %v823_v25 = vpop.permute.xlu1 %822 }
 0x1bb   : > { %v907_v28 = vmul.f32 %v4256_v54, %v823_v25  ;;  %v908_v36 = vmul.f32 %v4259_v41, %v823_v25  ;;  %v1931_v27 = vpack.c.bf16 %v1897_v12, %v1895_v61  ;;  %v1930_v9 = vpack.c.bf16 %v1896_v43, %v1894_v63 }
 0x1bd   : > { %v971_v42 = vadd.f32 %v907_v28, %v697_v47  ;;  %v972_v33 = vadd.f32 %v908_v36, %v698_v39  ;;  %2310 = vmatprep.mubr.bf16.mxu1 %v1931_v27 }
 0x1be   : > { %2311 = vmatmul.mubr.bf16.gmra.mrb[88].mxu1 %v1930_v9  ;;  %v827_v15 = vpop.permute.xlu1 %826 }
 0x1bf   : > { %v909_v6 = vmul.f32 %v4256_v54, %v827_v15  ;;  %v910_v40 = vmul.f32 %v4259_v41, %v827_v15  ;;  %v1245_v58 = vadd.f32 %v1181_v26, %v971_v42  ;;  %v1246_v55 = vadd.f32 %v1182_v32, %v972_v33 }
 0x1c1   : > { %v973_v34 = vadd.f32 %v909_v6, %v699_v21  ;;  %v974_v17 = vadd.f32 %v910_v40, %v700_v57  ;;  %v1754_v11 = vadd.f32 %v4939_v38, %v1245_v58  ;;  %v1756_v10 = vadd.f32 %v4946_v23, %v1246_v55 }
 0x1c3   : > { %v1101_v30 = vpop.permute.xlu1 %1100  ;;  %v1834_v41 = vadd.f32 %v4387_v53, %v1754_v11  ;;  %v1835_v7 = vadd.f32 %v4396_v19, %v1756_v10 }
 0x1c4   : > { %v1183_v4 = vmul.f32 %v4290_v45, %v1101_v30  ;;  %v1184_v35 = vmul.f32 %v4336_v20, %v1101_v30 }
 0x1c5   : > { %v1898_v37 = vmax.f32 %v1834_v41, 0.0  ;;  %v1899_v23 = vmax.f32 %v1835_v7, 0.0 }
 0x1c6   : > { %v1247_v54 = vadd.f32 %v1183_v4, %v973_v34  ;;  %v1248_v46 = vadd.f32 %v1184_v35, %v974_v17 }
 0x1c8   : > { %v1758_v56 = vadd.f32 %v4948_v62, %v1247_v54  ;;  %v1760_v59 = vadd.f32 %v4952_v44, %v1248_v46  ;;  %v5134_v62 = vrot.slane %v1966_v29, %v5401_v31  ;;  %v5402_v44 = vld [vmem:[#allocation8_spill] sm:$0xff] }
 0x1c9   : > { %v5137_v60 = vrot.slane %v1966_v29, %v5402_v44 }
 0x1ca   : > { %v1837_v49 = vadd.f32 %v4396_v19, %v1760_v59  ;;  %v1836_v38 = vadd.f32 %v4387_v53, %v1758_v56 }
 0x1cc   : > { %v1901_v52 = vmax.f32 %v1837_v49, 0.0  ;;  %v1900_v45 = vmax.f32 %v1836_v38, 0.0 }
 0x1ce   : > { %v1933_v0 = vpack.c.bf16 %v1901_v52, %v1899_v23  ;;  %v1932_v20 = vpack.c.bf16 %v1900_v45, %v1898_v37 }
 0x1d0   : > { %2320 = vmatprep.mubr.bf16.mxu1 %v1933_v0 }
 0x1d1   : > { %2321 = vmatmul.mubr.bf16.gmra.mrb[92].mxu1 %v1932_v20 }
 0x20c   : > { %v2172_v19 = vpop.f32.mrb[32].mxu1 }
 0x20d   : > { %v2173_v53 = vadd.f32 %v2172_v19, %v5134_v62  ;;  %v2174_v22 = vpop.f32.mrb[33].mxu1 }
 0x20e   : > { %v2175_v48 = vadd.f32 %v2174_v22, %v5137_v60  ;;  %v2176_v51 = vpop.f32.mrb[34].mxu1 }
 0x20f   : > { %v2177_v13 = vadd.f32 %v2176_v51, %v5134_v62  ;;  %v2178_v3 = vpop.f32.mrb[35].mxu1  ;;  %v2331_v1 = vmax.f32 %v2173_v53, 0.0 }
 0x210   : > { %v2179_v50 = vadd.f32 %v2178_v3, %v5137_v60  ;;  %v2332_v8 = vmax.f32 %v2175_v48, 0.0 }
 0x211   : > { %v2333_v5 = vmax.f32 %v2177_v13, 0.0 }
 0x212   : > { %v2334_v16 = vmax.f32 %v2179_v50, 0.0 }
 0x213   : > { %v2395_v2 = vpack.c.bf16 %v2333_v5, %v2331_v1 }
 0x214   : > { %v2396_v14 = vpack.c.bf16 %v2334_v16, %v2332_v8  ;;  %v2182_v24 = vpop.f32.mrb[36].mxu1 }
 0x215   : > { %v2183_v63 = vadd.f32 %v2182_v24, %v5134_v62  ;;  %v2184_v61 = vpop.f32.mrb[37].mxu1 }
 0x216   : > { %v2185_v43 = vadd.f32 %v2184_v61, %v5137_v60  ;;  %v2186_v12 = vpop.f32.mrb[38].mxu1  ;;  %2651 = vmatprep.mubr.bf16.mxu0 %v2396_v14 }
 0x217   : > { %v2187_v18 = vadd.f32 %v2186_v12, %v5134_v62  ;;  %v2188_v47 = vpop.f32.mrb[39].mxu1  ;;  %2652 = vmatmul.mubr.bf16.vlgmr.msra.gmra.mrb[32].mxu0 %v2395_v2  ;;  %v2335_v25 = vmax.f32 %v2183_v63, 0.0 }
 0x218   : > { %v2189_v39 = vadd.f32 %v2188_v47, %v5137_v60  ;;  %v2336_v36 = vmax.f32 %v2185_v43, 0.0 }
 0x219   : > { %v2337_v28 = vmax.f32 %v2187_v18, 0.0 }
 0x21a   : > { %v2338_v27 = vmax.f32 %v2189_v39, 0.0 }
 0x21b   : > { %v2397_v9 = vpack.c.bf16 %v2337_v28, %v2335_v25 }
 0x21c   : > { %v2398_v26 = vpack.c.bf16 %v2338_v27, %v2336_v36  ;;  %v2192_v32 = vpop.f32.mrb[40].mxu1 }
 0x21d   : > { %v2193_v42 = vadd.f32 %v2192_v32, %v5134_v62  ;;  %v2194_v33 = vpop.f32.mrb[41].mxu1 }
 0x21e   : > { %v2195_v15 = vadd.f32 %v2194_v33, %v5137_v60  ;;  %v2196_v6 = vpop.f32.mrb[42].mxu1  ;;  %2661 = vmatprep.mubr.bf16.mxu0 %v2398_v26 }
 0x21f   : > { %v2197_v40 = vadd.f32 %v2196_v6, %v5134_v62  ;;  %v2198_v58 = vpop.f32.mrb[43].mxu1  ;;  %2662 = vmatmul.mubr.bf16.gmra.mrb[36].mxu0 %v2397_v9  ;;  %v2339_v21 = vmax.f32 %v2193_v42, 0.0 }
 0x220   : > { %v2199_v55 = vadd.f32 %v2198_v58, %v5137_v60  ;;  %v2340_v34 = vmax.f32 %v2195_v15, 0.0 }
 0x221   : > { %v2341_v57 = vmax.f32 %v2197_v40, 0.0 }
 0x222   : > { %v2342_v17 = vmax.f32 %v2199_v55, 0.0 }
 0x223   : > { %v2399_v30 = vpack.c.bf16 %v2341_v57, %v2339_v21 }
 0x224   : > { %v2400_v11 = vpack.c.bf16 %v2342_v17, %v2340_v34  ;;  %v2202_v10 = vpop.f32.mrb[44].mxu1 }
 0x225   : > { %v2203_v4 = vadd.f32 %v2202_v10, %v5134_v62  ;;  %v2204_v35 = vpop.f32.mrb[45].mxu1 }
 0x226   : > { %v2205_v54 = vadd.f32 %v2204_v35, %v5137_v60  ;;  %v2206_v46 = vpop.f32.mrb[46].mxu1  ;;  %2671 = vmatprep.mubr.bf16.mxu0 %v2400_v11 }
 0x227   : > { %v2207_v41 = vadd.f32 %v2206_v46, %v5134_v62  ;;  %v2208_v7 = vpop.f32.mrb[47].mxu1  ;;  %2672 = vmatmul.mubr.bf16.gmra.mrb[40].mxu0 %v2399_v30  ;;  %v2343_v59 = vmax.f32 %v2203_v4, 0.0 }
 0x228   : > { %v2209_v56 = vadd.f32 %v2208_v7, %v5137_v60  ;;  %v2344_v38 = vmax.f32 %v2205_v54, 0.0 }
 0x229   : > { %v2345_v49 = vmax.f32 %v2207_v41, 0.0 }
 0x22a   : > { %v2346_v37 = vmax.f32 %v2209_v56, 0.0 }
 0x22b   : > { %v2401_v23 = vpack.c.bf16 %v2345_v49, %v2343_v59 }
 0x22c   : > { %v2402_v52 = vpack.c.bf16 %v2346_v37, %v2344_v38  ;;  %v2212_v45 = vpop.f32.mrb[48].mxu1 }
 0x22d   : > { %v2213_v0 = vadd.f32 %v2212_v45, %v5134_v62  ;;  %v2214_v20 = vpop.f32.mrb[49].mxu1 }
 0x22e   : > { %v2215_v29 = vadd.f32 %v2214_v20, %v5137_v60  ;;  %v2216_v19 = vpop.f32.mrb[50].mxu1  ;;  %2681 = vmatprep.mubr.bf16.mxu0 %v2402_v52 }
 0x22f   : > { %v2217_v53 = vadd.f32 %v2216_v19, %v5134_v62  ;;  %v2218_v22 = vpop.f32.mrb[51].mxu1  ;;  %2682 = vmatmul.mubr.bf16.gmra.mrb[44].mxu0 %v2401_v23  ;;  %v2347_v51 = vmax.f32 %v2213_v0, 0.0 }
 0x230   : > { %v2219_v48 = vadd.f32 %v2218_v22, %v5137_v60  ;;  %v2348_v3 = vmax.f32 %v2215_v29, 0.0 }
 0x231   : > { %v2349_v13 = vmax.f32 %v2217_v53, 0.0 }
 0x232   : > { %v2350_v50 = vmax.f32 %v2219_v48, 0.0 }
 0x233   : > { %v2403_v1 = vpack.c.bf16 %v2349_v13, %v2347_v51 }
 0x234   : > { %v2404_v5 = vpack.c.bf16 %v2350_v50, %v2348_v3  ;;  %v2222_v8 = vpop.f32.mrb[52].mxu1 }
 0x235   : > { %v2223_v16 = vadd.f32 %v2222_v8, %v5134_v62  ;;  %v2224_v2 = vpop.f32.mrb[53].mxu1 }
 0x236   : > { %v2225_v14 = vadd.f32 %v2224_v2, %v5137_v60  ;;  %v2226_v24 = vpop.f32.mrb[54].mxu1  ;;  %2691 = vmatprep.mubr.bf16.mxu0 %v2404_v5 }
 0x237   : > { %v2227_v63 = vadd.f32 %v2226_v24, %v5134_v62  ;;  %v2228_v61 = vpop.f32.mrb[55].mxu1  ;;  %2692 = vmatmul.mubr.bf16.gmra.mrb[48].mxu0 %v2403_v1  ;;  %v2351_v12 = vmax.f32 %v2223_v16, 0.0 }
 0x238   : > { %v2229_v43 = vadd.f32 %v2228_v61, %v5137_v60  ;;  %v2352_v47 = vmax.f32 %v2225_v14, 0.0 }
 0x239   : > { %v2353_v18 = vmax.f32 %v2227_v63, 0.0 }
 0x23a   : > { %v2354_v39 = vmax.f32 %v2229_v43, 0.0 }
 0x23b   : > { %v2405_v25 = vpack.c.bf16 %v2353_v18, %v2351_v12 }
 0x23c   : > { %v2406_v28 = vpack.c.bf16 %v2354_v39, %v2352_v47  ;;  %v2232_v36 = vpop.f32.mrb[56].mxu1 }
 0x23d   : > { %v2233_v27 = vadd.f32 %v2232_v36, %v5134_v62  ;;  %v2234_v9 = vpop.f32.mrb[57].mxu1 }
 0x23e   : > { %v2235_v26 = vadd.f32 %v2234_v9, %v5137_v60  ;;  %v2236_v32 = vpop.f32.mrb[58].mxu1  ;;  %2701 = vmatprep.mubr.bf16.mxu0 %v2406_v28 }
 0x23f   : > { %v2237_v42 = vadd.f32 %v2236_v32, %v5134_v62  ;;  %v2238_v33 = vpop.f32.mrb[59].mxu1  ;;  %2702 = vmatmul.mubr.bf16.gmra.mrb[52].mxu0 %v2405_v25  ;;  %v2355_v6 = vmax.f32 %v2233_v27, 0.0 }
 0x240   : > { %v2239_v15 = vadd.f32 %v2238_v33, %v5137_v60  ;;  %v2356_v58 = vmax.f32 %v2235_v26, 0.0 }
 0x241   : > { %v2357_v40 = vmax.f32 %v2237_v42, 0.0 }
 0x242   : > { %v2358_v55 = vmax.f32 %v2239_v15, 0.0 }
 0x243   : > { %v2407_v21 = vpack.c.bf16 %v2357_v40, %v2355_v6 }
 0x244   : > { %v2408_v57 = vpack.c.bf16 %v2358_v55, %v2356_v58  ;;  %v2242_v34 = vpop.f32.mrb[60].mxu1 }
 0x245   : > { %v2243_v17 = vadd.f32 %v2242_v34, %v5134_v62  ;;  %v2244_v30 = vpop.f32.mrb[61].mxu1 }
 0x246   : > { %v2245_v11 = vadd.f32 %v2244_v30, %v5137_v60  ;;  %v2246_v10 = vpop.f32.mrb[62].mxu1  ;;  %2711 = vmatprep.mubr.bf16.mxu0 %v2408_v57 }
 0x247   : > { %v2247_v4 = vadd.f32 %v2246_v10, %v5134_v62  ;;  %v2248_v35 = vpop.f32.mrb[63].mxu1  ;;  %2712 = vmatmul.mubr.bf16.gmra.mrb[56].mxu0 %v2407_v21  ;;  %v2359_v46 = vmax.f32 %v2243_v17, 0.0 }
 0x248   : > { %v2249_v54 = vadd.f32 %v2248_v35, %v5137_v60  ;;  %v2360_v7 = vmax.f32 %v2245_v11, 0.0 }
 0x249   : > { %v2361_v41 = vmax.f32 %v2247_v4, 0.0 }
 0x24a   : > { %v2362_v56 = vmax.f32 %v2249_v54, 0.0 }
 0x24b   : > { %v2409_v59 = vpack.c.bf16 %v2361_v41, %v2359_v46 }
 0x24c   : > { %v2410_v49 = vpack.c.bf16 %v2362_v56, %v2360_v7  ;;  %v2252_v38 = vpop.f32.mrb[64].mxu1 }
 0x24d   : > { %v2253_v37 = vadd.f32 %v2252_v38, %v5134_v62  ;;  %v2254_v23 = vpop.f32.mrb[65].mxu1 }
 0x24e   : > { %v2255_v52 = vadd.f32 %v2254_v23, %v5137_v60  ;;  %v2256_v45 = vpop.f32.mrb[66].mxu1  ;;  %2721 = vmatprep.mubr.bf16.mxu0 %v2410_v49 }
 0x24f   : > { %v2257_v0 = vadd.f32 %v2256_v45, %v5134_v62  ;;  %v2258_v20 = vpop.f32.mrb[67].mxu1  ;;  %2722 = vmatmul.mubr.bf16.gmra.mrb[60].mxu0 %v2409_v59  ;;  %v2363_v19 = vmax.f32 %v2253_v37, 0.0 }
 0x250   : > { %v2259_v29 = vadd.f32 %v2258_v20, %v5137_v60  ;;  %v2364_v22 = vmax.f32 %v2255_v52, 0.0 }
 0x251   : > { %v2365_v53 = vmax.f32 %v2257_v0, 0.0 }
 0x252   : > { %v2366_v48 = vmax.f32 %v2259_v29, 0.0 }
 0x253   : > { %v2411_v51 = vpack.c.bf16 %v2365_v53, %v2363_v19 }
 0x254   : > { %v2412_v13 = vpack.c.bf16 %v2366_v48, %v2364_v22  ;;  %v2262_v3 = vpop.f32.mrb[68].mxu1 }
 0x255   : > { %v2263_v50 = vadd.f32 %v2262_v3, %v5134_v62  ;;  %v2264_v1 = vpop.f32.mrb[69].mxu1 }
 0x256   : > { %v2265_v5 = vadd.f32 %v2264_v1, %v5137_v60  ;;  %v2266_v8 = vpop.f32.mrb[70].mxu1  ;;  %2731 = vmatprep.mubr.bf16.mxu0 %v2412_v13 }
 0x257   : > { %v2267_v16 = vadd.f32 %v2266_v8, %v5134_v62  ;;  %v2268_v2 = vpop.f32.mrb[71].mxu1  ;;  %2732 = vmatmul.mubr.bf16.gmra.mrb[64].mxu0 %v2411_v51  ;;  %v2367_v24 = vmax.f32 %v2263_v50, 0.0 }
 0x258   : > { %v2269_v14 = vadd.f32 %v2268_v2, %v5137_v60  ;;  %v2368_v61 = vmax.f32 %v2265_v5, 0.0 }
 0x259   : > { %v2369_v63 = vmax.f32 %v2267_v16, 0.0 }
 0x25a   : > { %v2370_v43 = vmax.f32 %v2269_v14, 0.0 }
 0x25b   : > { %v2413_v12 = vpack.c.bf16 %v2369_v63, %v2367_v24 }
 0x25c   : > { %v2414_v18 = vpack.c.bf16 %v2370_v43, %v2368_v61  ;;  %v2272_v47 = vpop.f32.mrb[72].mxu1 }
 0x25d   : > { %v2273_v39 = vadd.f32 %v2272_v47, %v5134_v62  ;;  %v2274_v25 = vpop.f32.mrb[73].mxu1 }
 0x25e   : > { %v2275_v28 = vadd.f32 %v2274_v25, %v5137_v60  ;;  %v2276_v36 = vpop.f32.mrb[74].mxu1  ;;  %2741 = vmatprep.mubr.bf16.mxu0 %v2414_v18 }
 0x25f   : > { %v2277_v27 = vadd.f32 %v2276_v36, %v5134_v62  ;;  %v2278_v9 = vpop.f32.mrb[75].mxu1  ;;  %2742 = vmatmul.mubr.bf16.gmra.mrb[68].mxu0 %v2413_v12  ;;  %v2371_v32 = vmax.f32 %v2273_v39, 0.0 }
 0x260   : > { %v2279_v26 = vadd.f32 %v2278_v9, %v5137_v60  ;;  %v2372_v33 = vmax.f32 %v2275_v28, 0.0 }
 0x261   : > { %v2373_v42 = vmax.f32 %v2277_v27, 0.0 }
 0x262   : > { %v2374_v15 = vmax.f32 %v2279_v26, 0.0 }
 0x263   : > { %v2415_v6 = vpack.c.bf16 %v2373_v42, %v2371_v32 }
 0x264   : > { %v2416_v40 = vpack.c.bf16 %v2374_v15, %v2372_v33  ;;  %v2282_v58 = vpop.f32.mrb[76].mxu1 }
 0x265   : > { %v2283_v55 = vadd.f32 %v2282_v58, %v5134_v62  ;;  %v2284_v21 = vpop.f32.mrb[77].mxu1 }
 0x266   : > { %v2285_v57 = vadd.f32 %v2284_v21, %v5137_v60  ;;  %v2286_v34 = vpop.f32.mrb[78].mxu1  ;;  %2751 = vmatprep.mubr.bf16.mxu0 %v2416_v40 }
 0x267   : > { %v2287_v17 = vadd.f32 %v2286_v34, %v5134_v62  ;;  %v2288_v30 = vpop.f32.mrb[79].mxu1  ;;  %2752 = vmatmul.mubr.bf16.gmra.mrb[72].mxu0 %v2415_v6  ;;  %v2375_v10 = vmax.f32 %v2283_v55, 0.0 }
 0x268   : > { %v2289_v11 = vadd.f32 %v2288_v30, %v5137_v60  ;;  %v2376_v35 = vmax.f32 %v2285_v57, 0.0 }
 0x269   : > { %v2377_v4 = vmax.f32 %v2287_v17, 0.0 }
 0x26a   : > { %v2378_v54 = vmax.f32 %v2289_v11, 0.0 }
 0x26b   : > { %v2417_v46 = vpack.c.bf16 %v2377_v4, %v2375_v10 }
 0x26c   : > { %v2418_v41 = vpack.c.bf16 %v2378_v54, %v2376_v35  ;;  %v2292_v7 = vpop.f32.mrb[80].mxu1 }
 0x26d   : > { %v2293_v56 = vadd.f32 %v2292_v7, %v5134_v62  ;;  %v2294_v59 = vpop.f32.mrb[81].mxu1 }
 0x26e   : > { %v2295_v49 = vadd.f32 %v2294_v59, %v5137_v60  ;;  %v2296_v38 = vpop.f32.mrb[82].mxu1  ;;  %2761 = vmatprep.mubr.bf16.mxu0 %v2418_v41 }
 0x26f   : > { %v2297_v37 = vadd.f32 %v2296_v38, %v5134_v62  ;;  %v2298_v23 = vpop.f32.mrb[83].mxu1  ;;  %2762 = vmatmul.mubr.bf16.gmra.mrb[76].mxu0 %v2417_v46  ;;  %v2379_v45 = vmax.f32 %v2293_v56, 0.0 }
 0x270   : > { %v2299_v52 = vadd.f32 %v2298_v23, %v5137_v60  ;;  %v2380_v20 = vmax.f32 %v2295_v49, 0.0 }
 0x271   : > { %v2381_v0 = vmax.f32 %v2297_v37, 0.0 }
 0x272   : > { %v2382_v29 = vmax.f32 %v2299_v52, 0.0 }
 0x273   : > { %v2419_v19 = vpack.c.bf16 %v2381_v0, %v2379_v45 }
 0x274   : > { %v2420_v53 = vpack.c.bf16 %v2382_v29, %v2380_v20 }
 0x276   : > { %2771 = vmatprep.mubr.bf16.mxu0 %v2420_v53 }
 0x277   : > { %2772 = vmatmul.mubr.bf16.gmra.mrb[80].mxu0 %v2419_v19 }
 0x27e   : > { %v2302_v22 = vpop.f32.mrb[84].mxu1 }
 0x27f   : > { %v2303_v48 = vadd.f32 %v2302_v22, %v5134_v62  ;;  %v2304_v51 = vpop.f32.mrb[85].mxu1 }
 0x280   : > { %v2305_v13 = vadd.f32 %v2304_v51, %v5137_v60  ;;  %v2306_v3 = vpop.f32.mrb[86].mxu1 }
 0x281   : > { %v2307_v50 = vadd.f32 %v2306_v3, %v5134_v62  ;;  %v2308_v1 = vpop.f32.mrb[87].mxu1  ;;  %v2383_v8 = vmax.f32 %v2303_v48, 0.0 }
 0x282   : > { %v2309_v5 = vadd.f32 %v2308_v1, %v5137_v60  ;;  %v2384_v2 = vmax.f32 %v2305_v13, 0.0 }
 0x283   : > { %v2385_v16 = vmax.f32 %v2307_v50, 0.0 }
 0x284   : > { %v2386_v14 = vmax.f32 %v2309_v5, 0.0 }
 0x285   : > { %v2421_v24 = vpack.c.bf16 %v2385_v16, %v2383_v8 }
 0x286   : > { %v2422_v63 = vpack.c.bf16 %v2386_v14, %v2384_v2 }
 0x288   : > { %2781 = vmatprep.mubr.bf16.mxu0 %v2422_v63 }
 0x289   : > { %2782 = vmatmul.mubr.bf16.gmra.mrb[84].mxu0 %v2421_v24 }
 0x291   : > { %v2312_v61 = vpop.f32.mrb[88].mxu1 }
 0x292   : > { %v2313_v43 = vadd.f32 %v2312_v61, %v5134_v62  ;;  %v2314_v12 = vpop.f32.mrb[89].mxu1 }
 0x293   : > { %v2315_v18 = vadd.f32 %v2314_v12, %v5137_v60  ;;  %v2316_v47 = vpop.f32.mrb[90].mxu1 }
 0x294   : > { %v2317_v39 = vadd.f32 %v2316_v47, %v5134_v62  ;;  %v2318_v25 = vpop.f32.mrb[91].mxu1  ;;  %v2387_v36 = vmax.f32 %v2313_v43, 0.0 }
 0x295   : > { %v2319_v28 = vadd.f32 %v2318_v25, %v5137_v60  ;;  %v2388_v9 = vmax.f32 %v2315_v18, 0.0 }
 0x296   : > { %v2389_v27 = vmax.f32 %v2317_v39, 0.0 }
 0x297   : > { %v2390_v26 = vmax.f32 %v2319_v28, 0.0 }
 0x298   : > { %v2423_v32 = vpack.c.bf16 %v2389_v27, %v2387_v36 }
 0x299   : > { %v2424_v42 = vpack.c.bf16 %v2390_v26, %v2388_v9  ;;  %v2956_v9 = vld [vmem:[%s5283_s8] sm:$0x3] }
 0x29b   : > { %2791 = vmatprep.mubr.bf16.mxu0 %v2424_v42 }
 0x29c   : > { %2792 = vmatmul.mubr.bf16.gmra.mrb[88].mxu0 %v2423_v32 }
 0x2a4   : > { %v2322_v33 = vpop.f32.mrb[92].mxu1 }
 0x2a5   : > { %v2323_v15 = vadd.f32 %v2322_v33, %v5134_v62  ;;  %v2324_v6 = vpop.f32.mrb[93].mxu1 }
 0x2a6   : > { %v2325_v40 = vadd.f32 %v2324_v6, %v5137_v60  ;;  %v2326_v58 = vpop.f32.mrb[94].mxu1 }
 0x2a7   : > { %v2327_v55 = vadd.f32 %v2326_v58, %v5134_v62  ;;  %v2328_v21 = vpop.f32.mrb[95].mxu1  ;;  %v2391_v34 = vmax.f32 %v2323_v15, 0.0 }
 0x2a8   : > { %v2329_v57 = vadd.f32 %v2328_v21, %v5137_v60  ;;  %v2392_v30 = vmax.f32 %v2325_v40, 0.0  ;;  %v5207_v21 = vrot.slane %v2956_v9, %v5401_v31 }
 0x2a9   : > { %v2393_v17 = vmax.f32 %v2327_v55, 0.0 }
 0x2aa   : > { %v2394_v11 = vmax.f32 %v2329_v57, 0.0 }
 0x2ab   : > { %v2425_v10 = vpack.c.bf16 %v2393_v17, %v2391_v34  ;;  %v5210_v17 = vrot.slane %v2956_v9, %v5402_v44 }
 0x2ac   : > { %v2426_v4 = vpack.c.bf16 %v2394_v11, %v2392_v30 }
 0x2ae   : > { %2801 = vmatprep.mubr.bf16.mxu0 %v2426_v4 }
 0x2af   : > { %2802 = vmatmul.mubr.bf16.gmra.mrb[92].mxu0 %v2425_v10 }
 0x2ea   : > { %v2653_v35 = vpop.f32.mrb[32].mxu0 }
 0x2eb   : > { %v2655_v54 = vpop.f32.mrb[33].mxu0 }
 0x2ec   : > { %v2657_v46 = vpop.f32.mrb[34].mxu0 }
 0x2ed   : > { %v2812_v41 = vmax.f32 %v2653_v35, %v2657_v46  ;;  %v2659_v7 = vpop.f32.mrb[35].mxu0 }
 0x2ee   : > { %v2821_v56 = vmax.f32 %v2655_v54, %v2659_v7 }
 0x2f2   : > { %v2663_v59 = vpop.f32.mrb[36].mxu0 }
 0x2f3   : > { %v2813_v49 = vmax.f32 %v2812_v41, %v2663_v59  ;;  %v2665_v62 = vpop.f32.mrb[37].mxu0 }
 0x2f4   : > { %v2822_v38 = vmax.f32 %v2821_v56, %v2665_v62  ;;  %v2667_v37 = vpop.f32.mrb[38].mxu0 }
 0x2f5   : > { %v2814_v60 = vmax.f32 %v2813_v49, %v2667_v37  ;;  %v2669_v23 = vpop.f32.mrb[39].mxu0 }
 0x2f6   : > { %v2823_v52 = vmax.f32 %v2822_v38, %v2669_v23 }
 0x2f7   : > { %v2815_v0 = vrot.slane %v2814_v60, 4 }
 0x2f8   : > { %v2824_v29 = vrot.slane %v2823_v52, 4 }
 0x2f9   : > { %v2816_v51 = vmax.f32 %v2814_v60, %v2815_v0 }
 0x2fa   : > { %v2673_v45 = vpop.f32.mrb[40].mxu0  ;;  %v2825_v13 = vmax.f32 %v2823_v52, %v2824_v29 }
 0x2fb   : > { %v2675_v20 = vpop.f32.mrb[41].mxu0  ;;  %v2817_v50 = vrot.slane %v2816_v51, 2 }
 0x2fc   : > { %v2677_v19 = vpop.f32.mrb[42].mxu0  ;;  %v2826_v8 = vrot.slane %v2825_v13, 2 }
 0x2fd   : > { %v2830_v53 = vmax.f32 %v2673_v45, %v2677_v19  ;;  %v2679_v22 = vpop.f32.mrb[43].mxu0  ;;  %v2818_v61 = vmax.f32 %v2816_v51, %v2817_v50 }
 0x2fe   : > { %v2839_v48 = vmax.f32 %v2675_v20, %v2679_v22  ;;  %v2827_v12 = vmax.f32 %v2825_v13, %v2826_v8 }
 0x2ff   : > { %v2819_v28 = vrot.slane %v2818_v61, 1 }
 0x300   : > { %v2828_v26 = vrot.slane %v2827_v12, 1 }
 0x301   : > { %v2820_v55 = vmax.f32 %v2818_v61, %v2819_v28 }
 0x302   : > { %v2683_v3 = vpop.f32.mrb[44].mxu0  ;;  %v2829_v34 = vmax.f32 %v2827_v12, %v2828_v26 }
 0x303   : > { %v2831_v1 = vmax.f32 %v2830_v53, %v2683_v3  ;;  %v2685_v5 = vpop.f32.mrb[45].mxu0  ;;  %v2968_v35 = vadd.f32 %v5207_v21, %v2820_v55 }
 0x304   : > { %v2840_v16 = vmax.f32 %v2839_v48, %v2685_v5  ;;  %v2687_v2 = vpop.f32.mrb[46].mxu0  ;;  %v2969_v7 = vadd.f32 %v5210_v17, %v2829_v34 }
 0x305   : > { %v2832_v14 = vmax.f32 %v2831_v1, %v2687_v2  ;;  %v2689_v24 = vpop.f32.mrb[47].mxu0  ;;  %v2984_v60 = vmax.f32 %v2968_v35, 0.0 }
 0x306   : > { %v2841_v63 = vmax.f32 %v2840_v16, %v2689_v24  ;;  %v2985_v45 = vmax.f32 %v2969_v7, 0.0 }
 0x307   : > { %v2833_v43 = vrot.slane %v2832_v14, 4 }
 0x308   : > { %v2842_v18 = vrot.slane %v2841_v63, 4 }
 0x309   : > { %v2834_v47 = vmax.f32 %v2832_v14, %v2833_v43 }
 0x30a   : > { %v2843_v39 = vmax.f32 %v2841_v63, %v2842_v18  ;;  %v2693_v25 = vpop.f32.mrb[48].mxu0 }
 0x30b   : > { %v2835_v36 = vrot.slane %v2834_v47, 2  ;;  %v2695_v27 = vpop.f32.mrb[49].mxu0 }
 0x30c   : > { %v2844_v32 = vrot.slane %v2843_v39, 2  ;;  %v2697_v42 = vpop.f32.mrb[50].mxu0 }
 0x30d   : > { %v2836_v33 = vmax.f32 %v2834_v47, %v2835_v36  ;;  %v2848_v15 = vmax.f32 %v2693_v25, %v2697_v42  ;;  %v2699_v6 = vpop.f32.mrb[51].mxu0 }
 0x30e   : > { %v2845_v40 = vmax.f32 %v2843_v39, %v2844_v32  ;;  %v2857_v58 = vmax.f32 %v2695_v27, %v2699_v6 }
 0x30f   : > { %v2837_v57 = vrot.slane %v2836_v33, 1 }
 0x310   : > { %v2846_v30 = vrot.slane %v2845_v40, 1 }
 0x311   : > { %v2838_v11 = vmax.f32 %v2836_v33, %v2837_v57 }
 0x312   : > { %v2847_v10 = vmax.f32 %v2845_v40, %v2846_v30  ;;  %v2703_v4 = vpop.f32.mrb[52].mxu0 }
 0x313   : > { %v2970_v54 = vadd.f32 %v5207_v21, %v2838_v11  ;;  %v2849_v46 = vmax.f32 %v2848_v15, %v2703_v4  ;;  %v2705_v41 = vpop.f32.mrb[53].mxu0 }
 0x314   : > { %v2971_v31 = vadd.f32 %v5210_v17, %v2847_v10  ;;  %v2858_v56 = vmax.f32 %v2857_v58, %v2705_v41  ;;  %v2707_v59 = vpop.f32.mrb[54].mxu0 }
 0x315   : > { %v2986_v49 = vmax.f32 %v2970_v54, 0.0  ;;  %v2850_v62 = vmax.f32 %v2849_v46, %v2707_v59  ;;  %v2709_v44 = vpop.f32.mrb[55].mxu0 }
 0x316   : > { %v2987_v38 = vmax.f32 %v2971_v31, 0.0  ;;  %v2859_v37 = vmax.f32 %v2858_v56, %v2709_v44 }
 0x317   : > { %v3016_v23 = vrot.slane %v2986_v49, 7  ;;  %v2851_v52 = vrot.slane %v2850_v62, 4 }
 0x318   : > { %v3037_v0 = vrot.slane %v2987_v38, 7  ;;  %v2860_v20 = vrot.slane %v2859_v37, 4 }
 0x319   : > { %v3018_v29 = vsel %vm3017_vm0, %v3016_v23, %v2984_v60  ;;  %v2852_v19 = vmax.f32 %v2850_v62, %v2851_v52 }
 0x31a   : > { %v3038_v53 = vsel %vm3017_vm0, %v3037_v0, %v2985_v45  ;;  %v2861_v22 = vmax.f32 %v2859_v37, %v2860_v20  ;;  %v2713_v48 = vpop.f32.mrb[56].mxu0 }
 0x31b   : > { %v2853_v51 = vrot.slane %v2852_v19, 2  ;;  %v2715_v13 = vpop.f32.mrb[57].mxu0 }
 0x31c   : > { %v2862_v3 = vrot.slane %v2861_v22, 2  ;;  %v2717_v50 = vpop.f32.mrb[58].mxu0 }
 0x31d   : > { %v2854_v1 = vmax.f32 %v2852_v19, %v2853_v51  ;;  %v2866_v5 = vmax.f32 %v2713_v48, %v2717_v50  ;;  %v2719_v8 = vpop.f32.mrb[59].mxu0 }
 0x31e   : > { %v2863_v16 = vmax.f32 %v2861_v22, %v2862_v3  ;;  %v2875_v2 = vmax.f32 %v2715_v13, %v2719_v8 }
 0x31f   : > { %v2855_v14 = vrot.slane %v2854_v1, 1 }
 0x320   : > { %v2864_v24 = vrot.slane %v2863_v16, 1 }
 0x321   : > { %v2856_v63 = vmax.f32 %v2854_v1, %v2855_v14 }
 0x322   : > { %v2865_v61 = vmax.f32 %v2863_v16, %v2864_v24  ;;  %v2723_v43 = vpop.f32.mrb[60].mxu0 }
 0x323   : > { %v2972_v12 = vadd.f32 %v5207_v21, %v2856_v63  ;;  %v2867_v18 = vmax.f32 %v2866_v5, %v2723_v43  ;;  %v2725_v47 = vpop.f32.mrb[61].mxu0 }
 0x324   : > { %v2973_v39 = vadd.f32 %v5210_v17, %v2865_v61  ;;  %v2876_v25 = vmax.f32 %v2875_v2, %v2725_v47  ;;  %v2727_v28 = vpop.f32.mrb[62].mxu0 }
 0x325   : > { %v2988_v36 = vmax.f32 %v2972_v12, 0.0  ;;  %v2868_v27 = vmax.f32 %v2867_v18, %v2727_v28  ;;  %v2729_v9 = vpop.f32.mrb[63].mxu0 }
 0x326   : > { %v2989_v26 = vmax.f32 %v2973_v39, 0.0  ;;  %v2877_v32 = vmax.f32 %v2876_v25, %v2729_v9 }
 0x327   : > { %v3019_v42 = vrot.slane %v2988_v36, 6  ;;  %v2869_v33 = vrot.slane %v2868_v27, 4 }
 0x328   : > { %v3039_v15 = vrot.slane %v2989_v26, 6  ;;  %v2878_v6 = vrot.slane %v2877_v32, 4 }
 0x329   : > { %v3021_v40 = vsel %vm3020_vm1, %v3019_v42, %v3018_v29  ;;  %v2870_v58 = vmax.f32 %v2868_v27, %v2869_v33 }
 0x32a   : > { %v3040_v55 = vsel %vm3020_vm1, %v3039_v15, %v3038_v53  ;;  %v2879_v57 = vmax.f32 %v2877_v32, %v2878_v6  ;;  %v2733_v34 = vpop.f32.mrb[64].mxu0 }
 0x32b   : > { %v2871_v30 = vrot.slane %v2870_v58, 2  ;;  %v2735_v11 = vpop.f32.mrb[65].mxu0 }
 0x32c   : > { %v2880_v10 = vrot.slane %v2879_v57, 2  ;;  %v2737_v4 = vpop.f32.mrb[66].mxu0 }
 0x32d   : > { %v2872_v35 = vmax.f32 %v2870_v58, %v2871_v30  ;;  %v2884_v54 = vmax.f32 %v2733_v34, %v2737_v4  ;;  %v2739_v46 = vpop.f32.mrb[67].mxu0 }
 0x32e   : > { %v2881_v41 = vmax.f32 %v2879_v57, %v2880_v10  ;;  %v2893_v7 = vmax.f32 %v2735_v11, %v2739_v46 }
 0x32f   : > { %v2873_v31 = vrot.slane %v2872_v35, 1 }
 0x330   : > { %v2882_v56 = vrot.slane %v2881_v41, 1 }
 0x331   : > { %v2874_v59 = vmax.f32 %v2872_v35, %v2873_v31 }
 0x332   : > { %v2883_v49 = vmax.f32 %v2881_v41, %v2882_v56  ;;  %v2743_v62 = vpop.f32.mrb[68].mxu0 }
 0x333   : > { %v2974_v44 = vadd.f32 %v5207_v21, %v2874_v59  ;;  %v2885_v38 = vmax.f32 %v2884_v54, %v2743_v62  ;;  %v2745_v37 = vpop.f32.mrb[69].mxu0 }
 0x334   : > { %v2975_v60 = vadd.f32 %v5210_v17, %v2883_v49  ;;  %v2894_v23 = vmax.f32 %v2893_v7, %v2745_v37  ;;  %v2747_v52 = vpop.f32.mrb[70].mxu0 }
 0x335   : > { %v2990_v45 = vmax.f32 %v2974_v44, 0.0  ;;  %v2886_v0 = vmax.f32 %v2885_v38, %v2747_v52  ;;  %v2749_v20 = vpop.f32.mrb[71].mxu0 }
 0x336   : > { %v2991_v29 = vmax.f32 %v2975_v60, 0.0  ;;  %v2895_v19 = vmax.f32 %v2894_v23, %v2749_v20 }
 0x337   : > { %v3022_v53 = vrot.slane %v2990_v45, 5  ;;  %v2887_v22 = vrot.slane %v2886_v0, 4 }
 0x338   : > { %v3041_v48 = vrot.slane %v2991_v29, 5  ;;  %v2896_v51 = vrot.slane %v2895_v19, 4 }
 0x339   : > { %v3024_v13 = vsel %vm3023_vm2, %v3022_v53, %v3021_v40  ;;  %v2888_v3 = vmax.f32 %v2886_v0, %v2887_v22 }
 0x33a   : > { %v3042_v50 = vsel %vm3023_vm2, %v3041_v48, %v3040_v55  ;;  %v2897_v1 = vmax.f32 %v2895_v19, %v2896_v51  ;;  %v2753_v5 = vpop.f32.mrb[72].mxu0 }
 0x33b   : > { %v2889_v8 = vrot.slane %v2888_v3, 2  ;;  %v2755_v16 = vpop.f32.mrb[73].mxu0 }
 0x33c   : > { %v2898_v2 = vrot.slane %v2897_v1, 2  ;;  %v2757_v14 = vpop.f32.mrb[74].mxu0 }
 0x33d   : > { %v2890_v24 = vmax.f32 %v2888_v3, %v2889_v8  ;;  %v2902_v63 = vmax.f32 %v2753_v5, %v2757_v14  ;;  %v2759_v61 = vpop.f32.mrb[75].mxu0 }
 0x33e   : > { %v2899_v43 = vmax.f32 %v2897_v1, %v2898_v2  ;;  %v2911_v12 = vmax.f32 %v2755_v16, %v2759_v61 }
 0x33f   : > { %v2891_v18 = vrot.slane %v2890_v24, 1 }
 0x340   : > { %v2900_v47 = vrot.slane %v2899_v43, 1 }
 0x341   : > { %v2892_v39 = vmax.f32 %v2890_v24, %v2891_v18 }
 0x342   : > { %v2901_v25 = vmax.f32 %v2899_v43, %v2900_v47  ;;  %v2763_v28 = vpop.f32.mrb[76].mxu0 }
 0x343   : > { %v2976_v36 = vadd.f32 %v5207_v21, %v2892_v39  ;;  %v2903_v27 = vmax.f32 %v2902_v63, %v2763_v28  ;;  %v2765_v9 = vpop.f32.mrb[77].mxu0 }
 0x344   : > { %v2977_v26 = vadd.f32 %v5210_v17, %v2901_v25  ;;  %v2912_v32 = vmax.f32 %v2911_v12, %v2765_v9  ;;  %v2767_v42 = vpop.f32.mrb[78].mxu0 }
 0x345   : > { %v2992_v33 = vmax.f32 %v2976_v36, 0.0  ;;  %v2904_v15 = vmax.f32 %v2903_v27, %v2767_v42  ;;  %v2769_v6 = vpop.f32.mrb[79].mxu0 }
 0x346   : > { %v2993_v40 = vmax.f32 %v2977_v26, 0.0  ;;  %v2913_v58 = vmax.f32 %v2912_v32, %v2769_v6 }
 0x347   : > { %v3025_v55 = vrot.slane %v2992_v33, 4  ;;  %v2905_v57 = vrot.slane %v2904_v15, 4 }
 0x348   : > { %v3043_v34 = vrot.slane %v2993_v40, 4  ;;  %v2914_v30 = vrot.slane %v2913_v58, 4 }
 0x349   : > { %v2906_v11 = vmax.f32 %v2904_v15, %v2905_v57  ;;  %v3027_v10 = vsel %vm3026_vm3, %v3025_v55, %v3024_v13 }
 0x34a   : > { %v2915_v4 = vmax.f32 %v2913_v58, %v2914_v30  ;;  %v2773_v35 = vpop.f32.mrb[80].mxu0  ;;  %v3044_v54 = vsel %vm3026_vm3, %v3043_v34, %v3042_v50 }
 0x34b   : > { %v2907_v46 = vrot.slane %v2906_v11, 2  ;;  %v2775_v41 = vpop.f32.mrb[81].mxu0 }
 0x34c   : > { %v2916_v7 = vrot.slane %v2915_v4, 2  ;;  %v2777_v31 = vpop.f32.mrb[82].mxu0 }
 0x34d   : > { %v2908_v56 = vmax.f32 %v2906_v11, %v2907_v46  ;;  %v2920_v59 = vmax.f32 %v2773_v35, %v2777_v31  ;;  %v2779_v49 = vpop.f32.mrb[83].mxu0 }
 0x34e   : > { %v2917_v62 = vmax.f32 %v2915_v4, %v2916_v7  ;;  %v2929_v44 = vmax.f32 %v2775_v41, %v2779_v49 }
 0x34f   : > { %v2909_v38 = vrot.slane %v2908_v56, 1 }
 0x350   : > { %v2918_v37 = vrot.slane %v2917_v62, 1 }
 0x351   : > { %v2910_v60 = vmax.f32 %v2908_v56, %v2909_v38 }
 0x352   : > { %v2919_v23 = vmax.f32 %v2917_v62, %v2918_v37 }
 0x353   : > { %v2978_v52 = vadd.f32 %v5207_v21, %v2910_v60 }
 0x354   : > { %v2979_v45 = vadd.f32 %v5210_v17, %v2919_v23 }
 0x355   : > { %v2994_v0 = vmax.f32 %v2978_v52, 0.0 }
 0x356   : > { %v2995_v20 = vmax.f32 %v2979_v45, 0.0 }
 0x357   : > { %v3028_v29 = vrot.slane %v2994_v0, 3 }
 0x358   : > { %v3045_v19 = vrot.slane %v2995_v20, 3 }
 0x359   : > { %v3030_v53 = vsel %vm3029_vm4, %v3028_v29, %v3027_v10 }
 0x35a   : > { %v3046_v22 = vsel %vm3029_vm4, %v3045_v19, %v3044_v54 }
 0x35c   : > { %v2783_v48 = vpop.f32.mrb[84].mxu0 }
 0x35d   : > { %v2921_v51 = vmax.f32 %v2920_v59, %v2783_v48  ;;  %v2785_v13 = vpop.f32.mrb[85].mxu0 }
 0x35e   : > { %v2930_v3 = vmax.f32 %v2929_v44, %v2785_v13  ;;  %v2787_v50 = vpop.f32.mrb[86].mxu0 }
 0x35f   : > { %v2922_v1 = vmax.f32 %v2921_v51, %v2787_v50  ;;  %v2789_v5 = vpop.f32.mrb[87].mxu0 }
 0x360   : > { %v2931_v8 = vmax.f32 %v2930_v3, %v2789_v5 }
 0x361   : > { %v2923_v16 = vrot.slane %v2922_v1, 4 }
 0x362   : > { %v2932_v2 = vrot.slane %v2931_v8, 4 }
 0x363   : > { %v2924_v14 = vmax.f32 %v2922_v1, %v2923_v16 }
 0x364   : > { %v2933_v24 = vmax.f32 %v2931_v8, %v2932_v2 }
 0x365   : > { %v2925_v63 = vrot.slane %v2924_v14, 2 }
 0x366   : > { %v2934_v61 = vrot.slane %v2933_v24, 2 }
 0x367   : > { %v2926_v43 = vmax.f32 %v2924_v14, %v2925_v63 }
 0x368   : > { %v2935_v12 = vmax.f32 %v2933_v24, %v2934_v61 }
 0x369   : > { %v2927_v18 = vrot.slane %v2926_v43, 1 }
 0x36a   : > { %v2936_v47 = vrot.slane %v2935_v12, 1 }
 0x36b   : > { %v2928_v39 = vmax.f32 %v2926_v43, %v2927_v18 }
 0x36c   : > { %v2937_v25 = vmax.f32 %v2935_v12, %v2936_v47 }
 0x36d   : > { %v2980_v28 = vadd.f32 %v5207_v21, %v2928_v39 }
 0x36e   : > { %v2981_v36 = vadd.f32 %v5210_v17, %v2937_v25 }
 0x36f   : > { %v2996_v27 = vmax.f32 %v2980_v28, 0.0  ;;  %v2793_v9 = vpop.f32.mrb[88].mxu0 }
 0x370   : > { %v2997_v26 = vmax.f32 %v2981_v36, 0.0  ;;  %v2795_v32 = vpop.f32.mrb[89].mxu0 }
 0x371   : > { %v3031_v42 = vrot.slane %v2996_v27, 2  ;;  %v2797_v33 = vpop.f32.mrb[90].mxu0 }
 0x372   : > { %v3047_v15 = vrot.slane %v2997_v26, 2  ;;  %v2938_v6 = vmax.f32 %v2793_v9, %v2797_v33  ;;  %v2799_v40 = vpop.f32.mrb[91].mxu0 }
 0x373   : > { %v2947_v58 = vmax.f32 %v2795_v32, %v2799_v40  ;;  %v3033_v55 = vsel %vm3032_vm5, %v3031_v42, %v3030_v53 }
 0x374   : > { %v3048_v57 = vsel %vm3032_vm5, %v3047_v15, %v3046_v22 }
 0x382   : > { %v2803_v34 = vpop.f32.mrb[92].mxu0 }
 0x383   : > { %v2939_v30 = vmax.f32 %v2938_v6, %v2803_v34  ;;  %v2805_v11 = vpop.f32.mrb[93].mxu0 }
 0x384   : > { %v2948_v10 = vmax.f32 %v2947_v58, %v2805_v11  ;;  %v2807_v4 = vpop.f32.mrb[94].mxu0 }
 0x385   : > { %v2940_v35 = vmax.f32 %v2939_v30, %v2807_v4  ;;  %v2809_v54 = vpop.f32.mrb[95].mxu0 }
 0x386   : > { %v2949_v46 = vmax.f32 %v2948_v10, %v2809_v54 }
 0x387   : > { %v2941_v41 = vrot.slane %v2940_v35, 4 }
 0x388   : > { %v2950_v7 = vrot.slane %v2949_v46, 4 }
 0x389   : > { %v2942_v31 = vmax.f32 %v2940_v35, %v2941_v41 }
 0x38a   : > { %v2951_v56 = vmax.f32 %v2949_v46, %v2950_v7 }
 0x38b   : > { %v2943_v59 = vrot.slane %v2942_v31, 2 }
 0x38c   : > { %v2952_v49 = vrot.slane %v2951_v56, 2 }
 0x38d   : > { %v2944_v62 = vmax.f32 %v2942_v31, %v2943_v59 }
 0x38e   : > { %v2953_v44 = vmax.f32 %v2951_v56, %v2952_v49 }
 0x38f   : > { %v2945_v38 = vrot.slane %v2944_v62, 1 }
 0x390   : > { %v2954_v37 = vrot.slane %v2953_v44, 1 }
 0x391   : > { %v2946_v60 = vmax.f32 %v2944_v62, %v2945_v38 }
 0x392   : > { %v2955_v23 = vmax.f32 %v2953_v44, %v2954_v37 }
 0x393   : > { %v2982_v52 = vadd.f32 %v5207_v21, %v2946_v60 }
 0x394   : > { %v2983_v45 = vadd.f32 %v5210_v17, %v2955_v23 }
 0x395   : > { %v2998_v0 = vmax.f32 %v2982_v52, 0.0 }
 0x396   : > { %v2999_v20 = vmax.f32 %v2983_v45, 0.0 }
 0x397   : > { %v3034_v29 = vrot.slane %v2998_v0, 1 }
 0x398   : > { %v3049_v19 = vrot.slane %v2999_v20, 1 }
 0x399   : > { %v3036_v53 = vsel %vm3035_vm6, %v3034_v29, %v3033_v55 }
 0x39a   : > { %v3050_v21 = vsel %vm3035_vm6, %v3049_v19, %v3048_v57  ;;  %3053 = vst [vmem:[%s346_s24] sm:$0xff] %v3036_v53 }
 0x39b   : > { %3054 = vst [vmem:[%s346_s24 + $0x8] sm:$0xff] %v3050_v21 }
 0x39c   : > { %3621 = shalt.err (!%p3618_p3)
}
 0x39d   : > { %s3622_s23 = scalar_lea.hbm %s5233_s27, 256  ;;  %s3626_s24 = scalar_lea.hbm %s5284_s9, 512 }
 0x39e   : > { %p3623_p4 = scmp.ne.s32.totalorder %s5233_s27, %s3622_s23  ;;  %p3627_p9 = scmp.lt.u32.totalorder %s5233_s27, %s5284_s9 }
 0x39f   : > { %p3628_p10 = scmp.lt.u32.totalorder %s3626_s24, %s3622_s23  ;;  %p3630_p12 = scmp.lt.u32.totalorder %s3622_s23, %s5233_s27 }
 0x3a0   : > { %p3624_p7 = pnand %p3623_p4, %p3764_p5 }
 0x3a1   : > { %p3629_p11 = por %p3628_p10, %p3627_p9 }
 0x3a2   : > { %p3625_p8 = pneg %p3624_p7 }
 0x3a3   : > { %p3631_p13 = por %p3630_p12, %p3629_p11 }
 0x3a5   : > { %p3632_p0 = pnand %p3631_p13, %p3625_p8 }
 0x3a7   : > { %3635 = shalt.err (!%p3632_p0)
}
 0x3a8   : > { %3320 = dma.vmem_to_hbm [thread:$0]  (%p3764_p5), %s5235_s26, 256, %s5233_s27, %s3056_s25  }
 0x3a9 PF: > { %p3326_p1 = scmp.ge.s32.totalorder %s3670_s12, 2  ;;  %s3082_s13 = sand.u32 1, %s3658_s30  }
 0x3aa   : > { %s3083_s14 = scalar_lea.sflag [#allocation3], %s3082_s13 }
 0x3ab   : > { %p3323_p2 = pnand %p3326_p1, %p3768_p6 }
 0x3ad   : > { %3653 = dma.done.wait (!%p3323_p2), %s3083_s14, 256  }
 0x3ae   : > { %3655 = vsyncadd (!%p3323_p2), %s3083_s14, 4294967040  ;;  %p19_p3 = scmp.ge.s32.totalorder %s3751_s15, 4   ;;  %s5403_s30 = smov %s3662_s10 }
 0x3af   : > { %s5404_s10 = smov %s3666_s11  ;;  %s5405_s11 = smov %s3762_s18 }
 0x3b0   : > { %s5406_s12 = smov %s3751_s15  ;;  %21 = sbr.rel (!%p19_p3) target bundleno = 3 (0x3), region = 94 }
 0x3b7   :  { %3088 = vsyncpa [#allocation3], 1 }
 0x3b8   :  { %3090 = vsyncpa [#allocation3 + $0x1], 1 }

</bundles_post_ra>
